<compile_context>
chip_gen: v7x
topology: tpu7x:2x2x1
jax: 0.10.0
libtpu: 0.0.40
codegen_flags: <defaults>
</compile_context>

<pallas_src>
import functools

import numpy as np

import jax
import jax.numpy as jnp
from jax import lax
from jax.experimental import pallas as pl
from jax.experimental.pallas import tpu as pltpu


# ----------------------------------------------------------------------------
# Pallas kernel: runs the whole Cross_Transformer for `calls` calls at once.
# ----------------------------------------------------------------------------
def _cross_transformer_kernel(img_ref, seq_ref,
                              wq_ref, wkv_ref, wout_ref, bout_ref,
                              wfold_ref, bfold_ref,
                              w1_ref, b1_ref, w2_ref, b2_ref,
                              gn_ref, bn_ref, out_ref,
                              *, depth, heads, dim, n_keys, n_img, calls,
                              num_fusion, mm_dtype, approx_recip):
    f32 = jnp.float32
    hd = heads * dim

    # Residual streams are kept in f32; matmul operands are cast to mm_dtype.
    G3 = img_ref[...].astype(f32).reshape(calls, n_keys, dim)   # img / key rows
    S = seq_ref[...].astype(f32)                                # seq / query row

    # Additive key mask generated in-kernel (no mask DMA): columns < n_img are
    # always valid; column n_img is valid only for the fusion calls, which the
    # wrapper places at flat call indices [0, num_fusion).
    col = lax.broadcasted_iota(jnp.int32, (calls, n_keys), 1)
    row = lax.broadcasted_iota(jnp.int32, (calls, n_keys), 0)
    flat = pl.program_id(0) * calls + row
    valid = (col < n_img) | ((col == n_img) & (flat < num_fusion))
    M_add = jnp.where(valid, 0.0, -1e30).astype(f32)

    def ln_core(x):                       # zero-mean / unit-variance LayerNorm core
        mu = jnp.mean(x, axis=-1, keepdims=True)
        xc = x - mu
        var = jnp.mean(xc * xc, axis=-1, keepdims=True)
        return xc * lax.rsqrt(var + 1e-5)

    def feed_forward(f, x2d):             # LayerNorm affine pre-folded into w1/b1
        h = jnp.dot(ln_core(x2d).astype(mm_dtype), w1_ref[f],
                    preferred_element_type=f32) + b1_ref[f]
        h = jax.nn.gelu(h, approximate=True)
        return jnp.dot(h.astype(mm_dtype), w2_ref[f],
                       preferred_element_type=f32) + b2_ref[f]

    def att_seq_query(a, s_in, g3_in):
        # queries: one seq token per call; keys/values: that call's img rows.
        q = jnp.dot(s_in.astype(mm_dtype), wq_ref[a],
                    preferred_element_type=f32)                        # (calls, hd), scale folded
        kv = jnp.dot(g3_in.reshape(calls * n_keys, dim).astype(mm_dtype),
                     wkv_ref[a], preferred_element_type=f32)           # (calls*n_keys, hd)
        kv3 = kv.reshape(calls, n_keys, hd)
        prod = q[:, None, :] * kv3                                     # one multiply, all heads
        probs = []
        for h in range(heads):                                         # per-head softmax (tiny arrays)
            s = jnp.sum(prod[:, :, h * dim:(h + 1) * dim], axis=-1) + M_add
            s = s - jnp.max(s, axis=-1, keepdims=True)
            e = jnp.exp(s)
            l = jnp.sum(e, axis=-1, keepdims=True)
            probs.append(e * pl.reciprocal(l, approx=approx_recip))
        p_full = jnp.concatenate(
            [jnp.broadcast_to(p[:, :, None], (calls, n_keys, dim)) for p in probs],
            axis=-1)                                                   # (calls, n_keys, hd)
        o = jnp.sum(p_full * kv3, axis=1)                              # (calls, hd)   (v == k)
        return jnp.dot(o.astype(mm_dtype), wout_ref[a],
                       preferred_element_type=f32) + bout_ref[a]

    def att_img_query(a, s_in):
        # queries: img rows; key/value: the single seq token.  Softmax over a
        # single key == 1.0 (dropout = 0), so the output is to_out(v_seq)
        # replicated over the img rows; wkv @ wout is pre-folded to (dim, dim).
        return jnp.dot(s_in.astype(mm_dtype), wfold_ref[a],
                       preferred_element_type=f32) + bfold_ref[a]      # (calls, dim)

    # depth is small (Python unroll).  TODO(synk): for depth > ~2 convert to
    # lax.fori_loop with dynamic first-axis indexing to bound vreg live ranges.
    for l in range(depth):
        S = S + att_seq_query(l, S, G3)
        S = S + feed_forward(2 * l, S)
        G3 = G3 + att_img_query(l, S)[:, None, :]                      # broadcast add in-register
        G3 = G3 + feed_forward(2 * l + 1,
                               G3.reshape(calls * n_keys, dim)).reshape(calls, n_keys, dim)
    S = S + att_seq_query(depth, S, G3)
    S = S + feed_forward(2 * depth, S)

    S = ln_core(S) * gn_ref[...] + bn_ref[...]                         # final nn.LayerNorm(dim)
    out_ref[...] = S.astype(out_ref.dtype)


# ----------------------------------------------------------------------------
# Wrapper: parameter folding, call batching, BlockSpecs.
# ----------------------------------------------------------------------------
def _pack_params(params, heads, dim, mm_dtype):
    """Torch-layout parameters -> stacked, matmul-ready kernel weights."""
    scale = float(dim) ** -0.5             # Attention.scale (dim_head == dim here)
    hd = heads * dim
    n_att = len(params["att"])
    depth = (n_att - 1) // 2
    wq_s, wkv_s, wout_s, bout_s, wfold, bfold = [], [], [], [], [], []
    for a, p in enumerate(params["att"]):
        w = jnp.transpose(p["w_qlv"]).astype(jnp.float32)              # (dim, hd)
        if p["w_out"] is None:                                         # project_out False -> Identity
            wo = jnp.eye(hd, dtype=jnp.float32)
            bo = jnp.zeros((1, dim), jnp.float32)
        else:
            wo = jnp.transpose(p["w_out"]).astype(jnp.float32)         # (hd, dim)
            bo = p["b_out"][None, :].astype(jnp.float32)
        if a % 2 == 0:        # seq-query attentions: indices 0, 2, ..., 2*depth
            wq_s.append((w * scale).astype(mm_dtype))                  # scale folded into q proj
            wkv_s.append(w.astype(mm_dtype))
            wout_s.append(wo.astype(mm_dtype))
            bout_s.append(bo)
        else:                 # img-query attentions: single-key softmax -> fold wkv @ wout
            wfold.append((w @ wo).astype(mm_dtype))                    # (dim, dim), exact fold
            bfold.append(bo)
    w1, b1, w2, b2 = [], [], [], []
    for p in params["ff"]:
        w1t = jnp.transpose(p["w1"]).astype(jnp.float32)               # (dim, mlp)
        w1.append((p["ln_g"][:, None] * w1t).astype(mm_dtype))         # LN affine folded into Linear1
        b1.append((p["ln_b"] @ w1t + p["b1"])[None, :].astype(jnp.float32))
        w2.append(jnp.transpose(p["w2"]).astype(mm_dtype))             # (mlp, dim)
        b2.append(p["b2"][None, :].astype(jnp.float32))
    if depth == 0:            # keep stacked shapes non-empty (unused when depth == 0)
        wfold = [jnp.zeros((dim, dim), mm_dtype)]
        bfold = [jnp.zeros((1, dim), jnp.float32)]
    st = lambda xs: jnp.stack(xs, axis=0)
    return dict(wq=st(wq_s), wkv=st(wkv_s), wout=st(wout_s), bout=st(bout_s),
                wfold=st(wfold), bfold=st(bfold),
                w1=st(w1), b1=st(b1), w2=st(w2), b2=st(b2),
                norm_g=params["norm_g"][None, :].astype(jnp.float32),
                norm_b=params["norm_b"][None, :].astype(jnp.float32))


def st_transformer_pallas(params, img_embedding, seq_embedding, *, depth, heads,
                          block_calls=None, mm_dtype=jnp.bfloat16):
    B, T, n, dim = img_embedding.shape
    assert seq_embedding.shape == (B, T, 1, dim)
    hd = heads * dim
    n1 = n + 1                                    # fusion call: n img rows + 1 seq row
    n_keys = ((n1 + 7) // 8) * 8                  # pad key rows to a sublane multiple
    ncalls = T * (T + 1) // 2
    nc = B * ncalls

    packed = _pack_params(params, heads, dim, mm_dtype)
    mlp = packed["w1"].shape[-1]

    # Per-call (key-frame, query-frame) indices, in the exact order
    # ST_transformer.forward concatenates results.  Calls are then re-ordered
    # so the B fusion calls (call 0 of each batch) come first -> the in-kernel
    # extra-key condition is a single compare against B.
    t_list = np.array([0] + [t for t in range(1, T) for _ in range(t + 1)])
    tt_list = np.array([0] + [tt for t in range(1, T) for tt in range(t + 1)])
    b_all = np.repeat(np.arange(B), ncalls)
    c_all = np.tile(np.arange(ncalls), B)
    order = np.concatenate([np.flatnonzero(c_all == 0), np.flatnonzero(c_all != 0)])
    inv_order = np.argsort(order)                 # kernel call order -> module call order
    b_of, c_of = b_all[order], c_all[order]
    t_of, tt_of = t_list[c_of], tt_list[c_of]

    # Large call blocks: amortise per-step overhead, keep >= 2 grid steps when
    # possible so the "parallel" axis can shard across both v7x TensorCores.
    if block_calls is None:
        cb = min(128, max(8, (((nc + 1) // 2) + 7) // 8 * 8))
    else:
        cb = max(8, (int(block_calls) + 7) // 8 * 8)
    nc_pad = ((nc + cb - 1) // cb) * cb
    pad = nc_pad - nc

    img_calls = img_embedding[b_of, tt_of]                        # (nc, n, dim)
    img_calls = jnp.pad(img_calls, ((0, 0), (0, n_keys - n), (0, 0)))
    fusion_rows = seq_embedding[:, 0, 0, :]                       # (B, dim): extra key of call 0
    img_calls = img_calls.at[jnp.arange(B), n].set(fusion_rows)   # first B calls are the fusion calls
    seq_calls = seq_embedding[b_of, t_of, 0]                      # (nc, dim)
    if pad:                                                       # padded calls: zero data
        img_calls = jnp.pad(img_calls, ((0, pad), (0, 0), (0, 0)))
        seq_calls = jnp.pad(seq_calls, ((0, pad), (0, 0)))
    img2d = img_calls.reshape(nc_pad * n_keys, dim).astype(mm_dtype)   # rows x channels slab
    seq2d = seq_calls.astype(mm_dtype)

    kernel = functools.partial(
        _cross_transformer_kernel, depth=depth, heads=heads, dim=dim,
        n_keys=n_keys, n_img=n, calls=cb, num_fusion=B, mm_dtype=mm_dtype,
        approx_recip=bool(np.dtype(mm_dtype) != np.dtype(np.float32)))

    def rep(shape):          # whole array resident, same block every grid step
        return pl.BlockSpec(shape, lambda i, _nd=len(shape): (0,) * _nd)

    rows = nc_pad * n_keys
    n_seq_att = depth + 1
    cost = pl.CostEstimate(
        flops=int(2 * n_seq_att * (rows * dim * hd + nc_pad * dim * hd
                                   + nc_pad * hd * dim + 2 * rows * hd)
                  + 2 * depth * nc_pad * dim * dim
                  + 4 * (n_seq_att * nc_pad + depth * rows) * dim * mlp),
        transcendentals=int(n_seq_att * (rows * heads + nc_pad * mlp) + depth * rows * mlp),
        bytes_accessed=int(img2d.size * img2d.dtype.itemsize
                           + seq2d.size * seq2d.dtype.itemsize
                           + 4 * nc_pad * dim
                           + sum(int(v.size) * v.dtype.itemsize for v in packed.values())),
    )

    out = pl.pallas_call(
        kernel,
        out_shape=jax.ShapeDtypeStruct((nc_pad, dim), jnp.float32),
        grid=(nc_pad // cb,),
        in_specs=[
            pl.BlockSpec((cb * n_keys, dim), lambda i: (i, 0)),   # img / key rows
            pl.BlockSpec((cb, dim), lambda i: (i, 0)),            # seq / query rows
            rep(packed["wq"].shape), rep(packed["wkv"].shape),
            rep(packed["wout"].shape), rep(packed["bout"].shape),
            rep(packed["wfold"].shape), rep(packed["bfold"].shape),
            rep(packed["w1"].shape), rep(packed["b1"].shape),
            rep(packed["w2"].shape), rep(packed["b2"].shape),
            rep(packed["norm_g"].shape), rep(packed["norm_b"].shape),
        ],
        out_specs=pl.BlockSpec((cb, dim), lambda i: (i, 0)),
        compiler_params=pltpu.CompilerParams(
            dimension_semantics=("parallel",),
            vmem_limit_bytes=32 * 1024 * 1024),
        cost_estimate=cost,
    )(img2d, seq2d,
      packed["wq"], packed["wkv"], packed["wout"], packed["bout"],
      packed["wfold"], packed["bfold"],
      packed["w1"], packed["b1"], packed["w2"], packed["b2"],
      packed["norm_g"], packed["norm_b"])

    out = out[:nc][inv_order].reshape(B, ncalls, dim)
    return out.astype(img_embedding.dtype)


# ----------------------------------------------------------------------------
# Pure-JAX reference (faithful port of the PyTorch module, eval mode).
# ----------------------------------------------------------------------------
def _layer_norm_ref(x, gamma, beta, eps=1e-5):
    mu = x.mean(axis=-1, keepdims=True)
    var = ((x - mu) ** 2).mean(axis=-1, keepdims=True)
    return (x - mu) / jnp.sqrt(var + eps) * gamma + beta


def _attention_ref(p, kv_src, q_src, heads, dim):
    # mirrors Attention.forward(img_embedding=kv_src, seq_embedding=q_src)
    w = p["w_qlv"]                                    # torch layout (heads*dim, dim)
    q, k, v = q_src @ w.T, kv_src @ w.T, kv_src @ w.T

    def split(t):
        b, m, _ = t.shape
        return t.reshape(b, m, heads, dim).transpose(0, 2, 1, 3)

    q, k, v = split(q), split(k), split(v)
    dots = jnp.einsum("bhqd,bhkd->bhqk", q, k) * (dim ** -0.5)
    attn = jax.nn.softmax(dots, axis=-1)
    out = jnp.einsum("bhqk,bhkd->bhqd", attn, v)
    b, h, m, d = out.shape
    out = out.transpose(0, 2, 1, 3).reshape(b, m, h * d)
    if p["w_out"] is not None:
        out = out @ p["w_out"].T + p["b_out"]
    return out


def _feed_forward_ref(p, x):
    h = _layer_norm_ref(x, p["ln_g"], p["ln_b"])
    h = h @ p["w1"].T + p["b1"]
    h = jax.nn.gelu(h, approximate=True)   # TODO(synk): torch default is exact erf GELU
    return h @ p["w2"].T + p["b2"]


def _cross_transformer_ref(params, img_emb, seq_emb, depth, heads, dim):
    for l in range(depth):
        seq_emb = _attention_ref(params["att"][2 * l], img_emb, seq_emb, heads, dim) + seq_emb
        seq_emb = _feed_forward_ref(params["ff"][2 * l], seq_emb) + seq_emb
        img_emb = _attention_ref(params["att"][2 * l + 1], seq_emb, img_emb, heads, dim) + img_emb
        img_emb = _feed_forward_ref(params["ff"][2 * l + 1], img_emb) + img_emb
    seq_emb = _attention_ref(params["att"][2 * depth], img_emb, seq_emb, heads, dim) + seq_emb
    seq_emb = _feed_forward_ref(params["ff"][2 * depth], seq_emb) + seq_emb
    return _layer_norm_ref(seq_emb, params["norm_g"], params["norm_b"])


def _st_transformer_ref(params, img, seq, depth, heads):
    B, T, n, dim = img.shape
    fusion = jnp.concatenate([img[:, 0], seq[:, 0]], axis=-2)
    att_score = _cross_transformer_ref(params, fusion, seq[:, 0], depth, heads, dim)
    for t in range(1, T):
        for tt in range(t + 1):
            att_t = _cross_transformer_ref(params, img[:, tt], seq[:, t], depth, heads, dim)
            att_score = jnp.concatenate([att_score, att_t], axis=-2)
    return att_score


# ----------------------------------------------------------------------------
# Parameter init (torch Linear layout: (out_features, in_features)).
# ----------------------------------------------------------------------------
def _init_params(key, dim, depth, heads, mlp_dim):
    # ST_transformer passes `dim` as dim_head, so project_out == (heads != 1).
    project_out = heads != 1
    n_att = 2 * depth + 1
    atts, ffs = [], []
    for _ in range(n_att):
        key, k1, k2, k3 = jax.random.split(key, 4)
        w_qlv = 0.1 * jax.random.normal(k1, (heads * dim, dim), jnp.float32)
        if project_out:
            w_out = 0.1 * jax.random.normal(k2, (dim, heads * dim), jnp.float32)
            b_out = 0.1 * jax.random.normal(k3, (dim,), jnp.float32)
        else:
            w_out, b_out = None, None
        atts.append(dict(w_qlv=w_qlv, w_out=w_out, b_out=b_out))
    for _ in range(n_att):
        key, k1, k2, k3, k4, k5, k6 = jax.random.split(key, 7)
        ffs.append(dict(
            ln_g=1.0 + 0.1 * jax.random.normal(k1, (dim,), jnp.float32),
            ln_b=0.1 * jax.random.normal(k2, (dim,), jnp.float32),
            w1=0.1 * jax.random.normal(k3, (mlp_dim, dim), jnp.float32),
            b1=0.1 * jax.random.normal(k4, (mlp_dim,), jnp.float32),
            w2=0.1 * jax.random.normal(k5, (dim, mlp_dim), jnp.float32),
            b2=0.1 * jax.random.normal(k6, (dim,), jnp.float32)))
    key, k1, k2 = jax.random.split(key, 3)
    return dict(att=atts, ff=ffs,
                norm_g=1.0 + 0.1 * jax.random.normal(k1, (dim,), jnp.float32),
                norm_b=0.1 * jax.random.normal(k2, (dim,), jnp.float32))


if __name__ == "__main__":
    # Small shapes consistent with the module: batch=2, T=4 frames, n=8 image
    # tokens per frame, dim=32, depth=1, heads=2, mlp_dim=64.
    B, T, n, dim = 2, 4, 8, 32
    depth, heads, mlp_dim = 1, 2, 64

    key = jax.random.PRNGKey(0)
    kp, ki, ks = jax.random.split(key, 3)
    params = _init_params(kp, dim, depth, heads, mlp_dim)
    img_embedding = jax.random.normal(ki, (B, T, n, dim), jnp.float32)
    seq_embedding = jax.random.normal(ks, (B, T, 1, dim), jnp.float32)

    ref = _st_transformer_ref(params, img_embedding, seq_embedding, depth, heads)

    # Strict-parity configuration: f32 matmul operands, exact reciprocal.
    out_f32 = st_transformer_pallas(params, img_embedding, seq_embedding,
                                    depth=depth, heads=heads, mm_dtype=jnp.float32)
    out_f32 = jax.block_until_ready(out_f32)
    assert out_f32.shape == (B, T * (T + 1) // 2, dim), out_f32.shape
    err32 = float(jnp.max(jnp.abs(out_f32 - ref)))
    assert jnp.allclose(out_f32, ref, rtol=1e-3, atol=1e-3), f"f32 mismatch vs reference: {err32}"

    # Performance configuration: bf16 MXU operands (f32 accumulation).  bf16
    # operand rounding compounds through the residual stack, so validate at a
    # looser — but still algorithm-revealing — tolerance.
    out_bf16 = st_transformer_pallas(params, img_embedding, seq_embedding,
                                     depth=depth, heads=heads, mm_dtype=jnp.bfloat16)
    out_bf16 = jax.block_until_ready(out_bf16)
    assert out_bf16.shape == (B, T * (T + 1) // 2, dim), out_bf16.shape
    errbf = float(jnp.max(jnp.abs(out_bf16 - ref)))
    assert jnp.allclose(out_bf16, ref, rtol=5e-2, atol=5e-2), f"bf16 mismatch vs reference: {errbf}"

    print("KERNEL_OK")
</pallas_src>

<mosaic_0001>
module attributes {stable_mosaic.version = 11 : i64} {
  func.func @_cross_transformer_kernel(%arg0: i32, %arg1: memref<256x32xf32, #tpu.memory_space<vmem>>, %arg2: memref<16x32xf32, #tpu.memory_space<vmem>>, %arg3: memref<2x32x64xf32, #tpu.memory_space<vmem>>, %arg4: memref<2x32x64xf32, #tpu.memory_space<vmem>>, %arg5: memref<2x64x32xf32, #tpu.memory_space<vmem>>, %arg6: memref<2x1x32xf32, #tpu.memory_space<vmem>>, %arg7: memref<1x32x32xf32, #tpu.memory_space<vmem>>, %arg8: memref<1x1x32xf32, #tpu.memory_space<vmem>>, %arg9: memref<3x32x64xf32, #tpu.memory_space<vmem>>, %arg10: memref<3x1x64xf32, #tpu.memory_space<vmem>>, %arg11: memref<3x64x32xf32, #tpu.memory_space<vmem>>, %arg12: memref<3x1x32xf32, #tpu.memory_space<vmem>>, %arg13: memref<1x32xf32, #tpu.memory_space<vmem>>, %arg14: memref<1x32xf32, #tpu.memory_space<vmem>>, %arg15: memref<16x32xf32, #tpu.memory_space<vmem>>) attributes {dimension_semantics = [#tpu.dimension_semantics<parallel>], iteration_bounds = array<i64: 2>, scalar_prefetch = 0 : i64, scratch_operands = 0 : i64, tpu.core_type = #tpu.core_type<tc>, window_params = [{transform_indices = @transform_0, window_bounds = array<i64: 256, 32>}, {transform_indices = @transform_1, window_bounds = array<i64: 16, 32>}, {pipeline_mode = #tpu.pipeline_mode<synchronous>, transform_indices = @transform_2, window_bounds = array<i64: 2, 32, 64>}, {pipeline_mode = #tpu.pipeline_mode<synchronous>, transform_indices = @transform_3, window_bounds = array<i64: 2, 32, 64>}, {pipeline_mode = #tpu.pipeline_mode<synchronous>, transform_indices = @transform_4, window_bounds = array<i64: 2, 64, 32>}, {pipeline_mode = #tpu.pipeline_mode<synchronous>, transform_indices = @transform_5, window_bounds = array<i64: 2, 1, 32>}, {pipeline_mode = #tpu.pipeline_mode<synchronous>, transform_indices = @transform_6, window_bounds = array<i64: 1, 32, 32>}, {pipeline_mode = #tpu.pipeline_mode<synchronous>, transform_indices = @transform_7, window_bounds = array<i64: 1, 1, 32>}, {pipeline_mode = #tpu.pipeline_mode<synchronous>, transform_indices = @transform_8, window_bounds = array<i64: 3, 32, 64>}, {pipeline_mode = #tpu.pipeline_mode<synchronous>, transform_indices = @transform_9, window_bounds = array<i64: 3, 1, 64>}, {pipeline_mode = #tpu.pipeline_mode<synchronous>, transform_indices = @transform_10, window_bounds = array<i64: 3, 64, 32>}, {pipeline_mode = #tpu.pipeline_mode<synchronous>, transform_indices = @transform_11, window_bounds = array<i64: 3, 1, 32>}, {pipeline_mode = #tpu.pipeline_mode<synchronous>, transform_indices = @transform_12, window_bounds = array<i64: 1, 32>}, {pipeline_mode = #tpu.pipeline_mode<synchronous>, transform_indices = @transform_13, window_bounds = array<i64: 1, 32>}, {transform_indices = @transform_14, window_bounds = array<i64: 16, 32>}]} {
    %c0 = arith.constant 0 : index
    %c0_0 = arith.constant 0 : index
    %0 = vector.load %arg1[%c0, %c0_0] : memref<256x32xf32, #tpu.memory_space<vmem>>, vector<256x32xf32>
    %1 = vector.shape_cast %0 : vector<256x32xf32> to vector<16x16x32xf32>
    %c0_1 = arith.constant 0 : index
    %c0_2 = arith.constant 0 : index
    %2 = vector.load %arg2[%c0_1, %c0_2] : memref<16x32xf32, #tpu.memory_space<vmem>>, vector<16x32xf32>
    %3 = tpu.iota {dimensions = array<i32: 1>} : vector<16x16xi32>
    %4 = tpu.iota {dimensions = array<i32: 0>} : vector<16x16xi32>
    %c16_i32 = arith.constant 16 : i32
    %5 = arith.muli %arg0, %c16_i32 : i32
    %6 = vector.broadcast %5 : i32 to vector<16x16xi32>
    %7 = arith.addi %6, %4 : vector<16x16xi32>
    %c8_i32 = arith.constant 8 : i32
    %8 = vector.broadcast %c8_i32 : i32 to vector<16x16xi32>
    %9 = arith.cmpi slt, %3, %8 : vector<16x16xi32>
    %c8_i32_3 = arith.constant 8 : i32
    %10 = vector.broadcast %c8_i32_3 : i32 to vector<16x16xi32>
    %11 = arith.cmpi eq, %3, %10 : vector<16x16xi32>
    %c2_i32 = arith.constant 2 : i32
    %12 = vector.broadcast %c2_i32 : i32 to vector<16x16xi32>
    %13 = arith.cmpi slt, %7, %12 : vector<16x16xi32>
    %14 = arith.andi %11, %13 : vector<16x16xi1>
    %15 = arith.ori %9, %14 : vector<16x16xi1>
    %cst = arith.constant 0.000000e+00 : f32
    %cst_4 = arith.constant -1.000000e+30 : f32
    %16 = vector.broadcast %cst : f32 to vector<16x16xf32>
    %17 = vector.broadcast %cst_4 : f32 to vector<16x16xf32>
    %18 = arith.select %15, %16, %17 : vector<16x16xi1>, vector<16x16xf32>
    %c0_5 = arith.constant 0 : index
    %c0_6 = arith.constant 0 : index
    %c0_7 = arith.constant 0 : index
    %19 = vector.load %arg3[%c0_5, %c0_6, %c0_7] : memref<2x32x64xf32, #tpu.memory_space<vmem>>, vector<1x32x64xf32>
    %20 = vector.shape_cast %19 : vector<1x32x64xf32> to vector<32x64xf32>
    %cst_8 = arith.constant dense<0.000000e+00> : vector<16x64xf32>
    %21 = tpu.matmul %2, %20, %cst_8 {dimension_numbers = #tpu.dot_dimension_numbers<[1], [0], [0], [1], [0, 0, 1, 1], [], []>} : vector<16x32xf32>, vector<32x64xf32>, vector<16x64xf32> -> vector<16x64xf32>
    %22 = vector.shape_cast %1 : vector<16x16x32xf32> to vector<256x32xf32>
    %c0_9 = arith.constant 0 : index
    %c0_10 = arith.constant 0 : index
    %c0_11 = arith.constant 0 : index
    %23 = vector.load %arg4[%c0_9, %c0_10, %c0_11] : memref<2x32x64xf32, #tpu.memory_space<vmem>>, vector<1x32x64xf32>
    %24 = vector.shape_cast %23 : vector<1x32x64xf32> to vector<32x64xf32>
    %cst_12 = arith.constant dense<0.000000e+00> : vector<256x64xf32>
    %25 = tpu.matmul %22, %24, %cst_12 {dimension_numbers = #tpu.dot_dimension_numbers<[1], [0], [0], [1], [0, 0, 1, 1], [], []>} : vector<256x32xf32>, vector<32x64xf32>, vector<256x64xf32> -> vector<256x64xf32>
    %26 = vector.shape_cast %25 : vector<256x64xf32> to vector<16x16x64xf32>
    %27 = vector.shape_cast %21 : vector<16x64xf32> to vector<16x1x64xf32>
    %28 = vector.broadcast %27 : vector<16x1x64xf32> to vector<16x16x64xf32>
    %29 = arith.mulf %28, %26 : vector<16x16x64xf32>
    %30 = vector.extract_strided_slice %29 {offsets = [0, 0, 0], sizes = [16, 16, 32], strides = [1, 1, 1]} : vector<16x16x64xf32> to vector<16x16x32xf32>
    %cst_13 = arith.constant dense<0.000000e+00> : vector<16x16xf32>
    %31 = vector.multi_reduction <add>, %30, %cst_13 [2] : vector<16x16x32xf32> to vector<16x16xf32>
    %32 = arith.addf %31, %18 : vector<16x16xf32>
    %cst_14 = arith.constant dense<0xFF800000> : vector<16xf32>
    %33 = vector.multi_reduction <maximumf>, %32, %cst_14 [1] : vector<16x16xf32> to vector<16xf32>
    %34 = vector.shape_cast %33 : vector<16xf32> to vector<16x1xf32>
    %35 = vector.broadcast %34 : vector<16x1xf32> to vector<16x16xf32>
    %36 = arith.subf %32, %35 : vector<16x16xf32>
    %37 = math.exp %36 : vector<16x16xf32>
    %cst_15 = arith.constant dense<0.000000e+00> : vector<16xf32>
    %38 = vector.multi_reduction <add>, %37, %cst_15 [1] : vector<16x16xf32> to vector<16xf32>
    %39 = vector.shape_cast %38 : vector<16xf32> to vector<16x1xf32>
    %40 = tpu.reciprocal %39 : vector<16x1xf32> -> vector<16x1xf32>
    %41 = vector.broadcast %40 : vector<16x1xf32> to vector<16x16xf32>
    %42 = arith.mulf %37, %41 : vector<16x16xf32>
    %43 = vector.extract_strided_slice %29 {offsets = [0, 0, 32], sizes = [16, 16, 32], strides = [1, 1, 1]} : vector<16x16x64xf32> to vector<16x16x32xf32>
    %cst_16 = arith.constant dense<0.000000e+00> : vector<16x16xf32>
    %44 = vector.multi_reduction <add>, %43, %cst_16 [2] : vector<16x16x32xf32> to vector<16x16xf32>
    %45 = arith.addf %44, %18 : vector<16x16xf32>
    %cst_17 = arith.constant dense<0xFF800000> : vector<16xf32>
    %46 = vector.multi_reduction <maximumf>, %45, %cst_17 [1] : vector<16x16xf32> to vector<16xf32>
    %47 = vector.shape_cast %46 : vector<16xf32> to vector<16x1xf32>
    %48 = vector.broadcast %47 : vector<16x1xf32> to vector<16x16xf32>
    %49 = arith.subf %45, %48 : vector<16x16xf32>
    %50 = math.exp %49 : vector<16x16xf32>
    %cst_18 = arith.constant dense<0.000000e+00> : vector<16xf32>
    %51 = vector.multi_reduction <add>, %50, %cst_18 [1] : vector<16x16xf32> to vector<16xf32>
    %52 = vector.shape_cast %51 : vector<16xf32> to vector<16x1xf32>
    %53 = tpu.reciprocal %52 : vector<16x1xf32> -> vector<16x1xf32>
    %54 = vector.broadcast %53 : vector<16x1xf32> to vector<16x16xf32>
    %55 = arith.mulf %50, %54 : vector<16x16xf32>
    %56 = vector.shape_cast %42 : vector<16x16xf32> to vector<16x16x1xf32>
    %57 = vector.shape_cast %56 : vector<16x16x1xf32> to vector<16x16x1xf32>
    %58 = vector.broadcast %57 : vector<16x16x1xf32> to vector<16x16x32xf32>
    %59 = vector.shape_cast %55 : vector<16x16xf32> to vector<16x16x1xf32>
    %60 = vector.shape_cast %59 : vector<16x16x1xf32> to vector<16x16x1xf32>
    %61 = vector.broadcast %60 : vector<16x16x1xf32> to vector<16x16x32xf32>
    %62 = tpu.concatenate %58, %61 in 2 : vector<16x16x32xf32>, vector<16x16x32xf32> -> vector<16x16x64xf32>
    %63 = arith.mulf %62, %26 : vector<16x16x64xf32>
    %cst_19 = arith.constant dense<0.000000e+00> : vector<16x64xf32>
    %64 = vector.multi_reduction <add>, %63, %cst_19 [1] : vector<16x16x64xf32> to vector<16x64xf32>
    %c0_20 = arith.constant 0 : index
    %c0_21 = arith.constant 0 : index
    %c0_22 = arith.constant 0 : index
    %65 = vector.load %arg5[%c0_20, %c0_21, %c0_22] : memref<2x64x32xf32, #tpu.memory_space<vmem>>, vector<1x64x32xf32>
    %66 = vector.shape_cast %65 : vector<1x64x32xf32> to vector<64x32xf32>
    %cst_23 = arith.constant dense<0.000000e+00> : vector<16x32xf32>
    %67 = tpu.matmul %64, %66, %cst_23 {dimension_numbers = #tpu.dot_dimension_numbers<[1], [0], [0], [1], [0, 0, 1, 1], [], []>} : vector<16x64xf32>, vector<64x32xf32>, vector<16x32xf32> -> vector<16x32xf32>
    %c0_24 = arith.constant 0 : index
    %c0_25 = arith.constant 0 : index
    %c0_26 = arith.constant 0 : index
    %68 = vector.load %arg6[%c0_24, %c0_25, %c0_26] : memref<2x1x32xf32, #tpu.memory_space<vmem>>, vector<1x1x32xf32>
    %69 = vector.shape_cast %68 : vector<1x1x32xf32> to vector<1x32xf32>
    %70 = vector.broadcast %69 : vector<1x32xf32> to vector<16x32xf32>
    %71 = arith.addf %67, %70 : vector<16x32xf32>
    %72 = arith.addf %2, %71 : vector<16x32xf32>
    %cst_27 = arith.constant dense<0.000000e+00> : vector<16xf32>
    %73 = vector.multi_reduction <add>, %72, %cst_27 [1] : vector<16x32xf32> to vector<16xf32>
    %74 = vector.shape_cast %73 : vector<16xf32> to vector<16x1xf32>
    %cst_28 = arith.constant 3.200000e+01 : f32
    %75 = vector.broadcast %cst_28 : f32 to vector<16x1xf32>
    %76 = arith.divf %74, %75 : vector<16x1xf32>
    %77 = vector.broadcast %76 : vector<16x1xf32> to vector<16x32xf32>
    %78 = arith.subf %72, %77 : vector<16x32xf32>
    %79 = arith.mulf %78, %78 : vector<16x32xf32>
    %cst_29 = arith.constant dense<0.000000e+00> : vector<16xf32>
    %80 = vector.multi_reduction <add>, %79, %cst_29 [1] : vector<16x32xf32> to vector<16xf32>
    %81 = vector.shape_cast %80 : vector<16xf32> to vector<16x1xf32>
    %cst_30 = arith.constant 3.200000e+01 : f32
    %82 = vector.broadcast %cst_30 : f32 to vector<16x1xf32>
    %83 = arith.divf %81, %82 : vector<16x1xf32>
    %cst_31 = arith.constant 9.99999974E-6 : f32
    %84 = vector.broadcast %cst_31 : f32 to vector<16x1xf32>
    %85 = arith.addf %83, %84 : vector<16x1xf32>
    %86 = math.rsqrt %85 : vector<16x1xf32>
    %87 = vector.broadcast %86 : vector<16x1xf32> to vector<16x32xf32>
    %88 = arith.mulf %78, %87 : vector<16x32xf32>
    %c0_32 = arith.constant 0 : index
    %c0_33 = arith.constant 0 : index
    %c0_34 = arith.constant 0 : index
    %89 = vector.load %arg9[%c0_32, %c0_33, %c0_34] : memref<3x32x64xf32, #tpu.memory_space<vmem>>, vector<1x32x64xf32>
    %90 = vector.shape_cast %89 : vector<1x32x64xf32> to vector<32x64xf32>
    %cst_35 = arith.constant dense<0.000000e+00> : vector<16x64xf32>
    %91 = tpu.matmul %88, %90, %cst_35 {dimension_numbers = #tpu.dot_dimension_numbers<[1], [0], [0], [1], [0, 0, 1, 1], [], []>} : vector<16x32xf32>, vector<32x64xf32>, vector<16x64xf32> -> vector<16x64xf32>
    %c0_36 = arith.constant 0 : index
    %c0_37 = arith.constant 0 : index
    %c0_38 = arith.constant 0 : index
    %92 = vector.load %arg10[%c0_36, %c0_37, %c0_38] : memref<3x1x64xf32, #tpu.memory_space<vmem>>, vector<1x1x64xf32>
    %93 = vector.shape_cast %92 : vector<1x1x64xf32> to vector<1x64xf32>
    %94 = vector.broadcast %93 : vector<1x64xf32> to vector<16x64xf32>
    %95 = arith.addf %91, %94 : vector<16x64xf32>
    %96 = arith.mulf %95, %95 : vector<16x64xf32>
    %97 = arith.mulf %95, %96 : vector<16x64xf32>
    %cst_39 = arith.constant 4.471500e-02 : f32
    %98 = vector.broadcast %cst_39 : f32 to vector<16x64xf32>
    %99 = arith.mulf %98, %97 : vector<16x64xf32>
    %100 = arith.addf %95, %99 : vector<16x64xf32>
    %cst_40 = arith.constant 0.797884583 : f32
    %101 = vector.broadcast %cst_40 : f32 to vector<16x64xf32>
    %102 = arith.mulf %101, %100 : vector<16x64xf32>
    %103 = math.tanh %102 : vector<16x64xf32>
    %cst_41 = arith.constant 1.000000e+00 : f32
    %104 = vector.broadcast %cst_41 : f32 to vector<16x64xf32>
    %105 = arith.addf %104, %103 : vector<16x64xf32>
    %cst_42 = arith.constant 5.000000e-01 : f32
    %106 = vector.broadcast %cst_42 : f32 to vector<16x64xf32>
    %107 = arith.mulf %106, %105 : vector<16x64xf32>
    %108 = arith.mulf %95, %107 : vector<16x64xf32>
    %c0_43 = arith.constant 0 : index
    %c0_44 = arith.constant 0 : index
    %c0_45 = arith.constant 0 : index
    %109 = vector.load %arg11[%c0_43, %c0_44, %c0_45] : memref<3x64x32xf32, #tpu.memory_space<vmem>>, vector<1x64x32xf32>
    %110 = vector.shape_cast %109 : vector<1x64x32xf32> to vector<64x32xf32>
    %cst_46 = arith.constant dense<0.000000e+00> : vector<16x32xf32>
    %111 = tpu.matmul %108, %110, %cst_46 {dimension_numbers = #tpu.dot_dimension_numbers<[1], [0], [0], [1], [0, 0, 1, 1], [], []>} : vector<16x64xf32>, vector<64x32xf32>, vector<16x32xf32> -> vector<16x32xf32>
    %c0_47 = arith.constant 0 : index
    %c0_48 = arith.constant 0 : index
    %c0_49 = arith.constant 0 : index
    %112 = vector.load %arg12[%c0_47, %c0_48, %c0_49] : memref<3x1x32xf32, #tpu.memory_space<vmem>>, vector<1x1x32xf32>
    %113 = vector.shape_cast %112 : vector<1x1x32xf32> to vector<1x32xf32>
    %114 = vector.broadcast %113 : vector<1x32xf32> to vector<16x32xf32>
    %115 = arith.addf %111, %114 : vector<16x32xf32>
    %116 = arith.addf %72, %115 : vector<16x32xf32>
    %c0_50 = arith.constant 0 : index
    %c0_51 = arith.constant 0 : index
    %c0_52 = arith.constant 0 : index
    %117 = vector.load %arg7[%c0_50, %c0_51, %c0_52] : memref<1x32x32xf32, #tpu.memory_space<vmem>>, vector<1x32x32xf32>
    %118 = vector.shape_cast %117 : vector<1x32x32xf32> to vector<32x32xf32>
    %cst_53 = arith.constant dense<0.000000e+00> : vector<16x32xf32>
    %119 = tpu.matmul %116, %118, %cst_53 {dimension_numbers = #tpu.dot_dimension_numbers<[1], [0], [0], [1], [0, 0, 1, 1], [], []>} : vector<16x32xf32>, vector<32x32xf32>, vector<16x32xf32> -> vector<16x32xf32>
    %c0_54 = arith.constant 0 : index
    %c0_55 = arith.constant 0 : index
    %c0_56 = arith.constant 0 : index
    %120 = vector.load %arg8[%c0_54, %c0_55, %c0_56] : memref<1x1x32xf32, #tpu.memory_space<vmem>>, vector<1x1x32xf32>
    %121 = vector.shape_cast %120 : vector<1x1x32xf32> to vector<1x32xf32>
    %122 = vector.broadcast %121 : vector<1x32xf32> to vector<16x32xf32>
    %123 = arith.addf %119, %122 : vector<16x32xf32>
    %124 = vector.shape_cast %123 : vector<16x32xf32> to vector<16x1x32xf32>
    %125 = vector.broadcast %124 : vector<16x1x32xf32> to vector<16x16x32xf32>
    %126 = arith.addf %1, %125 : vector<16x16x32xf32>
    %127 = vector.shape_cast %126 : vector<16x16x32xf32> to vector<256x32xf32>
    %cst_57 = arith.constant dense<0.000000e+00> : vector<256xf32>
    %128 = vector.multi_reduction <add>, %127, %cst_57 [1] : vector<256x32xf32> to vector<256xf32>
    %129 = vector.shape_cast %128 : vector<256xf32> to vector<256x1xf32>
    %cst_58 = arith.constant 3.200000e+01 : f32
    %130 = vector.broadcast %cst_58 : f32 to vector<256x1xf32>
    %131 = arith.divf %129, %130 : vector<256x1xf32>
    %132 = vector.broadcast %131 : vector<256x1xf32> to vector<256x32xf32>
    %133 = arith.subf %127, %132 : vector<256x32xf32>
    %134 = arith.mulf %133, %133 : vector<256x32xf32>
    %cst_59 = arith.constant dense<0.000000e+00> : vector<256xf32>
    %135 = vector.multi_reduction <add>, %134, %cst_59 [1] : vector<256x32xf32> to vector<256xf32>
    %136 = vector.shape_cast %135 : vector<256xf32> to vector<256x1xf32>
    %cst_60 = arith.constant 3.200000e+01 : f32
    %137 = vector.broadcast %cst_60 : f32 to vector<256x1xf32>
    %138 = arith.divf %136, %137 : vector<256x1xf32>
    %cst_61 = arith.constant 9.99999974E-6 : f32
    %139 = vector.broadcast %cst_61 : f32 to vector<256x1xf32>
    %140 = arith.addf %138, %139 : vector<256x1xf32>
    %141 = math.rsqrt %140 : vector<256x1xf32>
    %142 = vector.broadcast %141 : vector<256x1xf32> to vector<256x32xf32>
    %143 = arith.mulf %133, %142 : vector<256x32xf32>
    %c1 = arith.constant 1 : index
    %c0_62 = arith.constant 0 : index
    %c0_63 = arith.constant 0 : index
    %144 = vector.load %arg9[%c1, %c0_62, %c0_63] : memref<3x32x64xf32, #tpu.memory_space<vmem>>, vector<1x32x64xf32>
    %145 = vector.shape_cast %144 : vector<1x32x64xf32> to vector<32x64xf32>
    %cst_64 = arith.constant dense<0.000000e+00> : vector<256x64xf32>
    %146 = tpu.matmul %143, %145, %cst_64 {dimension_numbers = #tpu.dot_dimension_numbers<[1], [0], [0], [1], [0, 0, 1, 1], [], []>} : vector<256x32xf32>, vector<32x64xf32>, vector<256x64xf32> -> vector<256x64xf32>
    %c1_65 = arith.constant 1 : index
    %c0_66 = arith.constant 0 : index
    %c0_67 = arith.constant 0 : index
    %147 = vector.load %arg10[%c1_65, %c0_66, %c0_67] : memref<3x1x64xf32, #tpu.memory_space<vmem>>, vector<1x1x64xf32>
    %148 = vector.shape_cast %147 : vector<1x1x64xf32> to vector<1x64xf32>
    %149 = vector.broadcast %148 : vector<1x64xf32> to vector<256x64xf32>
    %150 = arith.addf %146, %149 : vector<256x64xf32>
    %151 = arith.mulf %150, %150 : vector<256x64xf32>
    %152 = arith.mulf %150, %151 : vector<256x64xf32>
    %cst_68 = arith.constant 4.471500e-02 : f32
    %153 = vector.broadcast %cst_68 : f32 to vector<256x64xf32>
    %154 = arith.mulf %153, %152 : vector<256x64xf32>
    %155 = arith.addf %150, %154 : vector<256x64xf32>
    %cst_69 = arith.constant 0.797884583 : f32
    %156 = vector.broadcast %cst_69 : f32 to vector<256x64xf32>
    %157 = arith.mulf %156, %155 : vector<256x64xf32>
    %158 = math.tanh %157 : vector<256x64xf32>
    %cst_70 = arith.constant 1.000000e+00 : f32
    %159 = vector.broadcast %cst_70 : f32 to vector<256x64xf32>
    %160 = arith.addf %159, %158 : vector<256x64xf32>
    %cst_71 = arith.constant 5.000000e-01 : f32
    %161 = vector.broadcast %cst_71 : f32 to vector<256x64xf32>
    %162 = arith.mulf %161, %160 : vector<256x64xf32>
    %163 = arith.mulf %150, %162 : vector<256x64xf32>
    %c1_72 = arith.constant 1 : index
    %c0_73 = arith.constant 0 : index
    %c0_74 = arith.constant 0 : index
    %164 = vector.load %arg11[%c1_72, %c0_73, %c0_74] : memref<3x64x32xf32, #tpu.memory_space<vmem>>, vector<1x64x32xf32>
    %165 = vector.shape_cast %164 : vector<1x64x32xf32> to vector<64x32xf32>
    %cst_75 = arith.constant dense<0.000000e+00> : vector<256x32xf32>
    %166 = tpu.matmul %163, %165, %cst_75 {dimension_numbers = #tpu.dot_dimension_numbers<[1], [0], [0], [1], [0, 0, 1, 1], [], []>} : vector<256x64xf32>, vector<64x32xf32>, vector<256x32xf32> -> vector<256x32xf32>
    %c1_76 = arith.constant 1 : index
    %c0_77 = arith.constant 0 : index
    %c0_78 = arith.constant 0 : index
    %167 = vector.load %arg12[%c1_76, %c0_77, %c0_78] : memref<3x1x32xf32, #tpu.memory_space<vmem>>, vector<1x1x32xf32>
    %168 = vector.shape_cast %167 : vector<1x1x32xf32> to vector<1x32xf32>
    %169 = vector.broadcast %168 : vector<1x32xf32> to vector<256x32xf32>
    %170 = arith.addf %166, %169 : vector<256x32xf32>
    %171 = vector.shape_cast %170 : vector<256x32xf32> to vector<16x16x32xf32>
    %172 = arith.addf %126, %171 : vector<16x16x32xf32>
    %c1_79 = arith.constant 1 : index
    %c0_80 = arith.constant 0 : index
    %c0_81 = arith.constant 0 : index
    %173 = vector.load %arg3[%c1_79, %c0_80, %c0_81] : memref<2x32x64xf32, #tpu.memory_space<vmem>>, vector<1x32x64xf32>
    %174 = vector.shape_cast %173 : vector<1x32x64xf32> to vector<32x64xf32>
    %cst_82 = arith.constant dense<0.000000e+00> : vector<16x64xf32>
    %175 = tpu.matmul %116, %174, %cst_82 {dimension_numbers = #tpu.dot_dimension_numbers<[1], [0], [0], [1], [0, 0, 1, 1], [], []>} : vector<16x32xf32>, vector<32x64xf32>, vector<16x64xf32> -> vector<16x64xf32>
    %176 = vector.shape_cast %172 : vector<16x16x32xf32> to vector<256x32xf32>
    %c1_83 = arith.constant 1 : index
    %c0_84 = arith.constant 0 : index
    %c0_85 = arith.constant 0 : index
    %177 = vector.load %arg4[%c1_83, %c0_84, %c0_85] : memref<2x32x64xf32, #tpu.memory_space<vmem>>, vector<1x32x64xf32>
    %178 = vector.shape_cast %177 : vector<1x32x64xf32> to vector<32x64xf32>
    %cst_86 = arith.constant dense<0.000000e+00> : vector<256x64xf32>
    %179 = tpu.matmul %176, %178, %cst_86 {dimension_numbers = #tpu.dot_dimension_numbers<[1], [0], [0], [1], [0, 0, 1, 1], [], []>} : vector<256x32xf32>, vector<32x64xf32>, vector<256x64xf32> -> vector<256x64xf32>
    %180 = vector.shape_cast %179 : vector<256x64xf32> to vector<16x16x64xf32>
    %181 = vector.shape_cast %175 : vector<16x64xf32> to vector<16x1x64xf32>
    %182 = vector.broadcast %181 : vector<16x1x64xf32> to vector<16x16x64xf32>
    %183 = arith.mulf %182, %180 : vector<16x16x64xf32>
    %184 = vector.extract_strided_slice %183 {offsets = [0, 0, 0], sizes = [16, 16, 32], strides = [1, 1, 1]} : vector<16x16x64xf32> to vector<16x16x32xf32>
    %cst_87 = arith.constant dense<0.000000e+00> : vector<16x16xf32>
    %185 = vector.multi_reduction <add>, %184, %cst_87 [2] : vector<16x16x32xf32> to vector<16x16xf32>
    %186 = arith.addf %185, %18 : vector<16x16xf32>
    %cst_88 = arith.constant dense<0xFF800000> : vector<16xf32>
    %187 = vector.multi_reduction <maximumf>, %186, %cst_88 [1] : vector<16x16xf32> to vector<16xf32>
    %188 = vector.shape_cast %187 : vector<16xf32> to vector<16x1xf32>
    %189 = vector.broadcast %188 : vector<16x1xf32> to vector<16x16xf32>
    %190 = arith.subf %186, %189 : vector<16x16xf32>
    %191 = math.exp %190 : vector<16x16xf32>
    %cst_89 = arith.constant dense<0.000000e+00> : vector<16xf32>
    %192 = vector.multi_reduction <add>, %191, %cst_89 [1] : vector<16x16xf32> to vector<16xf32>
    %193 = vector.shape_cast %192 : vector<16xf32> to vector<16x1xf32>
    %194 = tpu.reciprocal %193 : vector<16x1xf32> -> vector<16x1xf32>
    %195 = vector.broadcast %194 : vector<16x1xf32> to vector<16x16xf32>
    %196 = arith.mulf %191, %195 : vector<16x16xf32>
    %197 = vector.extract_strided_slice %183 {offsets = [0, 0, 32], sizes = [16, 16, 32], strides = [1, 1, 1]} : vector<16x16x64xf32> to vector<16x16x32xf32>
    %cst_90 = arith.constant dense<0.000000e+00> : vector<16x16xf32>
    %198 = vector.multi_reduction <add>, %197, %cst_90 [2] : vector<16x16x32xf32> to vector<16x16xf32>
    %199 = arith.addf %198, %18 : vector<16x16xf32>
    %cst_91 = arith.constant dense<0xFF800000> : vector<16xf32>
    %200 = vector.multi_reduction <maximumf>, %199, %cst_91 [1] : vector<16x16xf32> to vector<16xf32>
    %201 = vector.shape_cast %200 : vector<16xf32> to vector<16x1xf32>
    %202 = vector.broadcast %201 : vector<16x1xf32> to vector<16x16xf32>
    %203 = arith.subf %199, %202 : vector<16x16xf32>
    %204 = math.exp %203 : vector<16x16xf32>
    %cst_92 = arith.constant dense<0.000000e+00> : vector<16xf32>
    %205 = vector.multi_reduction <add>, %204, %cst_92 [1] : vector<16x16xf32> to vector<16xf32>
    %206 = vector.shape_cast %205 : vector<16xf32> to vector<16x1xf32>
    %207 = tpu.reciprocal %206 : vector<16x1xf32> -> vector<16x1xf32>
    %208 = vector.broadcast %207 : vector<16x1xf32> to vector<16x16xf32>
    %209 = arith.mulf %204, %208 : vector<16x16xf32>
    %210 = vector.shape_cast %196 : vector<16x16xf32> to vector<16x16x1xf32>
    %211 = vector.shape_cast %210 : vector<16x16x1xf32> to vector<16x16x1xf32>
    %212 = vector.broadcast %211 : vector<16x16x1xf32> to vector<16x16x32xf32>
    %213 = vector.shape_cast %209 : vector<16x16xf32> to vector<16x16x1xf32>
    %214 = vector.shape_cast %213 : vector<16x16x1xf32> to vector<16x16x1xf32>
    %215 = vector.broadcast %214 : vector<16x16x1xf32> to vector<16x16x32xf32>
    %216 = tpu.concatenate %212, %215 in 2 : vector<16x16x32xf32>, vector<16x16x32xf32> -> vector<16x16x64xf32>
    %217 = arith.mulf %216, %180 : vector<16x16x64xf32>
    %cst_93 = arith.constant dense<0.000000e+00> : vector<16x64xf32>
    %218 = vector.multi_reduction <add>, %217, %cst_93 [1] : vector<16x16x64xf32> to vector<16x64xf32>
    %c1_94 = arith.constant 1 : index
    %c0_95 = arith.constant 0 : index
    %c0_96 = arith.constant 0 : index
    %219 = vector.load %arg5[%c1_94, %c0_95, %c0_96] : memref<2x64x32xf32, #tpu.memory_space<vmem>>, vector<1x64x32xf32>
    %220 = vector.shape_cast %219 : vector<1x64x32xf32> to vector<64x32xf32>
    %cst_97 = arith.constant dense<0.000000e+00> : vector<16x32xf32>
    %221 = tpu.matmul %218, %220, %cst_97 {dimension_numbers = #tpu.dot_dimension_numbers<[1], [0], [0], [1], [0, 0, 1, 1], [], []>} : vector<16x64xf32>, vector<64x32xf32>, vector<16x32xf32> -> vector<16x32xf32>
    %c1_98 = arith.constant 1 : index
    %c0_99 = arith.constant 0 : index
    %c0_100 = arith.constant 0 : index
    %222 = vector.load %arg6[%c1_98, %c0_99, %c0_100] : memref<2x1x32xf32, #tpu.memory_space<vmem>>, vector<1x1x32xf32>
    %223 = vector.shape_cast %222 : vector<1x1x32xf32> to vector<1x32xf32>
    %224 = vector.broadcast %223 : vector<1x32xf32> to vector<16x32xf32>
    %225 = arith.addf %221, %224 : vector<16x32xf32>
    %226 = arith.addf %116, %225 : vector<16x32xf32>
    %cst_101 = arith.constant dense<0.000000e+00> : vector<16xf32>
    %227 = vector.multi_reduction <add>, %226, %cst_101 [1] : vector<16x32xf32> to vector<16xf32>
    %228 = vector.shape_cast %227 : vector<16xf32> to vector<16x1xf32>
    %cst_102 = arith.constant 3.200000e+01 : f32
    %229 = vector.broadcast %cst_102 : f32 to vector<16x1xf32>
    %230 = arith.divf %228, %229 : vector<16x1xf32>
    %231 = vector.broadcast %230 : vector<16x1xf32> to vector<16x32xf32>
    %232 = arith.subf %226, %231 : vector<16x32xf32>
    %233 = arith.mulf %232, %232 : vector<16x32xf32>
    %cst_103 = arith.constant dense<0.000000e+00> : vector<16xf32>
    %234 = vector.multi_reduction <add>, %233, %cst_103 [1] : vector<16x32xf32> to vector<16xf32>
    %235 = vector.shape_cast %234 : vector<16xf32> to vector<16x1xf32>
    %cst_104 = arith.constant 3.200000e+01 : f32
    %236 = vector.broadcast %cst_104 : f32 to vector<16x1xf32>
    %237 = arith.divf %235, %236 : vector<16x1xf32>
    %cst_105 = arith.constant 9.99999974E-6 : f32
    %238 = vector.broadcast %cst_105 : f32 to vector<16x1xf32>
    %239 = arith.addf %237, %238 : vector<16x1xf32>
    %240 = math.rsqrt %239 : vector<16x1xf32>
    %241 = vector.broadcast %240 : vector<16x1xf32> to vector<16x32xf32>
    %242 = arith.mulf %232, %241 : vector<16x32xf32>
    %c2 = arith.constant 2 : index
    %c0_106 = arith.constant 0 : index
    %c0_107 = arith.constant 0 : index
    %243 = vector.load %arg9[%c2, %c0_106, %c0_107] : memref<3x32x64xf32, #tpu.memory_space<vmem>>, vector<1x32x64xf32>
    %244 = vector.shape_cast %243 : vector<1x32x64xf32> to vector<32x64xf32>
    %cst_108 = arith.constant dense<0.000000e+00> : vector<16x64xf32>
    %245 = tpu.matmul %242, %244, %cst_108 {dimension_numbers = #tpu.dot_dimension_numbers<[1], [0], [0], [1], [0, 0, 1, 1], [], []>} : vector<16x32xf32>, vector<32x64xf32>, vector<16x64xf32> -> vector<16x64xf32>
    %c2_109 = arith.constant 2 : index
    %c0_110 = arith.constant 0 : index
    %c0_111 = arith.constant 0 : index
    %246 = vector.load %arg10[%c2_109, %c0_110, %c0_111] : memref<3x1x64xf32, #tpu.memory_space<vmem>>, vector<1x1x64xf32>
    %247 = vector.shape_cast %246 : vector<1x1x64xf32> to vector<1x64xf32>
    %248 = vector.broadcast %247 : vector<1x64xf32> to vector<16x64xf32>
    %249 = arith.addf %245, %248 : vector<16x64xf32>
    %250 = arith.mulf %249, %249 : vector<16x64xf32>
    %251 = arith.mulf %249, %250 : vector<16x64xf32>
    %cst_112 = arith.constant 4.471500e-02 : f32
    %252 = vector.broadcast %cst_112 : f32 to vector<16x64xf32>
    %253 = arith.mulf %252, %251 : vector<16x64xf32>
    %254 = arith.addf %249, %253 : vector<16x64xf32>
    %cst_113 = arith.constant 0.797884583 : f32
    %255 = vector.broadcast %cst_113 : f32 to vector<16x64xf32>
    %256 = arith.mulf %255, %254 : vector<16x64xf32>
    %257 = math.tanh %256 : vector<16x64xf32>
    %cst_114 = arith.constant 1.000000e+00 : f32
    %258 = vector.broadcast %cst_114 : f32 to vector<16x64xf32>
    %259 = arith.addf %258, %257 : vector<16x64xf32>
    %cst_115 = arith.constant 5.000000e-01 : f32
    %260 = vector.broadcast %cst_115 : f32 to vector<16x64xf32>
    %261 = arith.mulf %260, %259 : vector<16x64xf32>
    %262 = arith.mulf %249, %261 : vector<16x64xf32>
    %c2_116 = arith.constant 2 : index
    %c0_117 = arith.constant 0 : index
    %c0_118 = arith.constant 0 : index
    %263 = vector.load %arg11[%c2_116, %c0_117, %c0_118] : memref<3x64x32xf32, #tpu.memory_space<vmem>>, vector<1x64x32xf32>
    %264 = vector.shape_cast %263 : vector<1x64x32xf32> to vector<64x32xf32>
    %cst_119 = arith.constant dense<0.000000e+00> : vector<16x32xf32>
    %265 = tpu.matmul %262, %264, %cst_119 {dimension_numbers = #tpu.dot_dimension_numbers<[1], [0], [0], [1], [0, 0, 1, 1], [], []>} : vector<16x64xf32>, vector<64x32xf32>, vector<16x32xf32> -> vector<16x32xf32>
    %c2_120 = arith.constant 2 : index
    %c0_121 = arith.constant 0 : index
    %c0_122 = arith.constant 0 : index
    %266 = vector.load %arg12[%c2_120, %c0_121, %c0_122] : memref<3x1x32xf32, #tpu.memory_space<vmem>>, vector<1x1x32xf32>
    %267 = vector.shape_cast %266 : vector<1x1x32xf32> to vector<1x32xf32>
    %268 = vector.broadcast %267 : vector<1x32xf32> to vector<16x32xf32>
    %269 = arith.addf %265, %268 : vector<16x32xf32>
    %270 = arith.addf %226, %269 : vector<16x32xf32>
    %cst_123 = arith.constant dense<0.000000e+00> : vector<16xf32>
    %271 = vector.multi_reduction <add>, %270, %cst_123 [1] : vector<16x32xf32> to vector<16xf32>
    %272 = vector.shape_cast %271 : vector<16xf32> to vector<16x1xf32>
    %cst_124 = arith.constant 3.200000e+01 : f32
    %273 = vector.broadcast %cst_124 : f32 to vector<16x1xf32>
    %274 = arith.divf %272, %273 : vector<16x1xf32>
    %275 = vector.broadcast %274 : vector<16x1xf32> to vector<16x32xf32>
    %276 = arith.subf %270, %275 : vector<16x32xf32>
    %277 = arith.mulf %276, %276 : vector<16x32xf32>
    %cst_125 = arith.constant dense<0.000000e+00> : vector<16xf32>
    %278 = vector.multi_reduction <add>, %277, %cst_125 [1] : vector<16x32xf32> to vector<16xf32>
    %279 = vector.shape_cast %278 : vector<16xf32> to vector<16x1xf32>
    %cst_126 = arith.constant 3.200000e+01 : f32
    %280 = vector.broadcast %cst_126 : f32 to vector<16x1xf32>
    %281 = arith.divf %279, %280 : vector<16x1xf32>
    %cst_127 = arith.constant 9.99999974E-6 : f32
    %282 = vector.broadcast %cst_127 : f32 to vector<16x1xf32>
    %283 = arith.addf %281, %282 : vector<16x1xf32>
    %284 = math.rsqrt %283 : vector<16x1xf32>
    %285 = vector.broadcast %284 : vector<16x1xf32> to vector<16x32xf32>
    %286 = arith.mulf %276, %285 : vector<16x32xf32>
    %c0_128 = arith.constant 0 : index
    %c0_129 = arith.constant 0 : index
    %287 = vector.load %arg13[%c0_128, %c0_129] : memref<1x32xf32, #tpu.memory_space<vmem>>, vector<1x32xf32>
    %288 = vector.broadcast %287 : vector<1x32xf32> to vector<16x32xf32>
    %289 = arith.mulf %286, %288 : vector<16x32xf32>
    %c0_130 = arith.constant 0 : index
    %c0_131 = arith.constant 0 : index
    %290 = vector.load %arg14[%c0_130, %c0_131] : memref<1x32xf32, #tpu.memory_space<vmem>>, vector<1x32xf32>
    %291 = vector.broadcast %290 : vector<1x32xf32> to vector<16x32xf32>
    %292 = arith.addf %289, %291 : vector<16x32xf32>
    %c0_132 = arith.constant 0 : index
    %c0_133 = arith.constant 0 : index
    %293 = vector.load %arg15[%c0_132, %c0_133] : memref<16x32xf32, #tpu.memory_space<vmem>>, vector<16x32xf32>
    tpu.vector_store %arg15[%c0_132, %c0_133], %292 {strides = array<i32>} : memref<16x32xf32, #tpu.memory_space<vmem>>, vector<16x32xf32>,
    return
  }
  func.func @transform_0(%arg0: i32) -> (i32, i32) {
    %c0_i32 = arith.constant 0 : i32
    %c0_i32_0 = arith.constant 0 : i32
    return %arg0, %c0_i32 : i32, i32
  }
  func.func @transform_1(%arg0: i32) -> (i32, i32) {
    %c0_i32 = arith.constant 0 : i32
    %c0_i32_0 = arith.constant 0 : i32
    return %arg0, %c0_i32 : i32, i32
  }
  func.func @transform_2(%arg0: i32) -> (i32, i32, i32) {
    %c0_i32 = arith.constant 0 : i32
    %c0_i32_0 = arith.constant 0 : i32
    %c0_i32_1 = arith.constant 0 : i32
    %c0_i32_2 = arith.constant 0 : i32
    return %c0_i32, %c0_i32_0, %c0_i32_1 : i32, i32, i32
  }
  func.func @transform_3(%arg0: i32) -> (i32, i32, i32) {
    %c0_i32 = arith.constant 0 : i32
    %c0_i32_0 = arith.constant 0 : i32
    %c0_i32_1 = arith.constant 0 : i32
    %c0_i32_2 = arith.constant 0 : i32
    return %c0_i32, %c0_i32_0, %c0_i32_1 : i32, i32, i32
  }
  func.func @transform_4(%arg0: i32) -> (i32, i32, i32) {
    %c0_i32 = arith.constant 0 : i32
    %c0_i32_0 = arith.constant 0 : i32
    %c0_i32_1 = arith.constant 0 : i32
    %c0_i32_2 = arith.constant 0 : i32
    return %c0_i32, %c0_i32_0, %c0_i32_1 : i32, i32, i32
  }
  func.func @transform_5(%arg0: i32) -> (i32, i32, i32) {
    %c0_i32 = arith.constant 0 : i32
    %c0_i32_0 = arith.constant 0 : i32
    %c0_i32_1 = arith.constant 0 : i32
    %c0_i32_2 = arith.constant 0 : i32
    return %c0_i32, %c0_i32_0, %c0_i32_1 : i32, i32, i32
  }
  func.func @transform_6(%arg0: i32) -> (i32, i32, i32) {
    %c0_i32 = arith.constant 0 : i32
    %c0_i32_0 = arith.constant 0 : i32
    %c0_i32_1 = arith.constant 0 : i32
    %c0_i32_2 = arith.constant 0 : i32
    return %c0_i32, %c0_i32_0, %c0_i32_1 : i32, i32, i32
  }
  func.func @transform_7(%arg0: i32) -> (i32, i32, i32) {
    %c0_i32 = arith.constant 0 : i32
    %c0_i32_0 = arith.constant 0 : i32
    %c0_i32_1 = arith.constant 0 : i32
    %c0_i32_2 = arith.constant 0 : i32
    return %c0_i32, %c0_i32_0, %c0_i32_1 : i32, i32, i32
  }
  func.func @transform_8(%arg0: i32) -> (i32, i32, i32) {
    %c0_i32 = arith.constant 0 : i32
    %c0_i32_0 = arith.constant 0 : i32
    %c0_i32_1 = arith.constant 0 : i32
    %c0_i32_2 = arith.constant 0 : i32
    return %c0_i32, %c0_i32_0, %c0_i32_1 : i32, i32, i32
  }
  func.func @transform_9(%arg0: i32) -> (i32, i32, i32) {
    %c0_i32 = arith.constant 0 : i32
    %c0_i32_0 = arith.constant 0 : i32
    %c0_i32_1 = arith.constant 0 : i32
    %c0_i32_2 = arith.constant 0 : i32
    return %c0_i32, %c0_i32_0, %c0_i32_1 : i32, i32, i32
  }
  func.func @transform_10(%arg0: i32) -> (i32, i32, i32) {
    %c0_i32 = arith.constant 0 : i32
    %c0_i32_0 = arith.constant 0 : i32
    %c0_i32_1 = arith.constant 0 : i32
    %c0_i32_2 = arith.constant 0 : i32
    return %c0_i32, %c0_i32_0, %c0_i32_1 : i32, i32, i32
  }
  func.func @transform_11(%arg0: i32) -> (i32, i32, i32) {
    %c0_i32 = arith.constant 0 : i32
    %c0_i32_0 = arith.constant 0 : i32
    %c0_i32_1 = arith.constant 0 : i32
    %c0_i32_2 = arith.constant 0 : i32
    return %c0_i32, %c0_i32_0, %c0_i32_1 : i32, i32, i32
  }
  func.func @transform_12(%arg0: i32) -> (i32, i32) {
    %c0_i32 = arith.constant 0 : i32
    %c0_i32_0 = arith.constant 0 : i32
    %c0_i32_1 = arith.constant 0 : i32
    return %c0_i32, %c0_i32_0 : i32, i32
  }
  func.func @transform_13(%arg0: i32) -> (i32, i32) {
    %c0_i32 = arith.constant 0 : i32
    %c0_i32_0 = arith.constant 0 : i32
    %c0_i32_1 = arith.constant 0 : i32
    return %c0_i32, %c0_i32_0 : i32, i32
  }
  func.func @transform_14(%arg0: i32) -> (i32, i32) {
    %c0_i32 = arith.constant 0 : i32
    %c0_i32_0 = arith.constant 0 : i32
    return %arg0, %c0_i32 : i32, i32
  }
}

</mosaic_0001>

<bundles_post_ra>
// kernel: tpu_custom_call.1
= control target key start
LH: loop header
LB: loop body
LE: loop exit
PB: predicated region body
PF: predicated region fallthrough
CT: control target
= control target key end

     0   :  { %19 = vsyncpa [#allocation3], 0  ;;  %s16385_s0 = inlined_call_operand.vmem [shape: f32[512,32], index: 0, kind: input, shape index: {}]   ;;  %s16386_s1 = inlined_call_operand.vmem [shape: f32[32,32], index: 1, kind: input, shape index: {}]   ;;  %s16387_s2 = inlined_call_operand.vmem [shape: f32[2,32,64], index: 2, kind: input, shape index: {}]   ;;  %s16388_s3 = inlined_call_operand.vmem [shape: f32[2,32,64], index: 3, kind: input, shape index: {}]   ;;  %s16389_s4 = inlined_call_operand.vmem [shape: f32[2,64,32], index: 4, kind: input, shape index: {}]   ;;  %s16390_s5 = inlined_call_operand.vmem [shape: f32[2,1,32], index: 5, kind: input, shape index: {}]   ;;  %s16391_s6 = inlined_call_operand.vmem [shape: f32[1,32,32], index: 6, kind: input, shape index: {}]   ;;  %s16392_s7 = inlined_call_operand.vmem [shape: f32[1,1,32], index: 7, kind: input, shape index: {}]   ;;  %s16393_s8 = inlined_call_operand.vmem [shape: f32[3,32,64], index: 8, kind: input, shape index: {}]   ;;  %s16394_s9 = inlined_call_operand.vmem [shape: f32[3,1,64], index: 9, kind: input, shape index: {}]   ;;  %s16395_s10 = inlined_call_operand.vmem [shape: f32[3,64,32], index: 10, kind: input, shape index: {}]   ;;  %s16396_s11 = inlined_call_operand.vmem [shape: f32[3,1,32], index: 11, kind: input, shape index: {}]   ;;  %s16397_s12 = inlined_call_operand.vmem [shape: f32[1,32], index: 12, kind: input, shape index: {}]   ;;  %s16398_s13 = inlined_call_operand.vmem [shape: f32[1,32], index: 13, kind: input, shape index: {}]   ;;  %s16399_s14 = inlined_call_operand.hbm [shape: f32[32,32], index: 14, kind: output, shape index: {}]  }
   0x1   :  { %21 = vsyncpa [#allocation3 + $0x1], 0  ;;  %s11521_s29 = smov 0   ;;  %s11523_s30 = smov 0  }
   0x2   :  { %s11525_s15 = smov 0   ;;  %s11527_s16 = smov 0  }
   0x3 LB: > { %16741 = sst [smem:[#allocation5_spill]] %s11425_s29  ;;  %s11542_s17 = sadd.s32 4294967295, %s11437_s16   ;;  %s11437_s16 = sphi %s11527_s16, %s17327_s16   ;;  %s11433_s15 = sphi %s11525_s15, %s17329_s15   ;;  %s11429_s30 = sphi %s11523_s30, %s17331_s30   ;;  %s11425_s29 = sphi %s11521_s29, %s17330_s29  }
   0x4   : > { %16742 = sst [smem:[#allocation6_spill]] %s11433_s15  ;;  %s9931_s18 = sadd.s32 4294967294, %s11437_s16  }
   0x5   : > { %s11546_s19 = sadd.s32 1, %s11437_s16   ;;  %s338_s20 = sadd.s32 1, %s11433_s15 }
   0x6   : > { %16743 = sst [smem:[#allocation7_spill]] %s11546_s19  ;;  %s335_s21 = ssub.s32 %s11437_s16, %s11546_s19 }
   0x7   : > { %p348_p0 = scmp.ne.s32.totalorder %s11433_s15, %s11429_s30  ;;  %p336_p1 = scmp.eq.s32.totalorder %s335_s21, 0 }
   0x8   : > { %p349_p2 = scmp.eq.s32.totalorder %s11542_s17, 1  ;;  %p354_p3 = scmp.ne.s32.totalorder %s11429_s30, %s11425_s29 }
   0x9   : > { %p355_p4 = scmp.eq.s32.totalorder %s9931_s18, 1  ;;  %p9934_p7 = scmp.ge.s32.totalorder %s11437_s16, 1 }
   0xa   : > { %s11557_s22 = scalar_select %p336_p1, %s11433_s15, %s338_s20  }
   0xb   : > { %p11559_p5 = por %p349_p2, %p348_p0  ;;  %p11563_p6 = por %p355_p4, %p354_p3 }
   0xc   : > { %16744 = sst [smem:[#allocation8_spill]] %s11557_s22  ;;  %p427_p8 = scmp.lt.s32.totalorder %s11437_s16, 3 }
   0xd   : > { %s16746_s24 = scalar_select %p11563_p6, 1, 0 }
   0xe   : > { %p428_p9 = pnand %p9934_p7, %p427_p8 }
   0xf   : > { %16747 = sst [smem:[#allocation9_spill]] %s16746_s24 }
  0x10   : > { %431 = sbr.rel (%p428_p9) target bundleno = 8185 (0x1ff9), region = 76 }
  0x17   : > { %v544_v0 = vld [vmem:[%s16387_s2] sm:$0xff]  ;;  %v545_v1 = vld [vmem:[%s16387_s2 + $0x8] sm:$0xff]  ;;  %s9938_s21 = sshll.u32 %s11542_s17, 1  ;;  %s9936_s22 = sshll.u32 %s11542_s17, 5  ;;  %v525_v3 = vlaneseq  ;;  %v546_v6 = vld [vmem:[%s16387_s2 + $0x10] sm:$0xff]  ;;  %vm548_vm0 = vcmask 261120  }
  0x18   : > { %v630_v2 = vld [vmem:[%s16388_s3] sm:$0xff]  ;;  %v10730_v4 = vpack.c.bf16 %v545_v1, %v544_v0  ;;  %v631_v5 = vld [vmem:[%s16388_s3 + $0x8] sm:$0xff]  ;;  %v547_v7 = vld [vmem:[%s16387_s2 + $0x18] sm:$0xff]  ;;  %p485_p10 = scmp.lt.s32.totalorder %s9938_s21, 3  ;;  %p479_p11 = scmp.lt.s32.totalorder %s9936_s22, 63  ;;  %vm1642_vm9 = vcmask 130112  }
  0x19   : > { %v10738_v8 = vpack.c.bf16 %v631_v5, %v630_v2  ;;  %v10734_v9 = vpack.c.bf16 %v547_v7, %v546_v6  ;;  %v632_v10 = vld [vmem:[%s16388_s3 + $0x10] sm:$0xff]  ;;  %v633_v11 = vld [vmem:[%s16388_s3 + $0x18] sm:$0xff]  ;;  %s9940_s15 = sshll.u32 %s11542_s17, 4  ;;  %v11596_v13 = vshrl.u32 %v525_v3, 7  ;;  %v526_v14 = vand.u32 127, %v525_v3  ;;  %s475_s25 = sand.u32 1, %s11429_s30  }
  0x1a   : > { %10731 = vmatprep.subr.bf16.mxu0 %v10730_v4  ;;  %v10742_v12 = vpack.c.bf16 %v633_v11, %v632_v10  ;;  %s17333_s21 = smov (!%p485_p10, %s9938_s21), 3  ;;  %s17335_s22 = smov (!%p479_p11, %s9936_s22), 63  ;;  %v531_v15 = vstv %s9940_s15  ;;  %v11439_v33 = vmov -1e+30   ;;  %vm1779_vm10 = vcmask 1041409  }
  0x1b   : > { %10739 = vmatprep.subr.bf16.mxu1 %v10738_v8  ;;  %10733 = vmatpush3.bf16.msra.mxu0 %v10730_v4  ;;  %s9939_s19 = sshll.u32 %s17333_s21, 3  ;;  %s9937_s26 = sshll.u32 %s17335_s22, 3  ;;  %v11610_v17 = vsub.s32 %v526_v14, %v11596_v13  ;;  %v1637_v18 = vadd.s32 4294967288, %v526_v14  ;;  %v532_v21 = vadd.s32 %v531_v15, %v11596_v13  ;;  %v529_v24 = vadd.s32 8, %v11596_v13 }
  0x1c   : > { %10741 = vmatpush3.bf16.msra.mxu1 %v10738_v8  ;;  %10735 = vmatprep.subr.bf16.mxu0 %v10734_v9  ;;  %s11601_s29 = scalar_lea.vmem %s16386_s1, %s9939_s19  ;;  %s11607_s18 = scalar_lea.vmem %s16385_s0, %s9937_s26  ;;  %vm535_vm1 = vcmp.eq.s32.totalorder %v526_v14, 8  ;;  %vm534_vm3 = vcmp.lt.s32.totalorder %v526_v14, 8  ;;  %v11631_v29 = vsub.s32 0, %v11596_v13  ;;  %v11638_v32 = vsub.s32 1, %v11596_v13 }
  0x1d   : > { %10743 = vmatprep.subr.bf16.mxu1 %v10742_v12  ;;  %v523_v16 = vld [vmem:[%s11601_s29] sm:$0xff]  ;;  %16748 = vst [vmem:[#allocation10_spill] sm:$0xff] %v11610_v17  ;;  %v524_v19 = vld [vmem:[%s11601_s29 + $0x8] sm:$0xff]  ;;  %v11619_v23 = vsub.s32 %v1637_v18, %v11596_v13  ;;  %v493_v25 = vld [vmem:[%s11607_s18 + $0x10] sm:$0xff]  ;;  %vm536_vm2 = vcmp.lt.s32.totalorder %v532_v21, 2  ;;  %v533_v27 = vadd.s32 %v531_v15, %v529_v24  ;;  %v11649_v37 = vsub.s32 2, %v11596_v13 }
  0x1e   : > { %10375 = vmatprep.mubr.msk.f32.mxu0 %vm548_vm0, %v523_v16  ;;  %v491_v20 = vld [vmem:[%s11607_s18] sm:$0xff]  ;;  %v492_v22 = vld [vmem:[%s11607_s18 + $0x8] sm:$0xff]  ;;  %v494_v26 = vld [vmem:[%s11607_s18 + $0x18] sm:$0xff]  ;;  %16750 = vst [vmem:[#allocation12_spill] sm:$0xff] %v11631_v29  ;;  %v11673_v48 = vsub.s32 3, %v11596_v13  ;;  %v11688_v55 = vsub.s32 4, %v11596_v13 }
  0x1f   : > { %10737 = vmatpush3.bf16.msra.mxu0 %v10734_v9  ;;  %10386 = vmatprep.mubr.msk.f32.mxu1 %vm548_vm0, %v491_v20  ;;  %16749 = vst [vmem:[#allocation11_spill] sm:$0xff] %v11619_v23  ;;  %v495_v28 = vld [vmem:[%s11607_s18 + $0x20] sm:$0xff]  ;;  %vm538_vm4 = vmand %vm535_vm1, %vm536_vm2  ;;  %v496_v30 = vld [vmem:[%s11607_s18 + $0x28] sm:$0xff]  ;;  %vm537_vm5 = vcmp.lt.s32.totalorder %v533_v27, 2  ;;  %v11703_v62 = vsub.s32 5, %v11596_v13  ;;  %v11718_v5 = vsub.s32 6, %v11596_v13 }
  0x20   : > { %10745 = vmatpush3.bf16.msra.mxu1 %v10742_v12  ;;  %v497_v31 = vld [vmem:[%s11607_s18 + $0x30] sm:$0xff]  ;;  %vm540_vm6 = vmor %vm534_vm3, %vm538_vm4  ;;  %16751 = vst [vmem:[#allocation13_spill] sm:$0xff] %v11638_v32  ;;  %v498_v36 = vld [vmem:[%s11607_s18 + $0x38] sm:$0xff]  ;;  %v11733_v12 = vsub.s32 7, %v11596_v13  ;;  %v11440_v21 = vmov 1966171168  }
  0x21   : > { %v11640_v34 = vsel %vm540_vm6, 0.0, %v11439_v33  ;;  %vm539_vm7 = vmand %vm535_vm1, %vm537_vm5  ;;  %16752 = vst [vmem:[#allocation14_spill] sm:$0xff] %v11649_v37  ;;  %v499_v38 = vld [vmem:[%s11607_s18 + $0x40] sm:$0xff]  ;;  %v500_v40 = vld [vmem:[%s11607_s18 + $0x48] sm:$0xff]  ;;  %s11441_s22 = smov 96   ;;  %vm1781_vm11 = vcmask 1042434  }
  0x22   : > { %10376 = vmatmul.mubr.msk.f32.vlgmr.msra.gmra.mrb[0].mxu0 %vm548_vm0, %v524_v19  ;;  %v1268_v35 = vrot.slane %v11640_v34, %v11631_v29  ;;  %v1279_v39 = vrot.slane %v11640_v34, %v11638_v32  ;;  %vm541_vm8 = vmor %vm534_vm3, %vm539_vm7  ;;  %v1290_v41 = vrot.slane %v11640_v34, %v11649_v37  ;;  %v501_v42 = vld [vmem:[%s11607_s18 + $0x50] sm:$0xff]  ;;  %v502_v44 = vld [vmem:[%s11607_s18 + $0x58] sm:$0xff]  ;;  %16753 = vst [vmem:[#allocation15_spill] sm:$0xff] %v11673_v48  ;;  %vm1783_vm12 = vcmask 1043459   ;;  %s9935_s26 = sshll.u32 %s475_s25, 4 }
  0x23   : > { %10387 = vmatmul.mubr.msk.f32.vlgmr.msra.gmra.mrb[0].mxu1 %vm548_vm0, %v492_v22  ;;  %v11661_v43 = vsel %vm541_vm8, 0.0, %v11439_v33  ;;  %v503_v46 = vld [vmem:[%s11607_s18 + $0x60] sm:$0xff]  ;;  %v504_v47 = vld [vmem:[%s11607_s18 + $0x68] sm:$0xff]  ;;  %v505_v50 = vld [vmem:[%s11607_s18 + $0x70] sm:$0xff]  ;;  %v1301_v52 = vrot.slane %v11640_v34, %v11673_v48  ;;  %16754 = vst [vmem:[#allocation16_spill] sm:$0xff] %v11688_v55  ;;  %v1312_v59 = vrot.slane %v11640_v34, %v11688_v55  ;;  %v1323_v2 = vrot.slane %v11640_v34, %v11703_v62  ;;  %s477_s21 = scalar_lea.vmem [#allocation2], %s9935_s26 }
  0x24   : > { %10389 = vmatprep.mubr.msk.f32.mxu1 %vm548_vm0, %v493_v25  ;;  %1270 = vbcast.lane.b32.xlu1 %v1268_v35, 256  ;;  %v1356_v45 = vrot.slane %v11661_v43, %v11631_v29  ;;  %v1367_v49 = vrot.slane %v11661_v43, %v11638_v32  ;;  %v506_v51 = vld [vmem:[%s11607_s18 + $0x78] sm:$0xff]  ;;  %v507_v53 = vld [vmem:[%s11607_s18 + $0x80] sm:$0xff]  ;;  %v508_v54 = vld [vmem:[%s11607_s18 + $0x88] sm:$0xff]  ;;  %v1378_v56 = vrot.slane %v11661_v43, %v11649_v37  ;;  %v959_v22 = vunpack.c.l.s4 %v11440_v21  ;;  %s9857_s20 = sshll.u32 %s477_s21, 4  ;;  %s16340_s20 = int_to_ptr.vmem [resolvable:$true] %s9857_s20 }
  0x25   : > { %1274 = vbcast.lane.b32.xlu0 %v1268_v35, 264  ;;  %v509_v57 = vld [vmem:[%s11607_s18 + $0x90] sm:$0xff]  ;;  %v510_v58 = vld [vmem:[%s11607_s18 + $0x98] sm:$0xff]  ;;  %v511_v60 = vld [vmem:[%s11607_s18 + $0xa0] sm:$0xff]  ;;  %16755 = vst [vmem:[#allocation17_spill] sm:$0xff] %v11703_v62  ;;  %v1389_v63 = vrot.slane %v11661_v43, %v11673_v48  ;;  %v1400_v6 = vrot.slane %v11661_v43, %v11688_v55  ;;  %v1334_v9 = vrot.slane %v11640_v34, %v11718_v5  ;;  %vm1785_vm13 = vcmask 1044484  }
  0x26   : > { %v512_v61 = vld [vmem:[%s11607_s18 + $0xa8] sm:$0xff]  ;;  %v513_v0 = vld [vmem:[%s11607_s18 + $0xb0] sm:$0xff]  ;;  %v514_v1 = vld [vmem:[%s11607_s18 + $0xb8] sm:$0xff]  ;;  %16756 = vst [vmem:[#allocation18_spill] sm:$0xff] %v11718_v5  ;;  %v1411_v14 = vrot.slane %v11661_v43, %v11703_v62  ;;  %v1345_v18 = vrot.slane %v11640_v34, %v11733_v12  ;;  %v1422_v19 = vrot.slane %v11661_v43, %v11718_v5  ;;  %v1433_v20 = vrot.slane %v11661_v43, %v11733_v12  ;;  %s11375_s26 = scalar_lea.vmem %s16340_s20, 256 }
  0x27   : > { %10390 = vmatmul.mubr.msk.f32.gmra.mrb[2].mxu1 %vm548_vm0, %v494_v26  ;;  %v515_v3 = vld [vmem:[%s11607_s18 + $0xc0] sm:$0xff]  ;;  %v516_v4 = vld [vmem:[%s11607_s18 + $0xc8] sm:$0xff]  ;;  %v517_v7 = vld [vmem:[%s11607_s18 + $0xd0] sm:$0xff]  ;;  %16757 = vst [vmem:[#allocation19_spill] sm:$0xff] %v11733_v12  ;;  %v960_v24 = vunpack.c.0.s8 %v959_v22  ;;  %vm1787_vm14 = vcmask 1045509   ;;  %vm1789_vm15 = vcmask 1046534   ;;  %p11376_p12 = scmp.ne.s32.totalorder %s16340_s20, %s11375_s26 }
  0x28   : > { %10392 = vmatprep.mubr.msk.f32.mxu1 %vm548_vm0, %v495_v28  ;;  %1281 = vbcast.lane.b32.xlu1 %v1279_v39, 256  ;;  %v518_v8 = vld [vmem:[%s11607_s18 + $0xd8] sm:$0xff]  ;;  %v519_v10 = vld [vmem:[%s11607_s18 + $0xe0] sm:$0xff]  ;;  %v520_v11 = vld [vmem:[%s11607_s18 + $0xe8] sm:$0xff]  ;;  %vm1791_vm1 = vcmask 1047559   ;;  %vm1802_vm2 = vcmask 130048  }
  0x29   : > { %1292 = vbcast.lane.b32.xlu0 %v1290_v41, 256  ;;  %v521_v15 = vld [vmem:[%s11607_s18 + $0xf0] sm:$0xff]  ;;  %v522_v16 = vld [vmem:[%s11607_s18 + $0xf8] sm:$0xff]  ;;  %v11749_v25 = vsub.s32 %v960_v24, %v11596_v13  ;;  %vm3919_vm3 = vcmask 523264   ;;  %p11377_p13 = pnand %p11376_p12, %p11559_p5 }
  0x2b   : > { %10393 = vmatmul.mubr.msk.f32.gmra.mrb[4].mxu1 %vm548_vm0, %v496_v30  ;;  %16758 = vst [vmem:[#allocation20_spill] sm:$0xff] %v11749_v25  ;;  %p11378_p0 = pneg %p11377_p13 }
  0x2c   : > { %10395 = vmatprep.mubr.msk.f32.mxu1 %vm548_vm0, %v497_v31  ;;  %1285 = vbcast.lane.b32.xlu1 %v1279_v39, 264 }
  0x2d   : > { %1358 = vbcast.lane.b32.xlu0 %v1356_v45, 256 }
  0x2f   : > { %10396 = vmatmul.mubr.msk.f32.gmra.mrb[6].mxu1 %vm548_vm0, %v498_v36 }
  0x30   : > { %10398 = vmatprep.mubr.msk.f32.mxu1 %vm548_vm0, %v499_v38  ;;  %1296 = vbcast.lane.b32.xlu1 %v1290_v41, 264 }
  0x31   : > { %1369 = vbcast.lane.b32.xlu0 %v1367_v49, 256 }
  0x33   : > { %10399 = vmatmul.mubr.msk.f32.gmra.mrb[8].mxu1 %vm548_vm0, %v500_v40 }
  0x34   : > { %10401 = vmatprep.mubr.msk.f32.mxu1 %vm548_vm0, %v501_v42  ;;  %1362 = vbcast.lane.b32.xlu1 %v1356_v45, 264 }
  0x35   : > { %1303 = vbcast.lane.b32.xlu0 %v1301_v52, 256 }
  0x37   : > { %10402 = vmatmul.mubr.msk.f32.gmra.mrb[10].mxu1 %vm548_vm0, %v502_v44 }
  0x38   : > { %10404 = vmatprep.mubr.msk.f32.mxu1 %vm548_vm0, %v503_v46  ;;  %1373 = vbcast.lane.b32.xlu1 %v1367_v49, 264 }
  0x39   : > { %1380 = vbcast.lane.b32.xlu0 %v1378_v56, 256 }
  0x3b   : > { %10405 = vmatmul.mubr.msk.f32.gmra.mrb[12].mxu1 %vm548_vm0, %v504_v47 }
  0x3c   : > { %10407 = vmatprep.mubr.msk.f32.mxu1 %vm548_vm0, %v505_v50  ;;  %1307 = vbcast.lane.b32.xlu1 %v1301_v52, 264 }
  0x3d   : > { %1314 = vbcast.lane.b32.xlu0 %v1312_v59, 256 }
  0x3f   : > { %10408 = vmatmul.mubr.msk.f32.gmra.mrb[14].mxu1 %vm548_vm0, %v506_v51 }
  0x40   : > { %10410 = vmatprep.mubr.msk.f32.mxu1 %vm548_vm0, %v507_v53  ;;  %1384 = vbcast.lane.b32.xlu1 %v1378_v56, 264 }
  0x41   : > { %1391 = vbcast.lane.b32.xlu0 %v1389_v63, 256 }
  0x43   : > { %10411 = vmatmul.mubr.msk.f32.gmra.mrb[16].mxu1 %vm548_vm0, %v508_v54 }
  0x44   : > { %10413 = vmatprep.mubr.msk.f32.mxu1 %vm548_vm0, %v509_v57  ;;  %1318 = vbcast.lane.b32.xlu1 %v1312_v59, 264 }
  0x45   : > { %1325 = vbcast.lane.b32.xlu0 %v1323_v2, 256 }
  0x47   : > { %10414 = vmatmul.mubr.msk.f32.gmra.mrb[18].mxu1 %vm548_vm0, %v510_v58 }
  0x48   : > { %10416 = vmatprep.mubr.msk.f32.mxu1 %vm548_vm0, %v511_v60  ;;  %1395 = vbcast.lane.b32.xlu1 %v1389_v63, 264 }
  0x49   : > { %1402 = vbcast.lane.b32.xlu0 %v1400_v6, 256 }
  0x4b   : > { %10417 = vmatmul.mubr.msk.f32.gmra.mrb[20].mxu1 %vm548_vm0, %v512_v61 }
  0x4c   : > { %10419 = vmatprep.mubr.msk.f32.mxu1 %vm548_vm0, %v513_v0  ;;  %1329 = vbcast.lane.b32.xlu1 %v1323_v2, 264 }
  0x4d   : > { %1336 = vbcast.lane.b32.xlu0 %v1334_v9, 256 }
  0x4f   : > { %10420 = vmatmul.mubr.msk.f32.gmra.mrb[22].mxu1 %vm548_vm0, %v514_v1 }
  0x50   : > { %10422 = vmatprep.mubr.msk.f32.mxu1 %vm548_vm0, %v515_v3  ;;  %1406 = vbcast.lane.b32.xlu1 %v1400_v6, 264 }
  0x51   : > { %1413 = vbcast.lane.b32.xlu0 %v1411_v14, 256 }
  0x53   : > { %10423 = vmatmul.mubr.msk.f32.gmra.mrb[24].mxu1 %vm548_vm0, %v516_v4 }
  0x54   : > { %10425 = vmatprep.mubr.msk.f32.mxu1 %vm548_vm0, %v517_v7  ;;  %1340 = vbcast.lane.b32.xlu1 %v1334_v9, 264 }
  0x55   : > { %1347 = vbcast.lane.b32.xlu0 %v1345_v18, 256 }
  0x57   : > { %10426 = vmatmul.mubr.msk.f32.gmra.mrb[26].mxu1 %vm548_vm0, %v518_v8 }
  0x58   : > { %10428 = vmatprep.mubr.msk.f32.mxu1 %vm548_vm0, %v519_v10  ;;  %1417 = vbcast.lane.b32.xlu1 %v1411_v14, 264 }
  0x59   : > { %1424 = vbcast.lane.b32.xlu0 %v1422_v19, 256 }
  0x5b   : > { %10429 = vmatmul.mubr.msk.f32.gmra.mrb[28].mxu1 %vm548_vm0, %v520_v11 }
  0x5c   : > { %10431 = vmatprep.mubr.msk.f32.mxu1 %vm548_vm0, %v521_v15  ;;  %1351 = vbcast.lane.b32.xlu1 %v1345_v18, 264 }
  0x5d   : > { %1435 = vbcast.lane.b32.xlu0 %v1433_v20, 256 }
  0x5f   : > { %10432 = vmatmul.mubr.msk.f32.gmra.mrb[30].mxu1 %vm548_vm0, %v522_v16 }
  0x60   : > { %1428 = vbcast.lane.b32.xlu1 %v1422_v19, 264 }
  0x64   : > { %1439 = vbcast.lane.b32.xlu1 %v1433_v20, 264 }
  0xf5   : > { %v11751_v26 = vpop.f32.mrb[0].mxu0 }
  0xf6   : > { %v621_v27 = vpop.f32.mrb[1].mxu0  ;;  %v11753_v28 = vpop.f32.mrb[0].mxu1  ;;  %v1013_v15 = vrot.slane %v11751_v26, %v11749_v25 }
  0xf7   : > { %16759 = vst [vmem:[#allocation21_spill] sm:$0xff] %v11753_v28  ;;  %v964_v30 = vrot.slane %v621_v27, %v11749_v25  ;;  %v11756_v31 = vpop.f32.mrb[1].mxu1  ;;  %v957_v33 = vcombine.high %v621_v27, %v621_v27 }
  0xf8   : > { %16760 = vst [vmem:[#allocation22_spill] sm:$0xff] %v11756_v31  ;;  %v1021_v24 = vcombine.high %v1013_v15, %v1013_v15  ;;  %v1029_v27 = vrot.slane %v1013_v15, %v11749_v25 }
  0xf9   : > { %v972_v34 = vcombine.high %v964_v30, %v964_v30  ;;  %v980_v35 = vrot.slane %v964_v30, %v11749_v25  ;;  %v971_v41 = vrot.slane %v957_v33, %v11749_v25 }
  0xfa   : > { %v11759_v36 = vpop.f32.mrb[2].mxu1 }
  0xfb   : > { %16761 = vst [vmem:[#allocation23_spill] sm:$0xff] %v11759_v36  ;;  %v1058_v38 = vrot.slane %v980_v35, %v11631_v29  ;;  %v994_v13 = vrot.slane %v972_v34, %v11749_v25  ;;  %v11763_v39 = vpop.f32.mrb[3].mxu1  ;;  %v1002_v40 = vcombine.high %v980_v35, %v980_v35  ;;  %v973_v57 = vcombine.high %v971_v41, %v971_v41 }
  0xfc   : > { %16762 = vst [vmem:[#allocation24_spill] sm:$0xff] %v11763_v39  ;;  %v987_v58 = vrot.slane %v971_v41, %v11749_v25 }
  0xfd   : > { %v1136_v42 = vmul.f32 %v11753_v28, %v1058_v38  ;;  %v11768_v43 = vmul.f32 %v1058_v38, %v11756_v31  ;;  %v1062_v44 = vrot.slane %v994_v13, %v11631_v29  ;;  %v1066_v45 = vrot.slane %v1002_v40, %v11631_v29 }
  0xfe   : > { %v11772_v46 = vpop.f32.mrb[4].mxu1  ;;  %v1004_v47 = vcombine.high %v994_v13, %v994_v13  ;;  %v1074_v0 = vrot.slane %v987_v58, %v11631_v29  ;;  %v1001_v1 = vrot.slane %v973_v57, %v11749_v25  ;;  %v1003_v8 = vcombine.high %v987_v58, %v987_v58 }
  0xff   : > { %16763 = vst [vmem:[#allocation25_spill] sm:$0xff] %v11772_v46  ;;  %v11775_v49 = vmul.f32 %v11759_v36, %v1062_v44  ;;  %v11778_v50 = vmul.f32 %v1062_v44, %v11763_v39  ;;  %v11781_v51 = vmul.f32 %v11772_v46, %v1066_v45  ;;  %v11783_v52 = vpop.f32.mrb[5].mxu1  ;;  %2429 = vrot.lane.b32.xlu0 %v11768_v43, %s11441_s22  ;;  %v1170_v53 = vsel %vm548_vm0, %v1136_v42, 0.0 }
 0x100   : > { %16764 = vst [vmem:[#allocation26_spill] sm:$0xff] %v11783_v52  ;;  %v11789_v54 = vmul.f32 %v1066_v45, %v11783_v52  ;;  %1171 = vadd.xlane.f32.xlu1 %v1170_v53  ;;  %v1070_v56 = vrot.slane %v1004_v47, %v11631_v29  ;;  %v1078_v7 = vrot.slane %v1001_v1, %v11631_v29 }
 0x101   : > { %v1082_v16 = vrot.slane %v1003_v8, %v11631_v29  ;;  %v1005_v18 = vcombine.high %v1001_v1, %v1001_v1  ;;  %v1090_v13 = vrot.slane %v1029_v27, %v11631_v29  ;;  %v1043_v40 = vrot.slane %v1021_v24, %v11749_v25 }
 0x102   : > { %v11793_v59 = vpop.f32.mrb[6].mxu1  ;;  %v1006_v47 = vcombine.high %v11751_v26, %v11751_v26 }
 0x103   : > { %16765 = vst [vmem:[#allocation27_spill] sm:$0xff] %v11793_v59  ;;  %v11796_v60 = vmul.f32 %v11793_v59, %v1070_v56  ;;  %v11798_v61 = vpop.f32.mrb[7].mxu1  ;;  %2431 = vrot.lane.b32.xlu0 %v1136_v42, %s11441_s22  ;;  %v1086_v30 = vrot.slane %v1005_v18, %v11631_v29  ;;  %v1094_v53 = vrot.slane %v1043_v40, %v11631_v29 }
 0x104   : > { %16766 = vst [vmem:[#allocation28_spill] sm:$0xff] %v11798_v61  ;;  %v11802_v63 = vmul.f32 %v1070_v56, %v11798_v61  ;;  %v1051_v56 = vcombine.high %v1029_v27, %v1029_v27  ;;  %v1053_v8 = vcombine.high %v1043_v40, %v1043_v40 }
 0x106   : > { %v11806_v2 = vpop.f32.mrb[8].mxu1  ;;  %v1098_v26 = vrot.slane %v1051_v56, %v11631_v29 }
 0x107   : > { %16767 = vst [vmem:[#allocation29_spill] sm:$0xff] %v11806_v2  ;;  %v11809_v3 = vmul.f32 %v11806_v2, %v1074_v0  ;;  %v11811_v4 = vpop.f32.mrb[9].mxu1 }
 0x108   : > { %16768 = vst [vmem:[#allocation30_spill] sm:$0xff] %v11811_v4  ;;  %v11814_v6 = vmul.f32 %v1074_v0, %v11811_v4 }
 0x10a   : > { %v11817_v9 = vpop.f32.mrb[10].mxu1 }
 0x10b   : > { %16769 = vst [vmem:[#allocation31_spill] sm:$0xff] %v11817_v9  ;;  %v11820_v10 = vmul.f32 %v11817_v9, %v1078_v7  ;;  %v11822_v11 = vpop.f32.mrb[11].mxu1 }
 0x10c   : > { %16770 = vst [vmem:[#allocation32_spill] sm:$0xff] %v11822_v11  ;;  %v11825_v14 = vmul.f32 %v1078_v7, %v11822_v11  ;;  %v1020_v7 = vrot.slane %v1006_v47, %v11749_v25 }
 0x10e   : > { %v11830_v19 = vpop.f32.mrb[12].mxu1  ;;  %v1022_v27 = vcombine.high %v1020_v7, %v1020_v7  ;;  %v1036_v47 = vrot.slane %v1020_v7, %v11749_v25 }
 0x10f   : > { %16771 = vst [vmem:[#allocation33_spill] sm:$0xff] %v11830_v19  ;;  %v11833_v20 = vmul.f32 %v11830_v19, %v1082_v16  ;;  %v11835_v21 = vpop.f32.mrb[13].mxu1 }
 0x110   : > { %16772 = vst [vmem:[#allocation34_spill] sm:$0xff] %v11835_v21  ;;  %v11838_v22 = vmul.f32 %v1082_v16, %v11835_v21 }
 0x111   : > { %2433 = vrot.lane.b32.xlu1 %v11778_v50, %s11441_s22 }
 0x112   : > { %v11844_v33 = vpop.f32.mrb[14].mxu1 }
 0x113   : > { %16773 = vst [vmem:[#allocation35_spill] sm:$0xff] %v11844_v33  ;;  %v11847_v34 = vmul.f32 %v11844_v33, %v1086_v30  ;;  %v11849_v35 = vpop.f32.mrb[15].mxu1 }
 0x114   : > { %16774 = vst [vmem:[#allocation36_spill] sm:$0xff] %v11849_v35  ;;  %v11852_v38 = vmul.f32 %v1086_v30, %v11849_v35  ;;  %v1102_v30 = vrot.slane %v1053_v8, %v11631_v29  ;;  %v1050_v8 = vrot.slane %v1022_v27, %v11749_v25 }
 0x115   : > { %2435 = vrot.lane.b32.xlu1 %v11775_v49, %s11441_s22 }
 0x116   : > { %v11858_v41 = vpop.f32.mrb[16].mxu1 }
 0x117   : > { %16775 = vst [vmem:[#allocation37_spill] sm:$0xff] %v11858_v41  ;;  %v11861_v42 = vmul.f32 %v11858_v41, %v1090_v13  ;;  %v11863_v44 = vpop.f32.mrb[17].mxu1 }
 0x118   : > { %16776 = vst [vmem:[#allocation38_spill] sm:$0xff] %v11863_v44  ;;  %v11866_v45 = vmul.f32 %v1090_v13, %v11863_v44  ;;  %v1167_v13 = vsel %vm548_vm0, %v11768_v43, 0.0 }
 0x119   : > { %2439 = vrot.lane.b32.xlu1 %v11781_v51, %s11441_s22 }
 0x11a   : > { %v11873_v57 = vpop.f32.mrb[18].mxu1 }
 0x11b   : > { %16777 = vst [vmem:[#allocation39_spill] sm:$0xff] %v11873_v57  ;;  %v11876_v58 = vmul.f32 %v11873_v57, %v1094_v53  ;;  %v11878_v0 = vpop.f32.mrb[19].mxu1 }
 0x11c   : > { %16778 = vst [vmem:[#allocation40_spill] sm:$0xff] %v11878_v0  ;;  %v11881_v1 = vmul.f32 %v1094_v53, %v11878_v0  ;;  %v1052_v0 = vcombine.high %v1036_v47, %v1036_v47 }
 0x11e   : > { %v11885_v15 = vpop.f32.mrb[20].mxu1  ;;  %v1114_v25 = vrot.slane %v1052_v0, %v11631_v29 }
 0x11f   : > { %16779 = vst [vmem:[#allocation41_spill] sm:$0xff] %v11885_v15  ;;  %v11888_v16 = vmul.f32 %v11885_v15, %v1098_v26  ;;  %v11890_v18 = vpop.f32.mrb[21].mxu1 }
 0x120   : > { %16780 = vst [vmem:[#allocation42_spill] sm:$0xff] %v11890_v18  ;;  %v11893_v24 = vmul.f32 %v1098_v26, %v11890_v18  ;;  %v1106_v26 = vrot.slane %v1036_v47, %v11631_v29 }
 0x122   : > { %v11899_v53 = vpop.f32.mrb[22].mxu1  ;;  %1168 = vadd.xlane.f32.xlu0 %v1167_v13 }
 0x123   : > { %16781 = vst [vmem:[#allocation43_spill] sm:$0xff] %v11899_v53  ;;  %v11902_v40 = vmul.f32 %v11899_v53, %v1102_v30  ;;  %v11904_v56 = vpop.f32.mrb[23].mxu1  ;;  %v1110_v53 = vrot.slane %v1050_v8, %v11631_v29 }
 0x124   : > { %16782 = vst [vmem:[#allocation44_spill] sm:$0xff] %v11904_v56  ;;  %v11907_v15 = vmul.f32 %v1102_v30, %v11904_v56 }
 0x126   : > { %v11911_v18 = vpop.f32.mrb[24].mxu1 }
 0x127   : > { %16783 = vst [vmem:[#allocation45_spill] sm:$0xff] %v11911_v18  ;;  %v11914_v43 = vmul.f32 %v11911_v18, %v1106_v26  ;;  %v11916_v7 = vpop.f32.mrb[25].mxu1  ;;  %v1054_v18 = vcombine.high %v1050_v8, %v1050_v8  ;;  %v1179_v8 = vsel %vm548_vm0, %v11789_v54, 0.0 }
 0x128   : > { %16784 = vst [vmem:[#allocation46_spill] sm:$0xff] %v11916_v7  ;;  %v11919_v13 = vmul.f32 %v1106_v26, %v11916_v7 }
 0x12a   : > { %v11922_v57 = vpop.f32.mrb[26].mxu1 }
 0x12b   : > { %16785 = vst [vmem:[#allocation47_spill] sm:$0xff] %v11922_v57  ;;  %v11925_v30 = vmul.f32 %v11922_v57, %v1110_v53  ;;  %v11927_v56 = vpop.f32.mrb[27].mxu1  ;;  %v1118_v57 = vrot.slane %v1054_v18, %v11631_v29  ;;  %v1176_v18 = vsel %vm548_vm0, %v11775_v49, 0.0  ;;  %v1191_v49 = vsel %vm548_vm0, %v11814_v6, 0.0 }
 0x12c   : > { %16786 = vst [vmem:[#allocation48_spill] sm:$0xff] %v11927_v56  ;;  %v11930_v27 = vmul.f32 %v1110_v53, %v11927_v56 }
 0x12e   : > { %v11933_v44 = vpop.f32.mrb[28].mxu1 }
 0x12f   : > { %16787 = vst [vmem:[#allocation49_spill] sm:$0xff] %v11933_v44  ;;  %v11936_v26 = vmul.f32 %v11933_v44, %v1114_v25  ;;  %v11938_v7 = vpop.f32.mrb[29].mxu1 }
 0x130   : > { %16788 = vst [vmem:[#allocation50_spill] sm:$0xff] %v11938_v7  ;;  %v11941_v47 = vmul.f32 %v1114_v25, %v11938_v7  ;;  %v1173_v25 = vsel %vm548_vm0, %v11778_v50, 0.0  ;;  %v1188_v50 = vsel %vm548_vm0, %v11796_v60, 0.0 }
 0x131   : > { %v1254_v19 = vsel %vm548_vm0, %v11936_v26, 0.0 }
 0x132   : > { %v11944_v41 = vpop.f32.mrb[30].mxu1 }
 0x133   : > { %16789 = vst [vmem:[#allocation51_spill] sm:$0xff] %v11944_v41  ;;  %v11947_v53 = vmul.f32 %v11944_v41, %v1118_v57  ;;  %v11949_v56 = vpop.f32.mrb[31].mxu1 }
 0x134   : > { %16790 = vst [vmem:[#allocation52_spill] sm:$0xff] %v11949_v56  ;;  %v11952_v0 = vmul.f32 %v1118_v57, %v11949_v56  ;;  %v1182_v57 = vsel %vm548_vm0, %v11781_v51, 0.0  ;;  %v1185_v56 = vsel %vm548_vm0, %v11802_v63, 0.0  ;;  %v1194_v51 = vsel %vm548_vm0, %v11809_v3, 0.0 }
 0x136   : > { %v1257_v39 = vsel %vm548_vm0, %v11952_v0, 0.0 }
 0x138   : > { %2437 = vrot.lane.b32.xlu0 %v11789_v54, %s11441_s22  ;;  %v1197_v54 = vsel %vm548_vm0, %v11825_v14, 0.0 }
 0x13d   : > { %1180 = vadd.xlane.f32.xlu1 %v1179_v8 }
 0x14e   : > { %2443 = vrot.lane.b32.xlu1 %v11796_v60, %s11441_s22  ;;  %v1200_v60 = vsel %vm548_vm0, %v11820_v10, 0.0 }
 0x157   : > { %1174 = vadd.xlane.f32.xlu0 %v1173_v25  ;;  %v12056_v25 = vpop.permute.xlu1 %1270 }
 0x158   : > { %16796 = vst [vmem:[#allocation58_spill] sm:$0xff] %v12056_v25 }
 0x15b   : > { %1177 = vadd.xlane.f32.xlu0 %v1176_v18  ;;  %v12060_v18 = vpop.permute.xlu1 %1281 }
 0x15c   : > { %16798 = vst [vmem:[#allocation60_spill] sm:$0xff] %v12060_v18 }
 0x15f   : > { %1183 = vadd.xlane.f32.xlu0 %v1182_v57 }
 0x172   : > { %1186 = vadd.xlane.f32.xlu1 %v1185_v56 }
 0x175   : > { %2441 = vrot.lane.b32.xlu0 %v11802_v63, %s11441_s22  ;;  %v1203_v63 = vsel %vm548_vm0, %v11838_v22, 0.0 }
 0x183   : > { %2447 = vrot.lane.b32.xlu1 %v11809_v3, %s11441_s22  ;;  %v1206_v3 = vsel %vm548_vm0, %v11833_v20, 0.0 }
 0x194   : > { %1189 = vadd.xlane.f32.xlu0 %v1188_v50  ;;  %v1245_v50 = vsel %vm548_vm0, %v11930_v27, 0.0 }
 0x1a7   : > { %1192 = vadd.xlane.f32.xlu1 %v1191_v49  ;;  %v12066_v49 = vpop.permute.xlu1 %1285 }
 0x1a8   : > { %16800 = vst [vmem:[#allocation62_spill] sm:$0xff] %v12066_v49 }
 0x1aa   : > { %2445 = vrot.lane.b32.xlu0 %v11814_v6, %s11441_s22  ;;  %v1209_v6 = vsel %vm548_vm0, %v11852_v38, 0.0 }
 0x1b8   : > { %2451 = vrot.lane.b32.xlu1 %v11820_v10, %s11441_s22  ;;  %v1212_v10 = vsel %vm548_vm0, %v11847_v34, 0.0 }
 0x1c9   : > { %1195 = vadd.xlane.f32.xlu0 %v1194_v51 }
 0x1dc   : > { %1198 = vadd.xlane.f32.xlu1 %v1197_v54 }
 0x1df   : > { %2449 = vrot.lane.b32.xlu0 %v11825_v14, %s11441_s22  ;;  %v1215_v14 = vsel %vm548_vm0, %v11866_v45, 0.0 }
 0x1ed   : > { %2455 = vrot.lane.b32.xlu1 %v11833_v20, %s11441_s22  ;;  %v1218_v20 = vsel %vm548_vm0, %v11861_v42, 0.0 }
 0x1fe   : > { %1201 = vadd.xlane.f32.xlu0 %v1200_v60 }
 0x211   : > { %1204 = vadd.xlane.f32.xlu1 %v1203_v63 }
 0x214   : > { %2453 = vrot.lane.b32.xlu0 %v11838_v22, %s11441_s22  ;;  %v1221_v22 = vsel %vm548_vm0, %v11881_v1, 0.0 }
 0x222   : > { %2459 = vrot.lane.b32.xlu1 %v11847_v34, %s11441_s22  ;;  %v1224_v34 = vsel %vm548_vm0, %v11876_v58, 0.0 }
 0x233   : > { %1207 = vadd.xlane.f32.xlu0 %v1206_v3 }
 0x246   : > { %1210 = vadd.xlane.f32.xlu1 %v1209_v6 }
 0x249   : > { %2457 = vrot.lane.b32.xlu0 %v11852_v38, %s11441_s22  ;;  %v1227_v38 = vsel %vm548_vm0, %v11893_v24, 0.0 }
 0x257   : > { %2463 = vrot.lane.b32.xlu1 %v11861_v42, %s11441_s22  ;;  %v1230_v42 = vsel %vm548_vm0, %v11888_v16, 0.0 }
 0x268   : > { %1213 = vadd.xlane.f32.xlu0 %v1212_v10 }
 0x27b   : > { %1216 = vadd.xlane.f32.xlu1 %v1215_v14 }
 0x27e   : > { %2461 = vrot.lane.b32.xlu0 %v11866_v45, %s11441_s22  ;;  %v1233_v45 = vsel %vm548_vm0, %v11907_v15, 0.0 }
 0x28c   : > { %2467 = vrot.lane.b32.xlu1 %v11876_v58, %s11441_s22  ;;  %v1236_v58 = vsel %vm548_vm0, %v11902_v40, 0.0 }
 0x29d   : > { %1219 = vadd.xlane.f32.xlu0 %v1218_v20 }
 0x2b0   : > { %1222 = vadd.xlane.f32.xlu1 %v1221_v22 }
 0x2b3   : > { %2465 = vrot.lane.b32.xlu0 %v11881_v1, %s11441_s22  ;;  %v1239_v1 = vsel %vm548_vm0, %v11919_v13, 0.0 }
 0x2c1   : > { %2471 = vrot.lane.b32.xlu1 %v11888_v16, %s11441_s22  ;;  %v12042_v16 = vpop.permute.xlu0 %1274 }
 0x2c2   : > { %16791 = vst [vmem:[#allocation53_spill] sm:$0xff] %v12042_v16 }
 0x2d2   : > { %1225 = vadd.xlane.f32.xlu0 %v1224_v34  ;;  %v1248_v34 = vsel %vm548_vm0, %v11925_v30, 0.0 }
 0x2e5   : > { %1228 = vadd.xlane.f32.xlu1 %v1227_v38 }
 0x2e8   : > { %2469 = vrot.lane.b32.xlu0 %v11893_v24, %s11441_s22 }
 0x2f6   : > { %2475 = vrot.lane.b32.xlu1 %v11902_v40, %s11441_s22  ;;  %v1242_v40 = vsel %vm548_vm0, %v11914_v43, 0.0 }
 0x307   : > { %1231 = vadd.xlane.f32.xlu0 %v1230_v42 }
 0x31a   : > { %1234 = vadd.xlane.f32.xlu1 %v1233_v45 }
 0x31d   : > { %2473 = vrot.lane.b32.xlu0 %v11907_v15, %s11441_s22  ;;  %v12046_v15 = vpop.permute.xlu0 %1292 }
 0x31e   : > { %16792 = vst [vmem:[#allocation54_spill] sm:$0xff] %v12046_v15 }
 0x321   : > { %v12048_v24 = vpop.permute.xlu0 %1358 }
 0x322   : > { %16793 = vst [vmem:[#allocation55_spill] sm:$0xff] %v12048_v24 }
 0x325   : > { %v12050_v56 = vpop.permute.xlu0 %1369 }
 0x326   : > { %16794 = vst [vmem:[#allocation56_spill] sm:$0xff] %v12050_v56 }
 0x329   : > { %v12054_v8 = vpop.permute.xlu0 %1303 }
 0x32a   : > { %16795 = vst [vmem:[#allocation57_spill] sm:$0xff] %v12054_v8 }
 0x32b   : > { %2479 = vrot.lane.b32.xlu1 %v11914_v43, %s11441_s22  ;;  %v12072_v43 = vpop.permute.xlu1 %1296 }
 0x32c   : > { %16802 = vst [vmem:[#allocation64_spill] sm:$0xff] %v12072_v43 }
 0x32f   : > { %v12076_v60 = vpop.permute.xlu1 %1362 }
 0x330   : > { %16804 = vst [vmem:[#allocation66_spill] sm:$0xff] %v12076_v60 }
 0x333   : > { %v12082_v3 = vpop.permute.xlu1 %1373 }
 0x334   : > { %16806 = vst [vmem:[#allocation68_spill] sm:$0xff] %v12082_v3 }
 0x337   : > { %v12086_v10 = vpop.permute.xlu1 %1307 }
 0x338   : > { %16808 = vst [vmem:[#allocation70_spill] sm:$0xff] %v12086_v10 }
 0x33b   : > { %v12090_v20 = vpop.permute.xlu1 %1384 }
 0x33c   : > { %1237 = vadd.xlane.f32.xlu0 %v1236_v58  ;;  %16810 = vst [vmem:[#allocation72_spill] sm:$0xff] %v12090_v20 }
 0x33f   : > { %v12096_v38 = vpop.permute.xlu1 %1318 }
 0x340   : > { %16812 = vst [vmem:[#allocation74_spill] sm:$0xff] %v12096_v38 }
 0x343   : > { %v12100_v45 = vpop.permute.xlu1 %1395 }
 0x344   : > { %16814 = vst [vmem:[#allocation76_spill] sm:$0xff] %v12100_v45 }
 0x34f   : > { %1240 = vadd.xlane.f32.xlu1 %v1239_v1  ;;  %v12104_v1 = vpop.permute.xlu1 %1329 }
 0x350   : > { %16816 = vst [vmem:[#allocation78_spill] sm:$0xff] %v12104_v1 }
 0x352   : > { %2477 = vrot.lane.b32.xlu0 %v11919_v13, %s11441_s22  ;;  %v12058_v13 = vpop.permute.xlu0 %1380 }
 0x353   : > { %16797 = vst [vmem:[#allocation59_spill] sm:$0xff] %v12058_v13 }
 0x356   : > { %v12062_v57 = vpop.permute.xlu0 %1314 }
 0x357   : > { %16799 = vst [vmem:[#allocation61_spill] sm:$0xff] %v12062_v57 }
 0x35a   : > { %v12068_v51 = vpop.permute.xlu0 %1391 }
 0x35b   : > { %16801 = vst [vmem:[#allocation63_spill] sm:$0xff] %v12068_v51 }
 0x35e   : > { %v12074_v54 = vpop.permute.xlu0 %1325 }
 0x35f   : > { %16803 = vst [vmem:[#allocation65_spill] sm:$0xff] %v12074_v54 }
 0x360   : > { %2483 = vrot.lane.b32.xlu1 %v11925_v30, %s11441_s22 }
 0x362   : > { %v12078_v63 = vpop.permute.xlu0 %1402 }
 0x363   : > { %16805 = vst [vmem:[#allocation67_spill] sm:$0xff] %v12078_v63 }
 0x366   : > { %v12084_v6 = vpop.permute.xlu0 %1336 }
 0x367   : > { %16807 = vst [vmem:[#allocation69_spill] sm:$0xff] %v12084_v6 }
 0x36a   : > { %v12088_v14 = vpop.permute.xlu0 %1413 }
 0x36b   : > { %16809 = vst [vmem:[#allocation71_spill] sm:$0xff] %v12088_v14 }
 0x36e   : > { %v12092_v22 = vpop.permute.xlu0 %1347 }
 0x36f   : > { %16811 = vst [vmem:[#allocation73_spill] sm:$0xff] %v12092_v22 }
 0x371   : > { %1243 = vadd.xlane.f32.xlu0 %v1242_v40 }
 0x372   : > { %v12098_v42 = vpop.permute.xlu0 %1424 }
 0x373   : > { %16813 = vst [vmem:[#allocation75_spill] sm:$0xff] %v12098_v42 }
 0x376   : > { %v12102_v58 = vpop.permute.xlu0 %1435 }
 0x377   : > { %16815 = vst [vmem:[#allocation77_spill] sm:$0xff] %v12102_v58 }
 0x37a   : > { %v2430_v40 = vpop.permute.xlu0 %2429 }
 0x37e   : > { %v2432_v41 = vpop.permute.xlu0 %2431 }
 0x384   : > { %1246 = vadd.xlane.f32.xlu1 %v1245_v50  ;;  %v1251_v50 = vsel %vm548_vm0, %v11941_v47, 0.0 }
 0x387   : > { %2481 = vrot.lane.b32.xlu0 %v11930_v27, %s11441_s22  ;;  %v11442_v27 = vmov 0  }
 0x388   : > { %10920 = vset.pattern.permute.xlu1 %v11442_v27  ;;  %10919 = vset.pattern.permute.xlu0 %v11442_v27  ;;  %v12108_v27 = vpop.permute.xlu1 %1406 }
 0x389   : > { %16817 = vst [vmem:[#allocation79_spill] sm:$0xff] %v12108_v27 }
 0x38c   : > { %v12112_v30 = vpop.permute.xlu1 %1340 }
 0x38d   : > { %16818 = vst [vmem:[#allocation80_spill] sm:$0xff] %v12112_v30 }
 0x390   : > { %v12116_v7 = vpop.permute.xlu1 %1417 }
 0x391   : > { %16819 = vst [vmem:[#allocation81_spill] sm:$0xff] %v12116_v7 }
 0x394   : > { %v12122_v33 = vpop.permute.xlu1 %1351 }
 0x395   : > { %2487 = vrot.lane.b32.xlu1 %v11936_v26, %s11441_s22  ;;  %16820 = vst [vmem:[#allocation82_spill] sm:$0xff] %v12122_v33 }
 0x398   : > { %v12126_v21 = vpop.permute.xlu1 %1428 }
 0x399   : > { %16821 = vst [vmem:[#allocation83_spill] sm:$0xff] %v12126_v21 }
 0x3a6   : > { %1249 = vadd.xlane.f32.xlu0 %v1248_v34  ;;  %v12114_v34 = vpop.xlane.xlu0 %1168 }
 0x3aa   : > { %v2438_v44 = vpop.permute.xlu0 %2437 }
 0x3ab   : > { %v2537_v62 = vsel %vm548_vm0, %v2438_v44, 0.0 }
 0x3ae   : > { %v12118_v35 = vpop.xlane.xlu0 %1174 }
 0x3b9   : > { %1252 = vadd.xlane.f32.xlu1 %v1251_v50  ;;  %v12124_v50 = vpop.xlane.xlu0 %1177 }
 0x3bc   : > { %2485 = vrot.lane.b32.xlu0 %v11941_v47, %s11441_s22  ;;  %v12130_v47 = vpop.permute.xlu1 %1439 }
 0x3bd   : > { %v12128_v11 = vpop.xlane.xlu0 %1183  ;;  %16822 = vst [vmem:[#allocation84_spill] sm:$0xff] %v12130_v47 }
 0x3c0   : > { %v1172_v9 = vpop.xlane.xlu1 %1171 }
 0x3c1   : > { %v2442_v4 = vpop.permute.xlu0 %2441 }
 0x3c2   : > { %v2543_v48 = vsel %vm548_vm0, %v2442_v4, 0.0 }
 0x3c4   : > { %v2434_v61 = vpop.permute.xlu1 %2433 }
 0x3c5   : > { %v12134_v2 = vpop.xlane.xlu0 %1189  ;;  %v2531_v12 = vsel %vm548_vm0, %v2434_v61, 0.0 }
 0x3c8   : > { %v2436_v52 = vpop.permute.xlu1 %2435 }
 0x3c9   : > { %v2446_v59 = vpop.permute.xlu0 %2445 }
 0x3ca   : > { %2491 = vrot.lane.b32.xlu1 %v11947_v53, %s11441_s22 }
 0x3cc   : > { %v2440_v36 = vpop.permute.xlu1 %2439 }
 0x3cd   : > { %v12136_v46 = vpop.xlane.xlu0 %1195 }
 0x3d0   : > { %v12143_v26 = vpop.xlane.xlu1 %1180 }
 0x3d1   : > { %v2450_v31 = vpop.permute.xlu0 %2449 }
 0x3d2   : > { %v2555_v61 = vsel %vm548_vm0, %v2450_v31, 0.0 }
 0x3d4   : > { %v2444_v5 = vpop.permute.xlu1 %2443 }
 0x3d5   : > { %v12145_v28 = vpop.xlane.xlu0 %1201 }
 0x3d9   : > { %v2454_v55 = vpop.permute.xlu0 %2453 }
 0x3db   : > { %1255 = vadd.xlane.f32.xlu0 %v1254_v19  ;;  %v2525_v19 = vsel %vm548_vm0, %v2430_v40, 0.0  ;;  %v2549_v40 = vsel %vm548_vm0, %v2446_v59, 0.0 }
 0x3ee   : > { %1258 = vadd.xlane.f32.xlu1 %v1257_v39  ;;  %v12149_v39 = vpop.xlane.xlu1 %1186 }
 0x3f1   : > { %2489 = vrot.lane.b32.xlu0 %v11952_v0, %s11441_s22  ;;  %v12152_v0 = vpop.xlane.xlu0 %1207 }
 0x3f2   : > { %2526 = vadd.xlane.f32.xlu1 %v2525_v19  ;;  %v2448_v19 = vpop.permute.xlu1 %2447 }
 0x3f5   : > { %v2458_v37 = vpop.permute.xlu0 %2457 }
 0x3f6   : > { %2532 = vadd.xlane.f32.xlu1 %v2531_v12  ;;  %v12156_v12 = vpop.xlane.xlu1 %1192  ;;  %v2567_v4 = vsel %vm548_vm0, %v2458_v37, 0.0  ;;  %v2540_v37 = vsel %vm548_vm0, %v2440_v36, 0.0 }
 0x3f9   : > { %v12158_v44 = vpop.xlane.xlu0 %1213 }
 0x3fa   : > { %2538 = vadd.xlane.f32.xlu1 %v2537_v62  ;;  %v2561_v62 = vsel %vm548_vm0, %v2454_v55, 0.0  ;;  %v2452_v32 = vpop.permute.xlu1 %2451  ;;  %v2534_v55 = vsel %vm548_vm0, %v2436_v52, 0.0 }
 0x3fb   : > { %v2558_v52 = vsel %vm548_vm0, %v2452_v32, 0.0 }
 0x3fd   : > { %v2462_v29 = vpop.permute.xlu0 %2461 }
 0x3fe   : > { %2544 = vadd.xlane.f32.xlu1 %v2543_v48  ;;  %v1260_v48 = vsel %vm548_vm0, %v11947_v53, 0.0  ;;  %v12164_v59 = vpop.xlane.xlu1 %1198  ;;  %v2573_v31 = vsel %vm548_vm0, %v2462_v29, 0.0  ;;  %v2546_v53 = vsel %vm548_vm0, %v2444_v5, 0.0  ;;  %v2552_v29 = vsel %vm548_vm0, %v2448_v19, 0.0 }
 0x402   : > { %2550 = vadd.xlane.f32.xlu1 %v2549_v40  ;;  %v2528_v40 = vsel %vm548_vm0, %v2432_v41, 0.0 }
 0x406   : > { %2556 = vadd.xlane.f32.xlu1 %v2555_v61  ;;  %v2456_v61 = vpop.permute.xlu1 %2455 }
 0x407   : > { %v2564_v36 = vsel %vm548_vm0, %v2456_v61, 0.0  ;;  %v12192_v61 = vadd.f32 %v12056_v25, %v12114_v34  ;;  %v12212_v34 = vadd.f32 %v12046_v15, %v12143_v26  ;;  %v12228_v26 = vadd.f32 %v12054_v8, %v12149_v39 }
 0x408   : > { %v12244_v39 = vadd.f32 %v12062_v57, %v12156_v12  ;;  %v12258_v12 = vadd.f32 %v12074_v54, %v12164_v59 }
 0x409   : > { %16824 = vst [vmem:[#allocation86_spill] sm:$0xff] %v12192_v61  ;;  %16828 = vst [vmem:[#allocation90_spill] sm:$0xff] %v12212_v34 }
 0x40a   : > { %2562 = vadd.xlane.f32.xlu1 %v2561_v62  ;;  %v12169_v62 = vpop.xlane.xlu1 %1204  ;;  %16830 = vst [vmem:[#allocation92_spill] sm:$0xff] %v12228_v26  ;;  %16832 = vst [vmem:[#allocation94_spill] sm:$0xff] %v12244_v39 }
 0x40b   : > { %16834 = vst [vmem:[#allocation96_spill] sm:$0xff] %v12258_v12  ;;  %v12272_v59 = vadd.f32 %v12084_v6, %v12169_v62 }
 0x40d   : > { %16836 = vst [vmem:[#allocation98_spill] sm:$0xff] %v12272_v59 }
 0x40e   : > { %2568 = vadd.xlane.f32.xlu1 %v2567_v4  ;;  %v2460_v4 = vpop.permute.xlu1 %2459 }
 0x410   : > { %1261 = vadd.xlane.f32.xlu0 %v1260_v48  ;;  %v12174_v48 = vadd.f32 %v12042_v16, %v1172_v9 }
 0x412   : > { %2574 = vadd.xlane.f32.xlu1 %v2573_v31  ;;  %16823 = vst [vmem:[#allocation85_spill] sm:$0xff] %v12174_v48  ;;  %v12178_v41 = vpop.xlane.xlu1 %1210 }
 0x413   : > { %v12284_v62 = vadd.f32 %v12092_v22, %v12178_v41 }
 0x414   : > { %2529 = vadd.xlane.f32.xlu0 %v2528_v40  ;;  %v2570_v40 = vsel %vm548_vm0, %v2460_v4, 0.0  ;;  %v12197_v4 = vadd.f32 %v12066_v49, %v12124_v50 }
 0x415   : > { %16838 = vst [vmem:[#allocation100_spill] sm:$0xff] %v12284_v62 }
 0x416   : > { %v2464_v31 = vpop.permute.xlu1 %2463  ;;  %16825 = vst [vmem:[#allocation87_spill] sm:$0xff] %v12197_v4 }
 0x417   : > { %v2576_v9 = vsel %vm548_vm0, %v2464_v31, 0.0 }
 0x418   : > { %2535 = vadd.xlane.f32.xlu0 %v2534_v55 }
 0x41a   : > { %v12182_v5 = vpop.xlane.xlu1 %1216 }
 0x41c   : > { %2541 = vadd.xlane.f32.xlu0 %v2540_v37  ;;  %v12187_v37 = vpop.xlane.xlu0 %1219 }
 0x41e   : > { %v2468_v55 = vpop.permute.xlu1 %2467 }
 0x41f   : > { %v2582_v19 = vsel %vm548_vm0, %v2468_v55, 0.0 }
 0x420   : > { %2547 = vadd.xlane.f32.xlu0 %v2546_v53  ;;  %v2466_v32 = vpop.permute.xlu0 %2465 }
 0x421   : > { %v2579_v53 = vsel %vm548_vm0, %v2466_v32, 0.0 }
 0x422   : > { %v12215_v50 = vpop.xlane.xlu1 %1222 }
 0x423   : > { %1541 = vperm.xlu1 %10920, %v12174_v48  }
 0x424   : > { %2553 = vadd.xlane.f32.xlu0 %v2552_v29  ;;  %v12202_v29 = vadd.f32 %v12072_v43, %v12128_v11 }
 0x426   : > { %16826 = vst [vmem:[#allocation88_spill] sm:$0xff] %v12202_v29  ;;  %v2472_v31 = vpop.permute.xlu1 %2471 }
 0x427   : > { %v2588_v11 = vsel %vm548_vm0, %v2472_v31, 0.0 }
 0x428   : > { %2559 = vadd.xlane.f32.xlu0 %v2558_v52  ;;  %v12206_v52 = vadd.f32 %v12060_v18, %v12118_v35 }
 0x42a   : > { %16827 = vst [vmem:[#allocation89_spill] sm:$0xff] %v12206_v52  ;;  %v12231_v55 = vpop.xlane.xlu1 %1228 }
 0x42c   : > { %2565 = vadd.xlane.f32.xlu0 %v2564_v36  ;;  %v12218_v36 = vpop.xlane.xlu0 %1225 }
 0x430   : > { %2571 = vadd.xlane.f32.xlu0 %v2570_v40  ;;  %v2470_v35 = vpop.permute.xlu0 %2469 }
 0x431   : > { %v2585_v40 = vsel %vm548_vm0, %v2470_v35, 0.0 }
 0x434   : > { %2577 = vadd.xlane.f32.xlu0 %v2576_v9  ;;  %v12223_v9 = vadd.f32 %v12086_v10, %v12134_v2 }
 0x436   : > { %16829 = vst [vmem:[#allocation91_spill] sm:$0xff] %v12223_v9 }
 0x438   : > { %2583 = vadd.xlane.f32.xlu0 %v2582_v19  ;;  %v2476_v19 = vpop.permute.xlu1 %2475 }
 0x439   : > { %v2594_v32 = vsel %vm548_vm0, %v2476_v19, 0.0 }
 0x43c   : > { %v12247_v35 = vpop.xlane.xlu1 %1234 }
 0x447   : > { %2580 = vadd.xlane.f32.xlu1 %v2579_v53  ;;  %v12234_v53 = vpop.xlane.xlu0 %1231 }
 0x44b   : > { %v2474_v31 = vpop.permute.xlu0 %2473 }
 0x44c   : > { %v2591_v2 = vsel %vm548_vm0, %v2474_v31, 0.0 }
 0x44e   : > { %1538 = vperm.xlu0 %10919, %v12192_v61  }
 0x452   : > { %1547 = vperm.xlu0 %10919, %v12197_v4  }
 0x456   : > { %1553 = vperm.xlu0 %10919, %v12202_v29  }
 0x458   : > { %1544 = vperm.xlu1 %10920, %v12206_v52  }
 0x45c   : > { %1550 = vperm.xlu1 %10920, %v12212_v34  }
 0x475   : > { %2589 = vadd.xlane.f32.xlu0 %v2588_v11  ;;  %v12239_v11 = vadd.f32 %v12096_v38, %v12136_v46  ;;  %v12253_v46 = vadd.f32 %v12104_v1, %v12145_v28  ;;  %v12267_v28 = vadd.f32 %v12112_v30, %v12152_v0  ;;  %v12279_v0 = vadd.f32 %v12122_v33, %v12158_v44 }
 0x477   : > { %16831 = vst [vmem:[#allocation93_spill] sm:$0xff] %v12239_v11  ;;  %16833 = vst [vmem:[#allocation95_spill] sm:$0xff] %v12253_v46 }
 0x478   : > { %16835 = vst [vmem:[#allocation97_spill] sm:$0xff] %v12267_v28  ;;  %16837 = vst [vmem:[#allocation99_spill] sm:$0xff] %v12279_v0 }
 0x480   : > { %2586 = vadd.xlane.f32.xlu1 %v2585_v40  ;;  %v2480_v40 = vpop.permute.xlu1 %2479 }
 0x481   : > { %v2600_v19 = vsel %vm548_vm0, %v2480_v40, 0.0 }
 0x48b   : > { %1559 = vperm.xlu0 %10919, %v12223_v9  }
 0x491   : > { %1556 = vperm.xlu1 %10920, %v12228_v26  }
 0x4aa   : > { %2595 = vadd.xlane.f32.xlu0 %v2594_v32  ;;  %v1238_v32 = vpop.xlane.xlu0 %1237 }
 0x4ab   : > { %v12314_v61 = vadd.f32 %v12100_v45, %v1238_v32 }
 0x4ad   : > { %16842 = vst [vmem:[#allocation104_spill] sm:$0xff] %v12314_v61 }
 0x4ae   : > { %v2478_v31 = vpop.permute.xlu0 %2477 }
 0x4b5   : > { %2592 = vadd.xlane.f32.xlu1 %v2591_v2  ;;  %v2597_v2 = vsel %vm548_vm0, %v2478_v31, 0.0  ;;  %v1244_v31 = vpop.xlane.xlu0 %1243 }
 0x4c0   : > { %1565 = vperm.xlu0 %10919, %v12239_v11  }
 0x4c6   : > { %1562 = vperm.xlu1 %10920, %v12244_v39   ;;  %v12261_v39 = vpop.xlane.xlu1 %1240 }
 0x4ca   : > { %v2484_v40 = vpop.permute.xlu1 %2483 }
 0x4df   : > { %2601 = vadd.xlane.f32.xlu0 %v2600_v19  ;;  %v2606_v19 = vsel %vm548_vm0, %v2484_v40, 0.0 }
 0x4ea   : > { %2598 = vadd.xlane.f32.xlu1 %v2597_v2  ;;  %v2482_v2 = vpop.permute.xlu0 %2481 }
 0x4eb   : > { %v2603_v26 = vsel %vm548_vm0, %v2482_v2, 0.0 }
 0x4ee   : > { %v1250_v34 = vpop.xlane.xlu0 %1249 }
 0x4ef   : > { %v12332_v32 = vadd.f32 %v12116_v7, %v1250_v34 }
 0x4f1   : > { %16846 = vst [vmem:[#allocation108_spill] sm:$0xff] %v12332_v32 }
 0x4f2   : > { %v2486_v2 = vpop.permute.xlu0 %2485 }
 0x4f5   : > { %1571 = vperm.xlu0 %10919, %v12253_v46  }
 0x4fb   : > { %1568 = vperm.xlu1 %10920, %v12258_v12   ;;  %v1247_v12 = vpop.xlane.xlu1 %1246 }
 0x4ff   : > { %v2488_v40 = vpop.permute.xlu1 %2487 }
 0x514   : > { %2607 = vadd.xlane.f32.xlu0 %v2606_v19  ;;  %v2612_v19 = vsel %vm548_vm0, %v2488_v40, 0.0 }
 0x51f   : > { %2604 = vadd.xlane.f32.xlu1 %v2603_v26  ;;  %v2609_v26 = vsel %vm548_vm0, %v2486_v2, 0.0 }
 0x52a   : > { %1577 = vperm.xlu0 %10919, %v12267_v28  }
 0x530   : > { %1574 = vperm.xlu1 %10920, %v12272_v59   ;;  %v1256_v59 = vpop.xlane.xlu0 %1255 }
 0x534   : > { %v2490_v40 = vpop.permute.xlu0 %2489 }
 0x538   : > { %v1262_v28 = vpop.xlane.xlu0 %1261 }
 0x53c   : > { %v2530_v46 = vpop.xlane.xlu0 %2529 }
 0x540   : > { %v2536_v44 = vpop.xlane.xlu0 %2535 }
 0x544   : > { %v2542_v11 = vpop.xlane.xlu0 %2541 }
 0x548   : > { %v2548_v9 = vpop.xlane.xlu0 %2547 }
 0x549   : > { %2613 = vadd.xlane.f32.xlu0 %v2612_v19  ;;  %v1253_v19 = vpop.xlane.xlu1 %1252 }
 0x54c   : > { %v2554_v4 = vpop.xlane.xlu0 %2553 }
 0x54d   : > { %v2492_v52 = vpop.permute.xlu1 %2491 }
 0x54e   : > { %v2618_v2 = vsel %vm548_vm0, %v2492_v52, 0.0  ;;  %v12296_v52 = vadd.f32 %v12082_v3, %v12218_v36 }
 0x550   : > { %16840 = vst [vmem:[#allocation102_spill] sm:$0xff] %v12296_v52 }
 0x554   : > { %2610 = vadd.xlane.f32.xlu1 %v2609_v26  ;;  %v1259_v26 = vpop.xlane.xlu1 %1258 }
 0x558   : > { %v2527_v48 = vpop.xlane.xlu1 %2526 }
 0x55c   : > { %v2533_v41 = vpop.xlane.xlu1 %2532 }
 0x55f   : > { %1583 = vperm.xlu0 %10919, %v12279_v0   ;;  %v2615_v0 = vsel %vm548_vm0, %v2490_v40, 0.0  ;;  %v12300_v40 = vadd.f32 %v12048_v24, %v12182_v5  ;;  %v12319_v5 = vadd.f32 %v12058_v13, %v12231_v55 }
 0x560   : > { %v2539_v29 = vpop.xlane.xlu1 %2538 }
 0x561   : > { %16843 = vst [vmem:[#allocation105_spill] sm:$0xff] %v12319_v5 }
 0x565   : > { %1580 = vperm.xlu1 %10920, %v12284_v62   ;;  %v12291_v62 = vadd.f32 %v12076_v60, %v12187_v37  ;;  %v2560_v37 = vpop.xlane.xlu0 %2559 }
 0x567   : > { %16839 = vst [vmem:[#allocation101_spill] sm:$0xff] %v12291_v62 }
 0x57e   : > { %2619 = vadd.xlane.f32.xlu0 %v2618_v2  ;;  %v2545_v2 = vpop.xlane.xlu1 %2544 }
 0x582   : > { %v2551_v36 = vpop.xlane.xlu1 %2550 }
 0x589   : > { %2616 = vadd.xlane.f32.xlu1 %v2615_v0  ;;  %v12305_v0 = vadd.f32 %v12090_v20, %v12234_v53  ;;  %v2566_v53 = vpop.xlane.xlu0 %2565 }
 0x58b   : > { %16841 = vst [vmem:[#allocation103_spill] sm:$0xff] %v12305_v0 }
 0x58d   : > { %v2572_v55 = vpop.xlane.xlu0 %2571 }
 0x591   : > { %v2578_v34 = vpop.xlane.xlu0 %2577 }
 0x594   : > { %1589 = vperm.xlu0 %10919, %v12291_v62   ;;  %v12310_v62 = vadd.f32 %v12050_v56, %v12215_v50  ;;  %v2557_v50 = vpop.xlane.xlu1 %2556 }
 0x598   : > { %1595 = vperm.xlu0 %10919, %v12296_v52   ;;  %v12323_v52 = vadd.f32 %v12108_v27, %v1244_v31  ;;  %v2563_v31 = vpop.xlane.xlu1 %2562 }
 0x59a   : > { %1586 = vperm.xlu1 %10920, %v12300_v40   ;;  %16844 = vst [vmem:[#allocation106_spill] sm:$0xff] %v12323_v52 }
 0x59c   : > { %1601 = vperm.xlu0 %10919, %v12305_v0   ;;  %v12328_v0 = vadd.f32 %v12068_v51, %v12247_v35  ;;  %v12345_v35 = vadd.f32 %v12088_v14, %v1247_v12  ;;  %v2584_v12 = vpop.xlane.xlu0 %2583 }
 0x59e   : > { %1592 = vperm.xlu1 %10920, %v12310_v62   ;;  %16845 = vst [vmem:[#allocation107_spill] sm:$0xff] %v12328_v0 }
 0x5a0   : > { %1607 = vperm.xlu0 %10919, %v12314_v61   ;;  %v12337_v61 = vadd.f32 %v12078_v63, %v12261_v39  ;;  %v12353_v39 = vadd.f32 %v12098_v42, %v1253_v19  ;;  %v12368_v19 = vpop.permute.xlu0 %1538 }
 0x5a2   : > { %1598 = vperm.xlu1 %10920, %v12319_v5   ;;  %v12341_v5 = vadd.f32 %v12126_v21, %v1256_v59  ;;  %v12357_v59 = vadd.f32 %v2530_v46, %v12042_v16  ;;  %v12381_v16 = vadd.f32 %v2533_v41, %v12060_v18 }
 0x5a4   : > { %1613 = vperm.xlu0 %10919, %v12323_v52   ;;  %16847 = vst [vmem:[#allocation109_spill] sm:$0xff] %v12341_v5  ;;  %v2569_v52 = vpop.xlane.xlu1 %2568 }
 0x5a6   : > { %1604 = vperm.xlu1 %10920, %v12328_v0   ;;  %v12349_v0 = vadd.f32 %v12130_v47, %v1262_v28  ;;  %v12365_v28 = vadd.f32 %v2536_v44, %v12066_v49  ;;  %v12384_v44 = vpop.permute.xlu0 %1547  ;;  %v12387_v49 = vadd.f32 %v2548_v9, %v12086_v10  ;;  %v12407_v10 = vadd.f32 %v2560_v37, %v12104_v1 }
 0x5a7   : > { %v12423_v37 = vadd.f32 %v2557_v50, %v12074_v54  ;;  %v12427_v1 = vadd.f32 %v2572_v55, %v12122_v33  ;;  %v12441_v54 = vadd.f32 %v2569_v52, %v12092_v22  ;;  %v12445_v33 = vadd.f32 %v2584_v12, %v12082_v3 }
 0x5a8   : > { %1619 = vperm.xlu0 %10919, %v12332_v32   ;;  %16848 = vst [vmem:[#allocation110_spill] sm:$0xff] %v12349_v0  ;;  %v2575_v32 = vpop.xlane.xlu1 %2574 }
 0x5aa   : > { %1610 = vperm.xlu1 %10920, %v12337_v61   ;;  %v12398_v41 = vpop.permute.xlu0 %1553 }
 0x5ac   : > { %1625 = vperm.xlu0 %10919, %v12341_v5   ;;  %v12361_v5 = vadd.f32 %v12102_v58, %v1259_v26  ;;  %v12374_v46 = vpop.permute.xlu1 %1541  ;;  %v12377_v26 = vadd.f32 %v2542_v11, %v12072_v43  ;;  %v12395_v11 = vadd.f32 %v2554_v4, %v12096_v38  ;;  %v12401_v43 = vadd.f32 %v2545_v2, %v12054_v8 }
 0x5ad   : > { %v12411_v4 = vadd.f32 %v2551_v36, %v12062_v57  ;;  %v12415_v38 = vadd.f32 %v2566_v53, %v12112_v30  ;;  %v12431_v53 = vadd.f32 %v2563_v31, %v12084_v6  ;;  %v12435_v30 = vadd.f32 %v2578_v34, %v12076_v60 }
 0x5ae   : > { %1616 = vperm.xlu1 %10920, %v12345_v35   ;;  %v12449_v6 = vadd.f32 %v2575_v32, %v12048_v24 }
 0x5b0   : > { %1631 = vperm.xlu0 %10919, %v12349_v0   ;;  %v12371_v0 = vadd.f32 %v2527_v48, %v12056_v25  ;;  %v2581_v48 = vpop.xlane.xlu1 %2580  ;;  %v12391_v25 = vadd.f32 %v2539_v29, %v12046_v15  ;;  %v2590_v29 = vpop.xlane.xlu0 %2589  ;;  %16849 = vst [vmem:[#allocation111_spill] sm:$0xff] %v12449_v6  ;;  %v1651_v15 = vrot.slane %v12384_v44, %v11619_v23 }
 0x5b1   : > { %v12453_v60 = vadd.f32 %v2590_v29, %v12090_v20  ;;  %v12457_v22 = vadd.f32 %v2581_v48, %v12050_v56 }
 0x5b2   : > { %1622 = vperm.xlu1 %10920, %v12353_v39  }
 0x5b3   : > { %16850 = vst [vmem:[#allocation112_spill] sm:$0xff] %v12457_v22 }
 0x5b4   : > { %2689 = vperm.xlu0 %10919, %v12357_v59   ;;  %v12403_v9 = vpop.permute.xlu1 %1544  ;;  %v12420_v8 = vpop.permute.xlu0 %1559 }
 0x5b6   : > { %1628 = vperm.xlu1 %10920, %v12361_v5  }
 0x5b8   : > { %2695 = vperm.xlu0 %10919, %v12365_v28   ;;  %v12417_v2 = vpop.permute.xlu1 %1550  ;;  %v2596_v57 = vpop.xlane.xlu0 %2595 }
 0x5b9   : > { %v12461_v12 = vadd.f32 %v2596_v57, %v12100_v45 }
 0x5ba   : > { %2686 = vperm.xlu1 %10920, %v12371_v0  }
 0x5bc   : > { %2701 = vperm.xlu0 %10919, %v12377_v26   ;;  %v2587_v36 = vpop.xlane.xlu1 %2586  ;;  %v12438_v50 = vpop.permute.xlu0 %1565 }
 0x5bd   : > { %v12465_v24 = vadd.f32 %v2587_v36, %v12058_v13 }
 0x5be   : > { %2692 = vperm.xlu1 %10920, %v12381_v16  }
 0x5bf   : > { %16851 = vst [vmem:[#allocation113_spill] sm:$0xff] %v12465_v24 }
 0x5c0   : > { %2707 = vperm.xlu0 %10919, %v12387_v49   ;;  %v1557_v55 = vpop.permute.xlu1 %1556  ;;  %v2602_v31 = vpop.xlane.xlu0 %2601 }
 0x5c1   : > { %v12469_v29 = vadd.f32 %v2602_v31, %v12108_v27 }
 0x5c2   : > { %2698 = vperm.xlu1 %10920, %v12391_v25  }
 0x5c4   : > { %2713 = vperm.xlu0 %10919, %v12395_v11   ;;  %v2593_v34 = vpop.xlane.xlu1 %2592  ;;  %v1572_v52 = vpop.permute.xlu0 %1571 }
 0x5c5   : > { %v12475_v57 = vadd.f32 %v2593_v34, %v12068_v51  ;;  %v1647_v51 = vrot.slane %v12403_v9, %v11610_v17 }
 0x5c6   : > { %2704 = vperm.xlu1 %10920, %v12401_v43  }
 0x5c7   : > { %16852 = vst [vmem:[#allocation114_spill] sm:$0xff] %v12475_v57 }
 0x5c8   : > { %2719 = vperm.xlu0 %10919, %v12407_v10   ;;  %v1563_v3 = vpop.permute.xlu1 %1562  ;;  %v2608_v32 = vpop.xlane.xlu0 %2607 }
 0x5c9   : > { %v12479_v45 = vadd.f32 %v2608_v32, %v12116_v7  ;;  %v1656_v32 = vrot.slane %v12417_v2, %v11610_v17  ;;  %v1636_v7 = vrot.slane %v12368_v19, %v11610_v17  ;;  %v1674_v18 = vrot.slane %v1563_v3, %v11610_v17 }
 0x5ca   : > { %2710 = vperm.xlu1 %10920, %v12411_v4   ;;  %v1641_v2 = vrot.slane %v12374_v46, %v11619_v23  ;;  %v1669_v19 = vrot.slane %v12420_v8, %v11619_v23 }
 0x5cb   : > { %16853 = vst [vmem:[#allocation115_spill] sm:$0xff] %v12479_v45 }
 0x5cc   : > { %2725 = vperm.xlu0 %10919, %v12415_v38   ;;  %v12471_v20 = vpop.xlane.xlu1 %2598  ;;  %v1578_v48 = vpop.permute.xlu0 %1577 }
 0x5ce   : > { %2716 = vperm.xlu1 %10920, %v12423_v37  }
 0x5d0   : > { %2731 = vperm.xlu0 %10919, %v12427_v1   ;;  %v1569_v13 = vpop.permute.xlu1 %1568 }
 0x5d1   : > { %v1683_v44 = vrot.slane %v1569_v13, %v11610_v17  ;;  %v1696_v13 = vrot.slane %v1578_v48, %v11619_v23 }
 0x5d2   : > { %2722 = vperm.xlu1 %10920, %v12431_v53  }
 0x5d4   : > { %2737 = vperm.xlu0 %10919, %v12435_v30   ;;  %v2605_v27 = vpop.xlane.xlu1 %2604 }
 0x5d6   : > { %2728 = vperm.xlu1 %10920, %v12441_v54   ;;  %v2614_v36 = vpop.xlane.xlu0 %2613 }
 0x5d7   : > { %v12484_v31 = vadd.f32 %v2614_v36, %v12126_v21  ;;  %v1665_v36 = vrot.slane %v1557_v55, %v11610_v17  ;;  %v1660_v21 = vrot.slane %v12398_v41, %v11619_v23  ;;  %v1678_v41 = vrot.slane %v12438_v50, %v11619_v23 }
 0x5d8   : > { %2743 = vperm.xlu0 %10919, %v12445_v33   ;;  %v1575_v56 = vpop.permute.xlu1 %1574 }
 0x5d9   : > { %16854 = vst [vmem:[#allocation116_spill] sm:$0xff] %v12484_v31  ;;  %v1661_v55 = vsel %vm1642_vm9, %v1660_v21, %v1656_v32  ;;  %v1670_v46 = vsel %vm1642_vm9, %v1669_v19, %v1665_v36  ;;  %v1679_v21 = vsel %vm1642_vm9, %v1678_v41, %v1674_v18  ;;  %v12533_v41 = vadd.f32 %v12471_v20, %v12078_v63 }
 0x5da   : > { %2734 = vperm.xlu1 %10920, %v12449_v6   ;;  %v16865_v6 = vld [vmem:[#allocation15_spill] sm:$0xff] }
 0x5db   : > { %16856 = vst [vmem:[#allocation118_spill] sm:$0xff] %v12533_v41 }
 0x5dc   : > { %2749 = vperm.xlu0 %10919, %v12453_v60  }
 0x5de   : > { %2740 = vperm.xlu1 %10920, %v12457_v22   ;;  %v1584_v3 = vpop.permute.xlu0 %1583  ;;  %v1643_v22 = vsel %vm1642_vm9, %v1641_v2, %v1636_v7 }
 0x5df   : > { %v1705_v32 = vrot.slane %v1584_v3, %v11619_v23 }
 0x5e0   : > { %2755 = vperm.xlu0 %10919, %v12461_v12  }
 0x5e1   : > { %v2611_v34 = vpop.xlane.xlu1 %2610 }
 0x5e2   : > { %2746 = vperm.xlu1 %10920, %v12465_v24   ;;  %v1692_v24 = vrot.slane %v1575_v56, %v11610_v17 }
 0x5e4   : > { %2761 = vperm.xlu0 %10919, %v12469_v29  }
 0x5e5   : > { %v1581_v9 = vpop.permute.xlu1 %1580 }
 0x5e6   : > { %2752 = vperm.xlu1 %10920, %v12475_v57   ;;  %v1652_v57 = vsel %vm1642_vm9, %v1651_v15, %v1647_v51  ;;  %v1687_v15 = vrot.slane %v1572_v52, %v11619_v23  ;;  %v1701_v51 = vrot.slane %v1581_v9, %v11610_v17  ;;  %v1697_v52 = vsel %vm1642_vm9, %v1696_v13, %v1692_v24 }
 0x5e7   : > { %v1780_v8 = vsel %vm1779_vm10, %v1652_v57, %v1643_v22 }
 0x5e8   : > { %2767 = vperm.xlu0 %10919, %v12479_v45   ;;  %v1782_v50 = vsel %vm1781_vm11, %v1661_v55, %v1780_v8  ;;  %v1688_v56 = vsel %vm1642_vm9, %v1687_v15, %v1683_v44  ;;  %v1706_v22 = vsel %vm1642_vm9, %v1705_v32, %v1701_v51  ;;  %v12537_v15 = vadd.f32 %v2605_v27, %v12088_v14  ;;  %v16867_v45 = vld [vmem:[#allocation16_spill] sm:$0xff] }
 0x5e9   : > { %v1784_v7 = vsel %vm1783_vm12, %v1670_v46, %v1782_v50 }
 0x5ea   : > { %v1786_v36 = vsel %vm1785_vm13, %v1679_v21, %v1784_v7  ;;  %16857 = vst [vmem:[#allocation119_spill] sm:$0xff] %v12537_v15  ;;  %v12541_v21 = vadd.f32 %v2611_v34, %v12098_v42 }
 0x5eb   : > { %v1788_v18 = vsel %vm1787_vm14, %v1688_v56, %v1786_v36 }
 0x5ec   : > { %2773 = vperm.xlu0 %10919, %v12484_v31   ;;  %v1790_v48 = vsel %vm1789_vm15, %v1697_v52, %v1788_v18  ;;  %16858 = vst [vmem:[#allocation120_spill] sm:$0xff] %v12541_v21 }
 0x5ed   : > { %v1792_v57 = vsel %vm1791_vm1, %v1706_v22, %v1790_v48 }
 0x5ee   : > { %v1803_v9 = vsel %vm1802_vm2, %v1792_v57, -inf }
 0x60a   : > { %1804 = vmax.xlane.f32.xlu1 %v1803_v9 }
 0x60b   : > { %v2620_v2 = vpop.xlane.xlu0 %2619 }
 0x60c   : > { %v12528_v19 = vadd.f32 %v2620_v2, %v12130_v47 }
 0x60e   : > { %16855 = vst [vmem:[#allocation117_spill] sm:$0xff] %v12528_v19  ;;  %2779 = vperm.xlu0 %10919, %v12528_v19  }
 0x613   : > { %v1590_v24 = vpop.permute.xlu0 %1589 }
 0x616   : > { %v2617_v44 = vpop.xlane.xlu1 %2616 }
 0x617   : > { %v1596_v55 = vpop.permute.xlu0 %1595  ;;  %v12545_v20 = vadd.f32 %v2617_v44, %v12102_v58  ;;  %v1714_v44 = vrot.slane %v1590_v24, %v11619_v23 }
 0x618   : > { %v1723_v34 = vrot.slane %v1596_v55, %v11619_v23 }
 0x619   : > { %16859 = vst [vmem:[#allocation121_spill] sm:$0xff] %v12545_v20 }
 0x61a   : > { %v1587_v3 = vpop.permute.xlu1 %1586 }
 0x61b   : > { %v1602_v46 = vpop.permute.xlu0 %1601  ;;  %2758 = vperm.xlu1 %10920, %v12533_v41   ;;  %v1710_v18 = vrot.slane %v1587_v3, %v11610_v17 }
 0x61c   : > { %v1732_v9 = vrot.slane %v1602_v46, %v11619_v23 }
 0x61e   : > { %v1593_v51 = vpop.permute.xlu1 %1592 }
 0x61f   : > { %v1608_v8 = vpop.permute.xlu0 %1607  ;;  %2764 = vperm.xlu1 %10920, %v12537_v15   ;;  %v1719_v52 = vrot.slane %v1593_v51, %v11610_v17 }
 0x620   : > { %v1741_v51 = vrot.slane %v1608_v8, %v11619_v23 }
 0x621   : > { %v1724_v47 = vsel %vm1642_vm9, %v1723_v34, %v1719_v52 }
 0x622   : > { %v1599_v13 = vpop.permute.xlu1 %1598 }
 0x623   : > { %v1614_v50 = vpop.permute.xlu0 %1613  ;;  %2770 = vperm.xlu1 %10920, %v12541_v21   ;;  %v1728_v36 = vrot.slane %v1599_v13, %v11610_v17 }
 0x624   : > { %v1750_v55 = vrot.slane %v1614_v50, %v11619_v23 }
 0x625   : > { %v1733_v58 = vsel %vm1642_vm9, %v1732_v9, %v1728_v36 }
 0x626   : > { %v1605_v56 = vpop.permute.xlu1 %1604 }
 0x627   : > { %v1620_v32 = vpop.permute.xlu0 %1619  ;;  %2776 = vperm.xlu1 %10920, %v12545_v20   ;;  %v1737_v48 = vrot.slane %v1605_v56, %v11610_v17  ;;  %v1715_v56 = vsel %vm1642_vm9, %v1714_v44, %v1710_v18 }
 0x628   : > { %v1759_v46 = vrot.slane %v1620_v32, %v11619_v23  ;;  %v1793_v52 = vsel %vm1779_vm10, %v1724_v47, %v1715_v56 }
 0x629   : > { %v1742_v42 = vsel %vm1642_vm9, %v1741_v51, %v1737_v48  ;;  %v1794_v36 = vsel %vm1781_vm11, %v1733_v58, %v1793_v52 }
 0x62a   : > { %v1611_v27 = vpop.permute.xlu1 %1610  ;;  %v1795_v34 = vsel %vm1783_vm12, %v1742_v42, %v1794_v36 }
 0x62b   : > { %v1626_v7 = vpop.permute.xlu0 %1625  ;;  %v1746_v2 = vrot.slane %v1611_v27, %v11610_v17 }
 0x62d   : > { %v1751_v8 = vsel %vm1642_vm9, %v1750_v55, %v1746_v2 }
 0x62e   : > { %v1617_v22 = vpop.permute.xlu1 %1616  ;;  %v1796_v32 = vsel %vm1785_vm13, %v1751_v8, %v1795_v34 }
 0x62f   : > { %v1632_v57 = vpop.permute.xlu0 %1631  ;;  %v1755_v13 = vrot.slane %v1617_v22, %v11610_v17  ;;  %v1768_v22 = vrot.slane %v1626_v7, %v11619_v23 }
 0x630   : > { %v1777_v9 = vrot.slane %v1632_v57, %v11619_v23 }
 0x631   : > { %v1760_v50 = vsel %vm1642_vm9, %v1759_v46, %v1755_v13 }
 0x632   : > { %v1623_v3 = vpop.permute.xlu1 %1622  ;;  %v1797_v2 = vsel %vm1787_vm14, %v1760_v50, %v1796_v32 }
 0x633   : > { %v1764_v27 = vrot.slane %v1623_v3, %v11610_v17  ;;  %v2690_v24 = vpop.permute.xlu0 %2689 }
 0x635   : > { %v1769_v18 = vsel %vm1642_vm9, %v1768_v22, %v1764_v27 }
 0x636   : > { %v1629_v48 = vpop.permute.xlu1 %1628  ;;  %v1798_v58 = vsel %vm1789_vm15, %v1769_v18, %v1797_v2  ;;  %v2788_v2 = vrot.slane %v2690_v24, %v11619_v23 }
 0x637   : > { %v1773_v44 = vrot.slane %v1629_v48, %v11610_v17  ;;  %v2696_v47 = vpop.permute.xlu0 %2695 }
 0x638   : > { %v2797_v18 = vrot.slane %v2696_v47, %v11619_v23 }
 0x639   : > { %v1778_v7 = vsel %vm1642_vm9, %v1777_v9, %v1773_v44 }
 0x63a   : > { %v2687_v51 = vpop.permute.xlu1 %2686  ;;  %v1799_v13 = vsel %vm1791_vm1, %v1778_v7, %v1798_v58 }
 0x63b   : > { %v2702_v42 = vpop.permute.xlu0 %2701  ;;  %v1806_v55 = vsel %vm1802_vm2, %v1799_v13, -inf  ;;  %v2784_v48 = vrot.slane %v2687_v51, %v11610_v17 }
 0x63c   : > { %1807 = vmax.xlane.f32.xlu0 %v1806_v55  ;;  %v2806_v9 = vrot.slane %v2702_v42, %v11619_v23 }
 0x63d   : > { %v2789_v51 = vsel %vm1642_vm9, %v2788_v2, %v2784_v48 }
 0x63e   : > { %v2693_v3 = vpop.permute.xlu1 %2692 }
 0x63f   : > { %v2708_v56 = vpop.permute.xlu0 %2707  ;;  %v2793_v22 = vrot.slane %v2693_v3, %v11610_v17 }
 0x640   : > { %v2815_v58 = vrot.slane %v2708_v56, %v11619_v23 }
 0x641   : > { %v2798_v7 = vsel %vm1642_vm9, %v2797_v18, %v2793_v22 }
 0x642   : > { %v2699_v46 = vpop.permute.xlu1 %2698  ;;  %v2925_v24 = vsel %vm1779_vm10, %v2798_v7, %v2789_v51 }
 0x643   : > { %v2714_v57 = vpop.permute.xlu0 %2713  ;;  %v2802_v36 = vrot.slane %v2699_v46, %v11610_v17 }
 0x644   : > { %v2824_v47 = vrot.slane %v2714_v57, %v11619_v23 }
 0x645   : > { %v2807_v55 = vsel %vm1642_vm9, %v2806_v9, %v2802_v36 }
 0x646   : > { %v2705_v27 = vpop.permute.xlu1 %2704  ;;  %v2926_v36 = vsel %vm1781_vm11, %v2807_v55, %v2925_v24 }
 0x647   : > { %v2720_v52 = vpop.permute.xlu0 %2719  ;;  %v2811_v32 = vrot.slane %v2705_v27, %v11610_v17 }
 0x648   : > { %v2833_v42 = vrot.slane %v2720_v52, %v11619_v23 }
 0x649   : > { %v2816_v46 = vsel %vm1642_vm9, %v2815_v58, %v2811_v32 }
 0x64a   : > { %v2711_v8 = vpop.permute.xlu1 %2710 }
 0x64b   : > { %v2726_v50 = vpop.permute.xlu0 %2725  ;;  %v2820_v44 = vrot.slane %v2711_v8, %v11610_v17 }
 0x64c   : > { %v2842_v56 = vrot.slane %v2726_v50, %v11619_v23 }
 0x64d   : > { %v2825_v8 = vsel %vm1642_vm9, %v2824_v47, %v2820_v44 }
 0x64e   : > { %v2717_v34 = vpop.permute.xlu1 %2716 }
 0x64f   : > { %v2829_v13 = vrot.slane %v2717_v34, %v11610_v17  ;;  %v2732_v22 = vpop.permute.xlu0 %2731  ;;  %v2927_v34 = vsel %vm1783_vm12, %v2816_v46, %v2926_v36  ;;  %v16861_v36 = vld [vmem:[#allocation13_spill] sm:$0xff] }
 0x650   : > { %v2928_v52 = vsel %vm1785_vm13, %v2825_v8, %v2927_v34  ;;  %v2851_v32 = vrot.slane %v2732_v22, %v11619_v23 }
 0x651   : > { %v2834_v57 = vsel %vm1642_vm9, %v2833_v42, %v2829_v13 }
 0x652   : > { %v2723_v3 = vpop.permute.xlu1 %2722  ;;  %v2929_v44 = vsel %vm1787_vm14, %v2834_v57, %v2928_v52 }
 0x653   : > { %v2838_v27 = vrot.slane %v2723_v3, %v11610_v17  ;;  %v2738_v13 = vpop.permute.xlu0 %2737 }
 0x654   : > { %v2860_v20 = vrot.slane %v2738_v13, %v11619_v23 }
 0x655   : > { %v2843_v18 = vsel %vm1642_vm9, %v2842_v56, %v2838_v27  ;;  %v16860_v56 = vld [vmem:[#allocation12_spill] sm:$0xff] }
 0x656   : > { %v2729_v48 = vpop.permute.xlu1 %2728  ;;  %v2930_v2 = vsel %vm1789_vm15, %v2843_v18, %v2929_v44  ;;  %v16862_v18 = vld [vmem:[#allocation86_spill] sm:$0xff] }
 0x657   : > { %v2847_v9 = vrot.slane %v2729_v48, %v11610_v17  ;;  %v2744_v47 = vpop.permute.xlu0 %2743 }
 0x659   : > { %v2852_v50 = vsel %vm1642_vm9, %v2851_v32, %v2847_v9  ;;  %v16863_v9 = vld [vmem:[#allocation14_spill] sm:$0xff] }
 0x65a   : > { %v2931_v7 = vsel %vm1791_vm1, %v2852_v50, %v2930_v2  ;;  %v2735_v55 = vpop.permute.xlu1 %2734  ;;  %v16864_v50 = vld [vmem:[#allocation87_spill] sm:$0xff] }
 0x65b   : > { %v2941_v58 = vsel %vm1802_vm2, %v2931_v7, -inf  ;;  %v2750_v51 = vpop.permute.xlu0 %2749  ;;  %v2869_v7 = vrot.slane %v2744_v47, %v11619_v23  ;;  %v16866_v47 = vld [vmem:[#allocation88_spill] sm:$0xff] }
 0x65c   : > { %2942 = vmax.xlane.f32.xlu0 %v2941_v58  ;;  %v2856_v58 = vrot.slane %v2735_v55, %v11610_v17 }
 0x65e   : > { %v2741_v3 = vpop.permute.xlu1 %2740 }
 0x65f   : > { %v2756_v42 = vpop.permute.xlu0 %2755  ;;  %v2865_v52 = vrot.slane %v2741_v3, %v11610_v17 }
 0x660   : > { %v2887_v13 = vrot.slane %v2756_v42, %v11619_v23 }
 0x661   : > { %v2870_v3 = vsel %vm1642_vm9, %v2869_v7, %v2865_v52 }
 0x662   : > { %v2747_v46 = vpop.permute.xlu1 %2746 }
 0x663   : > { %v2762_v24 = vpop.permute.xlu0 %2761  ;;  %v2874_v14 = vrot.slane %v2747_v46, %v11610_v17 }
 0x664   : > { %v2896_v7 = vrot.slane %v2762_v24, %v11619_v23 }
 0x666   : > { %v2753_v27 = vpop.permute.xlu1 %2752 }
 0x667   : > { %v2768_v34 = vpop.permute.xlu0 %2767  ;;  %v2883_v21 = vrot.slane %v2753_v27, %v11610_v17 }
 0x668   : > { %v2905_v31 = vrot.slane %v2768_v34, %v11619_v23 }
 0x669   : > { %v2888_v19 = vsel %vm1642_vm9, %v2887_v13, %v2883_v21 }
 0x66b   : > { %v2774_v41 = vpop.permute.xlu0 %2773 }
 0x66c   : > { %v2914_v21 = vrot.slane %v2774_v41, %v11619_v23 }
 0x68d   : > { %v2780_v42 = vpop.permute.xlu0 %2779 }
 0x697   : > { %v12612_v8 = vpop.xlane.xlu1 %1804 }
 0x698   : > { %v12616_v22 = vrot.slane %v12612_v8, %v16860_v56  ;;  %v12620_v57 = vrot.slane %v12612_v8, %v16861_v36  ;;  %v12627_v44 = vrot.slane %v12612_v8, %v16863_v9 }
 0x69a   : > { %v1891_v48 = vsub.f32 %v16862_v18, %v12616_v22  ;;  %v1894_v2 = vsub.f32 %v16864_v50, %v12620_v57  ;;  %v2878_v18 = vrot.slane %v2750_v51, %v11619_v23  ;;  %v12640_v50 = vrot.slane %v12612_v8, %v16865_v6 }
 0x69b   : > { %v2759_v32 = vpop.permute.xlu1 %2758  ;;  %v1896_v55 = vsub.f32 %v16866_v47, %v12627_v44 }
 0x69c   : > { %v1923_v63 = vmul.f32 1.442695, %v1891_v48  ;;  %v1929_v46 = vmul.f32 1.442695, %v1894_v2  ;;  %v2861_v48 = vsel %vm1642_vm9, %v2860_v20, %v2856_v58  ;;  %v2892_v51 = vrot.slane %v2759_v32, %v11610_v17  ;;  %v16868_v32 = vld [vmem:[#allocation91_spill] sm:$0xff] }
 0x69d   : > { %v2932_v52 = vsel %vm1779_vm10, %v2870_v3, %v2861_v48  ;;  %v2879_v27 = vsel %vm1642_vm9, %v2878_v18, %v2874_v14  ;;  %v1898_v58 = vsub.f32 %v16868_v32, %v12640_v50  ;;  %v1933_v3 = vmul.f32 1.442695, %v1896_v55  ;;  %v16869_v48 = vld [vmem:[#allocation17_spill] sm:$0xff] }
 0x69e   : > { %10921 = vpow2.f32 %v1923_v63  ;;  %v12654_v63 = vrot.slane %v12612_v8, %v16867_v45  ;;  %v2933_v24 = vsel %vm1781_vm11, %v2879_v27, %v2932_v52  ;;  %v2897_v34 = vsel %vm1642_vm9, %v2896_v7, %v2892_v51 }
 0x69f   : > { %v2765_v15 = vpop.permute.xlu1 %2764  ;;  %10923 = vpow2.f32 %v1929_v46  ;;  %v2934_v18 = vsel %vm1783_vm12, %v2888_v19, %v2933_v24  ;;  %v1834_v13 = vrot.slane %v12612_v8, %v16869_v48  ;;  %v16870_v46 = vld [vmem:[#allocation93_spill] sm:$0xff]  ;;  %v1937_v52 = vmul.f32 1.442695, %v1898_v58 }
 0x6a0   : > { %v2901_v20 = vrot.slane %v2765_v15, %v11610_v17  ;;  %v2923_v15 = vrot.slane %v2780_v42, %v11619_v23  ;;  %v1900_v55 = vsub.f32 %v16870_v46, %v12654_v63  ;;  %10925 = vpow2.f32 %v1933_v3  ;;  %v16873_v3 = vld [vmem:[#allocation95_spill] sm:$0xff] }
 0x6a1   : > { %v2935_v41 = vsel %vm1785_vm13, %v2897_v34, %v2934_v18  ;;  %10927 = vpow2.f32 %v1937_v52 }
 0x6a2   : > { %v2906_v47 = vsel %vm1642_vm9, %v2905_v31, %v2901_v20  ;;  %v16871_v20 = vld [vmem:[#allocation18_spill] sm:$0xff]  ;;  %v1941_v34 = vmul.f32 1.442695, %v1900_v55 }
 0x6a3   : > { %v2771_v2 = vpop.permute.xlu1 %2770  ;;  %v2936_v19 = vsel %vm1787_vm14, %v2906_v47, %v2935_v41  ;;  %v1838_v42 = vrot.slane %v12612_v8, %v16871_v20  ;;  %v16876_v41 = vld [vmem:[#allocation97_spill] sm:$0xff]  ;;  %v16877_v55 = vld [vmem:[#allocation90_spill] sm:$0xff] }
 0x6a4   : > { %v2910_v14 = vrot.slane %v2771_v2, %v11610_v17  ;;  %10929 = vpow2.f32 %v1941_v34 }
 0x6a6   : > { %v2915_v2 = vsel %vm1642_vm9, %v2914_v21, %v2910_v14  ;;  %v16872_v14 = vld [vmem:[#allocation85_spill] sm:$0xff]  ;;  %v1902_v21 = vsub.f32 %v16873_v3, %v1834_v13 }
 0x6a7   : > { %v2777_v32 = vpop.permute.xlu1 %2776  ;;  %v2937_v7 = vsel %vm1789_vm15, %v2915_v2, %v2936_v19  ;;  %v1892_v24 = vsub.f32 %v16872_v14, %v12616_v22  ;;  %v16875_v22 = vld [vmem:[#allocation19_spill] sm:$0xff] }
 0x6a8   : > { %v2919_v51 = vrot.slane %v2777_v32, %v11610_v17  ;;  %v12674_v31 = vpop.eup %10921  ;;  %v1842_v32 = vrot.slane %v12612_v8, %v16875_v22  ;;  %v1945_v19 = vmul.f32 1.442695, %v1902_v21  ;;  %v16879_v8 = vld [vmem:[#allocation92_spill] sm:$0xff] }
 0x6a9   : > { %2020 = vperm.xlu0 %10919, %v12674_v31   ;;  %v12686_v47 = vpop.eup %10923  ;;  %v1925_v2 = vmul.f32 1.442695, %v1892_v24  ;;  %v1897_v3 = vsub.f32 %v16879_v8, %v12640_v50  ;;  %v16881_v50 = vld [vmem:[#allocation96_spill] sm:$0xff] }
 0x6aa   : > { %v2924_v27 = vsel %vm1642_vm9, %v2923_v15, %v2919_v51  ;;  %v16874_v15 = vld [vmem:[#allocation89_spill] sm:$0xff]  ;;  %v1904_v51 = vsub.f32 %v16876_v41, %v1838_v42  ;;  %v12694_v52 = vpop.eup %10925 }
 0x6ab   : > { %v2938_v58 = vsel %vm1791_vm1, %v2924_v27, %v2937_v7  ;;  %v1893_v46 = vsub.f32 %v16874_v15, %v12620_v57  ;;  %v1895_v27 = vsub.f32 %v16877_v55, %v12627_v44  ;;  %10931 = vpow2.f32 %v1925_v2  ;;  %v16878_v57 = vld [vmem:[#allocation99_spill] sm:$0xff] }
 0x6ac   : > { %v2944_v18 = vsel %vm1802_vm2, %v2938_v58, -inf  ;;  %v1906_v14 = vsub.f32 %v16878_v57, %v1842_v32  ;;  %10933 = vpow2.f32 %v1945_v19  ;;  %v1949_v24 = vmul.f32 1.442695, %v1904_v51  ;;  %v12700_v58 = vpop.eup %10927 }
 0x6ad   : > { %2945 = vmax.xlane.f32.xlu1 %v2944_v18  ;;  %2029 = vperm.xlu0 %10919, %v12686_v47   ;;  %v1927_v7 = vmul.f32 1.442695, %v1893_v46  ;;  %v1931_v21 = vmul.f32 1.442695, %v1895_v27  ;;  %v16880_v18 = vld [vmem:[#allocation94_spill] sm:$0xff]  ;;  %v1901_v51 = vsub.f32 %v16881_v50, %v1834_v13  ;;  %v16885_v13 = vld [vmem:[#allocation100_spill] sm:$0xff] }
 0x6ae   : > { %v1953_v34 = vmul.f32 1.442695, %v1906_v14  ;;  %v12705_v44 = vpop.eup %10929  ;;  %v1899_v15 = vsub.f32 %v16880_v18, %v12654_v63  ;;  %v1935_v46 = vmul.f32 1.442695, %v1897_v3  ;;  %v16883_v27 = vld [vmem:[#allocation98_spill] sm:$0xff]  ;;  %v1905_v8 = vsub.f32 %v16885_v13, %v1842_v32  ;;  %v16887_v50 = vld [vmem:[#allocation101_spill] sm:$0xff] }
 0x6af   : > { %10935 = vpow2.f32 %v1927_v7  ;;  %v1903_v7 = vsub.f32 %v16883_v27, %v1838_v42  ;;  %v1943_v57 = vmul.f32 1.442695, %v1901_v51 }
 0x6b0   : > { %10937 = vpow2.f32 %v1949_v24  ;;  %v1939_v19 = vmul.f32 1.442695, %v1899_v15  ;;  %v1951_v15 = vmul.f32 1.442695, %v1905_v8  ;;  %v16890_v8 = vld [vmem:[#allocation105_spill] sm:$0xff] }
 0x6b1   : > { %2035 = vperm.xlu0 %10919, %v12694_v52   ;;  %10939 = vpow2.f32 %v1931_v21  ;;  %v1947_v3 = vmul.f32 1.442695, %v1903_v7  ;;  %v16889_v7 = vld [vmem:[#allocation102_spill] sm:$0xff] }
 0x6b2   : > { %10941 = vpow2.f32 %v1953_v34 }
 0x6b3   : > { %10943 = vpow2.f32 %v1935_v46 }
 0x6b4   : > { %10945 = vpow2.f32 %v1939_v19 }
 0x6b5   : > { %2041 = vperm.xlu0 %10919, %v12700_v58   ;;  %v12710_v2 = vpop.eup %10931  ;;  %10947 = vpow2.f32 %v1943_v57 }
 0x6b6   : > { %v12712_v41 = vpop.eup %10933  ;;  %10949 = vpow2.f32 %v1947_v3 }
 0x6b7   : > { %10951 = vpow2.f32 %v1951_v15 }
 0x6b9   : > { %2047 = vperm.xlu0 %10919, %v12705_v44   ;;  %v12717_v55 = vpop.eup %10935 }
 0x6ba   : > { %16882 = vst [vmem:[#allocation86_spill] sm:$0xff] %v12717_v55  ;;  %v12719_v63 = vpop.eup %10937 }
 0x6bb   : > { %v12724_v14 = vpop.eup %10939 }
 0x6bc   : > { %16884 = vst [vmem:[#allocation87_spill] sm:$0xff] %v12724_v14  ;;  %v12726_v24 = vpop.eup %10941 }
 0x6bd   : > { %2053 = vperm.xlu0 %10919, %v12712_v41   ;;  %v12731_v21 = vpop.eup %10943 }
 0x6be   : > { %2023 = vperm.xlu1 %10920, %v12710_v2   ;;  %16886 = vst [vmem:[#allocation88_spill] sm:$0xff] %v12731_v21  ;;  %v12738_v32 = vpop.eup %10945 }
 0x6bf   : > { %16888 = vst [vmem:[#allocation91_spill] sm:$0xff] %v12738_v32 }
 0x6c1   : > { %2059 = vperm.xlu0 %10919, %v12719_v63  }
 0x6c2   : > { %2026 = vperm.xlu1 %10920, %v12717_v55  }
 0x6c5   : > { %2065 = vperm.xlu0 %10919, %v12726_v24  }
 0x6c6   : > { %2032 = vperm.xlu1 %10920, %v12724_v14  }
 0x6c9   : > { %v1808_v34 = vpop.xlane.xlu0 %1807 }
 0x6ca   : > { %v1846_v42 = vrot.slane %v1808_v34, %v16860_v56  ;;  %v1850_v18 = vrot.slane %v1808_v34, %v16861_v36  ;;  %2038 = vperm.xlu1 %10920, %v12731_v21   ;;  %v1854_v19 = vrot.slane %v1808_v34, %v16863_v9  ;;  %v12744_v21 = vpop.eup %10947  ;;  %v1862_v15 = vrot.slane %v1808_v34, %v16867_v45 }
 0x6cc   : > { %v1907_v46 = vsub.f32 %v12300_v40, %v1846_v42  ;;  %v1908_v51 = vsub.f32 %v16887_v50, %v1846_v42  ;;  %v1909_v27 = vsub.f32 %v12310_v62, %v1850_v18  ;;  %v1910_v57 = vsub.f32 %v16889_v7, %v1850_v18  ;;  %v16891_v50 = vld [vmem:[#allocation103_spill] sm:$0xff] }
 0x6cd   : > { %v1911_v3 = vsub.f32 %v16890_v8, %v1854_v19  ;;  %v1858_v42 = vrot.slane %v1808_v34, %v16865_v6  ;;  %v1912_v55 = vsub.f32 %v16891_v50, %v1854_v19  ;;  %v16893_v7 = vld [vmem:[#allocation107_spill] sm:$0xff]  ;;  %v16894_v19 = vld [vmem:[#allocation106_spill] sm:$0xff]  ;;  %v1915_v50 = vsub.f32 %v12337_v61, %v1862_v15 }
 0x6ce   : > { %2044 = vperm.xlu1 %10920, %v12738_v32   ;;  %v1955_v13 = vmul.f32 1.442695, %v1907_v46  ;;  %v1957_v14 = vmul.f32 1.442695, %v1908_v51  ;;  %v1959_v40 = vmul.f32 1.442695, %v1909_v27  ;;  %v12750_v32 = vpop.eup %10949 }
 0x6cf   : > { %v1961_v62 = vmul.f32 1.442695, %v1910_v57  ;;  %v1963_v18 = vmul.f32 1.442695, %v1911_v3  ;;  %v16892_v46 = vld [vmem:[#allocation104_spill] sm:$0xff]  ;;  %v12756_v8 = vpop.eup %10951  ;;  %v1916_v57 = vsub.f32 %v16894_v19, %v1862_v15  ;;  %v1874_v15 = vrot.slane %v1808_v34, %v16875_v22 }
 0x6d0   : > { %10953 = vpow2.f32 %v1955_v13  ;;  %v1914_v51 = vsub.f32 %v16892_v46, %v1858_v42  ;;  %v1965_v27 = vmul.f32 1.442695, %v1912_v55  ;;  %v1913_v13 = vsub.f32 %v16893_v7, %v1858_v42  ;;  %v16896_v42 = vld [vmem:[#allocation108_spill] sm:$0xff] }
 0x6d1   : > { %10955 = vpow2.f32 %v1957_v14  ;;  %v1866_v14 = vrot.slane %v1808_v34, %v16869_v48  ;;  %v1870_v55 = vrot.slane %v1808_v34, %v16871_v20  ;;  %v1973_v7 = vmul.f32 1.442695, %v1916_v57 }
 0x6d2   : > { %2050 = vperm.xlu1 %10920, %v12744_v21   ;;  %10957 = vpow2.f32 %v1959_v40  ;;  %v1969_v3 = vmul.f32 1.442695, %v1914_v51  ;;  %v1967_v46 = vmul.f32 1.442695, %v1913_v13  ;;  %v16898_v13 = vld [vmem:[#allocation109_spill] sm:$0xff] }
 0x6d3   : > { %10959 = vpow2.f32 %v1961_v62  ;;  %v1917_v51 = vsub.f32 %v12345_v35, %v1866_v14  ;;  %v1919_v57 = vsub.f32 %v12353_v39, %v1870_v55 }
 0x6d4   : > { %10961 = vpow2.f32 %v1963_v18  ;;  %v1918_v18 = vsub.f32 %v16896_v42, %v1866_v14 }
 0x6d5   : > { %10963 = vpow2.f32 %v1965_v27  ;;  %v1971_v27 = vmul.f32 1.442695, %v1915_v50  ;;  %v1975_v35 = vmul.f32 1.442695, %v1917_v51  ;;  %v16900_v50 = vld [vmem:[#allocation110_spill] sm:$0xff] }
 0x6d6   : > { %2056 = vperm.xlu1 %10920, %v12750_v32   ;;  %10965 = vpow2.f32 %v1969_v3  ;;  %v1977_v42 = vmul.f32 1.442695, %v1918_v18  ;;  %v1979_v18 = vmul.f32 1.442695, %v1919_v57 }
 0x6d7   : > { %10967 = vpow2.f32 %v1967_v46  ;;  %v1922_v46 = vsub.f32 %v16900_v50, %v1874_v15 }
 0x6d8   : > { %10969 = vpow2.f32 %v1973_v7 }
 0x6d9   : > { %10971 = vpow2.f32 %v1971_v27  ;;  %v1985_v51 = vmul.f32 1.442695, %v1922_v46 }
 0x6da   : > { %2062 = vperm.xlu1 %10920, %v12756_v8   ;;  %v12761_v40 = vpop.eup %10953  ;;  %10973 = vpow2.f32 %v1977_v42 }
 0x6db   : > { %16895 = vst [vmem:[#allocation93_spill] sm:$0xff] %v12761_v40  ;;  %v12764_v62 = vpop.eup %10955  ;;  %10975 = vpow2.f32 %v1975_v35 }
 0x6dc   : > { %2071 = vperm.xlu0 %10919, %v12764_v62   ;;  %v12770_v19 = vpop.eup %10957 }
 0x6dd   : > { %16897 = vst [vmem:[#allocation85_spill] sm:$0xff] %v12770_v19  ;;  %v12773_v61 = vpop.eup %10959 }
 0x6de   : > { %2068 = vperm.xlu1 %10920, %v12761_v40   ;;  %v1920_v40 = vsub.f32 %v16898_v13, %v1870_v55  ;;  %v12779_v3 = vpop.eup %10961  ;;  %v1921_v13 = vsub.f32 %v12361_v5, %v1874_v15 }
 0x6df   : > { %16899 = vst [vmem:[#allocation95_spill] sm:$0xff] %v12779_v3  ;;  %v12782_v14 = vpop.eup %10963 }
 0x6e0   : > { %2077 = vperm.xlu0 %10919, %v12773_v61   ;;  %v1981_v34 = vmul.f32 1.442695, %v1920_v40  ;;  %v12788_v7 = vpop.eup %10965  ;;  %v1983_v5 = vmul.f32 1.442695, %v1921_v13 }
 0x6e1   : > { %v12792_v39 = vpop.eup %10967 }
 0x6e2   : > { %2074 = vperm.xlu1 %10920, %v12770_v19   ;;  %16901 = vst [vmem:[#allocation89_spill] sm:$0xff] %v12792_v39  ;;  %10977 = vpow2.f32 %v1981_v34  ;;  %v12802_v42 = vpop.eup %10969 }
 0x6e3   : > { %10979 = vpow2.f32 %v1979_v18  ;;  %v12804_v57 = vpop.eup %10971 }
 0x6e4   : > { %2083 = vperm.xlu0 %10919, %v12782_v14   ;;  %16902 = vst [vmem:[#allocation97_spill] sm:$0xff] %v12804_v57  ;;  %10981 = vpow2.f32 %v1985_v51 }
 0x6e5   : > { %10983 = vpow2.f32 %v1983_v5 }
 0x6e6   : > { %2080 = vperm.xlu1 %10920, %v12779_v3  }
 0x6e8   : > { %2089 = vperm.xlu0 %10919, %v12788_v7  }
 0x6e9   : > { %v12790_v19 = vpop.xlane.xlu0 %2942 }
 0x6ea   : > { %v2952_v55 = vrot.slane %v12790_v19, %v16860_v56  ;;  %v2956_v40 = vrot.slane %v12790_v19, %v16861_v36  ;;  %2086 = vperm.xlu1 %10920, %v12792_v39   ;;  %v2960_v35 = vrot.slane %v12790_v19, %v16863_v9  ;;  %v2964_v18 = vrot.slane %v12790_v19, %v16865_v6 }
 0x6ec   : > { %v3029_v27 = vsub.f32 %v12371_v0, %v2952_v55  ;;  %v3030_v15 = vsub.f32 %v12357_v59, %v2952_v55  ;;  %2095 = vperm.xlu0 %10919, %v12802_v42   ;;  %v3032_v50 = vsub.f32 %v12365_v28, %v2956_v40  ;;  %v3031_v46 = vsub.f32 %v12381_v16, %v2956_v40  ;;  %v12812_v59 = vpop.eup %10973 }
 0x6ed   : > { %v12814_v13 = vpop.eup %10975  ;;  %v3034_v55 = vsub.f32 %v12377_v26, %v2960_v35  ;;  %v3033_v51 = vsub.f32 %v12391_v25, %v2960_v35 }
 0x6ee   : > { %2092 = vperm.xlu1 %10920, %v12804_v57   ;;  %v3061_v0 = vmul.f32 1.442695, %v3029_v27  ;;  %v3063_v34 = vmul.f32 1.442695, %v3030_v15  ;;  %16903 = vst [vmem:[#allocation90_spill] sm:$0xff] %v12814_v13  ;;  %v12822_v40 = vpop.eup %10977  ;;  %v2968_v27 = vrot.slane %v12790_v19, %v16867_v45  ;;  %v3036_v15 = vsub.f32 %v12387_v49, %v2964_v18 }
 0x6ef   : > { %v3067_v28 = vmul.f32 1.442695, %v3032_v50  ;;  %v3065_v16 = vmul.f32 1.442695, %v3031_v46  ;;  %v12824_v5 = vpop.eup %10979  ;;  %v3071_v26 = vmul.f32 1.442695, %v3034_v55  ;;  %v3035_v50 = vsub.f32 %v12401_v43, %v2964_v18 }
 0x6f0   : > { %2101 = vperm.xlu0 %10919, %v12812_v59   ;;  %10985 = vpow2.f32 %v3063_v34  ;;  %16904 = vst [vmem:[#allocation99_spill] sm:$0xff] %v12824_v5  ;;  %v3069_v25 = vmul.f32 1.442695, %v3033_v51  ;;  %v12832_v35 = vpop.eup %10981  ;;  %v3038_v34 = vsub.f32 %v12395_v11, %v2968_v27  ;;  %v3075_v49 = vmul.f32 1.442695, %v3036_v15 }
 0x6f1   : > { %10987 = vpow2.f32 %v3061_v0  ;;  %16905 = vst [vmem:[#allocation92_spill] sm:$0xff] %v12832_v35  ;;  %v12834_v46 = vpop.eup %10983  ;;  %v2972_v0 = vrot.slane %v12790_v19, %v16869_v48  ;;  %v3037_v55 = vsub.f32 %v12411_v4, %v2968_v27  ;;  %v3073_v43 = vmul.f32 1.442695, %v3035_v50 }
 0x6f2   : > { %2098 = vperm.xlu1 %10920, %v12814_v13   ;;  %10989 = vpow2.f32 %v3067_v28  ;;  %16906 = vst [vmem:[#allocation94_spill] sm:$0xff] %v12834_v46  ;;  %v2976_v51 = vrot.slane %v12790_v19, %v16871_v20  ;;  %v3079_v11 = vmul.f32 1.442695, %v3038_v34  ;;  %v2980_v50 = vrot.slane %v12790_v19, %v16875_v22 }
 0x6f3   : > { %10991 = vpow2.f32 %v3065_v16  ;;  %v3040_v16 = vsub.f32 %v12407_v10, %v2972_v0  ;;  %v3039_v15 = vsub.f32 %v12423_v37, %v2972_v0  ;;  %v3077_v4 = vmul.f32 1.442695, %v3037_v55 }
 0x6f4   : > { %2107 = vperm.xlu0 %10919, %v12822_v40   ;;  %10993 = vpow2.f32 %v3071_v26  ;;  %v3041_v34 = vsub.f32 %v12431_v53, %v2976_v51  ;;  %v3044_v55 = vsub.f32 %v12427_v1, %v2980_v50 }
 0x6f5   : > { %10995 = vpow2.f32 %v3069_v25  ;;  %v3042_v25 = vsub.f32 %v12415_v38, %v2976_v51  ;;  %v3083_v10 = vmul.f32 1.442695, %v3040_v16  ;;  %v3081_v37 = vmul.f32 1.442695, %v3039_v15 }
 0x6f6   : > { %2104 = vperm.xlu1 %10920, %v12824_v5   ;;  %10997 = vpow2.f32 %v3075_v49  ;;  %v3043_v38 = vsub.f32 %v12441_v54, %v2980_v50  ;;  %v3091_v51 = vmul.f32 1.442695, %v3044_v55 }
 0x6f7   : > { %10999 = vpow2.f32 %v3073_v43  ;;  %v3087_v19 = vmul.f32 1.442695, %v3042_v25  ;;  %v3085_v43 = vmul.f32 1.442695, %v3041_v34 }
 0x6f8   : > { %2113 = vperm.xlu0 %10919, %v12832_v35   ;;  %11001 = vpow2.f32 %v3079_v11  ;;  %v3089_v1 = vmul.f32 1.442695, %v3043_v38 }
 0x6f9   : > { %11003 = vpow2.f32 %v3077_v4 }
 0x6fa   : > { %2110 = vperm.xlu1 %10920, %v12834_v46   ;;  %v12842_v18 = vpop.eup %10985  ;;  %11005 = vpow2.f32 %v3083_v10 }
 0x6fb   : > { %16907 = vst [vmem:[#allocation96_spill] sm:$0xff] %v12842_v18  ;;  %v12844_v28 = vpop.eup %10987  ;;  %11007 = vpow2.f32 %v3081_v37 }
 0x6fc   : > { %16908 = vst [vmem:[#allocation98_spill] sm:$0xff] %v12844_v28  ;;  %3161 = vperm.xlu0 %10919, %v12842_v18   ;;  %v12852_v27 = vpop.eup %10989  ;;  %11009 = vpow2.f32 %v3087_v19 }
 0x6fd   : > { %16909 = vst [vmem:[#allocation100_spill] sm:$0xff] %v12852_v27  ;;  %v12854_v26 = vpop.eup %10991  ;;  %11011 = vpow2.f32 %v3085_v43 }
 0x6fe   : > { %3158 = vperm.xlu1 %10920, %v12844_v28   ;;  %16910 = vst [vmem:[#allocation101_spill] sm:$0xff] %v12854_v26  ;;  %v12862_v0 = vpop.eup %10993  ;;  %11013 = vpow2.f32 %v3091_v51 }
 0x6ff   : > { %16911 = vst [vmem:[#allocation102_spill] sm:$0xff] %v12862_v0  ;;  %v12864_v49 = vpop.eup %10995  ;;  %11015 = vpow2.f32 %v3089_v1 }
 0x700   : > { %3167 = vperm.xlu0 %10919, %v12852_v27   ;;  %16912 = vst [vmem:[#allocation105_spill] sm:$0xff] %v12864_v49  ;;  %v12870_v16 = vpop.eup %10997 }
 0x701   : > { %16913 = vst [vmem:[#allocation103_spill] sm:$0xff] %v12870_v16  ;;  %v12872_v53 = vpop.eup %10999 }
 0x702   : > { %3164 = vperm.xlu1 %10920, %v12854_v26   ;;  %16914 = vst [vmem:[#allocation104_spill] sm:$0xff] %v12872_v53  ;;  %v12876_v11 = vpop.eup %11001 }
 0x703   : > { %16915 = vst [vmem:[#allocation107_spill] sm:$0xff] %v12876_v11  ;;  %v12878_v15 = vpop.eup %11003 }
 0x704   : > { %3173 = vperm.xlu0 %10919, %v12862_v0   ;;  %16916 = vst [vmem:[#allocation106_spill] sm:$0xff] %v12878_v15  ;;  %v12882_v54 = vpop.eup %11005 }
 0x705   : > { %16917 = vst [vmem:[#allocation108_spill] sm:$0xff] %v12882_v54  ;;  %v12884_v4 = vpop.eup %11007 }
 0x706   : > { %3170 = vperm.xlu1 %10920, %v12864_v49   ;;  %16918 = vst [vmem:[#allocation109_spill] sm:$0xff] %v12884_v4  ;;  %v12888_v50 = vpop.eup %11009 }
 0x707   : > { %16919 = vst [vmem:[#allocation110_spill] sm:$0xff] %v12888_v50  ;;  %v12890_v25 = vpop.eup %11011 }
 0x708   : > { %3179 = vperm.xlu0 %10919, %v12870_v16   ;;  %16920 = vst [vmem:[#allocation122_spill] sm:$0xff] %v12890_v25  ;;  %v12894_v10 = vpop.eup %11013 }
 0x709   : > { %16921 = vst [vmem:[#allocation123_spill] sm:$0xff] %v12894_v10  ;;  %v12896_v34 = vpop.eup %11015 }
 0x70a   : > { %3176 = vperm.xlu1 %10920, %v12872_v53   ;;  %16922 = vst [vmem:[#allocation124_spill] sm:$0xff] %v12896_v34 }
 0x70c   : > { %3185 = vperm.xlu0 %10919, %v12876_v11  }
 0x70e   : > { %3182 = vperm.xlu1 %10920, %v12878_v15  }
 0x710   : > { %3191 = vperm.xlu0 %10919, %v12882_v54  }
 0x712   : > { %3188 = vperm.xlu1 %10920, %v12884_v4  }
 0x714   : > { %3197 = vperm.xlu0 %10919, %v12888_v50  }
 0x716   : > { %3194 = vperm.xlu1 %10920, %v12890_v25  }
 0x718   : > { %3203 = vperm.xlu0 %10919, %v12894_v10  }
 0x71a   : > { %3200 = vperm.xlu1 %10920, %v12896_v34  }
 0x728   : > { %v12900_v37 = vpop.permute.xlu0 %2020 }
 0x72c   : > { %v2030_v55 = vpop.permute.xlu0 %2029 }
 0x72d   : > { %v2131_v3 = vrot.slane %v2030_v55, %v11619_v23 }
 0x730   : > { %v2036_v19 = vpop.permute.xlu0 %2035 }
 0x734   : > { %v2042_v4 = vpop.permute.xlu0 %2041 }
 0x735   : > { %v2149_v55 = vrot.slane %v2042_v4, %v11619_v23 }
 0x738   : > { %v2048_v46 = vpop.permute.xlu0 %2047 }
 0x73a   : > { %v2946_v38 = vpop.xlane.xlu1 %2945 }
 0x73b   : > { %v12903_v43 = vrot.slane %v2946_v38, %v16860_v56  ;;  %v12906_v51 = vrot.slane %v2946_v38, %v16861_v36  ;;  %v12911_v15 = vrot.slane %v2946_v38, %v16863_v9  ;;  %v12916_v26 = vrot.slane %v2946_v38, %v16865_v6 }
 0x73c   : > { %v12921_v50 = vrot.slane %v2946_v38, %v16867_v45  ;;  %v12926_v54 = vrot.slane %v2946_v38, %v16869_v48  ;;  %v12933_v57 = vrot.slane %v2946_v38, %v16871_v20 }
 0x73d   : > { %v3046_v1 = vsub.f32 %v12435_v30, %v12903_v43  ;;  %v3048_v34 = vsub.f32 %v12445_v33, %v12906_v51  ;;  %v3050_v28 = vsub.f32 %v12453_v60, %v12911_v15  ;;  %v3052_v5 = vsub.f32 %v12461_v12, %v12916_v26  ;;  %v16924_v12 = vld [vmem:[#allocation115_spill] sm:$0xff] }
 0x73e   : > { %v2024_v25 = vpop.permute.xlu1 %2023  ;;  %v3054_v13 = vsub.f32 %v12469_v29, %v12921_v50  ;;  %v12942_v29 = vrot.slane %v2946_v38, %v16875_v22 }
 0x73f   : > { %v3095_v53 = vmul.f32 1.442695, %v3046_v1  ;;  %v3099_v10 = vmul.f32 1.442695, %v3048_v34  ;;  %v3103_v33 = vmul.f32 1.442695, %v3050_v28  ;;  %v3056_v28 = vsub.f32 %v16924_v12, %v12926_v54 }
 0x740   : > { %v3107_v60 = vmul.f32 1.442695, %v3052_v5  ;;  %v2122_v12 = vrot.slane %v2024_v25, %v11619_v23 }
 0x741   : > { %11017 = vpow2.f32 %v3095_v53  ;;  %v2054_v53 = vpop.permute.xlu0 %2053  ;;  %v3115_v38 = vmul.f32 1.442695, %v3056_v28 }
 0x742   : > { %v2027_v49 = vpop.permute.xlu1 %2026  ;;  %11019 = vpow2.f32 %v3099_v10  ;;  %v3111_v10 = vmul.f32 1.442695, %v3054_v13  ;;  %v2167_v28 = vrot.slane %v2054_v53, %v11619_v23 }
 0x743   : > { %11021 = vpow2.f32 %v3103_v33  ;;  %v2127_v16 = vrot.slane %v2027_v49, %v11610_v17  ;;  %v2140_v49 = vrot.slane %v2036_v19, %v11619_v23 }
 0x744   : > { %11023 = vpow2.f32 %v3107_v60 }
 0x745   : > { %v2060_v5 = vpop.permute.xlu0 %2059  ;;  %11025 = vpow2.f32 %v3111_v10  ;;  %v2132_v18 = vsel %vm1642_vm9, %v2131_v3, %v2127_v16 }
 0x746   : > { %v2033_v30 = vpop.permute.xlu1 %2032  ;;  %11027 = vpow2.f32 %v3115_v38 }
 0x747   : > { %v2136_v33 = vrot.slane %v2033_v30, %v11610_v17  ;;  %v2118_v30 = vrot.slane %v12900_v37, %v11610_v17 }
 0x749   : > { %v2123_v37 = vsel %vm1642_vm9, %v2122_v12, %v2118_v30 }
 0x74a   : > { %v2039_v1 = vpop.permute.xlu1 %2038 }
 0x74b   : > { %v12930_v34 = vpop.eup %11017  ;;  %v2145_v13 = vrot.slane %v2039_v1, %v11610_v17  ;;  %v2158_v1 = vrot.slane %v2048_v46, %v11619_v23  ;;  %v2176_v46 = vrot.slane %v2060_v5, %v11619_v23 }
 0x74c   : > { %16923 = vst [vmem:[#allocation125_spill] sm:$0xff] %v12930_v34  ;;  %3209 = vperm.xlu0 %10919, %v12930_v34   ;;  %v12939_v39 = vpop.eup %11019  ;;  %v16926_v34 = vld [vmem:[#allocation116_spill] sm:$0xff] }
 0x74d   : > { %16925 = vst [vmem:[#allocation115_spill] sm:$0xff] %v12939_v39  ;;  %v3058_v27 = vsub.f32 %v16926_v34, %v12933_v57  ;;  %v12958_v25 = vpop.eup %11021  ;;  %v2150_v4 = vsel %vm1642_vm9, %v2149_v55, %v2145_v13 }
 0x74e   : > { %v2045_v11 = vpop.permute.xlu1 %2044 }
 0x74f   : > { %v2154_v60 = vrot.slane %v2045_v11, %v11610_v17  ;;  %v2141_v11 = vsel %vm1642_vm9, %v2140_v49, %v2136_v33  ;;  %v3119_v35 = vmul.f32 1.442695, %v3058_v27  ;;  %v12974_v33 = vpop.eup %11023 }
 0x750   : > { %3215 = vperm.xlu0 %10919, %v12939_v39   ;;  %v16927_v39 = vld [vmem:[#allocation117_spill] sm:$0xff] }
 0x751   : > { %v3060_v19 = vsub.f32 %v16927_v39, %v12942_v29  ;;  %v2066_v39 = vpop.permute.xlu0 %2065  ;;  %v2159_v16 = vsel %vm1642_vm9, %v2158_v1, %v2154_v60  ;;  %11029 = vpow2.f32 %v3119_v35 }
 0x752   : > { %v2051_v0 = vpop.permute.xlu1 %2050  ;;  %v2185_v38 = vrot.slane %v2066_v39, %v11619_v23 }
 0x753   : > { %v2163_v34 = vrot.slane %v2051_v0, %v11610_v17  ;;  %v2259_v0 = vsel %vm1779_vm10, %v2132_v18, %v2123_v37  ;;  %v3123_v60 = vmul.f32 1.442695, %v3060_v19 }
 0x754   : > { %3221 = vperm.xlu0 %10919, %v12958_v25   ;;  %v2260_v53 = vsel %vm1781_vm11, %v2141_v11, %v2259_v0  ;;  %v16928_v11 = vld [vmem:[#allocation111_spill] sm:$0xff] }
 0x755   : > { %v2168_v27 = vsel %vm1642_vm9, %v2167_v28, %v2163_v34  ;;  %v2261_v12 = vsel %vm1783_vm12, %v2150_v4, %v2260_v53  ;;  %v12987_v28 = vpop.eup %11025  ;;  %11031 = vpow2.f32 %v3123_v60 }
 0x756   : > { %v2057_v10 = vpop.permute.xlu1 %2056  ;;  %v2262_v5 = vsel %vm1785_vm13, %v2159_v16, %v2261_v12 }
 0x757   : > { %v2172_v3 = vrot.slane %v2057_v10, %v11610_v17  ;;  %v2263_v30 = vsel %vm1787_vm14, %v2168_v27, %v2262_v5  ;;  %v3045_v10 = vsub.f32 %v16928_v11, %v12903_v43  ;;  %v16932_v27 = vld [vmem:[#allocation113_spill] sm:$0xff] }
 0x758   : > { %3227 = vperm.xlu0 %10919, %v12974_v33   ;;  %v3049_v12 = vsub.f32 %v16932_v27, %v12911_v15 }
 0x759   : > { %v2177_v13 = vsel %vm1642_vm9, %v2176_v46, %v2172_v3  ;;  %v12996_v3 = vpop.eup %11027  ;;  %v16930_v46 = vld [vmem:[#allocation112_spill] sm:$0xff]  ;;  %v3093_v39 = vmul.f32 1.442695, %v3045_v10 }
 0x75a   : > { %v2063_v49 = vpop.permute.xlu1 %2062  ;;  %v2264_v1 = vsel %vm1789_vm15, %v2177_v13, %v2263_v30  ;;  %16929 = vst [vmem:[#allocation116_spill] sm:$0xff] %v12996_v3  ;;  %v3047_v0 = vsub.f32 %v16930_v46, %v12906_v51  ;;  %v16934_v51 = vld [vmem:[#allocation114_spill] sm:$0xff]  ;;  %v3101_v60 = vmul.f32 1.442695, %v3049_v12  ;;  %v16936_v46 = vld [vmem:[#allocation119_spill] sm:$0xff] }
 0x75b   : > { %v2181_v18 = vrot.slane %v2063_v49, %v11610_v17  ;;  %v12983_v55 = vpop.permute.xlu0 %2071  ;;  %v13001_v53 = vpop.eup %11029  ;;  %11033 = vpow2.f32 %v3093_v39 }
 0x75c   : > { %3233 = vperm.xlu0 %10919, %v12987_v28   ;;  %16931 = vst [vmem:[#allocation117_spill] sm:$0xff] %v13001_v53  ;;  %v3097_v13 = vmul.f32 1.442695, %v3047_v0 }
 0x75d   : > { %v2186_v34 = vsel %vm1642_vm9, %v2185_v38, %v2181_v18  ;;  %v3051_v18 = vsub.f32 %v16934_v51, %v12916_v26  ;;  %v3055_v26 = vsub.f32 %v16936_v46, %v12926_v54 }
 0x75e   : > { %v12991_v37 = vpop.permute.xlu1 %2068  ;;  %v2265_v4 = vsel %vm1791_vm1, %v2186_v34, %v2264_v1  ;;  %11035 = vpow2.f32 %v3097_v13  ;;  %v16935_v1 = vld [vmem:[#allocation118_spill] sm:$0xff] }
 0x75f   : > { %v2275_v35 = vsel %vm1802_vm2, %v2265_v4, 0.0  ;;  %v2078_v19 = vpop.permute.xlu0 %2077  ;;  %v13006_v5 = vpop.eup %11031  ;;  %v3053_v15 = vsub.f32 %v16935_v1, %v12921_v50  ;;  %11037 = vpow2.f32 %v3101_v60  ;;  %v3105_v11 = vmul.f32 1.442695, %v3051_v18  ;;  %v16937_v50 = vld [vmem:[#allocation120_spill] sm:$0xff]  ;;  %v16938_v1 = vld [vmem:[#allocation121_spill] sm:$0xff] }
 0x760   : > { %2276 = vadd.xlane.f32.xlu1 %v2275_v35  ;;  %3239 = vperm.xlu0 %10919, %v12996_v3   ;;  %16933 = vst [vmem:[#allocation111_spill] sm:$0xff] %v13006_v5  ;;  %v3057_v13 = vsub.f32 %v16937_v50, %v12933_v57  ;;  %v3113_v51 = vmul.f32 1.442695, %v3055_v26  ;;  %v2203_v57 = vrot.slane %v2078_v19, %v11619_v23 }
 0x761   : > { %11039 = vpow2.f32 %v3105_v11  ;;  %v3109_v0 = vmul.f32 1.442695, %v3053_v15  ;;  %v2190_v26 = vrot.slane %v12991_v37, %v11610_v17 }
 0x762   : > { %v2075_v16 = vpop.permute.xlu1 %2074  ;;  %v3117_v11 = vmul.f32 1.442695, %v3057_v13  ;;  %v2194_v13 = vrot.slane %v12983_v55, %v11619_v23 }
 0x763   : > { %v2084_v43 = vpop.permute.xlu0 %2083  ;;  %11041 = vpow2.f32 %v3109_v0  ;;  %v2199_v54 = vrot.slane %v2075_v16, %v11610_v17 }
 0x764   : > { %3245 = vperm.xlu0 %10919, %v13001_v53   ;;  %11043 = vpow2.f32 %v3113_v51  ;;  %v2212_v16 = vrot.slane %v2084_v43, %v11619_v23 }
 0x765   : > { %v13013_v4 = vpop.eup %11033  ;;  %11045 = vpow2.f32 %v3117_v11 }
 0x766   : > { %v2081_v49 = vpop.permute.xlu1 %2080 }
 0x767   : > { %v2090_v38 = vpop.permute.xlu0 %2089  ;;  %v2208_v46 = vrot.slane %v2081_v49, %v11610_v17  ;;  %v2204_v49 = vsel %vm1642_vm9, %v2203_v57, %v2199_v54 }
 0x768   : > { %3251 = vperm.xlu0 %10919, %v13006_v5   ;;  %v13018_v27 = vpop.eup %11035  ;;  %v3059_v5 = vsub.f32 %v16938_v1, %v12942_v29  ;;  %v2221_v51 = vrot.slane %v2090_v38, %v11619_v23 }
 0x769   : > { %v13023_v60 = vpop.eup %11037  ;;  %v2213_v37 = vsel %vm1642_vm9, %v2212_v16, %v2208_v46 }
 0x76a   : > { %v2087_v30 = vpop.permute.xlu1 %2086  ;;  %v3121_v29 = vmul.f32 1.442695, %v3059_v5 }
 0x76b   : > { %v2096_v34 = vpop.permute.xlu0 %2095  ;;  %v2217_v0 = vrot.slane %v2087_v30, %v11610_v17  ;;  %v13034_v50 = vpop.eup %11039 }
 0x76c   : > { %v2230_v5 = vrot.slane %v2096_v34, %v11619_v23  ;;  %11047 = vpow2.f32 %v3121_v29 }
 0x76d   : > { %v2222_v55 = vsel %vm1642_vm9, %v2221_v51, %v2217_v0 }
 0x76e   : > { %v2093_v10 = vpop.permute.xlu1 %2092 }
 0x76f   : > { %v2102_v35 = vpop.permute.xlu0 %2101  ;;  %v2226_v1 = vrot.slane %v2093_v10, %v11610_v17  ;;  %v2195_v10 = vsel %vm1642_vm9, %v2194_v13, %v2190_v26 }
 0x770   : > { %v2239_v54 = vrot.slane %v2102_v35, %v11619_v23  ;;  %v2266_v57 = vsel %vm1779_vm10, %v2204_v49, %v2195_v10 }
 0x771   : > { %3206 = vperm.xlu1 %10920, %v13013_v4   ;;  %v2231_v11 = vsel %vm1642_vm9, %v2230_v5, %v2226_v1  ;;  %v2267_v34 = vsel %vm1781_vm11, %v2213_v37, %v2266_v57 }
 0x772   : > { %v2099_v39 = vpop.permute.xlu1 %2098 }
 0x773   : > { %v2108_v12 = vpop.permute.xlu0 %2107  ;;  %v2235_v19 = vrot.slane %v2099_v39, %v11610_v17  ;;  %v13051_v39 = vpop.eup %11041 }
 0x774   : > { %v2248_v46 = vrot.slane %v2108_v12, %v11619_v23  ;;  %v13064_v12 = vpop.eup %11043 }
 0x775   : > { %3212 = vperm.xlu1 %10920, %v13018_v27   ;;  %16939 = vst [vmem:[#allocation112_spill] sm:$0xff] %v13064_v12  ;;  %v13070_v37 = vpop.eup %11045 }
 0x776   : > { %v2105_v18 = vpop.permute.xlu1 %2104  ;;  %16940 = vst [vmem:[#allocation113_spill] sm:$0xff] %v13070_v37 }
 0x777   : > { %v2114_v15 = vpop.permute.xlu0 %2113  ;;  %v2244_v43 = vrot.slane %v2105_v18, %v11610_v17  ;;  %v2240_v18 = vsel %vm1642_vm9, %v2239_v54, %v2235_v19 }
 0x778   : > { %v2257_v26 = vrot.slane %v2114_v15, %v11619_v23 }
 0x779   : > { %3218 = vperm.xlu1 %10920, %v13023_v60   ;;  %v2249_v35 = vsel %vm1642_vm9, %v2248_v46, %v2244_v43 }
 0x77a   : > { %v2111_v53 = vpop.permute.xlu1 %2110 }
 0x77b   : > { %v3162_v3 = vpop.permute.xlu0 %3161  ;;  %v2253_v38 = vrot.slane %v2111_v53, %v11610_v17  ;;  %v2268_v53 = vsel %vm1783_vm12, %v2222_v55, %v2267_v34  ;;  %v13074_v55 = vpop.eup %11047 }
 0x77c   : > { %v2269_v13 = vsel %vm1785_vm13, %v2231_v11, %v2268_v53  ;;  %16941 = vst [vmem:[#allocation114_spill] sm:$0xff] %v13074_v55 }
 0x77d   : > { %3224 = vperm.xlu1 %10920, %v13034_v50   ;;  %v2258_v1 = vsel %vm1642_vm9, %v2257_v26, %v2253_v38  ;;  %v2270_v49 = vsel %vm1787_vm14, %v2240_v18, %v2269_v13 }
 0x77e   : > { %v3159_v30 = vpop.permute.xlu1 %3158  ;;  %v2271_v15 = vsel %vm1789_vm15, %v2249_v35, %v2270_v49 }
 0x77f   : > { %v3168_v16 = vpop.permute.xlu0 %3167  ;;  %v2272_v29 = vsel %vm1791_vm1, %v2258_v1, %v2271_v15  ;;  %v3256_v26 = vrot.slane %v3159_v30, %v11610_v17  ;;  %v3260_v1 = vrot.slane %v3162_v3, %v11619_v23 }
 0x780   : > { %v2278_v43 = vsel %vm1802_vm2, %v2272_v29, 0.0  ;;  %v3269_v18 = vrot.slane %v3168_v16, %v11619_v23 }
 0x781   : > { %3230 = vperm.xlu1 %10920, %v13051_v39  }
 0x782   : > { %v3165_v0 = vpop.permute.xlu1 %3164 }
 0x783   : > { %v3174_v51 = vpop.permute.xlu0 %3173  ;;  %v3265_v57 = vrot.slane %v3165_v0, %v11610_v17 }
 0x784   : > { %v3278_v35 = vrot.slane %v3174_v51, %v11619_v23 }
 0x785   : > { %3236 = vperm.xlu1 %10920, %v13064_v12   ;;  %v3270_v49 = vsel %vm1642_vm9, %v3269_v18, %v3265_v57 }
 0x786   : > { %v3171_v19 = vpop.permute.xlu1 %3170 }
 0x787   : > { %v3180_v5 = vpop.permute.xlu0 %3179  ;;  %2279 = vadd.xlane.f32.xlu0 %v2278_v43  ;;  %v3274_v46 = vrot.slane %v3171_v19, %v11610_v17  ;;  %v3261_v43 = vsel %vm1642_vm9, %v3260_v1, %v3256_v26 }
 0x788   : > { %v3287_v0 = vrot.slane %v3180_v5, %v11619_v23 }
 0x789   : > { %3242 = vperm.xlu1 %10920, %v13070_v37   ;;  %v3279_v29 = vsel %vm1642_vm9, %v3278_v35, %v3274_v46 }
 0x78a   : > { %v3177_v10 = vpop.permute.xlu1 %3176 }
 0x78b   : > { %v3186_v54 = vpop.permute.xlu0 %3185  ;;  %v3283_v53 = vrot.slane %v3177_v10, %v11610_v17 }
 0x78c   : > { %v3296_v16 = vrot.slane %v3186_v54, %v11619_v23 }
 0x78d   : > { %3248 = vperm.xlu1 %10920, %v13074_v55   ;;  %v3288_v51 = vsel %vm1642_vm9, %v3287_v0, %v3283_v53 }
 0x78e   : > { %v3183_v38 = vpop.permute.xlu1 %3182 }
 0x78f   : > { %v3192_v11 = vpop.permute.xlu0 %3191  ;;  %v3292_v13 = vrot.slane %v3183_v38, %v11610_v17  ;;  %v3397_v38 = vsel %vm1779_vm10, %v3270_v49, %v3261_v43 }
 0x790   : > { %v3305_v10 = vrot.slane %v3192_v11, %v11619_v23 }
 0x791   : > { %v3297_v5 = vsel %vm1642_vm9, %v3296_v16, %v3292_v13 }
 0x792   : > { %v3189_v34 = vpop.permute.xlu1 %3188 }
 0x793   : > { %v3198_v15 = vpop.permute.xlu0 %3197  ;;  %v3301_v19 = vrot.slane %v3189_v34, %v11610_v17  ;;  %v3398_v34 = vsel %vm1781_vm11, %v3279_v29, %v3397_v38 }
 0x794   : > { %v3314_v57 = vrot.slane %v3198_v15, %v11619_v23  ;;  %v3399_v18 = vsel %vm1783_vm12, %v3288_v51, %v3398_v34 }
 0x795   : > { %v3306_v46 = vsel %vm1642_vm9, %v3305_v10, %v3301_v19  ;;  %v3400_v11 = vsel %vm1785_vm13, %v3297_v5, %v3399_v18 }
 0x796   : > { %v3195_v30 = vpop.permute.xlu1 %3194  ;;  %v3401_v13 = vsel %vm1787_vm14, %v3306_v46, %v3400_v11 }
 0x797   : > { %v3310_v3 = vrot.slane %v3195_v30, %v11610_v17  ;;  %v3204_v54 = vpop.permute.xlu0 %3203 }
 0x798   : > { %v3323_v35 = vrot.slane %v3204_v54, %v11619_v23 }
 0x799   : > { %v3315_v26 = vsel %vm1642_vm9, %v3314_v57, %v3310_v3 }
 0x79a   : > { %v3201_v53 = vpop.permute.xlu1 %3200  ;;  %v3402_v0 = vsel %vm1789_vm15, %v3315_v26, %v3401_v13 }
 0x79b   : > { %v3319_v1 = vrot.slane %v3201_v53, %v11610_v17 }
 0x79d   : > { %v3324_v49 = vsel %vm1642_vm9, %v3323_v35, %v3319_v1 }
 0x79e   : > { %v3403_v15 = vsel %vm1791_vm1, %v3324_v49, %v3402_v0 }
 0x79f   : > { %v3413_v19 = vsel %vm1802_vm2, %v3403_v15, 0.0 }
 0x7a0   : > { %3414 = vadd.xlane.f32.xlu0 %v3413_v19 }
 0x7cb   : > { %v3210_v29 = vpop.permute.xlu0 %3209 }
 0x7cf   : > { %v3216_v16 = vpop.permute.xlu0 %3215 }
 0x7d0   : > { %v3341_v15 = vrot.slane %v3216_v16, %v11619_v23 }
 0x7d3   : > { %v3222_v30 = vpop.permute.xlu0 %3221 }
 0x7d7   : > { %v3228_v10 = vpop.permute.xlu0 %3227 }
 0x7db   : > { %v3234_v5 = vpop.permute.xlu0 %3233 }
 0x7df   : > { %v3240_v26 = vpop.permute.xlu0 %3239 }
 0x7e3   : > { %v3246_v49 = vpop.permute.xlu0 %3245 }
 0x7e4   : > { %v3386_v55 = vrot.slane %v3246_v49, %v11619_v23 }
 0x7e7   : > { %v3252_v12 = vpop.permute.xlu0 %3251 }
 0x7ed   : > { %v2277_v43 = vpop.xlane.xlu1 %2276 }
 0x7ee   : > { %11049 = vrcp.f32 %v2277_v43 }
 0x7f1   : > { %v3207_v51 = vpop.permute.xlu1 %3206 }
 0x7f2   : > { %v3328_v19 = vrot.slane %v3207_v51, %v11610_v17 }
 0x7f5   : > { %v3213_v3 = vpop.permute.xlu1 %3212 }
 0x7f6   : > { %v3337_v13 = vrot.slane %v3213_v3, %v11610_v17 }
 0x7f8   : > { %v13109_v38 = vpop.eup %11049  ;;  %v3342_v16 = vsel %vm1642_vm9, %v3341_v15, %v3337_v13 }
 0x7f9   : > { %v3219_v57 = vpop.permute.xlu1 %3218  ;;  %v13113_v34 = vrot.slane %v13109_v38, %v16860_v56  ;;  %v13119_v54 = vrot.slane %v13109_v38, %v16861_v36  ;;  %v13125_v11 = vrot.slane %v13109_v38, %v16863_v9  ;;  %v13144_v3 = vrot.slane %v13109_v38, %v16867_v45 }
 0x7fa   : > { %v3346_v0 = vrot.slane %v3219_v57, %v11610_v17  ;;  %v3332_v57 = vrot.slane %v3210_v29, %v11619_v23 }
 0x7fb   : > { %v2365_v46 = vmul.f32 %v12674_v31, %v13113_v34  ;;  %v2368_v53 = vmul.f32 %v12686_v47, %v13119_v54  ;;  %v2370_v1 = vmul.f32 %v12694_v52, %v13125_v11  ;;  %v13131_v31 = vrot.slane %v13109_v38, %v16865_v6 }
 0x7fc   : > { %v3333_v37 = vsel %vm1642_vm9, %v3332_v57, %v3328_v19  ;;  %v2312_v57 = vrot.slane %v13109_v38, %v16871_v20 }
 0x7fd   : > { %3537 = vperm.xlu0 %10919, %v2365_v46   ;;  %v3225_v18 = vpop.permute.xlu1 %3224  ;;  %v3350_v46 = vrot.slane %v3222_v30, %v11619_v23  ;;  %v3377_v30 = vrot.slane %v3240_v26, %v11619_v23  ;;  %v3404_v13 = vsel %vm1779_vm10, %v3342_v16, %v3333_v37  ;;  %v2308_v26 = vrot.slane %v13109_v38, %v16869_v48 }
 0x7fe   : > { %v3355_v43 = vrot.slane %v3225_v18, %v11610_v17  ;;  %v3368_v18 = vrot.slane %v3234_v5, %v11619_v23  ;;  %v2374_v5 = vmul.f32 %v12705_v44, %v13144_v3  ;;  %v3395_v37 = vrot.slane %v3252_v12, %v11619_v23 }
 0x7ff   : > { %v2376_v44 = vmul.f32 %v12712_v41, %v2308_v26  ;;  %v2316_v41 = vrot.slane %v13109_v38, %v16875_v22 }
 0x801   : > { %3552 = vperm.xlu0 %10919, %v2368_v53   ;;  %v3231_v35 = vpop.permute.xlu1 %3230  ;;  %v2372_v53 = vmul.f32 %v12700_v58, %v13131_v31 }
 0x802   : > { %v3364_v52 = vrot.slane %v3231_v35, %v11610_v17  ;;  %v3351_v35 = vsel %vm1642_vm9, %v3350_v46, %v3346_v0 }
 0x803   : > { %v3405_v0 = vsel %vm1781_vm11, %v3351_v35, %v3404_v13  ;;  %v16942_v13 = vld [vmem:[#allocation86_spill] sm:$0xff] }
 0x804   : > { %v2367_v38 = vmul.f32 %v16942_v13, %v13119_v54  ;;  %v16954_v13 = vld [vmem:[#allocation103_spill] sm:$0xff] }
 0x805   : > { %3562 = vperm.xlu0 %10919, %v2370_v1   ;;  %v3237_v47 = vpop.permute.xlu1 %3236  ;;  %v3359_v1 = vrot.slane %v3228_v10, %v11619_v23 }
 0x806   : > { %v3373_v51 = vrot.slane %v3237_v47, %v11610_v17  ;;  %v3369_v47 = vsel %vm1642_vm9, %v3368_v18, %v3364_v52 }
 0x807   : > { %v3360_v29 = vsel %vm1642_vm9, %v3359_v1, %v3355_v43 }
 0x808   : > { %v3378_v49 = vsel %vm1642_vm9, %v3377_v30, %v3373_v51  ;;  %v3406_v15 = vsel %vm1783_vm12, %v3360_v29, %v3405_v0  ;;  %v2378_v51 = vmul.f32 %v12719_v63, %v2312_v57  ;;  %v2380_v30 = vmul.f32 %v12726_v24, %v2316_v41 }
 0x809   : > { %3572 = vperm.xlu0 %10919, %v2372_v53   ;;  %v3243_v58 = vpop.permute.xlu1 %3242  ;;  %v3407_v46 = vsel %vm1785_vm13, %v3369_v47, %v3406_v15 }
 0x80a   : > { %v3382_v10 = vrot.slane %v3243_v58, %v11610_v17  ;;  %v3408_v53 = vsel %vm1787_vm14, %v3378_v49, %v3407_v46  ;;  %v2366_v58 = vmul.f32 %v12710_v2, %v13113_v34  ;;  %v16944_v34 = vld [vmem:[#allocation88_spill] sm:$0xff]  ;;  %v2377_v46 = vmul.f32 %v12750_v32, %v2312_v57 }
 0x80b   : > { %v2371_v49 = vmul.f32 %v16944_v34, %v13131_v31  ;;  %v16948_v32 = vld [vmem:[#allocation96_spill] sm:$0xff]  ;;  %v16957_v34 = vld [vmem:[#allocation90_spill] sm:$0xff] }
 0x80c   : > { %v3387_v19 = vsel %vm1642_vm9, %v3386_v55, %v3382_v10 }
 0x80d   : > { %3582 = vperm.xlu0 %10919, %v2374_v5   ;;  %v3249_v43 = vpop.permute.xlu1 %3248  ;;  %v3409_v16 = vsel %vm1789_vm15, %v3387_v19, %v3408_v53  ;;  %v16943_v5 = vld [vmem:[#allocation87_spill] sm:$0xff] }
 0x80e   : > { %v3391_v52 = vrot.slane %v3249_v43, %v11610_v17  ;;  %v2369_v0 = vmul.f32 %v16943_v5, %v13125_v11  ;;  %v16945_v19 = vld [vmem:[#allocation91_spill] sm:$0xff] }
 0x80f   : > { %v2373_v43 = vmul.f32 %v16945_v19, %v13144_v3  ;;  %v16959_v19 = vld [vmem:[#allocation99_spill] sm:$0xff] }
 0x810   : > { %v3396_v1 = vsel %vm1642_vm9, %v3395_v37, %v3391_v52  ;;  %v2375_v37 = vmul.f32 %v12744_v21, %v2308_v26  ;;  %v16946_v21 = vld [vmem:[#allocation92_spill] sm:$0xff] }
 0x811   : > { %3592 = vperm.xlu0 %10919, %v2376_v44   ;;  %v3410_v55 = vsel %vm1791_vm1, %v3396_v1, %v3409_v16 }
 0x812   : > { %v3416_v12 = vsel %vm1802_vm2, %v3410_v55, 0.0 }
 0x813   : > { %3417 = vadd.xlane.f32.xlu1 %v3416_v12  ;;  %v16950_v12 = vld [vmem:[#allocation100_spill] sm:$0xff] }
 0x814   : > { %v2280_v18 = vpop.xlane.xlu0 %2279 }
 0x815   : > { %3602 = vperm.xlu0 %10919, %v2378_v51   ;;  %11051 = vrcp.f32 %v2280_v18 }
 0x819   : > { %3612 = vperm.xlu0 %10919, %v2380_v30   ;;  %v16952_v30 = vld [vmem:[#allocation102_spill] sm:$0xff] }
 0x81f   : > { %v11052_v35 = vpop.eup %11051 }
 0x820   : > { %v2320_v29 = vrot.slane %v11052_v35, %v16860_v56  ;;  %v2324_v63 = vrot.slane %v11052_v35, %v16861_v36  ;;  %v2328_v47 = vrot.slane %v11052_v35, %v16863_v9  ;;  %v2340_v11 = vrot.slane %v11052_v35, %v16869_v48 }
 0x821   : > { %v2348_v52 = vrot.slane %v11052_v35, %v16875_v22 }
 0x822   : > { %v2382_v10 = vmul.f32 %v12764_v62, %v2320_v29  ;;  %v2384_v24 = vmul.f32 %v12773_v61, %v2324_v63  ;;  %v2386_v2 = vmul.f32 %v12782_v14, %v2328_v47  ;;  %v2332_v62 = vrot.slane %v11052_v35, %v16865_v6 }
 0x823   : > { %v2336_v61 = vrot.slane %v11052_v35, %v16867_v45  ;;  %v2392_v31 = vmul.f32 %v12812_v59, %v2340_v11  ;;  %v2396_v26 = vmul.f32 %v16946_v21, %v2348_v52  ;;  %v16947_v59 = vld [vmem:[#allocation93_spill] sm:$0xff] }
 0x824   : > { %3542 = vperm.xlu1 %10920, %v2366_v58   ;;  %3622 = vperm.xlu0 %10919, %v2382_v10   ;;  %v2388_v15 = vmul.f32 %v12788_v7, %v2332_v62  ;;  %v2344_v7 = vrot.slane %v11052_v35, %v16871_v20  ;;  %v2381_v1 = vmul.f32 %v16947_v59, %v2320_v29  ;;  %v16953_v29 = vld [vmem:[#allocation89_spill] sm:$0xff] }
 0x825   : > { %v2390_v14 = vmul.f32 %v12802_v42, %v2336_v61  ;;  %v2379_v42 = vmul.f32 %v12756_v8, %v2316_v41  ;;  %v16951_v41 = vld [vmem:[#allocation95_spill] sm:$0xff]  ;;  %v2387_v10 = vmul.f32 %v16953_v29, %v2332_v62 }
 0x826   : > { %v2394_v3 = vmul.f32 %v12822_v40, %v2344_v7  ;;  %v16949_v40 = vld [vmem:[#allocation85_spill] sm:$0xff]  ;;  %v2385_v18 = vmul.f32 %v16951_v41, %v2328_v47  ;;  %v16970_v41 = vld [vmem:[#allocation124_spill] sm:$0xff]  ;;  %v4065_v29 = vld [vmem:[%s16389_s4 + $0x8] sm:$0xff] }
 0x827   : > { %v2383_v55 = vmul.f32 %v16949_v40, %v2324_v63 }
 0x828   : > { %3547 = vperm.xlu1 %10920, %v2367_v38   ;;  %3632 = vperm.xlu0 %10919, %v2384_v24   ;;  %v16955_v24 = vld [vmem:[#allocation97_spill] sm:$0xff] }
 0x829   : > { %v2389_v5 = vmul.f32 %v16955_v24, %v2336_v61 }
 0x82c   : > { %3557 = vperm.xlu1 %10920, %v2369_v0   ;;  %3642 = vperm.xlu0 %10919, %v2386_v2   ;;  %v16956_v0 = vld [vmem:[#allocation107_spill] sm:$0xff] }
 0x82d   : > { %v3415_v54 = vpop.xlane.xlu0 %3414 }
 0x82e   : > { %11053 = vrcp.f32 %v3415_v54  ;;  %v16958_v54 = vld [vmem:[#allocation108_spill] sm:$0xff] }
 0x830   : > { %3567 = vperm.xlu1 %10920, %v2371_v49   ;;  %3652 = vperm.xlu0 %10919, %v2388_v15   ;;  %v2391_v49 = vmul.f32 %v16957_v34, %v2340_v11 }
 0x834   : > { %3577 = vperm.xlu1 %10920, %v2373_v43   ;;  %3662 = vperm.xlu0 %10919, %v2390_v14   ;;  %v2393_v43 = vmul.f32 %v16959_v19, %v2344_v7  ;;  %v16960_v14 = vld [vmem:[#allocation110_spill] sm:$0xff]  ;;  %v16965_v7 = vld [vmem:[#allocation105_spill] sm:$0xff] }
 0x838   : > { %3587 = vperm.xlu1 %10920, %v2375_v37   ;;  %3672 = vperm.xlu0 %10919, %v2392_v31   ;;  %v11054_v44 = vpop.eup %11053  ;;  %v16961_v31 = vld [vmem:[#allocation94_spill] sm:$0xff] }
 0x839   : > { %v3426_v53 = vrot.slane %v11054_v44, %v16860_v56  ;;  %v3430_v16 = vrot.slane %v11054_v44, %v16861_v36  ;;  %v3434_v51 = vrot.slane %v11054_v44, %v16863_v9  ;;  %v3438_v58 = vrot.slane %v11054_v44, %v16865_v6 }
 0x83a   : > { %v3442_v38 = vrot.slane %v11054_v44, %v16867_v45  ;;  %v3446_v2 = vrot.slane %v11054_v44, %v16869_v48  ;;  %v3450_v15 = vrot.slane %v11054_v44, %v16871_v20  ;;  %v3454_v37 = vrot.slane %v11054_v44, %v16875_v22  ;;  %v16967_v44 = vld [vmem:[#allocation106_spill] sm:$0xff] }
 0x83b   : > { %v3504_v57 = vmul.f32 %v16948_v32, %v3426_v53  ;;  %v3506_v8 = vmul.f32 %v16950_v12, %v3430_v16  ;;  %v3508_v35 = vmul.f32 %v16952_v30, %v3434_v51  ;;  %v3510_v63 = vmul.f32 %v16954_v13, %v3438_v58  ;;  %v16966_v32 = vld [vmem:[#allocation104_spill] sm:$0xff]  ;;  %v16969_v12 = vld [vmem:[#allocation122_spill] sm:$0xff] }
 0x83c   : > { %3597 = vperm.xlu1 %10920, %v2377_v46   ;;  %3682 = vperm.xlu0 %10919, %v2394_v3   ;;  %v3512_v47 = vmul.f32 %v16956_v0, %v3442_v38  ;;  %v3514_v62 = vmul.f32 %v16958_v54, %v3446_v2  ;;  %v3516_v61 = vmul.f32 %v16960_v14, %v3450_v15  ;;  %v16962_v3 = vld [vmem:[#allocation123_spill] sm:$0xff]  ;;  %v16971_v14 = vld [vmem:[#allocation125_spill] sm:$0xff] }
 0x83d   : > { %v2395_v46 = vmul.f32 %v16961_v31, %v2348_v52  ;;  %v3518_v11 = vmul.f32 %v16962_v3, %v3454_v37  ;;  %v3511_v40 = vmul.f32 %v16967_v44, %v3442_v38  ;;  %v16968_v52 = vld [vmem:[#allocation109_spill] sm:$0xff] }
 0x840   : > { %3607 = vperm.xlu1 %10920, %v2379_v42   ;;  %3692 = vperm.xlu0 %10919, %v2396_v26   ;;  %v16963_v42 = vld [vmem:[#allocation98_spill] sm:$0xff]  ;;  %v16964_v26 = vld [vmem:[#allocation101_spill] sm:$0xff] }
 0x841   : > { %v3503_v21 = vmul.f32 %v16963_v42, %v3426_v53  ;;  %v3505_v59 = vmul.f32 %v16964_v26, %v3430_v16  ;;  %v3517_v16 = vmul.f32 %v16970_v41, %v3454_v37  ;;  %v16974_v41 = vld [vmem:[#allocation112_spill] sm:$0xff] }
 0x844   : > { %3617 = vperm.xlu1 %10920, %v2381_v1   ;;  %3702 = vperm.xlu0 %10919, %v3504_v57   ;;  %v3507_v1 = vmul.f32 %v16965_v7, %v3434_v51  ;;  %v3509_v57 = vmul.f32 %v16966_v32, %v3438_v58  ;;  %v4064_v58 = vld [vmem:[%s16389_s4] sm:$0xff] }
 0x845   : > { %v10746_v13 = vpack.c.bf16 %v4065_v29, %v4064_v58 }
 0x847   : > { %10747 = vmatprep.subr.bf16.mxu1 %v10746_v13 }
 0x848   : > { %3627 = vperm.xlu1 %10920, %v2383_v55   ;;  %3712 = vperm.xlu0 %10919, %v3506_v8   ;;  %v3513_v55 = vmul.f32 %v16968_v52, %v3446_v2  ;;  %v3515_v8 = vmul.f32 %v16969_v12, %v3450_v15 }
 0x849   : > { %10749 = vmatpush3.bf16.msra.mxu1 %v10746_v13  ;;  %v16976_v13 = vld [vmem:[#allocation113_spill] sm:$0xff] }
 0x84c   : > { %3637 = vperm.xlu1 %10920, %v2385_v18   ;;  %3722 = vperm.xlu0 %10919, %v3508_v35  }
 0x850   : > { %3647 = vperm.xlu1 %10920, %v2387_v10   ;;  %3732 = vperm.xlu0 %10919, %v3510_v63   ;;  %v4066_v10 = vld [vmem:[%s16389_s4 + $0x10] sm:$0xff]  ;;  %v4067_v63 = vld [vmem:[%s16389_s4 + $0x18] sm:$0xff] }
 0x851   : > { %v10750_v24 = vpack.c.bf16 %v4067_v63, %v4066_v10 }
 0x853   : > { %10751 = vmatprep.subr.bf16.mxu1 %v10750_v24 }
 0x854   : > { %3657 = vperm.xlu1 %10920, %v2389_v5   ;;  %3742 = vperm.xlu0 %10919, %v3512_v47  }
 0x855   : > { %10753 = vmatpush3.bf16.msra.mxu1 %v10750_v24 }
 0x858   : > { %3667 = vperm.xlu1 %10920, %v2391_v49   ;;  %3752 = vperm.xlu0 %10919, %v3514_v62  }
 0x85c   : > { %3677 = vperm.xlu1 %10920, %v2393_v43   ;;  %3762 = vperm.xlu0 %10919, %v3516_v61  }
 0x860   : > { %3687 = vperm.xlu1 %10920, %v2395_v46   ;;  %3772 = vperm.xlu0 %10919, %v3518_v11   ;;  %v16972_v11 = vld [vmem:[#allocation115_spill] sm:$0xff] }
 0x864   : > { %3697 = vperm.xlu1 %10920, %v3503_v21  }
 0x868   : > { %3707 = vperm.xlu1 %10920, %v3505_v59  }
 0x86c   : > { %3717 = vperm.xlu1 %10920, %v3507_v1  }
 0x870   : > { %3727 = vperm.xlu1 %10920, %v3509_v57  }
 0x874   : > { %3737 = vperm.xlu1 %10920, %v3511_v40  }
 0x878   : > { %3747 = vperm.xlu1 %10920, %v3513_v55  }
 0x87c   : > { %v13242_v53 = vpop.permute.xlu0 %3537  ;;  %3757 = vperm.xlu1 %10920, %v3515_v8  }
 0x880   : > { %v13245_v18 = vpop.permute.xlu0 %3552  ;;  %3767 = vperm.xlu1 %10920, %v3517_v16  }
 0x884   : > { %v13247_v51 = vpop.permute.xlu0 %3562 }
 0x888   : > { %v13249_v30 = vpop.permute.xlu0 %3572 }
 0x88c   : > { %v13251_v35 = vpop.permute.xlu0 %3582 }
 0x890   : > { %v13265_v38 = vpop.permute.xlu0 %3592 }
 0x894   : > { %v13267_v5 = vpop.permute.xlu0 %3602 }
 0x898   : > { %v13269_v47 = vpop.permute.xlu0 %3612 }
 0x8a0   : > { %v3418_v0 = vpop.xlane.xlu1 %3417 }
 0x8a1   : > { %11055 = vrcp.f32 %v3418_v0 }
 0x8a3   : > { %v13273_v34 = vpop.permute.xlu0 %3622 }
 0x8a4   : > { %v13271_v2 = vpop.permute.xlu1 %3542 }
 0x8a7   : > { %v13277_v54 = vpop.permute.xlu0 %3632 }
 0x8a8   : > { %v13275_v49 = vpop.permute.xlu1 %3547 }
 0x8ab   : > { %v11056_v62 = vpop.eup %11055  ;;  %v13282_v43 = vpop.permute.xlu0 %3642 }
 0x8ac   : > { %v13279_v15 = vpop.permute.xlu1 %3557  ;;  %v3458_v19 = vrot.slane %v11056_v62, %v16860_v56  ;;  %v3462_v31 = vrot.slane %v11056_v62, %v16861_v36  ;;  %v3466_v26 = vrot.slane %v11056_v62, %v16863_v9  ;;  %v3470_v1 = vrot.slane %v11056_v62, %v16865_v6 }
 0x8ad   : > { %v3474_v40 = vrot.slane %v11056_v62, %v16867_v45  ;;  %v3478_v12 = vrot.slane %v11056_v62, %v16869_v48  ;;  %v3482_v58 = vrot.slane %v11056_v62, %v16871_v20  ;;  %v3486_v24 = vrot.slane %v11056_v62, %v16875_v22  ;;  %v4069_v62 = vld [vmem:[%s16389_s4 + $0x28] sm:$0xff] }
 0x8ae   : > { %v3520_v61 = vmul.f32 %v16971_v14, %v3458_v19  ;;  %v3519_v37 = vmul.f32 %v13013_v4, %v3458_v19  ;;  %v3522_v42 = vmul.f32 %v16972_v11, %v3462_v31  ;;  %v3521_v21 = vmul.f32 %v13018_v27, %v3462_v31  ;;  %v16977_v14 = vld [vmem:[#allocation111_spill] sm:$0xff] }
 0x8af   : > { %v13289_v3 = vpop.permute.xlu0 %3652  ;;  %v3524_v4 = vmul.f32 %v12958_v25, %v3466_v26  ;;  %v3523_v7 = vmul.f32 %v13023_v60, %v3466_v26  ;;  %v3526_v27 = vmul.f32 %v12974_v33, %v3470_v1  ;;  %v3525_v44 = vmul.f32 %v13034_v50, %v3470_v1  ;;  %v16973_v33 = vld [vmem:[#allocation116_spill] sm:$0xff] }
 0x8b0   : > { %3782 = vperm.xlu0 %10919, %v3520_v61   ;;  %3777 = vperm.xlu1 %10920, %v3519_v37   ;;  %v13287_v46 = vpop.permute.xlu1 %3567  ;;  %v3528_v60 = vmul.f32 %v12987_v28, %v3474_v40  ;;  %v3527_v55 = vmul.f32 %v13051_v39, %v3474_v40  ;;  %v3530_v50 = vmul.f32 %v16973_v33, %v3478_v12  ;;  %v16975_v28 = vld [vmem:[#allocation117_spill] sm:$0xff]  ;;  %v16978_v37 = vld [vmem:[#allocation114_spill] sm:$0xff] }
 0x8b1   : > { %v3529_v16 = vmul.f32 %v16974_v41, %v3478_v12  ;;  %v3532_v39 = vmul.f32 %v16975_v28, %v3482_v58  ;;  %v3531_v63 = vmul.f32 %v16976_v13, %v3482_v58  ;;  %v3534_v61 = vmul.f32 %v16977_v14, %v3486_v24 }
 0x8b2   : > { %v3533_v31 = vmul.f32 %v16978_v37, %v3486_v24  ;;  %v16981_v37 = vld [vmem:[#allocation23_spill] sm:$0xff] }
 0x8b3   : > { %v13299_v32 = vpop.permute.xlu0 %3662 }
 0x8b4   : > { %3792 = vperm.xlu0 %10919, %v3522_v42   ;;  %3787 = vperm.xlu1 %10920, %v3521_v21   ;;  %v13294_v59 = vpop.permute.xlu1 %3577  ;;  %v4068_v21 = vld [vmem:[%s16389_s4 + $0x20] sm:$0xff] }
 0x8b7   : > { %v13308_v25 = vpop.permute.xlu0 %3672 }
 0x8b8   : > { %3802 = vperm.xlu0 %10919, %v3524_v4   ;;  %3797 = vperm.xlu1 %10920, %v3523_v7   ;;  %v13301_v57 = vpop.permute.xlu1 %3587  ;;  %v10754_v4 = vpack.c.bf16 %v4069_v62, %v4068_v21 }
 0x8ba   : > { %10755 = vmatprep.subr.bf16.mxu1 %v10754_v4 }
 0x8bb   : > { %v13318_v29 = vpop.permute.xlu0 %3682  ;;  %10757 = vmatpush3.bf16.msra.mxu1 %v10754_v4  ;;  %v16982_v4 = vld [vmem:[#allocation24_spill] sm:$0xff] }
 0x8bc   : > { %3812 = vperm.xlu0 %10919, %v3526_v27   ;;  %3807 = vperm.xlu1 %10920, %v3525_v44   ;;  %v13306_v52 = vpop.permute.xlu1 %3597 }
 0x8bf   : > { %v13327_v19 = vpop.permute.xlu0 %3692 }
 0x8c0   : > { %3822 = vperm.xlu0 %10919, %v3528_v60   ;;  %3817 = vperm.xlu1 %10920, %v3527_v55   ;;  %v13313_v8 = vpop.permute.xlu1 %3607  ;;  %v4070_v60 = vld [vmem:[%s16389_s4 + $0x30] sm:$0xff]  ;;  %v4071_v55 = vld [vmem:[%s16389_s4 + $0x38] sm:$0xff] }
 0x8c1   : > { %v10758_v12 = vpack.c.bf16 %v4071_v55, %v4070_v60  ;;  %v16983_v55 = vld [vmem:[#allocation25_spill] sm:$0xff] }
 0x8c3   : > { %v3703_v42 = vpop.permute.xlu0 %3702  ;;  %10759 = vmatprep.subr.bf16.mxu1 %v10758_v12 }
 0x8c4   : > { %3832 = vperm.xlu0 %10919, %v3530_v50   ;;  %3827 = vperm.xlu1 %10920, %v3529_v16   ;;  %v13320_v10 = vpop.permute.xlu1 %3617  ;;  %v3856_v50 = vsel %vm548_vm0, %v13271_v2, %v3703_v42  ;;  %v16979_v16 = vld [vmem:[#allocation21_spill] sm:$0xff] }
 0x8c5   : > { %10761 = vmatpush3.bf16.msra.mxu1 %v10758_v12  ;;  %v3888_v58 = vmul.f32 %v16979_v16, %v3856_v50 }
 0x8c7   : > { %v3713_v1 = vpop.permute.xlu0 %3712 }
 0x8c8   : > { %3842 = vperm.xlu0 %10919, %v3532_v39   ;;  %3837 = vperm.xlu1 %10920, %v3531_v63   ;;  %v13325_v0 = vpop.permute.xlu1 %3627  ;;  %v3858_v39 = vsel %vm548_vm0, %v13245_v18, %v3713_v1  ;;  %v16980_v63 = vld [vmem:[#allocation22_spill] sm:$0xff] }
 0x8cb   : > { %v3723_v44 = vpop.permute.xlu0 %3722 }
 0x8cc   : > { %3852 = vperm.xlu0 %10919, %v3534_v61   ;;  %3847 = vperm.xlu1 %10920, %v3533_v31   ;;  %v13331_v11 = vpop.permute.xlu1 %3637  ;;  %v3921_v61 = vsel %vm3919_vm3, %v3888_v58, 0.0  ;;  %v3890_v31 = vmul.f32 %v16981_v37, %v3858_v39  ;;  %v3860_v21 = vsel %vm548_vm0, %v13247_v51, %v3723_v44  ;;  %v16985_v37 = vld [vmem:[#allocation27_spill] sm:$0xff] }
 0x8cd   : > { %v3892_v12 = vmul.f32 %v16983_v55, %v3860_v21 }
 0x8ce   : > { %v3930_v60 = vsel %vm3919_vm3, %v3890_v31, 0.0 }
 0x8cf   : > { %v3733_v41 = vpop.permute.xlu0 %3732 }
 0x8d0   : > { %v13339_v26 = vpop.permute.xlu1 %3647  ;;  %v3862_v58 = vsel %vm548_vm0, %v13249_v30, %v3733_v41 }
 0x8d1   : > { %v3894_v31 = vmul.f32 %v16985_v37, %v3862_v58 }
 0x8d3   : > { %v3743_v14 = vpop.permute.xlu0 %3742  ;;  %v3948_v55 = vsel %vm3919_vm3, %v3894_v31, 0.0 }
 0x8d4   : > { %v13341_v7 = vpop.permute.xlu1 %3657 }
 0x8d8   : > { %v13343_v27 = vpop.permute.xlu1 %3667 }
 0x8dc   : > { %v13345_v40 = vpop.permute.xlu1 %3677 }
 0x8e0   : > { %v13353_v33 = vpop.permute.xlu1 %3687 }
 0x8e4   : > { %v3698_v28 = vpop.permute.xlu1 %3697 }
 0x8e5   : > { %v3855_v13 = vsel %vm548_vm0, %v13242_v53, %v3698_v28  ;;  %v3753_v28 = vpop.permute.xlu0 %3752 }
 0x8e6   : > { %v3887_v24 = vmul.f32 %v3855_v13, %v16980_v63  ;;  %v3866_v58 = vsel %vm548_vm0, %v13265_v38, %v3753_v28 }
 0x8e8   : > { %v3920_v2 = vsel %vm3919_vm3, %v3887_v24, 0.0  ;;  %v3708_v42 = vpop.permute.xlu1 %3707 }
 0x8e9   : > { %v3922_v62 = vadd.f32 %v3921_v61, %v3920_v2  ;;  %v3857_v18 = vsel %vm548_vm0, %v13275_v49, %v3708_v42  ;;  %v16984_v49 = vld [vmem:[#allocation26_spill] sm:$0xff]  ;;  %v3939_v61 = vsel %vm3919_vm3, %v3892_v12, 0.0  ;;  %v3864_v2 = vsel %vm548_vm0, %v13251_v35, %v3743_v14  ;;  %v16987_v12 = vld [vmem:[#allocation29_spill] sm:$0xff] }
 0x8ea   : > { %v3889_v1 = vmul.f32 %v3857_v18, %v16982_v4  ;;  %v16986_v18 = vld [vmem:[#allocation28_spill] sm:$0xff] }
 0x8eb   : > { %v3923_v53 = vrot.slane %v3922_v62, 4 }
 0x8ec   : > { %v3929_v50 = vsel %vm3919_vm3, %v3889_v1, 0.0  ;;  %v3718_v16 = vpop.permute.xlu1 %3717  ;;  %v3763_v1 = vpop.permute.xlu0 %3762 }
 0x8ed   : > { %v3924_v39 = vadd.f32 %v3923_v53, %v3922_v62  ;;  %v3931_v51 = vadd.f32 %v3930_v60, %v3929_v50  ;;  %v3859_v44 = vsel %vm548_vm0, %v13279_v15, %v3718_v16  ;;  %v3896_v50 = vmul.f32 %v16987_v12, %v3864_v2  ;;  %v16989_v2 = vld [vmem:[#allocation31_spill] sm:$0xff]  ;;  %v16991_v12 = vld [vmem:[#allocation32_spill] sm:$0xff] }
 0x8ee   : > { %v3891_v13 = vmul.f32 %v3859_v44, %v16984_v49 }
 0x8ef   : > { %v3925_v63 = vrot.slane %v3924_v39, 2  ;;  %v3932_v24 = vrot.slane %v3931_v51, 4  ;;  %v3957_v31 = vsel %vm3919_vm3, %v3896_v50, 0.0 }
 0x8f0   : > { %v3938_v42 = vsel %vm3919_vm3, %v3891_v13, 0.0  ;;  %v3728_v30 = vpop.permute.xlu1 %3727  ;;  %v3773_v28 = vpop.permute.xlu0 %3772 }
 0x8f1   : > { %v3926_v41 = vadd.f32 %v3925_v63, %v3924_v39  ;;  %v3933_v21 = vadd.f32 %v3932_v24, %v3931_v51  ;;  %v3940_v62 = vadd.f32 %v3939_v61, %v3938_v42  ;;  %v3861_v15 = vsel %vm548_vm0, %v13287_v46, %v3728_v30  ;;  %v16988_v61 = vld [vmem:[#allocation30_spill] sm:$0xff] }
 0x8f2   : > { %v3893_v4 = vmul.f32 %v3861_v15, %v16986_v18  ;;  %v3868_v46 = vsel %vm548_vm0, %v13267_v5, %v3763_v1  ;;  %v3898_v42 = vmul.f32 %v16989_v2, %v3866_v58  ;;  %v16990_v18 = vld [vmem:[#allocation33_spill] sm:$0xff] }
 0x8f3   : > { %v3934_v53 = vrot.slane %v3933_v21, 2  ;;  %v3941_v60 = vrot.slane %v3940_v62, 4  ;;  %v3927_v16 = vrot.slane %v3926_v41, 1 }
 0x8f4   : > { %v3947_v35 = vsel %vm3919_vm3, %v3893_v4, 0.0  ;;  %v3738_v14 = vpop.permute.xlu1 %3737  ;;  %v3900_v4 = vmul.f32 %v16990_v18, %v3868_v46 }
 0x8f5   : > { %v3935_v39 = vadd.f32 %v3934_v53, %v3933_v21  ;;  %v3942_v51 = vadd.f32 %v3941_v60, %v3940_v62  ;;  %v3949_v44 = vadd.f32 %v3948_v55, %v3947_v35  ;;  %v3863_v49 = vsel %vm548_vm0, %v13294_v59, %v3738_v14 }
 0x8f6   : > { %v3895_v37 = vmul.f32 %v3863_v49, %v16988_v61  ;;  %v3928_v30 = vadd.f32 %v3927_v16, %v3926_v41  ;;  %v3966_v41 = vsel %vm3919_vm3, %v3898_v42, 0.0  ;;  %v3870_v16 = vsel %vm548_vm0, %v13269_v47, %v3773_v28  ;;  %v16992_v49 = vld [vmem:[#allocation34_spill] sm:$0xff] }
 0x8f7   : > { %v3936_v13 = vrot.slane %v3935_v39, 1  ;;  %v3943_v63 = vrot.slane %v3942_v51, 2  ;;  %v3950_v24 = vrot.slane %v3949_v44, 4 }
 0x8f8   : > { %v3748_v38 = vpop.permute.xlu1 %3747  ;;  %v3956_v5 = vsel %vm3919_vm3, %v3895_v37, 0.0  ;;  %v16993_v37 = vld [vmem:[#allocation35_spill] sm:$0xff] }
 0x8f9   : > { %v3937_v21 = vadd.f32 %v3936_v13, %v3935_v39  ;;  %v3944_v62 = vadd.f32 %v3943_v63, %v3942_v51  ;;  %v3951_v15 = vadd.f32 %v3950_v24, %v3949_v44  ;;  %v3958_v59 = vadd.f32 %v3957_v31, %v3956_v5 }
 0x8fa   : > { %v3865_v1 = vsel %vm548_vm0, %v13301_v57, %v3748_v38  ;;  %v3975_v63 = vsel %vm3919_vm3, %v3900_v4, 0.0  ;;  %v3902_v47 = vmul.f32 %v16993_v37, %v3870_v16 }
 0x8fb   : > { %v4095_v53 = vsel %vm1779_vm10, %v3937_v21, %v3928_v30  ;;  %v3945_v60 = vrot.slane %v3944_v62, 1  ;;  %v3952_v55 = vrot.slane %v3951_v15, 2  ;;  %v3897_v50 = vmul.f32 %v3865_v1, %v16991_v12 }
 0x8fc   : > { %v3959_v35 = vrot.slane %v3958_v59, 4  ;;  %v3758_v14 = vpop.permute.xlu1 %3757 }
 0x8fd   : > { %v3946_v58 = vadd.f32 %v3945_v60, %v3944_v62  ;;  %v3953_v39 = vadd.f32 %v3952_v55, %v3951_v15  ;;  %v3965_v51 = vsel %vm3919_vm3, %v3897_v50, 0.0  ;;  %v3867_v57 = vsel %vm548_vm0, %v13306_v52, %v3758_v14  ;;  %v16994_v15 = vld [vmem:[#allocation36_spill] sm:$0xff] }
 0x8fe   : > { %v3960_v44 = vadd.f32 %v3959_v35, %v3958_v59  ;;  %v3967_v46 = vadd.f32 %v3966_v41, %v3965_v51  ;;  %v3899_v13 = vmul.f32 %v3867_v57, %v16992_v49  ;;  %v3984_v59 = vsel %vm3919_vm3, %v3902_v47, 0.0 }
 0x8ff   : > { %v3954_v24 = vrot.slane %v3953_v39, 1  ;;  %v4096_v61 = vsel %vm1781_vm11, %v3946_v58, %v4095_v53 }
 0x900   : > { %v3961_v31 = vrot.slane %v3960_v44, 2  ;;  %v3968_v2 = vrot.slane %v3967_v46, 4  ;;  %v3974_v42 = vsel %vm3919_vm3, %v3899_v13, 0.0  ;;  %v3768_v30 = vpop.permute.xlu1 %3767 }
 0x901   : > { %v3955_v38 = vadd.f32 %v3954_v24, %v3953_v39  ;;  %v3976_v28 = vadd.f32 %v3975_v63, %v3974_v42  ;;  %v3869_v52 = vsel %vm548_vm0, %v13313_v8, %v3768_v30  ;;  %v16995_v30 = vld [vmem:[#allocation37_spill] sm:$0xff] }
 0x902   : > { %v3962_v21 = vadd.f32 %v3961_v31, %v3960_v44  ;;  %v3969_v62 = vadd.f32 %v3968_v2, %v3967_v46  ;;  %v3901_v5 = vmul.f32 %v3869_v52, %v16994_v15 }
 0x903   : > { %v3977_v18 = vrot.slane %v3976_v28, 4  ;;  %v4097_v4 = vsel %vm1783_vm12, %v3955_v38, %v4096_v61 }
 0x904   : > { %v3963_v1 = vrot.slane %v3962_v21, 1  ;;  %v3970_v53 = vrot.slane %v3969_v62, 2  ;;  %v3983_v60 = vsel %vm3919_vm3, %v3901_v5, 0.0 }
 0x905   : > { %v3978_v55 = vadd.f32 %v3977_v18, %v3976_v28  ;;  %v3985_v12 = vadd.f32 %v3984_v59, %v3983_v60  ;;  %v16996_v28 = vld [vmem:[#allocation38_spill] sm:$0xff]  ;;  %v16997_v59 = vld [vmem:[#allocation39_spill] sm:$0xff] }
 0x906   : > { %v3964_v50 = vadd.f32 %v3963_v1, %v3962_v21  ;;  %v3971_v41 = vadd.f32 %v3970_v53, %v3969_v62 }
 0x907   : > { %v3979_v16 = vrot.slane %v3978_v55, 2  ;;  %v3986_v35 = vrot.slane %v3985_v12, 4 }
 0x908   : > { %v3972_v8 = vrot.slane %v3971_v41, 1  ;;  %v4098_v14 = vsel %vm1785_vm13, %v3964_v50, %v4097_v4 }
 0x909   : > { %v3980_v58 = vadd.f32 %v3979_v16, %v3978_v55  ;;  %v3987_v39 = vadd.f32 %v3986_v35, %v3985_v12 }
 0x90a   : > { %v3973_v51 = vadd.f32 %v3972_v8, %v3971_v41 }
 0x90b   : > { %v3981_v57 = vrot.slane %v3980_v58, 1  ;;  %v3988_v44 = vrot.slane %v3987_v39, 2 }
 0x90c   : > { %v4099_v46 = vsel %vm1787_vm14, %v3973_v51, %v4098_v14 }
 0x90d   : > { %v3989_v49 = vadd.f32 %v3988_v44, %v3987_v39  ;;  %v3982_v13 = vadd.f32 %v3981_v57, %v3980_v58  ;;  %v17000_v58 = vld [vmem:[#allocation42_spill] sm:$0xff] }
 0x90f   : > { %v3990_v63 = vrot.slane %v3989_v49, 1  ;;  %v4100_v24 = vsel %vm1789_vm15, %v3982_v13, %v4099_v46 }
 0x911   : > { %v3991_v61 = vadd.f32 %v3990_v63, %v3989_v49 }
 0x913   : > { %v4101_v37 = vsel %vm1791_vm1, %v3991_v61, %v4100_v24 }
 0x914   : > { %10450 = vmatprep.mubr.msk.f32.mxu1 %vm3919_vm3, %v4101_v37  ;;  %v17001_v37 = vld [vmem:[#allocation43_spill] sm:$0xff] }
 0x92f   : > { %v3783_v47 = vpop.permute.xlu0 %3782  ;;  %v3778_v31 = vpop.permute.xlu1 %3777 }
 0x930   : > { %v3872_v2 = vsel %vm548_vm0, %v13273_v34, %v3783_v47  ;;  %v3871_v42 = vsel %vm548_vm0, %v13320_v10, %v3778_v31  ;;  %v16998_v10 = vld [vmem:[#allocation40_spill] sm:$0xff] }
 0x931   : > { %v3904_v38 = vmul.f32 %v16995_v30, %v3872_v2  ;;  %v3903_v52 = vmul.f32 %v3871_v42, %v16996_v28  ;;  %v17002_v42 = vld [vmem:[#allocation44_spill] sm:$0xff] }
 0x933   : > { %v3993_v21 = vsel %vm3919_vm3, %v3904_v38, 0.0  ;;  %v3992_v62 = vsel %vm3919_vm3, %v3903_v52, 0.0  ;;  %v3793_v15 = vpop.permute.xlu0 %3792  ;;  %v3788_v5 = vpop.permute.xlu1 %3787 }
 0x934   : > { %v3994_v18 = vadd.f32 %v3993_v21, %v3992_v62  ;;  %v3874_v4 = vsel %vm548_vm0, %v13277_v54, %v3793_v15  ;;  %v3873_v34 = vsel %vm548_vm0, %v13325_v0, %v3788_v5  ;;  %v16999_v0 = vld [vmem:[#allocation41_spill] sm:$0xff] }
 0x935   : > { %v3906_v1 = vmul.f32 %v16997_v59, %v3874_v4  ;;  %v3905_v53 = vmul.f32 %v3873_v34, %v16998_v10  ;;  %v17003_v59 = vld [vmem:[#allocation45_spill] sm:$0xff]  ;;  %v17004_v10 = vld [vmem:[#allocation46_spill] sm:$0xff] }
 0x936   : > { %v3995_v60 = vrot.slane %v3994_v18, 4 }
 0x937   : > { %v4002_v55 = vsel %vm3919_vm3, %v3906_v1, 0.0  ;;  %v4001_v12 = vsel %vm3919_vm3, %v3905_v53, 0.0  ;;  %v3803_v50 = vpop.permute.xlu0 %3802  ;;  %v3798_v41 = vpop.permute.xlu1 %3797 }
 0x938   : > { %v3996_v16 = vadd.f32 %v3995_v60, %v3994_v18  ;;  %v4003_v35 = vadd.f32 %v4002_v55, %v4001_v12  ;;  %v3876_v8 = vsel %vm548_vm0, %v13282_v43, %v3803_v50  ;;  %v3875_v54 = vsel %vm548_vm0, %v13331_v11, %v3798_v41 }
 0x939   : > { %v3908_v14 = vmul.f32 %v16999_v0, %v3876_v8  ;;  %v3907_v39 = vmul.f32 %v3875_v54, %v17000_v58 }
 0x93a   : > { %v3997_v51 = vrot.slane %v3996_v16, 2  ;;  %v4004_v57 = vrot.slane %v4003_v35, 4 }
 0x93b   : > { %v4011_v44 = vsel %vm3919_vm3, %v3908_v14, 0.0  ;;  %v4010_v46 = vsel %vm3919_vm3, %v3907_v39, 0.0  ;;  %v3813_v49 = vpop.permute.xlu0 %3812  ;;  %v3808_v13 = vpop.permute.xlu1 %3807  ;;  %v17005_v39 = vld [vmem:[#allocation47_spill] sm:$0xff] }
 0x93c   : > { %v3998_v63 = vadd.f32 %v3997_v51, %v3996_v16  ;;  %v4005_v24 = vadd.f32 %v4004_v57, %v4003_v35  ;;  %v4012_v61 = vadd.f32 %v4011_v44, %v4010_v46  ;;  %v3878_v43 = vsel %vm548_vm0, %v13289_v3, %v3813_v49  ;;  %v17006_v57 = vld [vmem:[#allocation48_spill] sm:$0xff] }
 0x93d   : > { %v3910_v11 = vmul.f32 %v17001_v37, %v3878_v43  ;;  %v3877_v47 = vsel %vm548_vm0, %v13339_v26, %v3808_v13 }
 0x93e   : > { %v4006_v31 = vrot.slane %v4005_v24, 2  ;;  %v4013_v2 = vrot.slane %v4012_v61, 4  ;;  %v3909_v30 = vmul.f32 %v3877_v47, %v17002_v42  ;;  %v3999_v38 = vrot.slane %v3998_v63, 1  ;;  %v17007_v47 = vld [vmem:[#allocation49_spill] sm:$0xff] }
 0x93f   : > { %v4020_v28 = vsel %vm3919_vm3, %v3910_v11, 0.0  ;;  %v3823_v52 = vpop.permute.xlu0 %3822  ;;  %v3818_v21 = vpop.permute.xlu1 %3817 }
 0x940   : > { %v4007_v62 = vadd.f32 %v4006_v31, %v4005_v24  ;;  %v4014_v15 = vadd.f32 %v4013_v2, %v4012_v61  ;;  %v4019_v5 = vsel %vm3919_vm3, %v3909_v30, 0.0  ;;  %v3880_v3 = vsel %vm548_vm0, %v13299_v32, %v3823_v52 }
 0x941   : > { %v4021_v18 = vadd.f32 %v4020_v28, %v4019_v5  ;;  %v3879_v26 = vsel %vm548_vm0, %v13341_v7, %v3818_v21  ;;  %v3912_v1 = vmul.f32 %v17003_v59, %v3880_v3  ;;  %v4000_v60 = vadd.f32 %v3999_v38, %v3998_v63 }
 0x942   : > { %v4008_v4 = vrot.slane %v4007_v62, 1  ;;  %v4015_v34 = vrot.slane %v4014_v15, 2  ;;  %v3911_v53 = vmul.f32 %v3879_v26, %v17004_v10 }
 0x943   : > { %v4022_v55 = vrot.slane %v4021_v18, 4  ;;  %v3833_v12 = vpop.permute.xlu0 %3832  ;;  %v3828_v50 = vpop.permute.xlu1 %3827  ;;  %v4029_v35 = vsel %vm3919_vm3, %v3912_v1, 0.0  ;;  %v17010_v1 = vld [vmem:[#allocation52_spill] sm:$0xff] }
 0x944   : > { %v4009_v41 = vadd.f32 %v4008_v4, %v4007_v62  ;;  %v4016_v16 = vadd.f32 %v4015_v34, %v4014_v15  ;;  %v4028_v8 = vsel %vm3919_vm3, %v3911_v53, 0.0  ;;  %v3882_v7 = vsel %vm548_vm0, %v13308_v25, %v3833_v12  ;;  %v17008_v15 = vld [vmem:[#allocation50_spill] sm:$0xff]  ;;  %v17009_v34 = vld [vmem:[#allocation51_spill] sm:$0xff] }
 0x945   : > { %v4023_v32 = vadd.f32 %v4022_v55, %v4021_v18  ;;  %v4030_v54 = vadd.f32 %v4029_v35, %v4028_v8  ;;  %v3881_v0 = vsel %vm548_vm0, %v13343_v27, %v3828_v50  ;;  %v3914_v51 = vmul.f32 %v17005_v39, %v3882_v7 }
 0x946   : > { %v4102_v14 = vsel %vm1779_vm10, %v4009_v41, %v4000_v60  ;;  %v4017_v58 = vrot.slane %v4016_v16, 1  ;;  %v3913_v44 = vmul.f32 %v3881_v0, %v17006_v57 }
 0x947   : > { %v4024_v46 = vrot.slane %v4023_v32, 2  ;;  %v4031_v49 = vrot.slane %v4030_v54, 4  ;;  %v3843_v13 = vpop.permute.xlu0 %3842  ;;  %v3838_v63 = vpop.permute.xlu1 %3837  ;;  %v4038_v61 = vsel %vm3919_vm3, %v3914_v51, 0.0 }
 0x948   : > { %v4018_v24 = vadd.f32 %v4017_v58, %v4016_v16  ;;  %v4037_v43 = vsel %vm3919_vm3, %v3913_v44, 0.0  ;;  %v3884_v25 = vsel %vm548_vm0, %v13318_v29, %v3843_v13  ;;  %v3883_v42 = vsel %vm548_vm0, %v13345_v40, %v3838_v63 }
 0x949   : > { %v4025_v27 = vadd.f32 %v4024_v46, %v4023_v32  ;;  %v4032_v37 = vadd.f32 %v4031_v49, %v4030_v54  ;;  %v4039_v11 = vadd.f32 %v4038_v61, %v4037_v43  ;;  %v3916_v31 = vmul.f32 %v17007_v47, %v3884_v25  ;;  %v9975_v43 = vld [vmem:[%s16390_s5] ss:$0 sm:$0xff]  ;;  %v11341_v47 = vld [vmem:[%s11601_s29 + $0x8] sm:$0xff] }
 0x94a   : > { %v4103_v2 = vsel %vm1781_vm11, %v4018_v24, %v4102_v14  ;;  %v3915_v5 = vmul.f32 %v3883_v42, %v17008_v15 }
 0x94b   : > { %v4026_v30 = vrot.slane %v4025_v27, 1  ;;  %v4033_v38 = vrot.slane %v4032_v37, 2  ;;  %v4040_v28 = vrot.slane %v4039_v11, 4  ;;  %v3853_v52 = vpop.permute.xlu0 %3852  ;;  %v3848_v21 = vpop.permute.xlu1 %3847  ;;  %v4047_v62 = vsel %vm3919_vm3, %v3916_v31, 0.0 }
 0x94c   : > { %v3886_v29 = vsel %vm548_vm0, %v13327_v19, %v3853_v52  ;;  %v3885_v18 = vsel %vm548_vm0, %v13353_v33, %v3848_v21  ;;  %v4046_v59 = vsel %vm3919_vm3, %v3915_v5, 0.0 }
 0x94d   : > { %v4027_v3 = vadd.f32 %v4026_v30, %v4025_v27  ;;  %v4034_v26 = vadd.f32 %v4033_v38, %v4032_v37  ;;  %v4041_v4 = vadd.f32 %v4040_v28, %v4039_v11  ;;  %v3918_v40 = vmul.f32 %v17009_v34, %v3886_v29  ;;  %v4218_v34 = vld [vmem:[%s16393_s8 + $0x8] sm:$0xff] }
 0x94e   : > { %v3917_v10 = vmul.f32 %v3885_v18, %v17010_v1  ;;  %v4048_v12 = vadd.f32 %v4047_v62, %v4046_v59  ;;  %v4220_v1 = vld [vmem:[%s16393_s8 + $0x18] sm:$0xff] }
 0x94f   : > { %v4104_v53 = vsel %vm1783_vm12, %v4027_v3, %v4103_v2  ;;  %v4035_v60 = vrot.slane %v4034_v26, 1  ;;  %v4042_v55 = vrot.slane %v4041_v4, 2  ;;  %v4056_v50 = vsel %vm3919_vm3, %v3918_v40, 0.0  ;;  %v11342_v2 = vld [vmem:[%s11601_s29] sm:$0xff]  ;;  %v4219_v40 = vld [vmem:[%s16393_s8 + $0x10] sm:$0xff]  ;;  %s10148_s29 = sshll.u32 %s11542_s17, 8 }
 0x950   : > { %v4055_v19 = vsel %vm3919_vm3, %v3917_v10, 0.0  ;;  %v4049_v16 = vrot.slane %v4048_v12, 4  ;;  %v10766_v10 = vpack.c.bf16 %v4220_v1, %v4219_v40  ;;  %v4427_v40 = vld [vmem:[%s16391_s6 + $0x10] sm:$0xff]  ;;  %s16338_s24 = scalar_lea.hbm %s16399_s14, %s10148_s29  ;;  %s16344_s17 = scalar_lea.sflag [#allocation3], %s475_s25 }
 0x951   : > { %v4036_v41 = vadd.f32 %v4035_v60, %v4034_v26  ;;  %v4043_v33 = vadd.f32 %v4042_v55, %v4041_v4  ;;  %v4057_v35 = vadd.f32 %v4056_v50, %v4055_v19  ;;  %v4217_v4 = vld [vmem:[%s16393_s8] sm:$0xff] }
 0x952   : > { %v4050_v32 = vadd.f32 %v4049_v16, %v4048_v12  ;;  %v10762_v59 = vpack.c.bf16 %v4218_v34, %v4217_v4 }
 0x953   : > { %v4044_v8 = vrot.slane %v4043_v33, 1  ;;  %v4058_v54 = vrot.slane %v4057_v35, 4  ;;  %v4105_v7 = vsel %vm1785_vm13, %v4036_v41, %v4104_v53 }
 0x954   : > { %v4051_v14 = vrot.slane %v4050_v32, 2  ;;  %10763 = vmatprep.subr.bf16.mxu0 %v10762_v59 }
 0x955   : > { %v4045_v0 = vadd.f32 %v4044_v8, %v4043_v33  ;;  %v4059_v58 = vadd.f32 %v4058_v54, %v4057_v35  ;;  %10765 = vmatpush3.bf16.msra.mxu0 %v10762_v59  ;;  %v4327_v8 = vld [vmem:[%s16395_s10] sm:$0xff]  ;;  %v4329_v54 = vld [vmem:[%s16395_s10 + $0x10] sm:$0xff]  ;;  %v4428_v59 = vld [vmem:[%s16391_s6 + $0x18] sm:$0xff] }
 0x956   : > { %v4052_v39 = vadd.f32 %v4051_v14, %v4050_v32  ;;  %10767 = vmatprep.subr.bf16.mxu0 %v10766_v10  ;;  %v4328_v32 = vld [vmem:[%s16395_s10 + $0x8] sm:$0xff]  ;;  %v10790_v1 = vpack.c.bf16 %v4428_v59, %v4427_v40  ;;  %v11350_v40 = vld [vmem:[%s11607_s18 + $0xa0] sm:$0xff] }
 0x957   : > { %v4060_v51 = vrot.slane %v4059_v58, 2  ;;  %v4106_v57 = vsel %vm1787_vm14, %v4045_v0, %v4105_v7  ;;  %v10770_v7 = vpack.c.bf16 %v4328_v32, %v4327_v8  ;;  %v4330_v0 = vld [vmem:[%s16395_s10 + $0x18] sm:$0xff]  ;;  %v17013_v8 = vld [vmem:[#allocation20_spill] sm:$0xff] }
 0x958   : > { %v4053_v44 = vrot.slane %v4052_v39, 1  ;;  %v10774_v14 = vpack.c.bf16 %v4330_v0, %v4329_v54 }
 0x959   : > { %v4061_v46 = vadd.f32 %v4060_v51, %v4059_v58  ;;  %10769 = vmatpush3.bf16.msra.mxu0 %v10766_v10  ;;  %v4331_v58 = vld [vmem:[%s16395_s10 + $0x20] sm:$0xff] }
 0x95a   : > { %v4054_v49 = vadd.f32 %v4053_v44, %v4052_v39  ;;  %v4332_v39 = vld [vmem:[%s16395_s10 + $0x28] sm:$0xff]  ;;  %10771 = vmatprep.subr.bf16.mxu0 %v10770_v7  ;;  %v4334_v44 = vld [vmem:[%s16395_s10 + $0x38] sm:$0xff]  ;;  %v9981_v10 = vld [vmem:[%s16396_s11] ss:$0 sm:$0xff] }
 0x95b   : > { %v4062_v13 = vrot.slane %v4061_v46, 1  ;;  %v10778_v51 = vpack.c.bf16 %v4332_v39, %v4331_v58 }
 0x95c   : > { %v4107_v24 = vsel %vm1789_vm15, %v4054_v49, %v4106_v57  ;;  %v4333_v57 = vld [vmem:[%s16395_s10 + $0x30] sm:$0xff]  ;;  %v4425_v49 = vld [vmem:[%s16391_s6] sm:$0xff] }
 0x95d   : > { %v4063_v63 = vadd.f32 %v4062_v13, %v4061_v46  ;;  %v10782_v46 = vpack.c.bf16 %v4334_v44, %v4333_v57  ;;  %v4426_v13 = vld [vmem:[%s16391_s6 + $0x8] sm:$0xff] }
 0x95e   : > { %v11343_v57 = vld [vmem:[%s11607_s18 + $0x88] sm:$0xff] }
 0x95f   : > { %v4108_v61 = vsel %vm1791_vm1, %v4063_v63, %v4107_v24  ;;  %v10786_v63 = vpack.c.bf16 %v4426_v13, %v4425_v49  ;;  %v9978_v24 = vld [vmem:[%s16394_s9] ss:$0 sm:$0xff] }
 0x960   : > { %10451 = vmatmul.mubr.msk.f32.vlgmr.msra.gmra.mrb[32].mxu1 %vm3919_vm3, %v4108_v61 }
 0xa33   : > { %v10452_v25 = vpop.f32.mrb[32].mxu1 }
 0xa34   : > { %v4185_v27 = vadd.f32 %v10452_v25, %v9975_v43  ;;  %v4179_v37 = vpop.f32.mrb[33].mxu1 }
 0xa35   : > { %v4180_v11 = vadd.f32 %v9975_v43, %v4179_v37 }
 0xa36   : > { %v13503_v31 = vadd.f32 %v11341_v47, %v4185_v27 }
 0xa37   : > { %v13506_v42 = vadd.f32 %v11342_v2, %v4180_v11 }
 0xa38   : > { %v4193_v30 = vsel %vm548_vm0, %v13503_v31, 0.0 }
 0xa39   : > { %4194 = vadd.xlane.f32.xlu0 %v4193_v30  ;;  %v4190_v38 = vsel %vm548_vm0, %v13506_v42, 0.0 }
 0xa3a   : > { %4191 = vadd.xlane.f32.xlu1 %v4190_v38 }
 0xac6   : > { %v4195_v28 = vpop.xlane.xlu0 %4194 }
 0xac7   : > { %v4198_v52 = vmul.f32 0.03125, %v4195_v28  ;;  %v4192_v21 = vpop.xlane.xlu1 %4191 }
 0xac8   : > { %v4197_v62 = vmul.f32 0.03125, %v4192_v21 }
 0xac9   : > { %v4200_v15 = vsub.f32 %v13503_v31, %v4198_v52 }
 0xaca   : > { %v4199_v5 = vsub.f32 %v13506_v42, %v4197_v62 }
 0xacb   : > { %v4202_v29 = vmul.f32 %v4200_v15, %v4200_v15 }
 0xacc   : > { %v4201_v18 = vmul.f32 %v4199_v5, %v4199_v5 }
 0xacd   : > { %v4206_v3 = vsel %vm548_vm0, %v4202_v29, 0.0 }
 0xace   : > { %4207 = vadd.xlane.f32.xlu1 %v4206_v3  ;;  %v4203_v26 = vsel %vm548_vm0, %v4201_v18, 0.0 }
 0xacf   : > { %4204 = vadd.xlane.f32.xlu0 %v4203_v26 }
 0xb5b   : > { %v4208_v53 = vpop.xlane.xlu1 %4207 }
 0xb5c   : > { %v4210_v60 = vmul.f32 0.03125, %v4208_v53  ;;  %v4205_v55 = vpop.xlane.xlu0 %4204 }
 0xb5d   : > { %v4209_v12 = vmul.f32 0.03125, %v4205_v55 }
 0xb5e   : > { %v4212_v50 = vadd.f32 1e-05, %v4210_v60 }
 0xb5f   : > { %v4211_v19 = vadd.f32 1e-05, %v4209_v12 }
 0xb60   : > { %11057 = vrsqrt.f32 %v4212_v50 }
 0xb61   : > { %11059 = vrsqrt.f32 %v4211_v19 }
 0xb6a   : > { %v11058_v41 = vpop.eup %11057 }
 0xb6b   : > { %v11060_v33 = vpop.eup %11059  ;;  %v4216_v35 = vmul.f32 %v11058_v41, %v4200_v15  ;;  %v9984_v41 = vld [vmem:[%s16392_s7] ss:$0 sm:$0xff] }
 0xb6c   : > { %v4215_v16 = vmul.f32 %v11060_v33, %v4199_v5 }
 0xb6e   : > { %10461 = vmatprep.mubr.msk.f32.mxu0 %vm548_vm0, %v4215_v16 }
 0xb6f   : > { %10462 = vmatmul.mubr.msk.f32.vlgmr.msra.gmra.mrb[2].mxu0 %vm548_vm0, %v4216_v35 }
 0xb70   : > { %10773 = vmatpush3.bf16.msra.mxu0 %v10770_v7 }
 0xb71   : > { %10775 = vmatprep.subr.bf16.mxu0 %v10774_v14 }
 0xb74   : > { %10777 = vmatpush3.bf16.msra.mxu0 %v10774_v14 }
 0xb75   : > { %10779 = vmatprep.subr.bf16.mxu0 %v10778_v51 }
 0xb78   : > { %10781 = vmatpush3.bf16.msra.mxu0 %v10778_v51 }
 0xb79   : > { %10783 = vmatprep.subr.bf16.mxu0 %v10782_v46 }
 0xb7c   : > { %10785 = vmatpush3.bf16.msra.mxu0 %v10782_v46  ;;  %v11344_v46 = vld [vmem:[%s11607_s18 + $0x80] sm:$0xff] }
 0xb7d   : > { %10787 = vmatprep.subr.bf16.mxu0 %v10786_v63 }
 0xc42   : > { %v10463_v61 = vpop.f32.mrb[2].mxu0 }
 0xc43   : > { %v4306_v43 = vadd.f32 %v10463_v61, %v9978_v24  ;;  %v4300_v25 = vpop.f32.mrb[3].mxu0 }
 0xc44   : > { %v4301_v27 = vadd.f32 %v9978_v24, %v4300_v25  ;;  %v11345_v25 = vld [vmem:[%s11607_s18 + $0x8] sm:$0xff] }
 0xc45   : > { %v4310_v37 = vmul.f32 %v4306_v43, %v4306_v43 }
 0xc46   : > { %v4309_v11 = vmul.f32 %v4301_v27, %v4301_v27 }
 0xc47   : > { %v4312_v47 = vmul.f32 %v4310_v37, %v4306_v43  ;;  %v11346_v37 = vld [vmem:[%s11607_s18] sm:$0xff] }
 0xc48   : > { %v4311_v2 = vmul.f32 %v4309_v11, %v4301_v27 }
 0xc49   : > { %v4314_v30 = vmul.f32 0.044715, %v4312_v47 }
 0xc4a   : > { %v4313_v38 = vmul.f32 0.044715, %v4311_v2 }
 0xc4b   : > { %v4316_v28 = vadd.f32 %v4314_v30, %v4306_v43 }
 0xc4c   : > { %v4315_v52 = vadd.f32 %v4313_v38, %v4301_v27 }
 0xc4d   : > { %v4318_v21 = vmul.f32 0.7978846, %v4316_v28 }
 0xc4e   : > { %v4317_v62 = vmul.f32 0.7978846, %v4315_v52  ;;  %v11347_v52 = vld [vmem:[%s11607_s18 + $0x98] sm:$0xff] }
 0xc4f   : > { %11061 = vtanh.f32 %v4318_v21 }
 0xc50   : > { %11063 = vtanh.f32 %v4317_v62  ;;  %v11348_v62 = vld [vmem:[%s11607_s18 + $0x90] sm:$0xff] }
 0xc59   : > { %v11062_v15 = vpop.eup %11061 }
 0xc5a   : > { %v11064_v5 = vpop.eup %11063  ;;  %v4322_v29 = vadd.f32 1.0, %v11062_v15 }
 0xc5b   : > { %v4321_v18 = vadd.f32 1.0, %v11064_v5 }
 0xc5c   : > { %v4324_v3 = vmul.f32 0.5, %v4322_v29 }
 0xc5d   : > { %v4323_v26 = vmul.f32 0.5, %v4321_v18 }
 0xc5e   : > { %v4326_v34 = vmul.f32 %v4324_v3, %v4306_v43 }
 0xc5f   : > { %v4325_v4 = vmul.f32 %v4323_v26, %v4301_v27 }
 0xc61   : > { %10480 = vmatprep.mubr.msk.f32.mxu0 %vm3919_vm3, %v4325_v4  ;;  %v11349_v4 = vld [vmem:[%s11607_s18 + $0xa8] sm:$0xff] }
 0xc62   : > { %10481 = vmatmul.mubr.msk.f32.vlgmr.msra.gmra.mrb[4].mxu0 %vm3919_vm3, %v4326_v34 }
 0xc63   : > { %10789 = vmatpush3.bf16.msra.mxu0 %v10786_v63 }
 0xc64   : > { %10791 = vmatprep.subr.bf16.mxu0 %v10790_v1 }
 0xc67   : > { %10793 = vmatpush3.bf16.msra.mxu0 %v10790_v1 }
 0xd35   : > { %v10482_v53 = vpop.f32.mrb[4].mxu0 }
 0xd36   : > { %v4420_v60 = vadd.f32 %v10482_v53, %v9981_v10  ;;  %v4414_v55 = vpop.f32.mrb[5].mxu0 }
 0xd37   : > { %v4415_v12 = vadd.f32 %v9981_v10, %v4414_v55 }
 0xd38   : > { %v13578_v19 = vadd.f32 %v4420_v60, %v13503_v31 }
 0xd39   : > { %v13575_v50 = vadd.f32 %v4415_v12, %v13506_v42  ;;  %v11351_v12 = vld [vmem:[%s11607_s18 + $0xc8] sm:$0xff] }
 0xd3a   : > { %17012 = vst [vmem:[#allocation119_spill] sm:$0xff] %v13578_v19 }
 0xd3b   : > { %17011 = vst [vmem:[#allocation118_spill] sm:$0xff] %v13575_v50  ;;  %10491 = vmatprep.mubr.msk.f32.mxu0 %vm548_vm0, %v13575_v50 }
 0xd3c   : > { %10492 = vmatmul.mubr.msk.f32.vlgmr.msra.gmra.mrb[6].mxu0 %vm548_vm0, %v13578_v19 }
 0xe0f   : > { %v10493_v33 = vpop.f32.mrb[6].mxu0 }
 0xe10   : > { %v4514_v16 = vadd.f32 %v10493_v33, %v9984_v41  ;;  %v4508_v35 = vpop.f32.mrb[7].mxu0  ;;  %v11352_v33 = vld [vmem:[%s11607_s18 + $0xc0] sm:$0xff] }
 0xe11   : > { %v4509_v42 = vadd.f32 %v9984_v41, %v4508_v35 }
 0xe12   : > { %v4575_v32 = vrot.slane %v4514_v16, %v17013_v8  ;;  %v4568_v14 = vcombine.high %v4514_v16, %v4514_v16 }
 0xe13   : > { %v4526_v31 = vrot.slane %v4509_v42, %v17013_v8  ;;  %v4519_v5 = vcombine.high %v4509_v42, %v4509_v42  ;;  %v11353_v42 = vld [vmem:[%s11607_s18 + $0x18] sm:$0xff] }
 0xe14   : > { %v4583_v54 = vcombine.high %v4575_v32, %v4575_v32  ;;  %v4591_v7 = vrot.slane %v4575_v32, %v17013_v8  ;;  %v13603_v13 = vrot.slane %v4568_v14, %v17013_v8 }
 0xe15   : > { %v4542_v0 = vrot.slane %v4526_v31, %v17013_v8  ;;  %v4534_v2 = vcombine.high %v4526_v31, %v4526_v31  ;;  %v13648_v1 = vrot.slane %v4519_v5, %v17013_v8 }
 0xe16   : > { %v13592_v58 = vrot.slane %v4583_v54, %v17013_v8  ;;  %v4652_v39 = vrot.slane %v4591_v7, %v16860_v56  ;;  %v4613_v63 = vcombine.high %v4591_v7, %v4591_v7  ;;  %v13619_v47 = vrot.slane %v13603_v13, %v17013_v8  ;;  %v11354_v7 = vld [vmem:[%s11607_s18 + $0x10] sm:$0xff] }
 0xe17   : > { %v4620_v51 = vrot.slane %v4542_v0, %v16860_v56  ;;  %v13633_v29 = vrot.slane %v4534_v2, %v17013_v8  ;;  %v4564_v10 = vcombine.high %v4542_v0, %v4542_v0  ;;  %v13664_v35 = vrot.slane %v13648_v1, %v17013_v8 }
 0xe18   : > { %v13597_v44 = vadd.f32 %v11343_v57, %v4652_v39  ;;  %v13600_v49 = vadd.f32 %v11344_v46, %v4652_v39  ;;  %v4656_v24 = vrot.slane %v13592_v58, %v16860_v56  ;;  %v4660_v30 = vrot.slane %v4613_v63, %v16860_v56 }
 0xe19   : > { %v13612_v27 = vadd.f32 %v11345_v25, %v4620_v51  ;;  %v13615_v11 = vadd.f32 %v11346_v37, %v4620_v51  ;;  %v4668_v18 = vrot.slane %v13619_v47, %v16860_v56  ;;  %v4624_v53 = vrot.slane %v13633_v29, %v16860_v56 }
 0xe1a   : > { %17014 = vst [vmem:[#allocation120_spill] sm:$0xff] %v13597_v44  ;;  %17015 = vst [vmem:[#allocation121_spill] sm:$0xff] %v13600_v49  ;;  %v4780_v61 = vsel %vm548_vm0, %v13597_v44, 0.0  ;;  %v4777_v43 = vsel %vm548_vm0, %v13600_v49, 0.0  ;;  %v13627_v21 = vadd.f32 %v11347_v52, %v4656_v24  ;;  %v13630_v15 = vadd.f32 %v11348_v62, %v4656_v24  ;;  %v11355_v24 = vld [vmem:[%s11607_s18 + $0x28] sm:$0xff] }
 0xe1b   : > { %4781 = vadd.xlane.f32.xlu1 %v4780_v61  ;;  %4778 = vadd.xlane.f32.xlu0 %v4777_v43  ;;  %v4732_v38 = vsel %vm548_vm0, %v13612_v27, 0.0  ;;  %v4729_v28 = vsel %vm548_vm0, %v13615_v11, 0.0  ;;  %v13642_v34 = vadd.f32 %v11349_v4, %v4660_v30  ;;  %v13645_v59 = vadd.f32 %v11350_v40, %v4660_v30  ;;  %v11356_v43 = vld [vmem:[%s11607_s18 + $0x20] sm:$0xff]  ;;  %v11357_v30 = vld [vmem:[%s11607_s18 + $0x48] sm:$0xff]  ;;  %v11360_v40 = vld [vmem:[%s11607_s18 + $0xb0] sm:$0xff] }
 0xe1c   : > { %17016 = vst [vmem:[#allocation86_spill] sm:$0xff] %v13627_v21  ;;  %17017 = vst [vmem:[#allocation87_spill] sm:$0xff] %v13630_v15  ;;  %v4786_v3 = vsel %vm548_vm0, %v13627_v21, 0.0  ;;  %v4783_v26 = vsel %vm548_vm0, %v13630_v15, 0.0  ;;  %v13657_v41 = vadd.f32 %v11351_v12, %v4668_v18  ;;  %v13660_v16 = vadd.f32 %v11352_v33, %v4668_v18 }
 0xe1d   : > { %17018 = vst [vmem:[#allocation88_spill] sm:$0xff] %v13642_v34  ;;  %17019 = vst [vmem:[#allocation91_spill] sm:$0xff] %v13645_v59  ;;  %v4792_v60 = vsel %vm548_vm0, %v13642_v34, 0.0  ;;  %v4789_v55 = vsel %vm548_vm0, %v13645_v59, 0.0  ;;  %v13667_v32 = vadd.f32 %v11353_v42, %v4624_v53  ;;  %v13674_v0 = vadd.f32 %v11354_v7, %v4624_v53  ;;  %v11362_v42 = vld [vmem:[%s11607_s18 + $0xd0] sm:$0xff] }
 0xe1e   : > { %17020 = vst [vmem:[#allocation92_spill] sm:$0xff] %v13657_v41  ;;  %17021 = vst [vmem:[#allocation93_spill] sm:$0xff] %v13660_v16  ;;  %v4804_v31 = vsel %vm548_vm0, %v13657_v41, 0.0  ;;  %v4801_v54 = vsel %vm548_vm0, %v13660_v16, 0.0  ;;  %v4628_v14 = vrot.slane %v4564_v10, %v16860_v56  ;;  %v4584_v39 = vcombine.high %v13603_v13, %v13603_v13 }
 0xe1f   : > { %4733 = vadd.xlane.f32.xlu1 %v4732_v38  ;;  %4730 = vadd.xlane.f32.xlu0 %v4729_v28  ;;  %17022 = vst [vmem:[#allocation96_spill] sm:$0xff] %v13667_v32  ;;  %17023 = vst [vmem:[#allocation85_spill] sm:$0xff] %v13674_v0  ;;  %v4615_v51 = vcombine.high %v13592_v58, %v13592_v58  ;;  %v4636_v57 = vrot.slane %v13664_v35, %v16860_v56  ;;  %v4738_v46 = vsel %vm548_vm0, %v13667_v32, 0.0  ;;  %v11358_v28 = vld [vmem:[%s11607_s18 + $0x40] sm:$0xff] }
 0xe20   : > { %v4735_v63 = vsel %vm548_vm0, %v13674_v0, 0.0  ;;  %v13688_v61 = vadd.f32 %v11355_v24, %v4628_v14  ;;  %v13691_v25 = vadd.f32 %v11356_v43, %v4628_v14  ;;  %v13694_v58 = vrot.slane %v4584_v39, %v17013_v8  ;;  %v11363_v14 = vld [vmem:[%s11607_s18 + $0xe8] sm:$0xff] }
 0xe21   : > { %v4664_v13 = vrot.slane %v4615_v51, %v16860_v56  ;;  %v13702_v38 = vadd.f32 %v11357_v30, %v4636_v57  ;;  %v13705_v52 = vadd.f32 %v11358_v28, %v4636_v57  ;;  %v4614_v62 = vcombine.high %v13619_v47, %v13619_v47  ;;  %v11364_v51 = vld [vmem:[%s11607_s18 + $0xe0] sm:$0xff]  ;;  %v11366_v30 = vld [vmem:[%s11607_s18 + $0x30] sm:$0xff] }
 0xe22   : > { %17024 = vst [vmem:[#allocation100_spill] sm:$0xff] %v13688_v61  ;;  %17025 = vst [vmem:[#allocation95_spill] sm:$0xff] %v13691_v25  ;;  %v4744_v37 = vsel %vm548_vm0, %v13688_v61, 0.0  ;;  %v4741_v2 = vsel %vm548_vm0, %v13691_v25, 0.0  ;;  %v4672_v5 = vrot.slane %v13694_v58, %v16860_v56  ;;  %v4535_v47 = vcombine.high %v13648_v1, %v13648_v1 }
 0xe23   : > { %4787 = vadd.xlane.f32.xlu1 %v4786_v3  ;;  %4784 = vadd.xlane.f32.xlu0 %v4783_v26  ;;  %17026 = vst [vmem:[#allocation102_spill] sm:$0xff] %v13702_v38  ;;  %17027 = vst [vmem:[#allocation89_spill] sm:$0xff] %v13705_v52  ;;  %v4756_v18 = vsel %vm548_vm0, %v13702_v38, 0.0  ;;  %v4753_v3 = vsel %vm548_vm0, %v13705_v52, 0.0  ;;  %v11359_v26 = vld [vmem:[%s11607_s18 + $0xb8] sm:$0xff]  ;;  %v13719_v10 = vadd.f32 %v11360_v40, %v4664_v13  ;;  %v11368_v40 = vld [vmem:[%s11607_s18 + $0x50] sm:$0xff] }
 0xe24   : > { %v13716_v4 = vadd.f32 %v11359_v26, %v4664_v13  ;;  %v4566_v53 = vcombine.high %v13633_v29, %v13633_v29  ;;  %v4563_v1 = vrot.slane %v4535_v47, %v17013_v8 }
 0xe25   : > { %17029 = vst [vmem:[#allocation97_spill] sm:$0xff] %v13719_v10  ;;  %v4795_v33 = vsel %vm548_vm0, %v13719_v10, 0.0 }
 0xe26   : > { %17028 = vst [vmem:[#allocation103_spill] sm:$0xff] %v13716_v4  ;;  %v4798_v12 = vsel %vm548_vm0, %v13716_v4, 0.0  ;;  %v4640_v24 = vrot.slane %v4563_v1, %v16860_v56 }
 0xe27   : > { %4793 = vadd.xlane.f32.xlu1 %v4792_v60  ;;  %4790 = vadd.xlane.f32.xlu0 %v4789_v55  ;;  %v11361_v60 = vld [vmem:[%s11607_s18 + $0xd8] sm:$0xff] }
 0xe28   : > { %v13726_v55 = vadd.f32 %v11361_v60, %v4672_v5  ;;  %v13772_v47 = vadd.f32 %v11368_v40, %v4640_v24 }
 0xe2a   : > { %17030 = vst [vmem:[#allocation107_spill] sm:$0xff] %v13726_v55  ;;  %v4810_v29 = vsel %vm548_vm0, %v13726_v55, 0.0  ;;  %17037 = vst [vmem:[#allocation98_spill] sm:$0xff] %v13772_v47 }
 0xe2b   : > { %4805 = vadd.xlane.f32.xlu1 %v4804_v31  ;;  %4802 = vadd.xlane.f32.xlu0 %v4801_v54  ;;  %v13733_v31 = vadd.f32 %v11362_v42, %v4672_v5  ;;  %v4676_v54 = vrot.slane %v4614_v62, %v16860_v56  ;;  %v4616_v62 = vcombine.high %v13694_v58, %v13694_v58  ;;  %v11370_v42 = vld [vmem:[%s11607_s18 + $0x60] sm:$0xff] }
 0xe2c   : > { %v4567_v58 = vcombine.high %v4563_v1, %v4563_v1 }
 0xe2d   : > { %17031 = vst [vmem:[#allocation90_spill] sm:$0xff] %v13733_v31  ;;  %v4807_v7 = vsel %vm548_vm0, %v13733_v31, 0.0  ;;  %v13742_v39 = vadd.f32 %v11363_v14, %v4676_v54  ;;  %v13745_v57 = vadd.f32 %v11364_v51, %v4676_v54  ;;  %v11371_v14 = vld [vmem:[%s11607_s18 + $0xf8] sm:$0xff] }
 0xe2f   : > { %4739 = vadd.xlane.f32.xlu1 %v4738_v46  ;;  %4736 = vadd.xlane.f32.xlu0 %v4735_v63  ;;  %17032 = vst [vmem:[#allocation108_spill] sm:$0xff] %v13742_v39  ;;  %17033 = vst [vmem:[#allocation99_spill] sm:$0xff] %v13745_v57  ;;  %v4632_v46 = vrot.slane %v4566_v53, %v16860_v56  ;;  %v4565_v63 = vcombine.high %v13664_v35, %v13664_v35  ;;  %v4816_v43 = vsel %vm548_vm0, %v13742_v39, 0.0  ;;  %v11369_v53 = vld [vmem:[%s11607_s18 + $0x68] sm:$0xff] }
 0xe30   : > { %v4813_v13 = vsel %vm548_vm0, %v13745_v57, 0.0 }
 0xe31   : > { %v13759_v28 = vadd.f32 %v11366_v30, %v4632_v46  ;;  %v4644_v35 = vrot.slane %v4565_v63, %v16860_v56 }
 0xe33   : > { %4745 = vadd.xlane.f32.xlu1 %v4744_v37  ;;  %4742 = vadd.xlane.f32.xlu0 %v4741_v2  ;;  %v11365_v37 = vld [vmem:[%s11607_s18 + $0x38] sm:$0xff]  ;;  %17035 = vst [vmem:[#allocation94_spill] sm:$0xff] %v13759_v28  ;;  %v13775_v60 = vadd.f32 %v11369_v53, %v4644_v35  ;;  %v13782_v54 = vadd.f32 %v11370_v42, %v4644_v35  ;;  %v11374_v35 = vld [vmem:[%s11607_s18 + $0x70] sm:$0xff] }
 0xe34   : > { %v13756_v2 = vadd.f32 %v11365_v37, %v4632_v46  ;;  %v11372_v46 = vld [vmem:[%s11607_s18 + $0xf0] sm:$0xff]  ;;  %v11373_v37 = vld [vmem:[%s11607_s18 + $0x78] sm:$0xff] }
 0xe35   : > { %17038 = vst [vmem:[#allocation101_spill] sm:$0xff] %v13775_v60  ;;  %17039 = vst [vmem:[#allocation105_spill] sm:$0xff] %v13782_v54  ;;  %v4765_v1 = vsel %vm548_vm0, %v13782_v54, 0.0 }
 0xe36   : > { %17034 = vst [vmem:[#allocation110_spill] sm:$0xff] %v13756_v2  ;;  %v4750_v5 = vsel %vm548_vm0, %v13756_v2, 0.0 }
 0xe37   : > { %4757 = vadd.xlane.f32.xlu1 %v4756_v18  ;;  %4754 = vadd.xlane.f32.xlu0 %v4753_v3  ;;  %v4747_v18 = vsel %vm548_vm0, %v13759_v28, 0.0  ;;  %v11367_v3 = vld [vmem:[%s11607_s18 + $0x58] sm:$0xff] }
 0xe38   : > { %v13769_v26 = vadd.f32 %v11367_v3, %v4640_v24  ;;  %v4648_v24 = vrot.slane %v4567_v58, %v16860_v56 }
 0xe3a   : > { %17036 = vst [vmem:[#allocation123_spill] sm:$0xff] %v13769_v26  ;;  %v13801_v30 = vadd.f32 %v11373_v37, %v4648_v24 }
 0xe3b   : > { %4799 = vadd.xlane.f32.xlu1 %v4798_v12  ;;  %4796 = vadd.xlane.f32.xlu0 %v4795_v33  ;;  %v4762_v12 = vsel %vm548_vm0, %v13769_v26, 0.0  ;;  %v4759_v33 = vsel %vm548_vm0, %v13772_v47, 0.0 }
 0xe3c   : > { %17042 = vst [vmem:[#allocation109_spill] sm:$0xff] %v13801_v30 }
 0xe3f   : > { %4811 = vadd.xlane.f32.xlu1 %v4810_v29  ;;  %4808 = vadd.xlane.f32.xlu0 %v4807_v7  ;;  %v4680_v29 = vrot.slane %v4616_v62, %v16860_v56  ;;  %v4768_v7 = vsel %vm548_vm0, %v13775_v60, 0.0  ;;  %v13804_v62 = vadd.f32 %v11374_v35, %v4648_v24 }
 0xe41   : > { %v13790_v51 = vadd.f32 %v11371_v14, %v4680_v29  ;;  %v13793_v63 = vadd.f32 %v11372_v46, %v4680_v29  ;;  %17043 = vst [vmem:[#allocation122_spill] sm:$0xff] %v13804_v62 }
 0xe43   : > { %4817 = vadd.xlane.f32.xlu1 %v4816_v43  ;;  %4814 = vadd.xlane.f32.xlu0 %v4813_v13  ;;  %17040 = vst [vmem:[#allocation104_spill] sm:$0xff] %v13790_v51  ;;  %17041 = vst [vmem:[#allocation106_spill] sm:$0xff] %v13793_v63  ;;  %v4822_v43 = vsel %vm548_vm0, %v13790_v51, 0.0  ;;  %v4819_v13 = vsel %vm548_vm0, %v13793_v63, 0.0 }
 0xe47   : > { %4751 = vadd.xlane.f32.xlu1 %v4750_v5  ;;  %4748 = vadd.xlane.f32.xlu0 %v4747_v18  ;;  %v4774_v5 = vsel %vm548_vm0, %v13801_v30, 0.0  ;;  %v4771_v18 = vsel %vm548_vm0, %v13804_v62, 0.0 }
 0xe4b   : > { %4763 = vadd.xlane.f32.xlu1 %v4762_v12  ;;  %4760 = vadd.xlane.f32.xlu0 %v4759_v33 }
 0xe4f   : > { %4769 = vadd.xlane.f32.xlu1 %v4768_v7  ;;  %4766 = vadd.xlane.f32.xlu0 %v4765_v1 }
 0xe53   : > { %4823 = vadd.xlane.f32.xlu1 %v4822_v43  ;;  %4820 = vadd.xlane.f32.xlu0 %v4819_v13 }
 0xe57   : > { %4775 = vadd.xlane.f32.xlu1 %v4774_v5  ;;  %4772 = vadd.xlane.f32.xlu0 %v4771_v18 }
 0xea8   : > { %v4782_v3 = vpop.xlane.xlu1 %4781  ;;  %v4779_v40 = vpop.xlane.xlu0 %4778 }
 0xea9   : > { %v4842_v53 = vmul.f32 0.03125, %v4782_v3  ;;  %v4841_v58 = vmul.f32 0.03125, %v4779_v40 }
 0xeab   : > { %v13811_v12 = vsub.f32 %v13597_v44, %v4842_v53  ;;  %v13814_v33 = vsub.f32 %v13600_v49, %v4841_v58 }
 0xeac   : > { %v4734_v42 = vpop.xlane.xlu1 %4733  ;;  %v4731_v29 = vpop.xlane.xlu0 %4730 }
 0xead   : > { %v4826_v7 = vmul.f32 0.03125, %v4734_v42  ;;  %v4825_v1 = vmul.f32 0.03125, %v4731_v29  ;;  %v4906_v14 = vmul.f32 %v13811_v12, %v13811_v12  ;;  %v4905_v46 = vmul.f32 %v13814_v33, %v13814_v33 }
 0xeaf   : > { %v13821_v24 = vsub.f32 %v13612_v27, %v4826_v7  ;;  %v13824_v43 = vsub.f32 %v13615_v11, %v4825_v1  ;;  %v4972_v13 = vsel %vm548_vm0, %v4906_v14, 0.0  ;;  %v4969_v37 = vsel %vm548_vm0, %v4905_v46, 0.0 }
 0xeb0   : > { %v4788_v35 = vpop.xlane.xlu1 %4787  ;;  %v4785_v5 = vpop.xlane.xlu0 %4784  ;;  %4973 = vadd.xlane.f32.xlu1 %v4972_v13  ;;  %4970 = vadd.xlane.f32.xlu0 %v4969_v37 }
 0xeb1   : > { %v4844_v18 = vmul.f32 0.03125, %v4788_v35  ;;  %v4843_v3 = vmul.f32 0.03125, %v4785_v5  ;;  %v4890_v40 = vmul.f32 %v13821_v24, %v13821_v24  ;;  %v4889_v53 = vmul.f32 %v13824_v43, %v13824_v43 }
 0xeb3   : > { %v13833_v58 = vsub.f32 %v13627_v21, %v4844_v18  ;;  %v13836_v42 = vsub.f32 %v13630_v15, %v4843_v3  ;;  %v4924_v29 = vsel %vm548_vm0, %v4890_v40, 0.0  ;;  %v4921_v7 = vsel %vm548_vm0, %v4889_v53, 0.0 }
 0xeb4   : > { %v4794_v1 = vpop.xlane.xlu1 %4793  ;;  %v4791_v14 = vpop.xlane.xlu0 %4790  ;;  %4925 = vadd.xlane.f32.xlu1 %v4924_v29  ;;  %4922 = vadd.xlane.f32.xlu0 %v4921_v7 }
 0xeb5   : > { %v4846_v46 = vmul.f32 0.03125, %v4794_v1  ;;  %v4845_v13 = vmul.f32 0.03125, %v4791_v14  ;;  %v4908_v37 = vmul.f32 %v13833_v58, %v13833_v58  ;;  %v4907_v35 = vmul.f32 %v13836_v42, %v13836_v42 }
 0xeb7   : > { %v13845_v5 = vsub.f32 %v13642_v34, %v4846_v46  ;;  %v13848_v18 = vsub.f32 %v13645_v59, %v4845_v13  ;;  %v4978_v3 = vsel %vm548_vm0, %v4908_v37, 0.0  ;;  %v4975_v40 = vsel %vm548_vm0, %v4907_v35, 0.0 }
 0xeb8   : > { %v4806_v53 = vpop.xlane.xlu1 %4805  ;;  %v4803_v29 = vpop.xlane.xlu0 %4802  ;;  %4979 = vadd.xlane.f32.xlu1 %v4978_v3  ;;  %4976 = vadd.xlane.f32.xlu0 %v4975_v40 }
 0xeb9   : > { %v4850_v7 = vmul.f32 0.03125, %v4806_v53  ;;  %v4849_v1 = vmul.f32 0.03125, %v4803_v29  ;;  %v4910_v14 = vmul.f32 %v13845_v5, %v13845_v5  ;;  %v4909_v46 = vmul.f32 %v13848_v18, %v13848_v18 }
 0xebb   : > { %v13857_v22 = vsub.f32 %v13657_v41, %v4850_v7  ;;  %v13860_v13 = vsub.f32 %v13660_v16, %v4849_v1  ;;  %v4984_v37 = vsel %vm548_vm0, %v4910_v14, 0.0  ;;  %v4981_v35 = vsel %vm548_vm0, %v4909_v46, 0.0 }
 0xebc   : > { %v4740_v3 = vpop.xlane.xlu1 %4739  ;;  %v4737_v40 = vpop.xlane.xlu0 %4736  ;;  %4985 = vadd.xlane.f32.xlu1 %v4984_v37  ;;  %4982 = vadd.xlane.f32.xlu0 %v4981_v35 }
 0xebd   : > { %v4828_v53 = vmul.f32 0.03125, %v4740_v3  ;;  %v4827_v29 = vmul.f32 0.03125, %v4737_v40  ;;  %v4914_v20 = vmul.f32 %v13857_v22, %v13857_v22  ;;  %v4913_v7 = vmul.f32 %v13860_v13, %v13860_v13 }
 0xebf   : > { %v13869_v48 = vsub.f32 %v13667_v32, %v4828_v53  ;;  %v13872_v1 = vsub.f32 %v13674_v0, %v4827_v29  ;;  %v4996_v14 = vsel %vm548_vm0, %v4914_v20, 0.0  ;;  %v4993_v46 = vsel %vm548_vm0, %v4913_v7, 0.0 }
 0xec0   : > { %v4746_v37 = vpop.xlane.xlu1 %4745  ;;  %v4743_v35 = vpop.xlane.xlu0 %4742  ;;  %4997 = vadd.xlane.f32.xlu1 %v4996_v14  ;;  %4994 = vadd.xlane.f32.xlu0 %v4993_v46 }
 0xec1   : > { %v4830_v3 = vmul.f32 0.03125, %v4746_v37  ;;  %v4829_v40 = vmul.f32 0.03125, %v4743_v35  ;;  %v4892_v45 = vmul.f32 %v13869_v48, %v13869_v48  ;;  %v4891_v53 = vmul.f32 %v13872_v1, %v13872_v1 }
 0xec3   : > { %v13881_v6 = vsub.f32 %v13688_v61, %v4830_v3  ;;  %v13884_v29 = vsub.f32 %v13691_v25, %v4829_v40  ;;  %v4930_v20 = vsel %vm548_vm0, %v4892_v45, 0.0  ;;  %v4927_v7 = vsel %vm548_vm0, %v4891_v53, 0.0 }
 0xec4   : > { %v4758_v14 = vpop.xlane.xlu1 %4757  ;;  %v4755_v46 = vpop.xlane.xlu0 %4754  ;;  %4931 = vadd.xlane.f32.xlu1 %v4930_v20  ;;  %4928 = vadd.xlane.f32.xlu0 %v4927_v7 }
 0xec5   : > { %v4834_v37 = vmul.f32 0.03125, %v4758_v14  ;;  %v4833_v35 = vmul.f32 0.03125, %v4755_v46  ;;  %v4894_v9 = vmul.f32 %v13881_v6, %v13881_v6  ;;  %v4893_v3 = vmul.f32 %v13884_v29, %v13884_v29 }
 0xec7   : > { %v13893_v36 = vsub.f32 %v13702_v38, %v4834_v37  ;;  %v13896_v40 = vsub.f32 %v13705_v52, %v4833_v35  ;;  %v4936_v45 = vsel %vm548_vm0, %v4894_v9, 0.0  ;;  %v4933_v53 = vsel %vm548_vm0, %v4893_v3, 0.0 }
 0xec8   : > { %v4800_v20 = vpop.xlane.xlu1 %4799  ;;  %v4797_v7 = vpop.xlane.xlu0 %4796  ;;  %4937 = vadd.xlane.f32.xlu1 %v4936_v45  ;;  %4934 = vadd.xlane.f32.xlu0 %v4933_v53 }
 0xec9   : > { %v4848_v14 = vmul.f32 0.03125, %v4800_v20  ;;  %v4847_v46 = vmul.f32 0.03125, %v4797_v7  ;;  %v4898_v23 = vmul.f32 %v13893_v36, %v13893_v36  ;;  %v4897_v37 = vmul.f32 %v13896_v40, %v13896_v40 }
 0xecb   : > { %v13905_v17 = vsub.f32 %v13716_v4, %v4848_v14  ;;  %v13908_v35 = vsub.f32 %v13719_v10, %v4847_v46  ;;  %v4948_v9 = vsel %vm548_vm0, %v4898_v23, 0.0  ;;  %v4945_v3 = vsel %vm548_vm0, %v4897_v37, 0.0 }
 0xecc   : > { %v4812_v45 = vpop.xlane.xlu1 %4811  ;;  %v4809_v53 = vpop.xlane.xlu0 %4808  ;;  %4949 = vadd.xlane.f32.xlu1 %v4948_v9  ;;  %4946 = vadd.xlane.f32.xlu0 %v4945_v3  ;;  %v9987_v9 = vld [vmem:[%s16393_s8 + $0x20] sm:$0xff]  ;;  %v9988_v3 = vld [vmem:[%s16393_s8 + $0x28] sm:$0xff] }
 0xecd   : > { %v4852_v20 = vmul.f32 0.03125, %v4812_v45  ;;  %v4851_v7 = vmul.f32 0.03125, %v4809_v53  ;;  %v4912_v56 = vmul.f32 %v13905_v17, %v13905_v17  ;;  %v4911_v14 = vmul.f32 %v13908_v35, %v13908_v35 }
 0xecf   : > { %v13917_v8 = vsub.f32 %v13726_v55, %v4852_v20  ;;  %v13920_v46 = vsub.f32 %v13733_v31, %v4851_v7  ;;  %v4990_v23 = vsel %vm548_vm0, %v4912_v56, 0.0  ;;  %v4987_v37 = vsel %vm548_vm0, %v4911_v14, 0.0 }
 0xed0   : > { %v4818_v45 = vpop.xlane.xlu1 %4817  ;;  %v4815_v53 = vpop.xlane.xlu0 %4814  ;;  %4991 = vadd.xlane.f32.xlu1 %v4990_v23  ;;  %4988 = vadd.xlane.f32.xlu0 %v4987_v37  ;;  %v10794_v20 = vpack.c.bf16 %v9988_v3, %v9987_v9  ;;  %v9989_v37 = vld [vmem:[%s16393_s8 + $0x30] sm:$0xff]  ;;  %v9990_v9 = vld [vmem:[%s16393_s8 + $0x38] sm:$0xff] }
 0xed1   : > { %v4854_v55 = vmul.f32 0.03125, %v4818_v45  ;;  %v4853_v7 = vmul.f32 0.03125, %v4815_v53  ;;  %v4916_v56 = vmul.f32 %v13917_v8, %v13917_v8  ;;  %v4915_v14 = vmul.f32 %v13920_v46, %v13920_v46 }
 0xed2   : > { %10795 = vmatprep.subr.bf16.mxu0 %v10794_v20 }
 0xed3   : > { %v13935_v31 = vsub.f32 %v13742_v39, %v4854_v55  ;;  %v13938_v41 = vsub.f32 %v13745_v57, %v4853_v7  ;;  %v5002_v16 = vsel %vm548_vm0, %v4916_v56, 0.0  ;;  %v4999_v23 = vsel %vm548_vm0, %v4915_v14, 0.0  ;;  %10797 = vmatpush3.bf16.msra.mxu0 %v10794_v20 }
 0xed4   : > { %v4752_v3 = vpop.xlane.xlu1 %4751  ;;  %v4749_v45 = vpop.xlane.xlu0 %4748  ;;  %5003 = vadd.xlane.f32.xlu1 %v5002_v16  ;;  %5000 = vadd.xlane.f32.xlu0 %v4999_v23  ;;  %v10798_v55 = vpack.c.bf16 %v9990_v9, %v9989_v37 }
 0xed5   : > { %v4832_v53 = vmul.f32 0.03125, %v4752_v3  ;;  %v4831_v7 = vmul.f32 0.03125, %v4749_v45  ;;  %v4918_v56 = vmul.f32 %v13935_v31, %v13935_v31  ;;  %v4917_v20 = vmul.f32 %v13938_v41, %v13938_v41 }
 0xed6   : > { %10799 = vmatprep.subr.bf16.mxu0 %v10798_v55 }
 0xed7   : > { %v13953_v14 = vsub.f32 %v13756_v2, %v4832_v53  ;;  %v13956_v39 = vsub.f32 %v13759_v28, %v4831_v7  ;;  %v5008_v57 = vsel %vm548_vm0, %v4918_v56, 0.0  ;;  %v5005_v16 = vsel %vm548_vm0, %v4917_v20, 0.0  ;;  %10801 = vmatpush3.bf16.msra.mxu0 %v10798_v55 }
 0xed8   : > { %v4764_v23 = vpop.xlane.xlu1 %4763  ;;  %v4761_v37 = vpop.xlane.xlu0 %4760  ;;  %5009 = vadd.xlane.f32.xlu1 %v5008_v57  ;;  %5006 = vadd.xlane.f32.xlu0 %v5005_v16 }
 0xed9   : > { %v4836_v9 = vmul.f32 0.03125, %v4764_v23  ;;  %v4835_v3 = vmul.f32 0.03125, %v4761_v37  ;;  %v4896_v45 = vmul.f32 %v13953_v14, %v13953_v14  ;;  %v4895_v53 = vmul.f32 %v13956_v39, %v13956_v39 }
 0xedb   : > { %v13965_v7 = vsub.f32 %v13769_v26, %v4836_v9  ;;  %v13968_v56 = vsub.f32 %v13772_v47, %v4835_v3  ;;  %v4942_v55 = vsel %vm548_vm0, %v4896_v45, 0.0  ;;  %v4939_v20 = vsel %vm548_vm0, %v4895_v53, 0.0 }
 0xedc   : > { %v4770_v57 = vpop.xlane.xlu1 %4769  ;;  %v4767_v16 = vpop.xlane.xlu0 %4766  ;;  %4943 = vadd.xlane.f32.xlu1 %v4942_v55  ;;  %4940 = vadd.xlane.f32.xlu0 %v4939_v20 }
 0xedd   : > { %v4838_v23 = vmul.f32 0.03125, %v4770_v57  ;;  %v4837_v37 = vmul.f32 0.03125, %v4767_v16  ;;  %v4900_v4 = vmul.f32 %v13965_v7, %v13965_v7  ;;  %v4899_v9 = vmul.f32 %v13968_v56, %v13968_v56 }
 0xedf   : > { %v13977_v10 = vsub.f32 %v13775_v60, %v4838_v23  ;;  %v13980_v3 = vsub.f32 %v13782_v54, %v4837_v37  ;;  %v4954_v45 = vsel %vm548_vm0, %v4900_v4, 0.0  ;;  %v4951_v53 = vsel %vm548_vm0, %v4899_v9, 0.0 }
 0xee0   : > { %v4824_v55 = vpop.xlane.xlu1 %4823  ;;  %v4821_v20 = vpop.xlane.xlu0 %4820  ;;  %4955 = vadd.xlane.f32.xlu1 %v4954_v45  ;;  %4952 = vadd.xlane.f32.xlu0 %v4951_v53 }
 0xee1   : > { %v4856_v57 = vmul.f32 0.03125, %v4824_v55  ;;  %v4855_v16 = vmul.f32 0.03125, %v4821_v20  ;;  %v4902_v34 = vmul.f32 %v13977_v10, %v13977_v10  ;;  %v4901_v23 = vmul.f32 %v13980_v3, %v13980_v3 }
 0xee3   : > { %v13989_v59 = vsub.f32 %v13790_v51, %v4856_v57  ;;  %v13992_v37 = vsub.f32 %v13793_v63, %v4855_v16  ;;  %v4960_v4 = vsel %vm548_vm0, %v4902_v34, 0.0  ;;  %v4957_v9 = vsel %vm548_vm0, %v4901_v23, 0.0 }
 0xee4   : > { %4961 = vadd.xlane.f32.xlu1 %v4960_v4  ;;  %v4776_v45 = vpop.xlane.xlu1 %4775  ;;  %4958 = vadd.xlane.f32.xlu0 %v4957_v9  ;;  %v4773_v53 = vpop.xlane.xlu0 %4772 }
 0xee5   : > { %v4840_v55 = vmul.f32 0.03125, %v4776_v45  ;;  %v4839_v20 = vmul.f32 0.03125, %v4773_v53  ;;  %v4920_v21 = vmul.f32 %v13989_v59, %v13989_v59  ;;  %v4919_v57 = vmul.f32 %v13992_v37, %v13992_v37 }
 0xee7   : > { %v14001_v51 = vsub.f32 %v13801_v30, %v4840_v55  ;;  %v14004_v16 = vsub.f32 %v13804_v62, %v4839_v20  ;;  %v5014_v34 = vsel %vm548_vm0, %v4920_v21, 0.0  ;;  %v5011_v23 = vsel %vm548_vm0, %v4919_v57, 0.0  ;;  %v10067_v21 = vld [vmem:[%s16387_s2 + $0x20] sm:$0xff]  ;;  %v10068_v55 = vld [vmem:[%s16387_s2 + $0x28] sm:$0xff] }
 0xee8   : > { %5015 = vadd.xlane.f32.xlu1 %v5014_v34  ;;  %5012 = vadd.xlane.f32.xlu0 %v5011_v23  ;;  %v10818_v20 = vpack.c.bf16 %v10068_v55, %v10067_v21 }
 0xee9   : > { %v4904_v4 = vmul.f32 %v14001_v51, %v14001_v51  ;;  %v4903_v9 = vmul.f32 %v14004_v16, %v14004_v16 }
 0xeea   : > { %10819 = vmatprep.subr.bf16.mxu0 %v10818_v20 }
 0xeeb   : > { %v4966_v45 = vsel %vm548_vm0, %v4904_v4, 0.0  ;;  %v4963_v53 = vsel %vm548_vm0, %v4903_v9, 0.0 }
 0xeec   : > { %4967 = vadd.xlane.f32.xlu1 %v4966_v45  ;;  %4964 = vadd.xlane.f32.xlu0 %v4963_v53 }
 0xf3d   : > { %v14020_v57 = vpop.xlane.xlu1 %4973  ;;  %v14022_v34 = vpop.xlane.xlu0 %4970 }
 0xf41   : > { %v4926_v23 = vpop.xlane.xlu1 %4925  ;;  %v4923_v4 = vpop.xlane.xlu0 %4922 }
 0xf42   : > { %v5018_v63 = vmul.f32 0.03125, %v4926_v23  ;;  %v5017_v9 = vmul.f32 0.03125, %v4923_v4  ;;  %v10070_v23 = vld [vmem:[%s16387_s2 + $0x38] sm:$0xff] }
 0xf44   : > { %v5050_v45 = vadd.f32 1e-05, %v5018_v63  ;;  %v5049_v53 = vadd.f32 1e-05, %v5017_v9  ;;  %v10069_v63 = vld [vmem:[%s16387_s2 + $0x30] sm:$0xff] }
 0xf45   : > { %v14024_v15 = vpop.xlane.xlu1 %4979  ;;  %v14026_v44 = vpop.xlane.xlu0 %4976  ;;  %v10822_v47 = vpack.c.bf16 %v10070_v23, %v10069_v63 }
 0xf46   : > { %11065 = vrsqrt.f32 %v5050_v45 }
 0xf47   : > { %11067 = vrsqrt.f32 %v5049_v53 }
 0xf49   : > { %v14028_v49 = vpop.xlane.xlu1 %4985  ;;  %v14030_v21 = vpop.xlane.xlu0 %4982 }
 0xf4d   : > { %v14032_v55 = vpop.xlane.xlu1 %4997  ;;  %v14034_v30 = vpop.xlane.xlu0 %4994 }
 0xf50   : > { %v11066_v62 = vpop.eup %11065 }
 0xf51   : > { %v11068_v4 = vpop.eup %11067  ;;  %v4932_v9 = vpop.xlane.xlu1 %4931  ;;  %v5114_v53 = vmul.f32 %v11066_v62, %v13821_v24 }
 0xf52   : > { %v4929_v45 = vpop.xlane.xlu0 %4928  ;;  %v5020_v60 = vmul.f32 0.03125, %v4932_v9  ;;  %v5113_v26 = vmul.f32 %v11068_v4, %v13824_v43 }
 0xf53   : > { %v5019_v54 = vmul.f32 0.03125, %v4929_v45 }
 0xf54   : > { %v5052_v38 = vadd.f32 1e-05, %v5020_v60  ;;  %10502 = vmatprep.mubr.msk.f32.mxu0 %vm548_vm0, %v5113_v26 }
 0xf55   : > { %v5051_v52 = vadd.f32 1e-05, %v5019_v54  ;;  %10503 = vmatmul.mubr.msk.f32.vlgmr.msra.gmra.mrb[8].mxu0 %vm548_vm0, %v5114_v53  ;;  %v4938_v2 = vpop.xlane.xlu1 %4937 }
 0xf56   : > { %v4935_v28 = vpop.xlane.xlu0 %4934  ;;  %11069 = vrsqrt.f32 %v5052_v38  ;;  %v5022_v61 = vmul.f32 0.03125, %v4938_v2  ;;  %10821 = vmatpush3.bf16.msra.mxu0 %v10818_v20 }
 0xf57   : > { %v5021_v25 = vmul.f32 0.03125, %v4935_v28  ;;  %11071 = vrsqrt.f32 %v5051_v52  ;;  %10823 = vmatprep.subr.bf16.mxu0 %v10822_v47 }
 0xf58   : > { %v5054_v62 = vadd.f32 1e-05, %v5022_v61 }
 0xf59   : > { %v5053_v24 = vadd.f32 1e-05, %v5021_v25  ;;  %v4950_v9 = vpop.xlane.xlu1 %4949 }
 0xf5a   : > { %v4947_v45 = vpop.xlane.xlu0 %4946  ;;  %11073 = vrsqrt.f32 %v5054_v62  ;;  %10825 = vmatpush3.bf16.msra.mxu0 %v10822_v47  ;;  %v5026_v62 = vmul.f32 0.03125, %v4950_v9 }
 0xf5b   : > { %11075 = vrsqrt.f32 %v5053_v24  ;;  %v5025_v28 = vmul.f32 0.03125, %v4947_v45 }
 0xf5c   : > { %v5058_v32 = vadd.f32 1e-05, %v5026_v62 }
 0xf5d   : > { %v14046_v60 = vpop.xlane.xlu1 %4991 }
 0xf5e   : > { %v14048_v26 = vpop.xlane.xlu0 %4988 }
 0xf60   : > { %v11070_v54 = vpop.eup %11069 }
 0xf61   : > { %v11072_v43 = vpop.eup %11071  ;;  %v14050_v63 = vpop.xlane.xlu1 %5003  ;;  %v5116_v52 = vmul.f32 %v11070_v54, %v13869_v48  ;;  %v5057_v48 = vadd.f32 1e-05, %v5025_v28 }
 0xf62   : > { %v14052_v38 = vpop.xlane.xlu0 %5000  ;;  %v5115_v61 = vmul.f32 %v11072_v43, %v13872_v1 }
 0xf63   : > { %11077 = vrsqrt.f32 %v5057_v48 }
 0xf64   : > { %v11074_v25 = vpop.eup %11073  ;;  %10505 = vmatprep.mubr.msk.f32.mxu0 %vm548_vm0, %v5115_v61 }
 0xf65   : > { %v11076_v2 = vpop.eup %11075  ;;  %10506 = vmatmul.mubr.msk.f32.gmra.mrb[10].mxu0 %vm548_vm0, %v5116_v52  ;;  %v14058_v47 = vpop.xlane.xlu1 %5009  ;;  %v5118_v23 = vmul.f32 %v11074_v25, %v13881_v6 }
 0xf66   : > { %v14060_v20 = vpop.xlane.xlu0 %5006  ;;  %v5117_v4 = vmul.f32 %v11076_v2, %v13884_v29 }
 0xf68   : > { %10508 = vmatprep.mubr.msk.f32.mxu0 %vm548_vm0, %v5117_v4 }
 0xf69   : > { %10509 = vmatmul.mubr.msk.f32.gmra.mrb[12].mxu0 %vm548_vm0, %v5118_v23  ;;  %v4944_v1 = vpop.xlane.xlu1 %4943 }
 0xf6a   : > { %v4941_v53 = vpop.xlane.xlu0 %4940  ;;  %v5024_v24 = vmul.f32 0.03125, %v4944_v1  ;;  %v5033_v1 = vmul.f32 0.03125, %v14022_v34 }
 0xf6b   : > { %v5023_v45 = vmul.f32 0.03125, %v4941_v53 }
 0xf6c   : > { %v5056_v54 = vadd.f32 1e-05, %v5024_v24 }
 0xf6d   : > { %v5055_v43 = vadd.f32 1e-05, %v5023_v45  ;;  %v4956_v52 = vpop.xlane.xlu1 %4955  ;;  %v11078_v24 = vpop.eup %11077 }
 0xf6e   : > { %v4953_v61 = vpop.xlane.xlu0 %4952  ;;  %11079 = vrsqrt.f32 %v5056_v54  ;;  %v5028_v6 = vmul.f32 0.03125, %v4956_v52 }
 0xf6f   : > { %v5027_v25 = vmul.f32 0.03125, %v4953_v61  ;;  %11081 = vrsqrt.f32 %v5055_v43  ;;  %v5034_v43 = vmul.f32 0.03125, %v14020_v57 }
 0xf70   : > { %11083 = vrsqrt.f32 %v5058_v32  ;;  %v5060_v23 = vadd.f32 1e-05, %v5028_v6  ;;  %v5065_v32 = vadd.f32 1e-05, %v5033_v1 }
 0xf71   : > { %v5059_v29 = vadd.f32 1e-05, %v5027_v25  ;;  %v4962_v2 = vpop.xlane.xlu1 %4961 }
 0xf72   : > { %v4959_v28 = vpop.xlane.xlu0 %4958  ;;  %v5030_v4 = vmul.f32 0.03125, %v4962_v2 }
 0xf73   : > { %v5029_v0 = vmul.f32 0.03125, %v4959_v28  ;;  %11085 = vrsqrt.f32 %v5059_v29  ;;  %v5035_v29 = vmul.f32 0.03125, %v14026_v44  ;;  %v5037_v44 = vmul.f32 0.03125, %v14030_v21 }
 0xf74   : > { %11087 = vrsqrt.f32 %v5060_v23  ;;  %v5062_v62 = vadd.f32 1e-05, %v5030_v4  ;;  %v5121_v4 = vmul.f32 %v11078_v24, %v13896_v40 }
 0xf75   : > { %v5061_v9 = vadd.f32 1e-05, %v5029_v0  ;;  %v14067_v53 = vpop.xlane.xlu1 %5015 }
 0xf76   : > { %v14069_v48 = vpop.xlane.xlu0 %5012 }
 0xf77   : > { %11089 = vrsqrt.f32 %v5061_v9  ;;  %v5066_v9 = vadd.f32 1e-05, %v5034_v43  ;;  %v5039_v43 = vmul.f32 0.03125, %v14048_v26 }
 0xf78   : > { %v11080_v45 = vpop.eup %11079  ;;  %11091 = vrsqrt.f32 %v5062_v62 }
 0xf79   : > { %v11082_v54 = vpop.eup %11081  ;;  %v4968_v52 = vpop.xlane.xlu1 %4967  ;;  %v5120_v6 = vmul.f32 %v11080_v45, %v13953_v14  ;;  %11093 = vrsqrt.f32 %v5065_v32  ;;  %v5036_v14 = vmul.f32 0.03125, %v14024_v15  ;;  %v5069_v15 = vadd.f32 1e-05, %v5037_v44 }
 0xf7a   : > { %v4965_v61 = vpop.xlane.xlu0 %4964  ;;  %v5032_v0 = vmul.f32 0.03125, %v4968_v52  ;;  %v5119_v25 = vmul.f32 %v11082_v54, %v13956_v39  ;;  %v11084_v2 = vpop.eup %11083  ;;  %v5067_v39 = vadd.f32 1e-05, %v5035_v29  ;;  %v5038_v54 = vmul.f32 0.03125, %v14028_v49 }
 0xf7b   : > { %v5031_v34 = vmul.f32 0.03125, %v4965_v61  ;;  %v5122_v1 = vmul.f32 %v11084_v2, %v13893_v36  ;;  %v5068_v24 = vadd.f32 1e-05, %v5036_v14  ;;  %v5040_v52 = vmul.f32 0.03125, %v14046_v60 }
 0xf7c   : > { %v5064_v28 = vadd.f32 1e-05, %v5032_v0  ;;  %10511 = vmatprep.mubr.msk.f32.mxu0 %vm548_vm0, %v5119_v25  ;;  %v5041_v61 = vmul.f32 0.03125, %v14034_v30  ;;  %v5043_v2 = vmul.f32 0.03125, %v14052_v38  ;;  %v5046_v14 = vmul.f32 0.03125, %v14058_v47 }
 0xf7d   : > { %v5063_v23 = vadd.f32 1e-05, %v5031_v34  ;;  %v11086_v57 = vpop.eup %11085  ;;  %10512 = vmatmul.mubr.msk.f32.gmra.mrb[14].mxu0 %vm548_vm0, %v5120_v6  ;;  %v5071_v6 = vadd.f32 1e-05, %v5039_v43  ;;  %v5042_v34 = vmul.f32 0.03125, %v14032_v55  ;;  %v5045_v55 = vmul.f32 0.03125, %v14060_v20 }
 0xf7e   : > { %11095 = vrsqrt.f32 %v5064_v28  ;;  %10514 = vmatprep.mubr.msk.f32.mxu0 %vm548_vm0, %v5121_v4  ;;  %v11088_v62 = vpop.eup %11087  ;;  %v5123_v45 = vmul.f32 %v11086_v57, %v13968_v56  ;;  %v5070_v56 = vadd.f32 1e-05, %v5038_v54  ;;  %v5072_v25 = vadd.f32 1e-05, %v5040_v52 }
 0xf7f   : > { %11097 = vrsqrt.f32 %v5063_v23  ;;  %v5124_v21 = vmul.f32 %v11088_v62, %v13965_v7  ;;  %v5073_v29 = vadd.f32 1e-05, %v5041_v61  ;;  %v5074_v23 = vadd.f32 1e-05, %v5042_v34  ;;  %v10029_v61 = vld [vmem:[%s16395_s10 + $0x60] sm:$0xff] }
 0xf80   : > { %11099 = vrsqrt.f32 %v5066_v9  ;;  %v5048_v62 = vmul.f32 0.03125, %v14067_v53  ;;  %v14169_v34 = vld [vmem:[%s16394_s9 + $0x1] ss:$0 sm:$0xff] }
 0xf81   : > { %v11090_v40 = vpop.eup %11089  ;;  %10515 = vmatmul.mubr.msk.f32.gmra.mrb[16].mxu0 %vm548_vm0, %v5122_v1  ;;  %11101 = vrsqrt.f32 %v5067_v39  ;;  %v5047_v39 = vmul.f32 0.03125, %v14069_v48 }
 0xf82   : > { %10517 = vmatprep.mubr.msk.f32.mxu0 %vm548_vm0, %v5123_v45  ;;  %v11092_v32 = vpop.eup %11091  ;;  %v5125_v36 = vmul.f32 %v11090_v40, %v13980_v3  ;;  %11103 = vrsqrt.f32 %v5068_v24 }
 0xf83   : > { %v11094_v49 = vpop.eup %11093  ;;  %11105 = vrsqrt.f32 %v5069_v15  ;;  %v5126_v26 = vmul.f32 %v11092_v32, %v13977_v10  ;;  %v5079_v47 = vadd.f32 1e-05, %v5047_v39 }
 0xf84   : > { %11107 = vrsqrt.f32 %v5070_v56  ;;  %v5129_v10 = vmul.f32 %v11094_v49, %v13814_v33 }
 0xf85   : > { %10518 = vmatmul.mubr.msk.f32.gmra.mrb[18].mxu0 %vm548_vm0, %v5124_v21  ;;  %11109 = vrsqrt.f32 %v5071_v6  ;;  %v10030_v6 = vld [vmem:[%s16395_s10 + $0x68] sm:$0xff] }
 0xf86   : > { %10520 = vmatprep.mubr.msk.f32.mxu0 %vm548_vm0, %v5125_v36  ;;  %11111 = vrsqrt.f32 %v5072_v25 }
 0xf87   : > { %11113 = vrsqrt.f32 %v5073_v29 }
 0xf88   : > { %v11096_v0 = vpop.eup %11095  ;;  %11115 = vrsqrt.f32 %v5074_v23 }
 0xf89   : > { %v11098_v7 = vpop.eup %11097  ;;  %10521 = vmatmul.mubr.msk.f32.gmra.mrb[20].mxu0 %vm548_vm0, %v5126_v26  ;;  %v5128_v3 = vmul.f32 %v11096_v0, %v14001_v51  ;;  %v5044_v51 = vmul.f32 0.03125, %v14050_v63  ;;  %v5077_v63 = vadd.f32 1e-05, %v5045_v55  ;;  %v10031_v26 = vld [vmem:[%s16395_s10 + $0x70] sm:$0xff]  ;;  %v10810_v0 = vpack.c.bf16 %v10030_v6, %v10029_v61  ;;  %v10074_v55 = vld [vmem:[%s16388_s3 + $0x28] sm:$0xff] }
 0xf8a   : > { %v5127_v60 = vmul.f32 %v11098_v7, %v14004_v16  ;;  %v11100_v30 = vpop.eup %11099  ;;  %v5075_v16 = vadd.f32 1e-05, %v5043_v2  ;;  %v10032_v7 = vld [vmem:[%s16395_s10 + $0x78] sm:$0xff] }
 0xf8b   : > { %v11102_v28 = vpop.eup %11101  ;;  %v5130_v38 = vmul.f32 %v11100_v30, %v13811_v12  ;;  %v5076_v33 = vadd.f32 1e-05, %v5044_v51 }
 0xf8c   : > { %10523 = vmatprep.mubr.msk.f32.mxu0 %vm548_vm0, %v5127_v60  ;;  %v11104_v4 = vpop.eup %11103  ;;  %v5131_v57 = vmul.f32 %v11102_v28, %v13836_v42  ;;  %11117 = vrsqrt.f32 %v5075_v16  ;;  %v5078_v42 = vadd.f32 1e-05, %v5046_v14  ;;  %v10073_v16 = vld [vmem:[%s16388_s3 + $0x20] sm:$0xff] }
 0xf8d   : > { %10524 = vmatmul.mubr.msk.f32.gmra.mrb[22].mxu0 %vm548_vm0, %v5128_v3  ;;  %v11106_v9 = vpop.eup %11105  ;;  %v5132_v20 = vmul.f32 %v11104_v4, %v13833_v58  ;;  %11119 = vrsqrt.f32 %v5076_v33  ;;  %v10814_v3 = vpack.c.bf16 %v10032_v7, %v10031_v26  ;;  %v10826_v4 = vpack.c.bf16 %v10074_v55, %v10073_v16 }
 0xf8e   : > { %10526 = vmatprep.mubr.msk.f32.mxu0 %vm548_vm0, %v5129_v10  ;;  %v11108_v44 = vpop.eup %11107  ;;  %v5133_v12 = vmul.f32 %v11106_v9, %v13848_v18  ;;  %11121 = vrsqrt.f32 %v5077_v63  ;;  %v5080_v18 = vadd.f32 1e-05, %v5048_v62 }
 0xf8f   : > { %v11110_v1 = vpop.eup %11109  ;;  %v5134_v45 = vmul.f32 %v11108_v44, %v13845_v5  ;;  %11123 = vrsqrt.f32 %v5078_v42  ;;  %10827 = vmatprep.subr.bf16.mxu0 %v10826_v4 }
 0xf90   : > { %v11112_v40 = vpop.eup %11111  ;;  %v5135_v48 = vmul.f32 %v11110_v1, %v13908_v35  ;;  %11125 = vrsqrt.f32 %v5079_v47 }
 0xf91   : > { %10527 = vmatmul.mubr.msk.f32.gmra.mrb[24].mxu0 %vm548_vm0, %v5130_v38  ;;  %v11114_v58 = vpop.eup %11113  ;;  %v5136_v24 = vmul.f32 %v11112_v40, %v13905_v17  ;;  %11127 = vrsqrt.f32 %v5080_v18 }
 0xf92   : > { %10529 = vmatprep.mubr.msk.f32.mxu0 %vm548_vm0, %v5131_v57  ;;  %v11116_v53 = vpop.eup %11115  ;;  %v5137_v54 = vmul.f32 %v11114_v58, %v13860_v13 }
 0xf93   : > { %v5138_v5 = vmul.f32 %v11116_v53, %v13857_v22 }
 0xf95   : > { %10530 = vmatmul.mubr.msk.f32.gmra.mrb[26].mxu0 %vm548_vm0, %v5132_v20 }
 0xf96   : > { %10532 = vmatprep.mubr.msk.f32.mxu0 %vm548_vm0, %v5133_v12  ;;  %v11118_v15 = vpop.eup %11117 }
 0xf97   : > { %v11120_v35 = vpop.eup %11119  ;;  %v5139_v43 = vmul.f32 %v11118_v15, %v13920_v46 }
 0xf98   : > { %v11122_v21 = vpop.eup %11121  ;;  %v5140_v17 = vmul.f32 %v11120_v35, %v13917_v8  ;;  %v10025_v8 = vld [vmem:[%s16395_s10 + $0x40] sm:$0xff] }
 0xf99   : > { %10533 = vmatmul.mubr.msk.f32.gmra.mrb[28].mxu0 %vm548_vm0, %v5134_v45  ;;  %v11124_v32 = vpop.eup %11123  ;;  %v5141_v13 = vmul.f32 %v11122_v21, %v13938_v41  ;;  %v10026_v41 = vld [vmem:[%s16395_s10 + $0x48] sm:$0xff] }
 0xf9a   : > { %10535 = vmatprep.mubr.msk.f32.mxu0 %vm548_vm0, %v5135_v48  ;;  %v11126_v36 = vpop.eup %11125  ;;  %v5142_v22 = vmul.f32 %v11124_v32, %v13935_v31  ;;  %v10802_v31 = vpack.c.bf16 %v10026_v41, %v10025_v8 }
 0xf9b   : > { %v11128_v56 = vpop.eup %11127  ;;  %v5143_v46 = vmul.f32 %v11126_v36, %v13992_v37  ;;  %v10028_v37 = vld [vmem:[%s16395_s10 + $0x58] sm:$0xff] }
 0xf9c   : > { %v5144_v52 = vmul.f32 %v11128_v56, %v13989_v59  ;;  %10803 = vmatprep.subr.bf16.mxu1 %v10802_v31  ;;  %v10027_v59 = vld [vmem:[%s16395_s10 + $0x50] sm:$0xff] }
 0xf9d   : > { %10536 = vmatmul.mubr.msk.f32.gmra.mrb[30].mxu0 %vm548_vm0, %v5136_v24  ;;  %10805 = vmatpush3.bf16.msra.mxu1 %v10802_v31  ;;  %v10806_v49 = vpack.c.bf16 %v10028_v37, %v10027_v59 }
 0xf9e   : > { %10538 = vmatprep.mubr.msk.f32.mxu0 %vm548_vm0, %v5137_v54 }
 0xf9f   : > { %10807 = vmatprep.subr.bf16.mxu1 %v10806_v49 }
 0xfa1   : > { %10539 = vmatmul.mubr.msk.f32.gmra.mrb[32].mxu0 %vm548_vm0, %v5138_v5  ;;  %10809 = vmatpush3.bf16.msra.mxu1 %v10806_v49 }
 0xfa2   : > { %10541 = vmatprep.mubr.msk.f32.mxu0 %vm548_vm0, %v5139_v43  ;;  %10811 = vmatprep.subr.bf16.mxu1 %v10810_v0 }
 0xfa5   : > { %10542 = vmatmul.mubr.msk.f32.gmra.mrb[34].mxu0 %vm548_vm0, %v5140_v17  ;;  %10813 = vmatpush3.bf16.msra.mxu1 %v10810_v0 }
 0xfa6   : > { %10544 = vmatprep.mubr.msk.f32.mxu0 %vm548_vm0, %v5141_v13  ;;  %10815 = vmatprep.subr.bf16.mxu1 %v10814_v3 }
 0xfa9   : > { %10545 = vmatmul.mubr.msk.f32.gmra.mrb[36].mxu0 %vm548_vm0, %v5142_v22  ;;  %10817 = vmatpush3.bf16.msra.mxu1 %v10814_v3 }
 0xfaa   : > { %10547 = vmatprep.mubr.msk.f32.mxu0 %vm548_vm0, %v5143_v46 }
 0xfad   : > { %10548 = vmatmul.mubr.msk.f32.gmra.mrb[38].mxu0 %vm548_vm0, %v5144_v52 }
 0xfae   : > { %10622 = vmatprep.mubr.msk.f32.mxu0 %vm548_vm0, %v13575_v50 }
 0xfb1   : > { %10623 = vmatmul.mubr.msk.f32.vlgmr.msra.gmra.mrb[40].mxu0 %vm548_vm0, %v13578_v19 }
 0xfb2   : > { %10829 = vmatpush3.bf16.msra.mxu0 %v10826_v4 }
0x1028   : > { %v10504_v25 = vpop.f32.mrb[8].mxu0 }
0x1029   : > { %v5326_v60 = vadd.f32 %v10504_v25, %v14169_v34  ;;  %v5320_v29 = vpop.f32.mrb[9].mxu0 }
0x102a   : > { %v5321_v2 = vadd.f32 %v14169_v34, %v5320_v29 }
0x102b   : > { %v5480_v30 = vmul.f32 %v5326_v60, %v5326_v60 }
0x102c   : > { %v5479_v10 = vmul.f32 %v5321_v2, %v5321_v2 }
0x102d   : > { %v5512_v28 = vmul.f32 %v5480_v30, %v5326_v60 }
0x102e   : > { %v5511_v23 = vmul.f32 %v5479_v10, %v5321_v2 }
0x102f   : > { %v5544_v51 = vmul.f32 0.044715, %v5512_v28 }
0x1030   : > { %v5543_v38 = vmul.f32 0.044715, %v5511_v23 }
0x1031   : > { %v5576_v57 = vadd.f32 %v5544_v51, %v5326_v60 }
0x1032   : > { %v5575_v9 = vadd.f32 %v5543_v38, %v5321_v2 }
0x1033   : > { %v5608_v33 = vmul.f32 0.7978846, %v5576_v57 }
0x1034   : > { %v5607_v14 = vmul.f32 0.7978846, %v5575_v9 }
0x1035   : > { %11129 = vtanh.f32 %v5608_v33 }
0x1036   : > { %11131 = vtanh.f32 %v5607_v14 }
0x1038   : > { %v10507_v63 = vpop.f32.mrb[10].mxu0 }
0x1039   : > { %v14180_v39 = vadd.f32 %v10507_v63, %v14169_v34  ;;  %v5330_v20 = vpop.f32.mrb[11].mxu0 }
0x103a   : > { %v5331_v44 = vadd.f32 %v14169_v34, %v5330_v20 }
0x103b   : > { %v5482_v12 = vmul.f32 %v14180_v39, %v14180_v39 }
0x103c   : > { %v5481_v1 = vmul.f32 %v5331_v44, %v5331_v44  ;;  %v10510_v42 = vpop.f32.mrb[12].mxu0 }
0x103d   : > { %v5514_v62 = vmul.f32 %v5482_v12, %v14180_v39  ;;  %v14187_v47 = vadd.f32 %v10510_v42, %v14169_v34  ;;  %v5340_v45 = vpop.f32.mrb[13].mxu0 }
0x103e   : > { %v5513_v40 = vmul.f32 %v5481_v1, %v5331_v44  ;;  %v14190_v48 = vadd.f32 %v14169_v34, %v5340_v45 }
0x103f   : > { %v11130_v58 = vpop.eup %11129  ;;  %v5546_v18 = vmul.f32 0.044715, %v5514_v62  ;;  %v5484_v24 = vmul.f32 %v14187_v47, %v14187_v47 }
0x1040   : > { %v11132_v53 = vpop.eup %11131  ;;  %v5672_v54 = vadd.f32 1.0, %v11130_v58  ;;  %v5545_v15 = vmul.f32 0.044715, %v5513_v40  ;;  %v5483_v5 = vmul.f32 %v14190_v48, %v14190_v48 }
0x1041   : > { %v5578_v35 = vadd.f32 %v5546_v18, %v14180_v39  ;;  %v5516_v43 = vmul.f32 %v5484_v24, %v14187_v47  ;;  %v5671_v21 = vadd.f32 1.0, %v11132_v53 }
0x1042   : > { %v5704_v17 = vmul.f32 0.5, %v5672_v54  ;;  %v5577_v32 = vadd.f32 %v5545_v15, %v5331_v44  ;;  %v5515_v13 = vmul.f32 %v5483_v5, %v14190_v48 }
0x1043   : > { %v5610_v36 = vmul.f32 0.7978846, %v5578_v35  ;;  %v5548_v22 = vmul.f32 0.044715, %v5516_v43  ;;  %v5703_v56 = vmul.f32 0.5, %v5671_v21 }
0x1044   : > { %v5609_v46 = vmul.f32 0.7978846, %v5577_v32  ;;  %v5547_v52 = vmul.f32 0.044715, %v5515_v13  ;;  %v5736_v31 = vmul.f32 %v5704_v17, %v5326_v60 }
0x1045   : > { %11133 = vtanh.f32 %v5610_v36  ;;  %v5580_v8 = vadd.f32 %v5548_v22, %v14187_v47  ;;  %v5735_v41 = vmul.f32 %v5703_v56, %v5321_v2 }
0x1046   : > { %11135 = vtanh.f32 %v5609_v46  ;;  %v5579_v59 = vadd.f32 %v5547_v52, %v14190_v48 }
0x1047   : > { %v5612_v37 = vmul.f32 0.7978846, %v5580_v8  ;;  %10566 = vmatprep.mubr.msk.f32.mxu1 %vm3919_vm3, %v5735_v41 }
0x1048   : > { %v5611_v49 = vmul.f32 0.7978846, %v5579_v59  ;;  %10567 = vmatmul.mubr.msk.f32.vlgmr.msra.gmra.mrb[34].mxu1 %vm3919_vm3, %v5736_v31 }
0x1049   : > { %11137 = vtanh.f32 %v5612_v37 }
0x104a   : > { %11139 = vtanh.f32 %v5611_v49 }
0x104f   : > { %v11134_v61 = vpop.eup %11133 }
0x1050   : > { %v11136_v6 = vpop.eup %11135  ;;  %v10513_v26 = vpop.f32.mrb[14].mxu0  ;;  %v5674_v0 = vadd.f32 1.0, %v11134_v61 }
0x1051   : > { %v14204_v7 = vadd.f32 %v10513_v26, %v14169_v34  ;;  %v5350_v3 = vpop.f32.mrb[15].mxu0  ;;  %v5673_v25 = vadd.f32 1.0, %v11136_v6 }
0x1052   : > { %v14207_v60 = vadd.f32 %v14169_v34, %v5350_v3  ;;  %v5706_v29 = vmul.f32 0.5, %v5674_v0 }
0x1053   : > { %v11138_v2 = vpop.eup %11137  ;;  %v5486_v30 = vmul.f32 %v14204_v7, %v14204_v7  ;;  %v5705_v10 = vmul.f32 0.5, %v5673_v25 }
0x1054   : > { %v11140_v28 = vpop.eup %11139  ;;  %v5485_v23 = vmul.f32 %v14207_v60, %v14207_v60  ;;  %v10516_v51 = vpop.f32.mrb[16].mxu0  ;;  %v5676_v16 = vadd.f32 1.0, %v11138_v2  ;;  %v5738_v63 = vmul.f32 %v5706_v29, %v14180_v39 }
0x1055   : > { %v5518_v55 = vmul.f32 %v5486_v30, %v14204_v7  ;;  %v14215_v38 = vadd.f32 %v10516_v51, %v14169_v34  ;;  %v5360_v4 = vpop.f32.mrb[17].mxu0  ;;  %v5737_v57 = vmul.f32 %v5705_v10, %v5331_v44  ;;  %v5675_v9 = vadd.f32 1.0, %v11140_v28 }
0x1056   : > { %v5517_v33 = vmul.f32 %v5485_v23, %v14207_v60  ;;  %v14219_v14 = vadd.f32 %v14169_v34, %v5360_v4  ;;  %v5708_v20 = vmul.f32 0.5, %v5676_v16 }
0x1057   : > { %v5550_v12 = vmul.f32 0.044715, %v5518_v55  ;;  %v5488_v1 = vmul.f32 %v14215_v38, %v14215_v38  ;;  %10569 = vmatprep.mubr.msk.f32.mxu1 %vm3919_vm3, %v5737_v57  ;;  %v5707_v42 = vmul.f32 0.5, %v5675_v9 }
0x1058   : > { %v5549_v62 = vmul.f32 0.044715, %v5517_v33  ;;  %v5487_v44 = vmul.f32 %v14219_v14, %v14219_v14  ;;  %v10519_v45 = vpop.f32.mrb[18].mxu0  ;;  %10570 = vmatmul.mubr.msk.f32.gmra.mrb[36].mxu1 %vm3919_vm3, %v5738_v63  ;;  %v5740_v5 = vmul.f32 %v5708_v20, %v14187_v47 }
0x1059   : > { %v5582_v40 = vadd.f32 %v5550_v12, %v14204_v7  ;;  %v5520_v58 = vmul.f32 %v5488_v1, %v14215_v38  ;;  %v14231_v39 = vadd.f32 %v10519_v45, %v14169_v34  ;;  %v5370_v18 = vpop.f32.mrb[19].mxu0  ;;  %v5739_v24 = vmul.f32 %v5707_v42, %v14190_v48 }
0x105a   : > { %v5581_v53 = vadd.f32 %v5549_v62, %v14207_v60  ;;  %v5519_v54 = vmul.f32 %v5487_v44, %v14219_v14  ;;  %v14237_v15 = vadd.f32 %v14169_v34, %v5370_v18 }
0x105b   : > { %v5614_v35 = vmul.f32 0.7978846, %v5582_v40  ;;  %v5552_v43 = vmul.f32 0.044715, %v5520_v58  ;;  %v5490_v21 = vmul.f32 %v14231_v39, %v14231_v39  ;;  %10572 = vmatprep.mubr.msk.f32.mxu1 %vm3919_vm3, %v5739_v24 }
0x105c   : > { %v5613_v17 = vmul.f32 0.7978846, %v5581_v53  ;;  %v5551_v32 = vmul.f32 0.044715, %v5519_v54  ;;  %v5489_v48 = vmul.f32 %v14237_v15, %v14237_v15  ;;  %v10522_v13 = vpop.f32.mrb[20].mxu0  ;;  %10573 = vmatmul.mubr.msk.f32.gmra.mrb[38].mxu1 %vm3919_vm3, %v5740_v5 }
0x105d   : > { %11141 = vtanh.f32 %v5614_v35  ;;  %v5522_v36 = vmul.f32 %v5490_v21, %v14231_v39  ;;  %v14248_v47 = vadd.f32 %v10522_v13, %v14169_v34  ;;  %v5380_v22 = vpop.f32.mrb[21].mxu0  ;;  %v5584_v8 = vadd.f32 %v5552_v43, %v14215_v38 }
0x105e   : > { %11143 = vtanh.f32 %v5613_v17  ;;  %v5583_v56 = vadd.f32 %v5551_v32, %v14219_v14  ;;  %v5521_v46 = vmul.f32 %v5489_v48, %v14237_v15  ;;  %v14253_v52 = vadd.f32 %v14169_v34, %v5380_v22 }
0x105f   : > { %v5554_v41 = vmul.f32 0.044715, %v5522_v36  ;;  %v5492_v31 = vmul.f32 %v14248_v47, %v14248_v47  ;;  %v5616_v30 = vmul.f32 0.7978846, %v5584_v8 }
0x1060   : > { %v5553_v59 = vmul.f32 0.044715, %v5521_v46  ;;  %v5491_v37 = vmul.f32 %v14253_v52, %v14253_v52  ;;  %v10525_v49 = vpop.f32.mrb[22].mxu0  ;;  %v5615_v61 = vmul.f32 0.7978846, %v5583_v56 }
0x1061   : > { %v5586_v6 = vadd.f32 %v5554_v41, %v14231_v39  ;;  %v5524_v26 = vmul.f32 %v5492_v31, %v14248_v47  ;;  %v14263_v0 = vadd.f32 %v10525_v49, %v14169_v34  ;;  %v5390_v3 = vpop.f32.mrb[23].mxu0 }
0x1062   : > { %v5585_v25 = vadd.f32 %v5553_v59, %v14237_v15  ;;  %v5523_v29 = vmul.f32 %v5491_v37, %v14253_v52  ;;  %v14268_v2 = vadd.f32 %v14169_v34, %v5390_v3  ;;  %11145 = vtanh.f32 %v5615_v61 }
0x1063   : > { %v5556_v10 = vmul.f32 0.044715, %v5524_v26  ;;  %v5494_v28 = vmul.f32 %v14263_v0, %v14263_v0  ;;  %v5618_v23 = vmul.f32 0.7978846, %v5586_v6  ;;  %11147 = vtanh.f32 %v5616_v30 }
0x1064   : > { %v5555_v51 = vmul.f32 0.044715, %v5523_v29  ;;  %v5493_v16 = vmul.f32 %v14268_v2, %v14268_v2  ;;  %v10528_v55 = vpop.f32.mrb[24].mxu0  ;;  %v5617_v63 = vmul.f32 0.7978846, %v5585_v25 }
0x1065   : > { %v5588_v4 = vadd.f32 %v5556_v10, %v14248_v47  ;;  %v5526_v57 = vmul.f32 %v5494_v28, %v14263_v0  ;;  %v14277_v9 = vadd.f32 %v10528_v55, %v14169_v34  ;;  %v5400_v33 = vpop.f32.mrb[25].mxu0  ;;  %11149 = vtanh.f32 %v5618_v23 }
0x1066   : > { %v5587_v20 = vadd.f32 %v5555_v51, %v14253_v52  ;;  %v5525_v12 = vmul.f32 %v5493_v16, %v14268_v2  ;;  %v14282_v1 = vadd.f32 %v14169_v34, %v5400_v33  ;;  %11151 = vtanh.f32 %v5617_v63 }
0x1067   : > { %v11142_v42 = vpop.eup %11141  ;;  %v5558_v62 = vmul.f32 0.044715, %v5526_v57  ;;  %v5496_v44 = vmul.f32 %v14277_v9, %v14277_v9  ;;  %v5620_v40 = vmul.f32 0.7978846, %v5588_v4 }
0x1068   : > { %v11144_v45 = vpop.eup %11143  ;;  %v5557_v58 = vmul.f32 0.044715, %v5525_v12  ;;  %v5495_v18 = vmul.f32 %v14282_v1, %v14282_v1  ;;  %v10531_v24 = vpop.f32.mrb[26].mxu0  ;;  %v5619_v53 = vmul.f32 0.7978846, %v5587_v20  ;;  %v5678_v32 = vadd.f32 1.0, %v11142_v42 }
0x1069   : > { %v5590_v54 = vadd.f32 %v5558_v62, %v14263_v0  ;;  %v5528_v5 = vmul.f32 %v5496_v44, %v14277_v9  ;;  %v14291_v35 = vadd.f32 %v10531_v24, %v14169_v34  ;;  %v5410_v43 = vpop.f32.mrb[27].mxu0  ;;  %v5677_v22 = vadd.f32 1.0, %v11144_v45 }
0x106a   : > { %v5527_v21 = vmul.f32 %v5495_v18, %v14282_v1  ;;  %v14295_v17 = vadd.f32 %v14169_v34, %v5410_v43  ;;  %v5589_v48 = vadd.f32 %v5557_v58, %v14268_v2  ;;  %11153 = vtanh.f32 %v5620_v40 }
0x106b   : > { %v5560_v13 = vmul.f32 0.044715, %v5528_v5  ;;  %v5498_v36 = vmul.f32 %v14291_v35, %v14291_v35  ;;  %v5622_v56 = vmul.f32 0.7978846, %v5590_v54  ;;  %11155 = vtanh.f32 %v5619_v53 }
0x106c   : > { %v5559_v46 = vmul.f32 0.044715, %v5527_v21  ;;  %v5497_v8 = vmul.f32 %v14295_v17, %v14295_v17  ;;  %v10534_v41 = vpop.f32.mrb[28].mxu0  ;;  %v5710_v3 = vmul.f32 0.5, %v5678_v32  ;;  %v11146_v25 = vpop.eup %11145  ;;  %v5621_v29 = vmul.f32 0.7978846, %v5589_v48 }
0x106d   : > { %v5592_v31 = vadd.f32 %v5560_v13, %v14277_v9  ;;  %v5530_v59 = vmul.f32 %v5498_v36, %v14291_v35  ;;  %v14305_v37 = vadd.f32 %v10534_v41, %v14169_v34  ;;  %v5420_v49 = vpop.f32.mrb[29].mxu0  ;;  %v5709_v28 = vmul.f32 0.5, %v5677_v22  ;;  %v11148_v55 = vpop.eup %11147 }
0x106e   : > { %v5591_v61 = vadd.f32 %v5559_v46, %v14282_v1  ;;  %v5529_v6 = vmul.f32 %v5497_v8, %v14295_v17  ;;  %v14310_v26 = vadd.f32 %v14169_v34, %v5420_v49  ;;  %11157 = vtanh.f32 %v5622_v56 }
0x106f   : > { %v5562_v30 = vmul.f32 0.044715, %v5530_v59  ;;  %v5500_v10 = vmul.f32 %v14305_v37, %v14305_v37  ;;  %v5624_v4 = vmul.f32 0.7978846, %v5592_v31  ;;  %v5741_v63 = vmul.f32 %v5709_v28, %v14207_v60  ;;  %v11150_v12 = vpop.eup %11149 }
0x1070   : > { %v5561_v23 = vmul.f32 0.044715, %v5529_v6  ;;  %v5499_v51 = vmul.f32 %v14310_v26, %v14310_v26  ;;  %v10537_v16 = vpop.f32.mrb[30].mxu0  ;;  %v5623_v57 = vmul.f32 0.7978846, %v5591_v61  ;;  %v5742_v45 = vmul.f32 %v5710_v3, %v14204_v7  ;;  %v11152_v60 = vpop.eup %11151 }
0x1071   : > { %v5532_v33 = vmul.f32 %v5500_v10, %v14305_v37  ;;  %v5430_v20 = vpop.f32.mrb[31].mxu0  ;;  %v5594_v42 = vadd.f32 %v5562_v30, %v14291_v35  ;;  %v14321_v44 = vadd.f32 %v10537_v16, %v14169_v34  ;;  %11159 = vtanh.f32 %v5621_v29  ;;  %10575 = vmatprep.mubr.msk.f32.mxu1 %vm3919_vm3, %v5741_v63 }
0x1072   : > { %v5531_v62 = vmul.f32 %v5499_v51, %v14310_v26  ;;  %v14326_v58 = vadd.f32 %v14169_v34, %v5430_v20  ;;  %v5679_v18 = vadd.f32 1.0, %v11146_v25  ;;  %v5593_v24 = vadd.f32 %v5561_v23, %v14295_v17  ;;  %10576 = vmatmul.mubr.msk.f32.gmra.mrb[40].mxu1 %vm3919_vm3, %v5742_v45 }
0x1073   : > { %v5564_v40 = vmul.f32 0.044715, %v5532_v33  ;;  %v5502_v54 = vmul.f32 %v14321_v44, %v14321_v44  ;;  %v5680_v43 = vadd.f32 1.0, %v11148_v55  ;;  %11161 = vtanh.f32 %v5624_v4 }
0x1074   : > { %v5563_v53 = vmul.f32 0.044715, %v5531_v62  ;;  %v10540_v5 = vpop.f32.mrb[32].mxu0  ;;  %v5501_v21 = vmul.f32 %v14326_v58, %v14326_v58  ;;  %v5711_v32 = vmul.f32 0.5, %v5679_v18  ;;  %v11154_v13 = vpop.eup %11153  ;;  %11163 = vtanh.f32 %v5623_v57 }
0x1075   : > { %v5596_v7 = vadd.f32 %v5564_v40, %v14305_v37  ;;  %v5440_v48 = vpop.f32.mrb[33].mxu0  ;;  %v5626_v36 = vmul.f32 0.7978846, %v5594_v42  ;;  %v5534_v22 = vmul.f32 %v5502_v54, %v14321_v44  ;;  %v14337_v56 = vadd.f32 %v10540_v5, %v14169_v34  ;;  %v11156_v46 = vpop.eup %11155 }
0x1076   : > { %v5595_v8 = vadd.f32 %v5563_v53, %v14310_v26  ;;  %v5533_v41 = vmul.f32 %v5501_v21, %v14326_v58  ;;  %v5743_v31 = vmul.f32 %v5711_v32, %v14219_v14  ;;  %v5712_v59 = vmul.f32 0.5, %v5680_v43 }
0x1077   : > { %v5625_v49 = vmul.f32 0.7978846, %v5593_v24  ;;  %v5566_v61 = vmul.f32 0.044715, %v5534_v22  ;;  %v5504_v6 = vmul.f32 %v14337_v56, %v14337_v56  ;;  %v14345_v3 = vadd.f32 %v14169_v34, %v5440_v48 }
0x1078   : > { %v10543_v25 = vpop.f32.mrb[34].mxu0  ;;  %v5628_v29 = vmul.f32 0.7978846, %v5596_v7  ;;  %v5565_v30 = vmul.f32 0.044715, %v5533_v41  ;;  %10578 = vmatprep.mubr.msk.f32.mxu1 %vm3919_vm3, %v5743_v31  ;;  %v5744_v10 = vmul.f32 %v5712_v59, %v14215_v38  ;;  %v5681_v28 = vadd.f32 1.0, %v11152_v60  ;;  %v14349_v51 = vpop.eup %11157 }
0x1079   : > { %v5450_v23 = vpop.f32.mrb[35].mxu0  ;;  %11165 = vtanh.f32 %v5626_v36  ;;  %v5598_v14 = vadd.f32 %v5566_v61, %v14321_v44  ;;  %v5536_v16 = vmul.f32 %v5504_v6, %v14337_v56  ;;  %v5503_v55 = vmul.f32 %v14345_v3, %v14345_v3 }
0x107a   : > { %v5627_v4 = vmul.f32 0.7978846, %v5595_v8  ;;  %10579 = vmatmul.mubr.msk.f32.gmra.mrb[42].mxu1 %vm3919_vm3, %v5744_v10  ;;  %v5713_v57 = vmul.f32 0.5, %v5681_v28  ;;  %v14357_v33 = vadd.f32 %v10543_v25, %v14169_v34  ;;  %v5682_v38 = vadd.f32 1.0, %v11150_v12 }
0x107b   : > { %11167 = vtanh.f32 %v5625_v49  ;;  %v5597_v63 = vadd.f32 %v5565_v30, %v14326_v58  ;;  %v5535_v20 = vmul.f32 %v5503_v55, %v14345_v3  ;;  %v14362_v42 = vadd.f32 %v14169_v34, %v5450_v23  ;;  %v11160_v45 = vpop.eup %11159 }
0x107c   : > { %v10546_v62 = vpop.f32.mrb[36].mxu0  ;;  %11169 = vtanh.f32 %v5628_v29  ;;  %v5745_v40 = vmul.f32 %v5713_v57, %v14237_v15  ;;  %v5506_v18 = vmul.f32 %v14357_v33, %v14357_v33  ;;  %v5714_v60 = vmul.f32 0.5, %v5682_v38 }
0x107d   : > { %v5460_v24 = vpop.f32.mrb[37].mxu0  ;;  %v5630_v53 = vmul.f32 0.7978846, %v5598_v14  ;;  %v5568_v12 = vmul.f32 0.044715, %v5536_v16  ;;  %v5505_v5 = vmul.f32 %v14362_v42, %v14362_v42  ;;  %v11162_v43 = vpop.eup %11161  ;;  %11171 = vtanh.f32 %v5627_v4 }
0x107e   : > { %v5567_v54 = vmul.f32 0.044715, %v5535_v20  ;;  %10581 = vmatprep.mubr.msk.f32.mxu1 %vm3919_vm3, %v5745_v40  ;;  %v5538_v7 = vmul.f32 %v5506_v18, %v14357_v33  ;;  %v5746_v21 = vmul.f32 %v5714_v60, %v14231_v39  ;;  %v5683_v15 = vadd.f32 1.0, %v11156_v46  ;;  %v11164_v32 = vpop.eup %11163 }
0x107f   : > { %v5629_v48 = vmul.f32 0.7978846, %v5597_v63  ;;  %v5537_v22 = vmul.f32 %v5505_v5, %v14362_v42  ;;  %v14375_v8 = vadd.f32 %v10546_v62, %v14169_v34  ;;  %v5684_v49 = vadd.f32 1.0, %v11154_v13 }
0x1080   : > { %v5599_v36 = vadd.f32 %v5567_v54, %v14345_v3  ;;  %v10549_v41 = vpop.f32.mrb[38].mxu0  ;;  %v5570_v31 = vmul.f32 0.044715, %v5538_v7  ;;  %10582 = vmatmul.mubr.msk.f32.gmra.mrb[44].mxu1 %vm3919_vm3, %v5746_v21  ;;  %v5715_v59 = vmul.f32 0.5, %v5683_v15  ;;  %v14379_v61 = vadd.f32 %v14169_v34, %v5460_v24 }
0x1081   : > { %v5470_v39 = vpop.f32.mrb[39].mxu0  ;;  %11173 = vtanh.f32 %v5630_v53  ;;  %v5600_v46 = vadd.f32 %v5568_v12, %v14337_v56  ;;  %v5569_v6 = vmul.f32 0.044715, %v5537_v22  ;;  %v5508_v25 = vmul.f32 %v14375_v8, %v14375_v8 }
0x1082   : > { %v5631_v29 = vmul.f32 0.7978846, %v5599_v36  ;;  %v5747_v30 = vmul.f32 %v5715_v59, %v14253_v52  ;;  %v5716_v10 = vmul.f32 0.5, %v5684_v49  ;;  %v5507_v28 = vmul.f32 %v14379_v61, %v14379_v61 }
0x1083   : > { %v11166_v23 = vpop.eup %11165  ;;  %v5602_v13 = vadd.f32 %v5570_v31, %v14357_v33  ;;  %v5601_v14 = vadd.f32 %v5569_v6, %v14362_v42  ;;  %v5540_v16 = vmul.f32 %v5508_v25, %v14375_v8  ;;  %v5685_v55 = vadd.f32 1.0, %v11160_v45 }
0x1084   : > { %v14390_v4 = vpop.f32.mrb[40].mxu0  ;;  %11175 = vtanh.f32 %v5629_v48  ;;  %10584 = vmatprep.mubr.msk.f32.mxu1 %vm3919_vm3, %v5747_v30  ;;  %v5748_v57 = vmul.f32 %v5716_v10, %v14248_v47  ;;  %v5539_v52 = vmul.f32 %v5507_v28, %v14379_v61  ;;  %v14396_v38 = vadd.f32 %v10549_v41, %v14169_v34 }
0x1085   : > { %v14398_v63 = vpop.f32.mrb[41].mxu0  ;;  %v11168_v20 = vpop.eup %11167  ;;  %v5633_v62 = vmul.f32 0.7978846, %v5601_v14  ;;  %v5572_v40 = vmul.f32 0.044715, %v5540_v16  ;;  %v5717_v18 = vmul.f32 0.5, %v5685_v55  ;;  %v14405_v12 = vadd.f32 %v14169_v34, %v5470_v39 }
0x1086   : > { %v5686_v45 = vadd.f32 1.0, %v14349_v51  ;;  %v11170_v60 = vpop.eup %11169  ;;  %v5632_v24 = vmul.f32 0.7978846, %v5600_v46  ;;  %10585 = vmatmul.mubr.msk.f32.gmra.mrb[46].mxu1 %vm3919_vm3, %v5748_v57  ;;  %v5571_v53 = vmul.f32 0.044715, %v5539_v52  ;;  %v5510_v47 = vmul.f32 %v14396_v38, %v14396_v38 }
0x1087   : > { %11177 = vtanh.f32 %v5631_v29  ;;  %v5634_v54 = vmul.f32 0.7978846, %v5602_v13  ;;  %v5749_v5 = vmul.f32 %v5717_v18, %v14268_v2  ;;  %v11172_v21 = vpop.eup %11171  ;;  %v5509_v48 = vmul.f32 %v14405_v12, %v14405_v12 }
0x1088   : > { %v5718_v7 = vmul.f32 0.5, %v5686_v45  ;;  %v5603_v15 = vadd.f32 %v5571_v53, %v14379_v61  ;;  %v5542_v51 = vmul.f32 %v5510_v47, %v14396_v38  ;;  %v5687_v36 = vadd.f32 1.0, %v11164_v32 }
0x1089   : > { %11179 = vtanh.f32 %v5633_v62  ;;  %v5604_v22 = vadd.f32 %v5572_v40, %v14375_v8  ;;  %10587 = vmatprep.mubr.msk.f32.mxu1 %vm3919_vm3, %v5749_v5  ;;  %v5688_v41 = vadd.f32 1.0, %v11162_v43  ;;  %v5541_v59 = vmul.f32 %v5509_v48, %v14405_v12 }
0x108a   : > { %v5750_v34 = vmul.f32 %v5718_v7, %v14263_v0  ;;  %v5635_v31 = vmul.f32 0.7978846, %v5603_v15  ;;  %v5574_v2 = vmul.f32 0.044715, %v5542_v51  ;;  %v5719_v49 = vmul.f32 0.5, %v5687_v36 }
0x108b   : > { %v11174_v39 = vpop.eup %11173  ;;  %11181 = vtanh.f32 %v5632_v24  ;;  %v5720_v46 = vmul.f32 0.5, %v5688_v41  ;;  %v5573_v6 = vmul.f32 0.044715, %v5541_v59  ;;  %v5636_v25 = vmul.f32 0.7978846, %v5604_v22 }
0x108c   : > { %10588 = vmatmul.mubr.msk.f32.gmra.mrb[48].mxu1 %vm3919_vm3, %v5750_v34  ;;  %v5751_v32 = vmul.f32 %v5719_v49, %v14282_v1  ;;  %11183 = vtanh.f32 %v5634_v54  ;;  %v5606_v0 = vadd.f32 %v5574_v2, %v14396_v38  ;;  %v5689_v10 = vadd.f32 1.0, %v11168_v20  ;;  %v10076_v2 = vld [vmem:[%s16388_s3 + $0x38] sm:$0xff] }
0x108d   : > { %v5752_v29 = vmul.f32 %v5720_v46, %v14277_v9  ;;  %11185 = vtanh.f32 %v5635_v31  ;;  %v5605_v43 = vadd.f32 %v5573_v6, %v14405_v12  ;;  %v5690_v28 = vadd.f32 1.0, %v11166_v23 }
0x108e   : > { %v11176_v30 = vpop.eup %11175  ;;  %10590 = vmatprep.mubr.msk.f32.mxu1 %vm3919_vm3, %v5751_v32  ;;  %v5691_v13 = vadd.f32 1.0, %v11172_v21  ;;  %v5692_v14 = vadd.f32 1.0, %v11170_v60  ;;  %11187 = vtanh.f32 %v5636_v25  ;;  %v5721_v55 = vmul.f32 0.5, %v5689_v10 }
0x108f   : > { %v5637_v16 = vmul.f32 0.7978846, %v5605_v43  ;;  %v5722_v57 = vmul.f32 0.5, %v5690_v28  ;;  %v5693_v52 = vadd.f32 1.0, %v11176_v30  ;;  %v5638_v40 = vmul.f32 0.7978846, %v5606_v0 }
0x1090   : > { %10591 = vmatmul.mubr.msk.f32.gmra.mrb[50].mxu1 %vm3919_vm3, %v5752_v29  ;;  %v5723_v9 = vmul.f32 0.5, %v5691_v13  ;;  %v5753_v18 = vmul.f32 %v5721_v55, %v14295_v17  ;;  %v5724_v24 = vmul.f32 0.5, %v5692_v14  ;;  %v5694_v53 = vadd.f32 1.0, %v11174_v39 }
0x1091   : > { %v11178_v1 = vpop.eup %11177  ;;  %11189 = vtanh.f32 %v5637_v16  ;;  %v5754_v20 = vmul.f32 %v5722_v57, %v14291_v35  ;;  %v5725_v23 = vmul.f32 0.5, %v5693_v52 }
0x1092   : > { %v5755_v45 = vmul.f32 %v5723_v9, %v14310_v26  ;;  %v5695_v60 = vadd.f32 1.0, %v11178_v1  ;;  %10593 = vmatprep.mubr.msk.f32.mxu1 %vm3919_vm3, %v5753_v18  ;;  %11191 = vtanh.f32 %v5638_v40  ;;  %v5756_v21 = vmul.f32 %v5724_v24, %v14305_v37  ;;  %v10075_v37 = vld [vmem:[%s16388_s3 + $0x30] sm:$0xff]  ;;  %v17044_v9 = vld [vmem:[#allocation85_spill] sm:$0xff]  ;;  %v17046_v24 = vld [vmem:[#allocation95_spill] sm:$0xff] }
0x1093   : > { %v11180_v62 = vpop.eup %11179  ;;  %v5757_v5 = vmul.f32 %v5725_v23, %v14326_v58  ;;  %v5726_v35 = vmul.f32 0.5, %v5694_v53  ;;  %v10830_v39 = vpack.c.bf16 %v10076_v2, %v10075_v37  ;;  %v17045_v40 = vld [vmem:[#allocation96_spill] sm:$0xff] }
0x1094   : > { %10594 = vmatmul.mubr.msk.f32.gmra.mrb[52].mxu1 %vm3919_vm3, %v5754_v20  ;;  %v5727_v17 = vmul.f32 0.5, %v5695_v60  ;;  %v5697_v7 = vadd.f32 1.0, %v11180_v62  ;;  %v17047_v23 = vld [vmem:[#allocation100_spill] sm:$0xff] }
0x1095   : > { %v11182_v47 = vpop.eup %11181  ;;  %10596 = vmatprep.mubr.msk.f32.mxu1 %vm3919_vm3, %v5755_v45  ;;  %v5758_v41 = vmul.f32 %v5726_v35, %v14321_v44  ;;  %10831 = vmatprep.subr.bf16.mxu0 %v10830_v39 }
0x1096   : > { %v11184_v54 = vpop.eup %11183  ;;  %v5696_v15 = vadd.f32 1.0, %v11182_v47  ;;  %v5759_v48 = vmul.f32 %v5727_v17, %v14345_v3  ;;  %v5729_v36 = vmul.f32 0.5, %v5697_v7  ;;  %10833 = vmatpush3.bf16.msra.mxu0 %v10830_v39  ;;  %v17048_v17 = vld [vmem:[#allocation94_spill] sm:$0xff] }
0x1097   : > { %v11186_v26 = vpop.eup %11185  ;;  %v5698_v31 = vadd.f32 1.0, %v11184_v54 }
0x1098   : > { %10597 = vmatmul.mubr.msk.f32.gmra.mrb[54].mxu1 %vm3919_vm3, %v5756_v21  ;;  %v11188_v51 = vpop.eup %11187  ;;  %v5699_v22 = vadd.f32 1.0, %v11186_v26  ;;  %v5728_v58 = vmul.f32 0.5, %v5696_v15  ;;  %v5761_v3 = vmul.f32 %v5729_v36, %v14362_v42  ;;  %v17049_v26 = vld [vmem:[#allocation110_spill] sm:$0xff]  ;;  %v17050_v36 = vld [vmem:[#allocation89_spill] sm:$0xff] }
0x1099   : > { %10599 = vmatprep.mubr.msk.f32.mxu1 %vm3919_vm3, %v5757_v5  ;;  %v5730_v46 = vmul.f32 0.5, %v5698_v31  ;;  %v5700_v6 = vadd.f32 1.0, %v11188_v51 }
0x109a   : > { %v5731_v59 = vmul.f32 0.5, %v5699_v22  ;;  %v5760_v44 = vmul.f32 %v5728_v58, %v14337_v56 }
0x109b   : > { %v11190_v34 = vpop.eup %11189  ;;  %v5762_v30 = vmul.f32 %v5730_v46, %v14357_v33  ;;  %v5732_v42 = vmul.f32 0.5, %v5700_v6  ;;  %v14460_v33 = vld [vmem:[%s16396_s11 + $0x1] ss:$0 sm:$0xff] }
0x109c   : > { %10600 = vmatmul.mubr.msk.f32.gmra.mrb[56].mxu1 %vm3919_vm3, %v5758_v41  ;;  %v5701_v49 = vadd.f32 1.0, %v11190_v34  ;;  %v11192_v32 = vpop.eup %11191  ;;  %v5763_v25 = vmul.f32 %v5731_v59, %v14379_v61  ;;  %v17051_v34 = vld [vmem:[#allocation102_spill] sm:$0xff] }
0x109d   : > { %10602 = vmatprep.mubr.msk.f32.mxu1 %vm3919_vm3, %v5759_v48  ;;  %v5702_v0 = vadd.f32 1.0, %v11192_v32  ;;  %v5764_v43 = vmul.f32 %v5732_v42, %v14375_v8 }
0x109e   : > { %v5733_v29 = vmul.f32 0.5, %v5701_v49  ;;  %v17053_v49 = vld [vmem:[#allocation123_spill] sm:$0xff] }
0x109f   : > { %v5734_v10 = vmul.f32 0.5, %v5702_v0 }
0x10a0   : > { %10603 = vmatmul.mubr.msk.f32.gmra.mrb[58].mxu1 %vm3919_vm3, %v5760_v44  ;;  %v5765_v56 = vmul.f32 %v5733_v29, %v14405_v12 }
0x10a1   : > { %10605 = vmatprep.mubr.msk.f32.mxu1 %vm3919_vm3, %v5761_v3  ;;  %v5766_v61 = vmul.f32 %v5734_v10, %v14396_v38  ;;  %v17052_v3 = vld [vmem:[#allocation98_spill] sm:$0xff] }
0x10a4   : > { %10606 = vmatmul.mubr.msk.f32.gmra.mrb[60].mxu1 %vm3919_vm3, %v5762_v30  ;;  %v17055_v30 = vld [vmem:[#allocation101_spill] sm:$0xff] }
0x10a5   : > { %10608 = vmatprep.mubr.msk.f32.mxu1 %vm3919_vm3, %v5763_v25  ;;  %v17054_v25 = vld [vmem:[#allocation105_spill] sm:$0xff] }
0x10a8   : > { %10609 = vmatmul.mubr.msk.f32.gmra.mrb[62].mxu1 %vm3919_vm3, %v5764_v43 }
0x10a9   : > { %10611 = vmatprep.mubr.msk.f32.mxu1 %vm3919_vm3, %v5765_v56 }
0x10ac   : > { %10612 = vmatmul.mubr.msk.f32.gmra.mrb[64].mxu1 %vm3919_vm3, %v5766_v61  ;;  %v17056_v61 = vld [vmem:[#allocation122_spill] sm:$0xff] }
0x111b   : > { %v10568_v28 = vpop.f32.mrb[34].mxu1 }
0x111c   : > { %v5952_v13 = vadd.f32 %v10568_v28, %v14460_v33  ;;  %v5946_v12 = vpop.f32.mrb[35].mxu1 }
0x111d   : > { %v5947_v8 = vadd.f32 %v14460_v33, %v5946_v12  ;;  %v17057_v12 = vld [vmem:[#allocation109_spill] sm:$0xff] }
0x111e   : > { %v6106_v16 = vadd.f32 %v5952_v13, %v13612_v27 }
0x111f   : > { %v6105_v14 = vadd.f32 %v5947_v8, %v13615_v11 }
0x1121   : > { %10633 = vmatprep.mubr.msk.f32.mxu0 %vm548_vm0, %v6105_v14 }
0x1122   : > { %10634 = vmatmul.mubr.msk.f32.vlgmr.msra.gmra.mrb[42].mxu0 %vm548_vm0, %v6106_v16 }
0x112b   : > { %v10571_v38 = vpop.f32.mrb[36].mxu1 }
0x112c   : > { %v5962_v1 = vadd.f32 %v10571_v38, %v14460_v33  ;;  %v5956_v55 = vpop.f32.mrb[37].mxu1 }
0x112d   : > { %v5957_v57 = vadd.f32 %v14460_v33, %v5956_v55 }
0x112e   : > { %v6108_v18 = vadd.f32 %v5962_v1, %v17045_v40  ;;  %v17058_v1 = vld [vmem:[#allocation121_spill] sm:$0xff] }
0x112f   : > { %v6107_v52 = vadd.f32 %v5957_v57, %v17044_v9  ;;  %v10574_v62 = vpop.f32.mrb[38].mxu1  ;;  %v17059_v57 = vld [vmem:[#allocation120_spill] sm:$0xff] }
0x1130   : > { %v5972_v45 = vadd.f32 %v10574_v62, %v14460_v33  ;;  %v5966_v11 = vpop.f32.mrb[39].mxu1 }
0x1131   : > { %v5967_v27 = vadd.f32 %v14460_v33, %v5966_v11  ;;  %10636 = vmatprep.mubr.msk.f32.mxu0 %vm548_vm0, %v6107_v52 }
0x1132   : > { %10637 = vmatmul.mubr.msk.f32.gmra.mrb[44].mxu0 %vm548_vm0, %v6108_v18  ;;  %v6110_v53 = vadd.f32 %v5972_v45, %v17047_v23  ;;  %v17060_v45 = vld [vmem:[#allocation87_spill] sm:$0xff] }
0x1133   : > { %v6109_v20 = vadd.f32 %v5967_v27, %v17046_v24  ;;  %v17061_v24 = vld [vmem:[#allocation86_spill] sm:$0xff] }
0x1135   : > { %10639 = vmatprep.mubr.msk.f32.mxu0 %vm548_vm0, %v6109_v20 }
0x1136   : > { %10640 = vmatmul.mubr.msk.f32.gmra.mrb[46].mxu0 %vm548_vm0, %v6110_v53 }
0x1145   : > { %v10577_v60 = vpop.f32.mrb[40].mxu1 }
0x1146   : > { %v5982_v47 = vadd.f32 %v10577_v60, %v14460_v33  ;;  %v5976_v54 = vpop.f32.mrb[41].mxu1 }
0x1147   : > { %v5977_v5 = vadd.f32 %v14460_v33, %v5976_v54 }
0x1148   : > { %v6112_v21 = vadd.f32 %v5982_v47, %v17049_v26  ;;  %v17062_v47 = vld [vmem:[#allocation91_spill] sm:$0xff] }
0x1149   : > { %v6111_v7 = vadd.f32 %v5977_v5, %v17048_v17  ;;  %v17063_v17 = vld [vmem:[#allocation88_spill] sm:$0xff] }
0x114b   : > { %10642 = vmatprep.mubr.msk.f32.mxu0 %vm548_vm0, %v6111_v7 }
0x114c   : > { %10643 = vmatmul.mubr.msk.f32.gmra.mrb[48].mxu0 %vm548_vm0, %v6112_v21 }
0x114d   : > { %v10580_v35 = vpop.f32.mrb[42].mxu1 }
0x114e   : > { %v5992_v15 = vadd.f32 %v10580_v35, %v14460_v33  ;;  %v5986_v51 = vpop.f32.mrb[43].mxu1 }
0x114f   : > { %v5987_v48 = vadd.f32 %v14460_v33, %v5986_v51 }
0x1150   : > { %v6114_v41 = vadd.f32 %v5992_v15, %v17051_v34  ;;  %v17064_v15 = vld [vmem:[#allocation97_spill] sm:$0xff] }
0x1151   : > { %v6113_v22 = vadd.f32 %v5987_v48, %v17050_v36  ;;  %v17065_v36 = vld [vmem:[#allocation103_spill] sm:$0xff] }
0x1153   : > { %v10583_v58 = vpop.f32.mrb[44].mxu1  ;;  %10645 = vmatprep.mubr.msk.f32.mxu0 %vm548_vm0, %v6113_v22 }
0x1154   : > { %v6002_v31 = vadd.f32 %v10583_v58, %v14460_v33  ;;  %v5996_v37 = vpop.f32.mrb[45].mxu1  ;;  %10646 = vmatmul.mubr.msk.f32.gmra.mrb[50].mxu0 %vm548_vm0, %v6114_v41 }
0x1155   : > { %v5997_v2 = vadd.f32 %v14460_v33, %v5996_v37 }
0x1156   : > { %v6116_v39 = vadd.f32 %v6002_v31, %v17053_v49  ;;  %v17066_v31 = vld [vmem:[#allocation93_spill] sm:$0xff] }
0x1157   : > { %v6115_v59 = vadd.f32 %v5997_v2, %v17052_v3  ;;  %v17067_v3 = vld [vmem:[#allocation92_spill] sm:$0xff] }
0x1159   : > { %v10586_v44 = vpop.f32.mrb[46].mxu1  ;;  %10648 = vmatprep.mubr.msk.f32.mxu0 %vm548_vm0, %v6115_v59 }
0x115a   : > { %v6012_v46 = vadd.f32 %v10586_v44, %v14460_v33  ;;  %v6006_v6 = vpop.f32.mrb[47].mxu1  ;;  %10649 = vmatmul.mubr.msk.f32.gmra.mrb[52].mxu0 %vm548_vm0, %v6116_v39 }
0x115b   : > { %v6007_v32 = vadd.f32 %v14460_v33, %v6006_v6 }
0x115c   : > { %v6118_v42 = vadd.f32 %v6012_v46, %v17055_v30  ;;  %v17068_v46 = vld [vmem:[#allocation90_spill] sm:$0xff] }
0x115d   : > { %v6117_v29 = vadd.f32 %v6007_v32, %v17054_v25  ;;  %v17069_v25 = vld [vmem:[#allocation107_spill] sm:$0xff] }
0x115f   : > { %v10589_v0 = vpop.f32.mrb[48].mxu1  ;;  %10651 = vmatprep.mubr.msk.f32.mxu0 %vm548_vm0, %v6117_v29 }
0x1160   : > { %v6022_v56 = vadd.f32 %v10589_v0, %v14460_v33  ;;  %v6016_v43 = vpop.f32.mrb[49].mxu1  ;;  %10652 = vmatmul.mubr.msk.f32.gmra.mrb[54].mxu0 %vm548_vm0, %v6118_v42 }
0x1161   : > { %v6017_v10 = vadd.f32 %v14460_v33, %v6016_v43 }
0x1162   : > { %v6120_v8 = vadd.f32 %v6022_v56, %v17057_v12  ;;  %v17070_v56 = vld [vmem:[#allocation99_spill] sm:$0xff] }
0x1163   : > { %v6119_v28 = vadd.f32 %v6017_v10, %v17056_v61  ;;  %v10592_v13 = vpop.f32.mrb[50].mxu1  ;;  %v17071_v61 = vld [vmem:[#allocation108_spill] sm:$0xff] }
0x1164   : > { %v6032_v14 = vadd.f32 %v10592_v13, %v14460_v33  ;;  %v6026_v16 = vpop.f32.mrb[51].mxu1 }
0x1165   : > { %v6027_v38 = vadd.f32 %v14460_v33, %v6026_v16  ;;  %10654 = vmatprep.mubr.msk.f32.mxu0 %vm548_vm0, %v6119_v28 }
0x1166   : > { %10655 = vmatmul.mubr.msk.f32.gmra.mrb[56].mxu0 %vm548_vm0, %v6120_v8  ;;  %v6122_v9 = vadd.f32 %v6032_v14, %v17059_v57  ;;  %v17072_v14 = vld [vmem:[#allocation106_spill] sm:$0xff] }
0x1167   : > { %v6121_v55 = vadd.f32 %v6027_v38, %v17058_v1  ;;  %v10595_v52 = vpop.f32.mrb[52].mxu1  ;;  %v17073_v38 = vld [vmem:[#allocation104_spill] sm:$0xff] }
0x1168   : > { %v6042_v62 = vadd.f32 %v10595_v52, %v14460_v33  ;;  %v6036_v40 = vpop.f32.mrb[53].mxu1  ;;  %v17075_v52 = vld [vmem:[#allocation12_spill] sm:$0xff] }
0x1169   : > { %10657 = vmatprep.mubr.msk.f32.mxu0 %vm548_vm0, %v6121_v55  ;;  %v6037_v18 = vadd.f32 %v14460_v33, %v6036_v40  ;;  %v17074_v55 = vld [vmem:[#allocation20_spill] sm:$0xff] }
0x116a   : > { %10658 = vmatmul.mubr.msk.f32.gmra.mrb[58].mxu0 %vm548_vm0, %v6122_v9  ;;  %v6124_v20 = vadd.f32 %v6042_v62, %v17061_v24  ;;  %v6552_v57 = vrot.slane %v14398_v63, %v17074_v55 }
0x116b   : > { %v6123_v11 = vadd.f32 %v6037_v18, %v17060_v45  ;;  %v10598_v27 = vpop.f32.mrb[54].mxu1 }
0x116c   : > { %v6052_v23 = vadd.f32 %v10598_v27, %v14460_v33  ;;  %v6046_v53 = vpop.f32.mrb[55].mxu1  ;;  %v6568_v9 = vrot.slane %v6552_v57, %v17074_v55 }
0x116d   : > { %v6047_v60 = vadd.f32 %v14460_v33, %v6046_v53  ;;  %10660 = vmatprep.mubr.msk.f32.mxu0 %vm548_vm0, %v6123_v11  ;;  %v6560_v11 = vcombine.high %v6552_v57, %v6552_v57 }
0x116e   : > { %10661 = vmatmul.mubr.msk.f32.gmra.mrb[60].mxu0 %vm548_vm0, %v6124_v20  ;;  %v6126_v7 = vadd.f32 %v6052_v23, %v17063_v17  ;;  %v6646_v62 = vrot.slane %v6568_v9, %v17075_v52  ;;  %v6590_v20 = vcombine.high %v6568_v9, %v6568_v9 }
0x116f   : > { %v6125_v54 = vadd.f32 %v6047_v60, %v17062_v47  ;;  %v10601_v5 = vpop.f32.mrb[56].mxu1  ;;  %v6582_v27 = vrot.slane %v6560_v11, %v17074_v55  ;;  %v6594_v11 = vcombine.high %v14390_v4, %v14390_v4 }
0x1170   : > { %v6062_v26 = vadd.f32 %v10601_v5, %v14460_v33  ;;  %v6056_v21 = vpop.f32.mrb[57].mxu1 }
0x1171   : > { %v6057_v35 = vadd.f32 %v14460_v33, %v6056_v21  ;;  %10663 = vmatprep.mubr.msk.f32.mxu0 %vm548_vm0, %v6125_v54  ;;  %v6650_v24 = vrot.slane %v6582_v27, %v17075_v52  ;;  %v6654_v54 = vrot.slane %v6590_v20, %v17075_v52 }
0x1172   : > { %10664 = vmatmul.mubr.msk.f32.gmra.mrb[62].mxu0 %vm548_vm0, %v6126_v7  ;;  %v6128_v22 = vadd.f32 %v6062_v26, %v17065_v36 }
0x1173   : > { %v6127_v51 = vadd.f32 %v6057_v35, %v17064_v15  ;;  %v10604_v48 = vpop.f32.mrb[58].mxu1  ;;  %v6545_v35 = vcombine.high %v14398_v63, %v14398_v63 }
0x1174   : > { %v6072_v34 = vadd.f32 %v10604_v48, %v14460_v33  ;;  %v6066_v41 = vpop.f32.mrb[59].mxu1 }
0x1175   : > { %v6067_v58 = vadd.f32 %v14460_v33, %v6066_v41  ;;  %10666 = vmatprep.mubr.msk.f32.mxu0 %vm548_vm0, %v6127_v51  ;;  %v6592_v51 = vcombine.high %v6582_v27, %v6582_v27  ;;  %v6559_v48 = vrot.slane %v6545_v35, %v17074_v55 }
0x1176   : > { %10667 = vmatmul.mubr.msk.f32.gmra.mrb[64].mxu0 %vm548_vm0, %v6128_v22  ;;  %v6130_v59 = vadd.f32 %v6072_v34, %v17067_v3 }
0x1177   : > { %v6129_v37 = vadd.f32 %v6067_v58, %v17066_v31  ;;  %v10607_v2 = vpop.f32.mrb[60].mxu1  ;;  %v6658_v36 = vrot.slane %v6592_v51, %v17075_v52  ;;  %v6575_v63 = vrot.slane %v6559_v48, %v17074_v55  ;;  %v6561_v31 = vcombine.high %v6559_v48, %v6559_v48 }
0x1178   : > { %v6082_v49 = vadd.f32 %v10607_v2, %v14460_v33  ;;  %v6076_v39 = vpop.f32.mrb[61].mxu1 }
0x1179   : > { %v6077_v44 = vadd.f32 %v14460_v33, %v6076_v39  ;;  %10669 = vmatprep.mubr.msk.f32.mxu0 %vm548_vm0, %v6129_v37  ;;  %v6662_v37 = vrot.slane %v6575_v63, %v17075_v52 }
0x117a   : > { %10670 = vmatmul.mubr.msk.f32.gmra.mrb[66].mxu0 %vm548_vm0, %v6130_v59  ;;  %v6132_v29 = vadd.f32 %v6082_v49, %v17069_v25  ;;  %v6589_v49 = vrot.slane %v6561_v31, %v17074_v55  ;;  %v6591_v25 = vcombine.high %v6575_v63, %v6575_v63 }
0x117b   : > { %v6131_v6 = vadd.f32 %v6077_v44, %v17068_v46  ;;  %v10610_v32 = vpop.f32.mrb[62].mxu1 }
0x117c   : > { %v6092_v30 = vadd.f32 %v10610_v32, %v14460_v33  ;;  %v6086_v42 = vpop.f32.mrb[63].mxu1  ;;  %v6666_v44 = vrot.slane %v6589_v49, %v17075_v52 }
0x117d   : > { %v6087_v0 = vadd.f32 %v14460_v33, %v6086_v42  ;;  %10672 = vmatprep.mubr.msk.f32.mxu0 %vm548_vm0, %v6131_v6  ;;  %v6601_v42 = vrot.slane %v14390_v4, %v17074_v55 }
0x117e   : > { %10673 = vmatmul.mubr.msk.f32.gmra.mrb[68].mxu0 %vm548_vm0, %v6132_v29  ;;  %v6134_v28 = vadd.f32 %v6092_v30, %v17071_v61  ;;  %v6670_v30 = vrot.slane %v6591_v25, %v17075_v52 }
0x117f   : > { %v6133_v43 = vadd.f32 %v6087_v0, %v17070_v56  ;;  %v10613_v10 = vpop.f32.mrb[64].mxu1  ;;  %v6593_v56 = vcombine.high %v6589_v49, %v6589_v49 }
0x1180   : > { %v6102_v13 = vadd.f32 %v10613_v10, %v14460_v33  ;;  %v6096_v12 = vpop.f32.mrb[65].mxu1 }
0x1181   : > { %v6097_v8 = vadd.f32 %v14460_v33, %v6096_v12  ;;  %10675 = vmatprep.mubr.msk.f32.mxu0 %vm548_vm0, %v6133_v43 }
0x1182   : > { %10676 = vmatmul.mubr.msk.f32.gmra.mrb[70].mxu0 %vm548_vm0, %v6134_v28  ;;  %v6136_v1 = vadd.f32 %v6102_v13, %v17073_v38  ;;  %v6617_v28 = vrot.slane %v6601_v42, %v17074_v55  ;;  %v6674_v13 = vrot.slane %v6593_v56, %v17075_v52 }
0x1183   : > { %v6135_v16 = vadd.f32 %v6097_v8, %v17072_v14 }
0x1185   : > { %10678 = vmatprep.mubr.msk.f32.mxu0 %vm548_vm0, %v6135_v16  ;;  %v6609_v16 = vcombine.high %v6601_v42, %v6601_v42 }
0x1186   : > { %10679 = vmatmul.mubr.msk.f32.gmra.mrb[72].mxu0 %vm548_vm0, %v6136_v1  ;;  %v6678_v1 = vrot.slane %v6617_v28, %v17075_v52 }
0x11f5   : > { %v14562_v33 = vpop.f32.mrb[42].mxu0 }
0x11f6   : > { %17076 = vst [vmem:[#allocation124_spill] sm:$0xff] %v14562_v33  ;;  %v6724_v40 = vmul.f32 %v14562_v33, %v6646_v62  ;;  %v14565_v18 = vpop.f32.mrb[43].mxu0  ;;  %v17141_v33 = vld [vmem:[#allocation68_spill] sm:$0xff] }
0x11f7   : > { %17077 = vst [vmem:[#allocation125_spill] sm:$0xff] %v14565_v18  ;;  %v6723_v45 = vmul.f32 %v6646_v62, %v14565_v18 }
0x11f8   : > { %7799 = vrot.lane.b32.xlu1 %v6724_v40, %s11441_s22  ;;  %v6758_v21 = vsel %vm548_vm0, %v6724_v40, 0.0 }
0x11f9   : > { %7797 = vrot.lane.b32.xlu0 %v6723_v45, %s11441_s22  ;;  %v6755_v15 = vsel %vm548_vm0, %v6723_v45, 0.0  ;;  %v6631_v45 = vrot.slane %v6609_v16, %v17074_v55 }
0x11fb   : > { %v6682_v27 = vrot.slane %v6631_v45, %v17075_v52  ;;  %v6641_v48 = vcombine.high %v6631_v45, %v6631_v45 }
0x11fd   : > { %v6690_v49 = vrot.slane %v6641_v48, %v17075_v52 }
0x1205   : > { %v14572_v23 = vpop.f32.mrb[44].mxu0 }
0x1206   : > { %17078 = vst [vmem:[#allocation115_spill] sm:$0xff] %v14572_v23  ;;  %v14575_v53 = vmul.f32 %v14572_v23, %v6650_v24  ;;  %v14577_v60 = vpop.f32.mrb[45].mxu0  ;;  %v17135_v23 = vld [vmem:[#allocation55_spill] sm:$0xff] }
0x1207   : > { %17079 = vst [vmem:[#allocation116_spill] sm:$0xff] %v14577_v60  ;;  %v14580_v47 = vmul.f32 %v6650_v24, %v14577_v60  ;;  %v6639_v24 = vcombine.high %v6617_v28, %v6617_v28 }
0x1208   : > { %v6764_v45 = vsel %vm548_vm0, %v14575_v53, 0.0 }
0x1209   : > { %v14583_v5 = vpop.f32.mrb[46].mxu0  ;;  %v6686_v51 = vrot.slane %v6639_v24, %v17075_v52 }
0x120a   : > { %17080 = vst [vmem:[#allocation112_spill] sm:$0xff] %v14583_v5  ;;  %v14586_v17 = vmul.f32 %v14583_v5, %v6654_v54  ;;  %v14588_v7 = vpop.f32.mrb[47].mxu0 }
0x120b   : > { %17081 = vst [vmem:[#allocation117_spill] sm:$0xff] %v14588_v7  ;;  %v14591_v26 = vmul.f32 %v6654_v54, %v14588_v7 }
0x1218   : > { %6759 = vadd.xlane.f32.xlu0 %v6758_v21 }
0x121c   : > { %6756 = vadd.xlane.f32.xlu1 %v6755_v15  ;;  %v6608_v15 = vrot.slane %v6594_v11, %v17074_v55 }
0x121f   : > { %v14599_v22 = vpop.f32.mrb[48].mxu0 }
0x1220   : > { %17082 = vst [vmem:[#allocation113_spill] sm:$0xff] %v14599_v22  ;;  %v14602_v34 = vmul.f32 %v14599_v22, %v6658_v36  ;;  %v14604_v41 = vpop.f32.mrb[49].mxu0 }
0x1221   : > { %17083 = vst [vmem:[#allocation111_spill] sm:$0xff] %v14604_v41  ;;  %v14607_v58 = vmul.f32 %v6658_v36, %v14604_v41 }
0x1227   : > { %v14611_v2 = vpop.f32.mrb[50].mxu0 }
0x1228   : > { %17084 = vst [vmem:[#allocation114_spill] sm:$0xff] %v14611_v2  ;;  %v14614_v3 = vmul.f32 %v14611_v2, %v6662_v37  ;;  %v14616_v59 = vpop.f32.mrb[51].mxu0 }
0x1229   : > { %17085 = vst [vmem:[#allocation21_spill] sm:$0xff] %v14616_v59  ;;  %v14620_v39 = vmul.f32 %v6662_v37, %v14616_v59  ;;  %v6610_v37 = vcombine.high %v6608_v15, %v6608_v15 }
0x122b   : > { %v6638_v16 = vrot.slane %v6610_v37, %v17074_v55 }
0x122d   : > { %7801 = vrot.lane.b32.xlu1 %v14580_v47, %s11441_s22  ;;  %v14625_v46 = vpop.f32.mrb[52].mxu0  ;;  %v6698_v24 = vrot.slane %v6638_v16, %v17075_v52 }
0x122e   : > { %17086 = vst [vmem:[#allocation22_spill] sm:$0xff] %v14625_v46  ;;  %7803 = vrot.lane.b32.xlu0 %v14575_v53, %s11441_s22  ;;  %v14630_v6 = vmul.f32 %v14625_v46, %v6666_v44  ;;  %v14632_v32 = vpop.f32.mrb[53].mxu0 }
0x122f   : > { %17087 = vst [vmem:[#allocation23_spill] sm:$0xff] %v14632_v32  ;;  %v14635_v29 = vmul.f32 %v6666_v44, %v14632_v32  ;;  %v6624_v44 = vrot.slane %v6608_v15, %v17074_v55 }
0x1231   : > { %v6640_v15 = vcombine.high %v6624_v44, %v6624_v44 }
0x1233   : > { %v14640_v0 = vpop.f32.mrb[54].mxu0  ;;  %v6702_v37 = vrot.slane %v6640_v15, %v17075_v52  ;;  %v6767_v15 = vsel %vm548_vm0, %v14591_v26, 0.0 }
0x1234   : > { %17088 = vst [vmem:[#allocation24_spill] sm:$0xff] %v14640_v0  ;;  %v14643_v43 = vmul.f32 %v14640_v0, %v6670_v30  ;;  %v14645_v10 = vpop.f32.mrb[55].mxu0 }
0x1235   : > { %17089 = vst [vmem:[#allocation25_spill] sm:$0xff] %v14645_v10  ;;  %v14648_v61 = vmul.f32 %v6670_v30, %v14645_v10  ;;  %v6761_v30 = vsel %vm548_vm0, %v14580_v47, 0.0 }
0x1239   : > { %v14652_v12 = vpop.f32.mrb[56].mxu0 }
0x123a   : > { %17090 = vst [vmem:[#allocation26_spill] sm:$0xff] %v14652_v12  ;;  %v14655_v8 = vmul.f32 %v14652_v12, %v6674_v13  ;;  %v14657_v14 = vpop.f32.mrb[57].mxu0  ;;  %v17137_v12 = vld [vmem:[#allocation66_spill] sm:$0xff] }
0x123b   : > { %17091 = vst [vmem:[#allocation27_spill] sm:$0xff] %v14657_v14  ;;  %v14660_v38 = vmul.f32 %v6674_v13, %v14657_v14  ;;  %v6694_v13 = vrot.slane %v6624_v44, %v17075_v52 }
0x123d   : > { %v14663_v57 = vpop.f32.mrb[58].mxu0 }
0x123e   : > { %17092 = vst [vmem:[#allocation28_spill] sm:$0xff] %v14663_v57  ;;  %v14666_v9 = vmul.f32 %v14663_v57, %v6678_v1  ;;  %v14668_v62 = vpop.f32.mrb[59].mxu0 }
0x123f   : > { %17093 = vst [vmem:[#allocation29_spill] sm:$0xff] %v14668_v62  ;;  %v14671_v40 = vmul.f32 %v6678_v1, %v14668_v62 }
0x1241   : > { %v14677_v20 = vpop.f32.mrb[60].mxu0 }
0x1242   : > { %17094 = vst [vmem:[#allocation30_spill] sm:$0xff] %v14677_v20  ;;  %v14680_v54 = vmul.f32 %v14677_v20, %v6682_v27  ;;  %v14682_v21 = vpop.f32.mrb[61].mxu0 }
0x1243   : > { %17095 = vst [vmem:[#allocation31_spill] sm:$0xff] %v14682_v21  ;;  %v14685_v35 = vmul.f32 %v6682_v27, %v14682_v21 }
0x1245   : > { %v14689_v36 = vpop.f32.mrb[62].mxu0 }
0x1246   : > { %17096 = vst [vmem:[#allocation33_spill] sm:$0xff] %v14689_v36  ;;  %v14692_v4 = vmul.f32 %v14689_v36, %v6686_v51  ;;  %v14694_v63 = vpop.f32.mrb[63].mxu0 }
0x1247   : > { %17097 = vst [vmem:[#allocation32_spill] sm:$0xff] %v14694_v63  ;;  %v14697_v31 = vmul.f32 %v6686_v51, %v14694_v63 }
0x1249   : > { %v14701_v25 = vpop.f32.mrb[64].mxu0 }
0x124a   : > { %17098 = vst [vmem:[#allocation34_spill] sm:$0xff] %v14701_v25  ;;  %v14706_v42 = vmul.f32 %v14701_v25, %v6690_v49  ;;  %v14708_v56 = vpop.f32.mrb[65].mxu0  ;;  %v17123_v25 = vld [vmem:[#allocation65_spill] sm:$0xff] }
0x124b   : > { %17099 = vst [vmem:[#allocation35_spill] sm:$0xff] %v14708_v56  ;;  %v14711_v28 = vmul.f32 %v6690_v49, %v14708_v56  ;;  %v6642_v49 = vcombine.high %v6638_v16, %v6638_v16  ;;  %v17125_v56 = vld [vmem:[#allocation78_spill] sm:$0xff] }
0x124d   : > { %6762 = vadd.xlane.f32.xlu0 %v6761_v30  ;;  %v14715_v1 = vpop.f32.mrb[66].mxu0  ;;  %v6706_v50 = vrot.slane %v6642_v49, %v17075_v52  ;;  %v6776_v49 = vsel %vm548_vm0, %v14602_v34, 0.0 }
0x124e   : > { %17100 = vst [vmem:[#allocation36_spill] sm:$0xff] %v14715_v1  ;;  %v14720_v47 = vmul.f32 %v14715_v1, %v6694_v13  ;;  %v14722_v11 = vpop.f32.mrb[67].mxu0 }
0x124f   : > { %17101 = vst [vmem:[#allocation37_spill] sm:$0xff] %v14722_v11  ;;  %v14725_v27 = vmul.f32 %v6694_v13, %v14722_v11 }
0x1251   : > { %6765 = vadd.xlane.f32.xlu1 %v6764_v45  ;;  %v14728_v51 = vpop.f32.mrb[68].mxu0 }
0x1252   : > { %17102 = vst [vmem:[#allocation38_spill] sm:$0xff] %v14728_v51  ;;  %v14731_v55 = vmul.f32 %v14728_v51, %v6698_v24  ;;  %v14733_v48 = vpop.f32.mrb[69].mxu0 }
0x1253   : > { %17103 = vst [vmem:[#allocation39_spill] sm:$0xff] %v14733_v48  ;;  %v14736_v53 = vmul.f32 %v6698_v24, %v14733_v48  ;;  %v17122_v48 = vld [vmem:[#allocation74_spill] sm:$0xff] }
0x1255   : > { %v14739_v30 = vpop.f32.mrb[70].mxu0 }
0x1256   : > { %17104 = vst [vmem:[#allocation40_spill] sm:$0xff] %v14739_v30  ;;  %v14742_v13 = vmul.f32 %v14739_v30, %v6702_v37  ;;  %v14744_v45 = vpop.f32.mrb[71].mxu0 }
0x1257   : > { %17105 = vst [vmem:[#allocation41_spill] sm:$0xff] %v14744_v45  ;;  %v14747_v44 = vmul.f32 %v6702_v37, %v14744_v45  ;;  %v6770_v37 = vsel %vm548_vm0, %v14586_v17, 0.0  ;;  %v17120_v45 = vld [vmem:[#allocation61_spill] sm:$0xff] }
0x1259   : > { %v14750_v19 = vpop.f32.mrb[72].mxu0 }
0x125a   : > { %17106 = vst [vmem:[#allocation42_spill] sm:$0xff] %v14750_v19  ;;  %v14753_v24 = vmul.f32 %v14750_v19, %v6706_v50  ;;  %v14755_v51 = vpop.f32.mrb[73].mxu0  ;;  %v17119_v19 = vld [vmem:[#allocation70_spill] sm:$0xff] }
0x125b   : > { %17107 = vst [vmem:[#allocation43_spill] sm:$0xff] %v14755_v51  ;;  %v14758_v16 = vmul.f32 %v6706_v50, %v14755_v51  ;;  %v6773_v50 = vsel %vm548_vm0, %v14607_v58, 0.0 }
0x1262   : > { %7805 = vrot.lane.b32.xlu1 %v14591_v26, %s11441_s22  ;;  %v6782_v26 = vsel %vm548_vm0, %v14614_v3, 0.0 }
0x1263   : > { %7807 = vrot.lane.b32.xlu0 %v14586_v17, %s11441_s22  ;;  %v6779_v17 = vsel %vm548_vm0, %v14620_v39, 0.0 }
0x1282   : > { %6768 = vadd.xlane.f32.xlu0 %v6767_v15  ;;  %v7798_v15 = vpop.permute.xlu0 %7797 }
0x1286   : > { %6771 = vadd.xlane.f32.xlu1 %v6770_v37 }
0x1297   : > { %7809 = vrot.lane.b32.xlu1 %v14607_v58, %s11441_s22  ;;  %v6788_v58 = vsel %vm548_vm0, %v14630_v6, 0.0 }
0x1298   : > { %7811 = vrot.lane.b32.xlu0 %v14602_v34, %s11441_s22  ;;  %v6785_v34 = vsel %vm548_vm0, %v14635_v29, 0.0 }
0x12b7   : > { %6774 = vadd.xlane.f32.xlu0 %v6773_v50 }
0x12bb   : > { %6777 = vadd.xlane.f32.xlu1 %v6776_v49 }
0x12cc   : > { %7813 = vrot.lane.b32.xlu1 %v14620_v39, %s11441_s22  ;;  %v6794_v39 = vsel %vm548_vm0, %v14643_v43, 0.0 }
0x12cd   : > { %7815 = vrot.lane.b32.xlu0 %v14614_v3, %s11441_s22  ;;  %v6791_v3 = vsel %vm548_vm0, %v14648_v61, 0.0 }
0x12ec   : > { %6780 = vadd.xlane.f32.xlu0 %v6779_v17 }
0x12f0   : > { %6783 = vadd.xlane.f32.xlu1 %v6782_v26 }
0x1301   : > { %7817 = vrot.lane.b32.xlu1 %v14635_v29, %s11441_s22  ;;  %v6800_v29 = vsel %vm548_vm0, %v14655_v8, 0.0 }
0x1302   : > { %7819 = vrot.lane.b32.xlu0 %v14630_v6, %s11441_s22  ;;  %v6797_v6 = vsel %vm548_vm0, %v14660_v38, 0.0 }
0x1321   : > { %6786 = vadd.xlane.f32.xlu0 %v6785_v34 }
0x1325   : > { %6789 = vadd.xlane.f32.xlu1 %v6788_v58 }
0x1336   : > { %7821 = vrot.lane.b32.xlu1 %v14648_v61, %s11441_s22  ;;  %v6806_v61 = vsel %vm548_vm0, %v14666_v9, 0.0 }
0x1337   : > { %7823 = vrot.lane.b32.xlu0 %v14643_v43, %s11441_s22  ;;  %v6803_v43 = vsel %vm548_vm0, %v14671_v40, 0.0 }
0x1356   : > { %6792 = vadd.xlane.f32.xlu0 %v6791_v3 }
0x135a   : > { %6795 = vadd.xlane.f32.xlu1 %v6794_v39 }
0x136b   : > { %7825 = vrot.lane.b32.xlu1 %v14660_v38, %s11441_s22  ;;  %v6812_v38 = vsel %vm548_vm0, %v14680_v54, 0.0 }
0x136c   : > { %7827 = vrot.lane.b32.xlu0 %v14655_v8, %s11441_s22  ;;  %v6809_v8 = vsel %vm548_vm0, %v14685_v35, 0.0 }
0x138b   : > { %6798 = vadd.xlane.f32.xlu0 %v6797_v6 }
0x138f   : > { %6801 = vadd.xlane.f32.xlu1 %v6800_v29 }
0x13a0   : > { %7829 = vrot.lane.b32.xlu1 %v14671_v40, %s11441_s22  ;;  %v6818_v40 = vsel %vm548_vm0, %v14692_v4, 0.0 }
0x13a1   : > { %7831 = vrot.lane.b32.xlu0 %v14666_v9, %s11441_s22  ;;  %v6815_v9 = vsel %vm548_vm0, %v14697_v31, 0.0 }
0x13c0   : > { %6804 = vadd.xlane.f32.xlu0 %v6803_v43 }
0x13c4   : > { %6807 = vadd.xlane.f32.xlu1 %v6806_v61  ;;  %v6845_v61 = vsel %vm548_vm0, %v14758_v16, 0.0 }
0x13d5   : > { %7833 = vrot.lane.b32.xlu1 %v14685_v35, %s11441_s22  ;;  %v6824_v35 = vsel %vm548_vm0, %v14706_v42, 0.0 }
0x13d6   : > { %7835 = vrot.lane.b32.xlu0 %v14680_v54, %s11441_s22  ;;  %v6821_v54 = vsel %vm548_vm0, %v14711_v28, 0.0 }
0x13f5   : > { %6810 = vadd.xlane.f32.xlu0 %v6809_v8 }
0x13f9   : > { %6813 = vadd.xlane.f32.xlu1 %v6812_v38 }
0x140a   : > { %7837 = vrot.lane.b32.xlu1 %v14697_v31, %s11441_s22  ;;  %v6830_v31 = vsel %vm548_vm0, %v14720_v47, 0.0 }
0x140b   : > { %7839 = vrot.lane.b32.xlu0 %v14692_v4, %s11441_s22  ;;  %v6827_v4 = vsel %vm548_vm0, %v14725_v27, 0.0 }
0x142a   : > { %6816 = vadd.xlane.f32.xlu0 %v6815_v9  ;;  %v6848_v9 = vsel %vm548_vm0, %v14753_v24, 0.0 }
0x142e   : > { %6819 = vadd.xlane.f32.xlu1 %v6818_v40  ;;  %v7893_v40 = vsel %vm548_vm0, %v7798_v15, 0.0 }
0x143f   : > { %7841 = vrot.lane.b32.xlu1 %v14711_v28, %s11441_s22  ;;  %v6836_v28 = vsel %vm548_vm0, %v14731_v55, 0.0 }
0x1440   : > { %7843 = vrot.lane.b32.xlu0 %v14706_v42, %s11441_s22  ;;  %v6833_v42 = vsel %vm548_vm0, %v14736_v53, 0.0 }
0x145f   : > { %6822 = vadd.xlane.f32.xlu0 %v6821_v54 }
0x1463   : > { %6825 = vadd.xlane.f32.xlu1 %v6824_v35 }
0x1474   : > { %7845 = vrot.lane.b32.xlu1 %v14725_v27, %s11441_s22  ;;  %v6842_v27 = vsel %vm548_vm0, %v14742_v13, 0.0 }
0x1475   : > { %7847 = vrot.lane.b32.xlu0 %v14720_v47, %s11441_s22  ;;  %v6839_v47 = vsel %vm548_vm0, %v14747_v44, 0.0 }
0x1494   : > { %6828 = vadd.xlane.f32.xlu0 %v6827_v4 }
0x1498   : > { %6831 = vadd.xlane.f32.xlu1 %v6830_v31 }
0x14a9   : > { %7849 = vrot.lane.b32.xlu1 %v14736_v53, %s11441_s22  ;;  %v7800_v53 = vpop.permute.xlu1 %7799 }
0x14aa   : > { %7851 = vrot.lane.b32.xlu0 %v14731_v55, %s11441_s22  ;;  %v14866_v55 = vpop.xlane.xlu0 %6759  ;;  %v7896_v35 = vsel %vm548_vm0, %v7800_v53, 0.0 }
0x14ad   : > { %v14864_v37 = vpop.xlane.xlu1 %6756 }
0x14ae   : > { %v7804_v49 = vpop.permute.xlu0 %7803 }
0x14b1   : > { %v7802_v50 = vpop.permute.xlu1 %7801 }
0x14b2   : > { %v14874_v17 = vpop.xlane.xlu0 %6762  ;;  %v7899_v4 = vsel %vm548_vm0, %v7802_v50, 0.0 }
0x14b6   : > { %v7808_v26 = vpop.permute.xlu0 %7807 }
0x14ba   : > { %v14878_v58 = vpop.xlane.xlu0 %6768 }
0x14be   : > { %v7812_v39 = vpop.permute.xlu0 %7811 }
0x14bf   : > { %v7914_v50 = vsel %vm548_vm0, %v7812_v39, 0.0 }
0x14c2   : > { %v14882_v29 = vpop.xlane.xlu0 %6774 }
0x14c6   : > { %v7816_v8 = vpop.permute.xlu0 %7815 }
0x14c9   : > { %6834 = vadd.xlane.f32.xlu0 %v6833_v42 }
0x14ca   : > { %v14891_v54 = vpop.xlane.xlu0 %6780 }
0x14cd   : > { %6837 = vadd.xlane.f32.xlu1 %v6836_v28 }
0x14ce   : > { %v7820_v28 = vpop.permute.xlu0 %7819 }
0x14d2   : > { %v14901_v15 = vpop.xlane.xlu0 %6786 }
0x14de   : > { %7853 = vrot.lane.b32.xlu1 %v14747_v44, %s11441_s22  ;;  %v14872_v44 = vpop.xlane.xlu1 %6765 }
0x14df   : > { %7855 = vrot.lane.b32.xlu0 %v14742_v13, %s11441_s22 }
0x14e2   : > { %v7806_v13 = vpop.permute.xlu1 %7805 }
0x14e3   : > { %v7905_v42 = vsel %vm548_vm0, %v7806_v13, 0.0  ;;  %v7824_v13 = vpop.permute.xlu0 %7823 }
0x14e6   : > { %v14876_v34 = vpop.xlane.xlu1 %6771 }
0x14ea   : > { %v7810_v3 = vpop.permute.xlu1 %7809 }
0x14ee   : > { %v14880_v6 = vpop.xlane.xlu1 %6777 }
0x14ef   : > { %v14970_v51 = vadd.f32 %v14880_v6, %v17119_v19  ;;  %v14982_v6 = vadd.f32 %v14891_v54, %v17120_v45 }
0x14f1   : > { %17121 = vst [vmem:[#allocation48_spill] sm:$0xff] %v14982_v6 }
0x14f2   : > { %v7814_v43 = vpop.permute.xlu1 %7813 }
0x14f6   : > { %v14886_v38 = vpop.xlane.xlu1 %6783 }
0x14f7   : > { %v14986_v1 = vadd.f32 %v14886_v38, %v17122_v48  ;;  %v14998_v38 = vadd.f32 %v14901_v15, %v17123_v25  ;;  %v17127_v15 = vld [vmem:[#allocation69_spill] sm:$0xff] }
0x14f9   : > { %17124 = vst [vmem:[#allocation49_spill] sm:$0xff] %v14998_v38 }
0x14fa   : > { %v7818_v31 = vpop.permute.xlu1 %7817 }
0x14fe   : > { %6840 = vadd.xlane.f32.xlu0 %v6839_v47  ;;  %v14897_v47 = vpop.xlane.xlu1 %6789 }
0x14ff   : > { %v15002_v36 = vadd.f32 %v14897_v47, %v17125_v56  ;;  %v17129_v47 = vld [vmem:[#allocation80_spill] sm:$0xff] }
0x1501   : > { %17126 = vst [vmem:[#allocation50_spill] sm:$0xff] %v15002_v36 }
0x1502   : > { %6843 = vadd.xlane.f32.xlu1 %v6842_v27  ;;  %v7911_v27 = vsel %vm548_vm0, %v7810_v3, 0.0  ;;  %v7822_v53 = vpop.permute.xlu1 %7821  ;;  %v14909_v3 = vpop.xlane.xlu0 %6792 }
0x1503   : > { %v15012_v21 = vadd.f32 %v14909_v3, %v17127_v15  ;;  %v17131_v3 = vld [vmem:[#allocation73_spill] sm:$0xff] }
0x1505   : > { %17128 = vst [vmem:[#allocation51_spill] sm:$0xff] %v15012_v21 }
0x1513   : > { %7857 = vrot.lane.b32.xlu1 %v14758_v16, %s11441_s22  ;;  %v7902_v16 = vsel %vm548_vm0, %v7804_v49, 0.0  ;;  %v7917_v49 = vsel %vm548_vm0, %v7814_v43, 0.0  ;;  %v7932_v43 = vsel %vm548_vm0, %v7824_v13, 0.0 }
0x1514   : > { %7859 = vrot.lane.b32.xlu0 %v14753_v24, %s11441_s22  ;;  %v7908_v24 = vsel %vm548_vm0, %v7808_v26, 0.0  ;;  %v7923_v26 = vsel %vm548_vm0, %v7818_v31, 0.0  ;;  %v17108_v31 = vld [vmem:[#allocation53_spill] sm:$0xff]  ;;  %s11443_s22 = smov [#allocation2]  }
0x1515   : > { %s11379_s18 = sshll.u32 %s11443_s22, 4  ;;  %s11380_s18 = int_to_ptr.vmem [resolvable:$false] %s11379_s18 }
0x1516   : > { %s11381_s27 = scalar_lea.vmem %s11380_s18, 512  ;;  %p11382_p1 = scmp.lt.s32.totalorder %s16340_s20, %s11380_s18 }
0x1517   : > { %p11383_p2 = scmp.lt.s32.totalorder %s11381_s27, %s11375_s26 }
0x1519   : > { %p11384_p3 = por %p11383_p2, %p11382_p1 }
0x151b   : > { %p11385_p4 = pnand %p11384_p3, %p11378_p0 }
0x1533   : > { %6846 = vadd.xlane.f32.xlu0 %v6845_v61  ;;  %v14905_v61 = vpop.xlane.xlu1 %6795 }
0x1534   : > { %v15016_v57 = vadd.f32 %v14905_v61, %v17129_v47  ;;  %v17133_v61 = vld [vmem:[#allocation82_spill] sm:$0xff] }
0x1536   : > { %17130 = vst [vmem:[#allocation52_spill] sm:$0xff] %v15016_v57 }
0x1537   : > { %6849 = vadd.xlane.f32.xlu1 %v6848_v9  ;;  %7894 = vadd.xlane.f32.xlu0 %v7893_v40  ;;  %v7920_v9 = vsel %vm548_vm0, %v7816_v8, 0.0  ;;  %v7926_v40 = vsel %vm548_vm0, %v7820_v28, 0.0  ;;  %v7826_v39 = vpop.permute.xlu1 %7825  ;;  %v17110_v28 = vld [vmem:[#allocation58_spill] sm:$0xff] }
0x153b   : > { %7897 = vadd.xlane.f32.xlu1 %v7896_v35  ;;  %7900 = vadd.xlane.f32.xlu0 %v7899_v4  ;;  %v7929_v35 = vsel %vm548_vm0, %v7822_v53, 0.0  ;;  %v7935_v4 = vsel %vm548_vm0, %v7826_v39, 0.0 }
0x153f   : > { %7903 = vadd.xlane.f32.xlu1 %v7902_v16  ;;  %7906 = vadd.xlane.f32.xlu0 %v7905_v42  ;;  %v7828_v16 = vpop.permute.xlu0 %7827  ;;  %v14918_v42 = vadd.f32 %v14866_v55, %v17108_v31 }
0x1540   : > { %v7938_v8 = vsel %vm548_vm0, %v7828_v16, 0.0 }
0x1541   : > { %17109 = vst [vmem:[#allocation44_spill] sm:$0xff] %v14918_v42 }
0x1543   : > { %7909 = vadd.xlane.f32.xlu1 %v7908_v24  ;;  %7912 = vadd.xlane.f32.xlu0 %v7911_v27  ;;  %v14922_v24 = vadd.f32 %v14864_v37, %v17110_v28  ;;  %v14926_v27 = vpop.xlane.xlu1 %6801  ;;  %v14928_v53 = vpop.xlane.xlu0 %6798 }
0x1544   : > { %v15028_v32 = vadd.f32 %v14926_v27, %v17133_v61 }
0x1546   : > { %17134 = vst [vmem:[#allocation96_spill] sm:$0xff] %v15028_v32 }
0x1547   : > { %7915 = vadd.xlane.f32.xlu1 %v7914_v50  ;;  %7918 = vadd.xlane.f32.xlu0 %v7917_v49  ;;  %v7830_v50 = vpop.permute.xlu1 %7829  ;;  %v7832_v13 = vpop.permute.xlu0 %7831 }
0x1548   : > { %v7941_v49 = vsel %vm548_vm0, %v7830_v50, 0.0  ;;  %v7944_v55 = vsel %vm548_vm0, %v7832_v13, 0.0  ;;  %v17116_v50 = vld [vmem:[#allocation64_spill] sm:$0xff] }
0x154b   : > { %7921 = vadd.xlane.f32.xlu1 %v7920_v9  ;;  %7924 = vadd.xlane.f32.xlu0 %v7923_v26  ;;  %v17111_v9 = vld [vmem:[#allocation60_spill] sm:$0xff]  ;;  %v17113_v26 = vld [vmem:[#allocation62_spill] sm:$0xff]  ;;  %v14944_v39 = vpop.xlane.xlu0 %6804 }
0x154c   : > { %v14934_v37 = vadd.f32 %v14874_v17, %v17111_v9  ;;  %v15040_v18 = vadd.f32 %v14944_v39, %v17135_v23 }
0x154e   : > { %17112 = vst [vmem:[#allocation45_spill] sm:$0xff] %v14934_v37  ;;  %17136 = vst [vmem:[#allocation95_spill] sm:$0xff] %v15040_v18 }
0x154f   : > { %7927 = vadd.xlane.f32.xlu1 %v7926_v40  ;;  %7930 = vadd.xlane.f32.xlu0 %v7929_v35  ;;  %v14938_v40 = vadd.f32 %v14872_v44, %v17113_v26  ;;  %v14942_v35 = vpop.xlane.xlu1 %6807  ;;  %v7836_v16 = vpop.permute.xlu0 %7835 }
0x1550   : > { %v7950_v17 = vsel %vm548_vm0, %v7836_v16, 0.0  ;;  %v15044_v0 = vadd.f32 %v14942_v35, %v17137_v12  ;;  %v17143_v35 = vld [vmem:[#allocation59_spill] sm:$0xff] }
0x1552   : > { %17138 = vst [vmem:[#allocation100_spill] sm:$0xff] %v15044_v0 }
0x1553   : > { %7933 = vadd.xlane.f32.xlu1 %v7932_v43  ;;  %7936 = vadd.xlane.f32.xlu0 %v7935_v4  ;;  %v7834_v43 = vpop.permute.xlu1 %7833 }
0x1554   : > { %v7947_v4 = vsel %vm548_vm0, %v7834_v43, 0.0 }
0x1557   : > { %7939 = vadd.xlane.f32.xlu1 %v7938_v8  ;;  %v17114_v8 = vld [vmem:[#allocation54_spill] sm:$0xff]  ;;  %v14958_v13 = vpop.xlane.xlu1 %6813 }
0x1558   : > { %v14950_v44 = vadd.f32 %v14878_v58, %v17114_v8 }
0x155a   : > { %17115 = vst [vmem:[#allocation46_spill] sm:$0xff] %v14950_v44 }
0x155b   : > { %v7838_v43 = vpop.permute.xlu1 %7837 }
0x155f   : > { %v14974_v30 = vpop.xlane.xlu1 %6819 }
0x1568   : > { %6919 = vperm.xlu1 %10920, %v14918_v42  }
0x1569   : > { %6916 = vperm.xlu0 %10919, %v14922_v24  }
0x1588   : > { %7942 = vadd.xlane.f32.xlu0 %v7941_v49  ;;  %v14954_v49 = vadd.f32 %v14876_v34, %v17116_v50 }
0x158c   : > { %7945 = vadd.xlane.f32.xlu1 %v7944_v55  ;;  %v14960_v55 = vpop.xlane.xlu0 %6810 }
0x1590   : > { %v7840_v16 = vpop.permute.xlu0 %7839 }
0x1591   : > { %v7956_v58 = vsel %vm548_vm0, %v7840_v16, 0.0 }
0x159d   : > { %6922 = vperm.xlu1 %10920, %v14934_v37  }
0x159e   : > { %6925 = vperm.xlu0 %10919, %v14938_v40  }
0x15bd   : > { %7948 = vadd.xlane.f32.xlu0 %v7947_v4  ;;  %v7953_v4 = vsel %vm548_vm0, %v7838_v43, 0.0  ;;  %v14976_v43 = vpop.xlane.xlu0 %6816 }
0x15be   : > { %v15062_v39 = vadd.f32 %v14976_v43, %v17143_v35 }
0x15c0   : > { %17144 = vst [vmem:[#allocation89_spill] sm:$0xff] %v15062_v39 }
0x15c1   : > { %7951 = vadd.xlane.f32.xlu1 %v7950_v17  ;;  %v17117_v17 = vld [vmem:[#allocation57_spill] sm:$0xff] }
0x15c2   : > { %v14966_v34 = vadd.f32 %v14882_v29, %v17117_v17 }
0x15c4   : > { %17118 = vst [vmem:[#allocation47_spill] sm:$0xff] %v14966_v34 }
0x15d2   : > { %6928 = vperm.xlu1 %10920, %v14950_v44  }
0x15d3   : > { %6931 = vperm.xlu0 %10919, %v14954_v49  }
0x15f2   : > { %7954 = vadd.xlane.f32.xlu0 %v7953_v4  ;;  %v7842_v4 = vpop.permute.xlu1 %7841 }
0x15f3   : > { %v7959_v16 = vsel %vm548_vm0, %v7842_v4, 0.0 }
0x15f6   : > { %7957 = vadd.xlane.f32.xlu1 %v7956_v58  ;;  %v7844_v58 = vpop.permute.xlu0 %7843  ;;  %v14990_v11 = vpop.xlane.xlu1 %6825 }
0x15f7   : > { %v7962_v29 = vsel %vm548_vm0, %v7844_v58, 0.0 }
0x15fa   : > { %v14992_v4 = vpop.xlane.xlu0 %6822 }
0x1607   : > { %6934 = vperm.xlu1 %10920, %v14966_v34  }
0x1608   : > { %6937 = vperm.xlu0 %10919, %v14970_v51  }
0x1627   : > { %7960 = vadd.xlane.f32.xlu0 %v7959_v16  ;;  %v7846_v16 = vpop.permute.xlu1 %7845 }
0x1628   : > { %v7965_v58 = vsel %vm548_vm0, %v7846_v16, 0.0 }
0x162b   : > { %7963 = vadd.xlane.f32.xlu1 %v7962_v29  ;;  %v7848_v29 = vpop.permute.xlu0 %7847  ;;  %v15006_v63 = vpop.xlane.xlu1 %6831 }
0x162c   : > { %v7968_v54 = vsel %vm548_vm0, %v7848_v29, 0.0 }
0x162f   : > { %v6829_v16 = vpop.xlane.xlu0 %6828  ;;  %v7850_v20 = vpop.permute.xlu1 %7849 }
0x1633   : > { %v7852_v29 = vpop.permute.xlu0 %7851  ;;  %v6838_v62 = vpop.xlane.xlu1 %6837 }
0x1637   : > { %v6835_v14 = vpop.xlane.xlu0 %6834 }
0x163b   : > { %v7856_v10 = vpop.permute.xlu0 %7855 }
0x163c   : > { %6940 = vperm.xlu1 %10920, %v14982_v6  }
0x163d   : > { %6943 = vperm.xlu0 %10919, %v14986_v1  }
0x165c   : > { %7966 = vadd.xlane.f32.xlu0 %v7965_v58  ;;  %v7971_v58 = vsel %vm548_vm0, %v7850_v20, 0.0  ;;  %v7854_v20 = vpop.permute.xlu1 %7853 }
0x1660   : > { %7969 = vadd.xlane.f32.xlu1 %v7968_v54  ;;  %v7974_v54 = vsel %vm548_vm0, %v7852_v29, 0.0  ;;  %v7980_v29 = vsel %vm548_vm0, %v7856_v10, 0.0  ;;  %v6844_v46 = vpop.xlane.xlu1 %6843 }
0x1664   : > { %v7858_v59 = vpop.permute.xlu1 %7857 }
0x1665   : > { %v7983_v10 = vsel %vm548_vm0, %v7858_v59, 0.0  ;;  %v17139_v59 = vld [vmem:[#allocation56_spill] sm:$0xff] }
0x1671   : > { %6946 = vperm.xlu1 %10920, %v14998_v38  }
0x1672   : > { %6949 = vperm.xlu0 %10919, %v15002_v36   ;;  %v17163_v36 = vld [vmem:[#allocation84_spill] sm:$0xff] }
0x1691   : > { %7972 = vadd.xlane.f32.xlu0 %v7971_v58  ;;  %v7977_v58 = vsel %vm548_vm0, %v7854_v20, 0.0  ;;  %v6850_v20 = vpop.xlane.xlu1 %6849 }
0x1692   : > { %v15113_v42 = vadd.f32 %v6850_v20, %v17163_v36 }
0x1695   : > { %7975 = vadd.xlane.f32.xlu1 %v7974_v54  ;;  %v15024_v54 = vadd.f32 %v14928_v53, %v17131_v3  ;;  %v7898_v2 = vpop.xlane.xlu1 %7897 }
0x1697   : > { %17132 = vst [vmem:[#allocation85_spill] sm:$0xff] %v15024_v54 }
0x1699   : > { %v7904_v41 = vpop.xlane.xlu1 %7903 }
0x169d   : > { %v7910_v22 = vpop.xlane.xlu1 %7909 }
0x16a1   : > { %v15034_v7 = vpop.xlane.xlu1 %7915 }
0x16a5   : > { %v15036_v60 = vpop.xlane.xlu1 %7921 }
0x16a6   : > { %6952 = vperm.xlu1 %10920, %v15012_v21  }
0x16a7   : > { %6955 = vperm.xlu0 %10919, %v15016_v57   ;;  %v17159_v57 = vld [vmem:[#allocation83_spill] sm:$0xff] }
0x16c6   : > { %7978 = vadd.xlane.f32.xlu0 %v7977_v58  ;;  %v6841_v58 = vpop.xlane.xlu0 %6840 }
0x16ca   : > { %7981 = vadd.xlane.f32.xlu1 %v7980_v29  ;;  %v7860_v29 = vpop.permute.xlu0 %7859 }
0x16cb   : > { %v7986_v53 = vsel %vm548_vm0, %v7860_v29, 0.0 }
0x16ce   : > { %v6847_v27 = vpop.xlane.xlu0 %6846 }
0x16d2   : > { %v7895_v5 = vpop.xlane.xlu0 %7894 }
0x16d6   : > { %v7901_v29 = vpop.xlane.xlu0 %7900 }
0x16d7   : > { %v15128_v20 = vadd.f32 %v7901_v29, %v17111_v9  ;;  %v15161_v29 = vadd.f32 %v15036_v60, %v17122_v48 }
0x16db   : > { %6958 = vperm.xlu1 %10920, %v15024_v54   ;;  %v15056_v54 = vadd.f32 %v14958_v13, %v17141_v33  ;;  %v17147_v13 = vld [vmem:[#allocation63_spill] sm:$0xff] }
0x16dc   : > { %6961 = vperm.xlu0 %10919, %v15028_v32   ;;  %v17156_v32 = vld [vmem:[#allocation81_spill] sm:$0xff] }
0x16dd   : > { %17142 = vst [vmem:[#allocation110_spill] sm:$0xff] %v15056_v54 }
0x16fb   : > { %7984 = vadd.xlane.f32.xlu0 %v7983_v10  ;;  %v15050_v10 = vadd.f32 %v14960_v55, %v17139_v59  ;;  %v7907_v55 = vpop.xlane.xlu0 %7906 }
0x16fd   : > { %17140 = vst [vmem:[#allocation94_spill] sm:$0xff] %v15050_v10 }
0x16ff   : > { %7987 = vadd.xlane.f32.xlu1 %v7986_v53  ;;  %v15052_v53 = vpop.xlane.xlu1 %7927  ;;  %v7913_v6 = vpop.xlane.xlu0 %7912 }
0x1703   : > { %v15068_v21 = vpop.xlane.xlu1 %7933 }
0x1707   : > { %v7940_v34 = vpop.xlane.xlu1 %7939 }
0x170b   : > { %v15097_v44 = vpop.permute.xlu1 %6919 }
0x1710   : > { %6964 = vperm.xlu1 %10920, %v15040_v18  }
0x1711   : > { %6967 = vperm.xlu0 %10919, %v15044_v0   ;;  %v17145_v0 = vld [vmem:[#allocation72_spill] sm:$0xff] }
0x1712   : > { %v15066_v18 = vadd.f32 %v14974_v30, %v17145_v0  ;;  %v17151_v30 = vld [vmem:[#allocation67_spill] sm:$0xff] }
0x1713   : > { %v15083_v43 = vadd.f32 %v6829_v16, %v17151_v30  ;;  %v17157_v16 = vld [vmem:[#allocation75_spill] sm:$0xff] }
0x1714   : > { %6970 = vperm.xlu1 %10920, %v15050_v10   ;;  %17146 = vst [vmem:[#allocation102_spill] sm:$0xff] %v15066_v18  ;;  %v15074_v10 = vadd.f32 %v14992_v4, %v17147_v13  ;;  %v17155_v4 = vld [vmem:[#allocation71_spill] sm:$0xff] }
0x1715   : > { %6973 = vperm.xlu0 %10919, %v15056_v54   ;;  %v17149_v54 = vld [vmem:[#allocation76_spill] sm:$0xff]  ;;  %17152 = vst [vmem:[#allocation105_spill] sm:$0xff] %v15083_v43 }
0x1716   : > { %17148 = vst [vmem:[#allocation98_spill] sm:$0xff] %v15074_v10  ;;  %v15078_v38 = vadd.f32 %v14990_v11, %v17149_v54  ;;  %v15092_v11 = vadd.f32 %v6835_v14, %v17155_v4  ;;  %v17161_v14 = vld [vmem:[#allocation77_spill] sm:$0xff] }
0x1718   : > { %6976 = vperm.xlu1 %10920, %v15062_v39   ;;  %17150 = vst [vmem:[#allocation123_spill] sm:$0xff] %v15078_v38  ;;  %v17153_v39 = vld [vmem:[#allocation79_spill] sm:$0xff] }
0x1719   : > { %6979 = vperm.xlu0 %10919, %v15066_v18   ;;  %v15087_v18 = vadd.f32 %v15006_v63, %v17153_v39  ;;  %v15102_v63 = vadd.f32 %v6841_v58, %v17157_v16  ;;  %v15118_v58 = vadd.f32 %v7895_v5, %v17110_v28  ;;  %v15136_v5 = vadd.f32 %v7907_v55, %v17114_v8 }
0x171b   : > { %17154 = vst [vmem:[#allocation101_spill] sm:$0xff] %v15087_v18  ;;  %17158 = vst [vmem:[#allocation122_spill] sm:$0xff] %v15102_v63 }
0x171c   : > { %6982 = vperm.xlu1 %10920, %v15074_v10   ;;  %v15095_v10 = vadd.f32 %v6838_v62, %v17156_v32  ;;  %v15110_v62 = vadd.f32 %v6847_v27, %v17161_v14 }
0x171d   : > { %6985 = vperm.xlu0 %10919, %v15078_v38   ;;  %v7919_v38 = vpop.xlane.xlu0 %7918 }
0x171e   : > { %17162 = vst [vmem:[#allocation121_spill] sm:$0xff] %v15110_v62 }
0x1720   : > { %6988 = vperm.xlu1 %10920, %v15083_v43   ;;  %v15105_v43 = vadd.f32 %v6844_v46, %v17159_v57 }
0x1721   : > { %6991 = vperm.xlu0 %10919, %v15087_v18   ;;  %v7946_v18 = vpop.xlane.xlu1 %7945  ;;  %v7925_v37 = vpop.xlane.xlu0 %7924 }
0x1722   : > { %17160 = vst [vmem:[#allocation109_spill] sm:$0xff] %v15105_v43 }
0x1724   : > { %6994 = vperm.xlu1 %10920, %v15092_v11  }
0x1725   : > { %6997 = vperm.xlu0 %10919, %v15095_v10   ;;  %v15120_v46 = vpop.permute.xlu1 %6922 }
0x1728   : > { %7000 = vperm.xlu1 %10920, %v15102_v63   ;;  %v15123_v63 = vadd.f32 %v7898_v2, %v17108_v31  ;;  %v15139_v31 = vadd.f32 %v7910_v22, %v17116_v50  ;;  %v15157_v22 = vadd.f32 %v7919_v38, %v17120_v45  ;;  %v15174_v45 = vadd.f32 %v15052_v53, %v17125_v56 }
0x1729   : > { %7003 = vperm.xlu0 %10919, %v15105_v43   ;;  %v7931_v43 = vpop.xlane.xlu0 %7930  ;;  %v7952_v27 = vpop.xlane.xlu1 %7951  ;;  %v15191_v38 = vadd.f32 %v7940_v34, %v17133_v61 }
0x172a   : > { %v15179_v60 = vadd.f32 %v7931_v43, %v17127_v15  ;;  %v15209_v61 = vadd.f32 %v7952_v27, %v17141_v33 }
0x172c   : > { %7006 = vperm.xlu1 %10920, %v15110_v62   ;;  %v15131_v62 = vadd.f32 %v7904_v41, %v17113_v26  ;;  %v15146_v41 = vadd.f32 %v7913_v6, %v17117_v17  ;;  %v15152_v26 = vadd.f32 %v15034_v7, %v17119_v19  ;;  %v15166_v19 = vadd.f32 %v7925_v37, %v17123_v25 }
0x172d   : > { %7009 = vperm.xlu0 %10919, %v15113_v42   ;;  %v7937_v2 = vpop.xlane.xlu0 %7936  ;;  %v15141_v28 = vpop.permute.xlu1 %6928  ;;  %v15183_v25 = vadd.f32 %v15068_v21, %v17129_v47  ;;  %v15201_v47 = vadd.f32 %v7946_v18, %v17137_v12 }
0x172e   : > { %v15188_v56 = vadd.f32 %v7937_v2, %v17131_v3 }
0x1730   : > { %8054 = vperm.xlu1 %10920, %v15118_v58  }
0x1731   : > { %8057 = vperm.xlu0 %10919, %v15123_v63   ;;  %v15148_v9 = vpop.permute.xlu0 %6916  ;;  %v7958_v8 = vpop.xlane.xlu1 %7957 }
0x1732   : > { %v15217_v43 = vadd.f32 %v7958_v8, %v17145_v0 }
0x1734   : > { %8060 = vperm.xlu1 %10920, %v15128_v20  }
0x1735   : > { %8063 = vperm.xlu0 %10919, %v15131_v62   ;;  %v7943_v50 = vpop.xlane.xlu0 %7942  ;;  %v15170_v17 = vpop.permute.xlu1 %6934 }
0x1736   : > { %v15198_v21 = vadd.f32 %v7943_v50, %v17135_v23 }
0x1738   : > { %8066 = vperm.xlu1 %10920, %v15136_v5   ;;  %17164 = vst [vmem:[#allocation120_spill] sm:$0xff] %v15198_v21 }
0x1739   : > { %8069 = vperm.xlu0 %10919, %v15139_v31   ;;  %v15168_v7 = vpop.permute.xlu0 %6925  ;;  %v7964_v6 = vpop.xlane.xlu1 %7963 }
0x173a   : > { %v15225_v2 = vadd.f32 %v7964_v6, %v17149_v54 }
0x173c   : > { %8072 = vperm.xlu1 %10920, %v15146_v41   ;;  %17168 = vst [vmem:[#allocation88_spill] sm:$0xff] %v15225_v2 }
0x173d   : > { %8075 = vperm.xlu0 %10919, %v15152_v26   ;;  %v7949_v48 = vpop.xlane.xlu0 %7948  ;;  %v15193_v53 = vpop.permute.xlu1 %6940 }
0x173e   : > { %v15206_v34 = vadd.f32 %v7949_v48, %v17139_v59 }
0x1740   : > { %8078 = vperm.xlu1 %10920, %v15157_v22   ;;  %17165 = vst [vmem:[#allocation87_spill] sm:$0xff] %v15206_v34 }
0x1741   : > { %8081 = vperm.xlu0 %10919, %v15161_v29   ;;  %v6932_v37 = vpop.permute.xlu0 %6931  ;;  %v7970_v55 = vpop.xlane.xlu1 %7969 }
0x1742   : > { %v15230_v0 = vadd.f32 %v7970_v55, %v17153_v39  ;;  %v17172_v39 = vld [vmem:[#allocation10_spill] sm:$0xff] }
0x1743   : > { %v7023_v55 = vrot.slane %v15120_v46, %v17172_v39  ;;  %v7050_v46 = vrot.slane %v15193_v53, %v17172_v39 }
0x1744   : > { %8084 = vperm.xlu1 %10920, %v15166_v19   ;;  %17169 = vst [vmem:[#allocation97_spill] sm:$0xff] %v15230_v0 }
0x1745   : > { %8087 = vperm.xlu0 %10919, %v15174_v45   ;;  %v7955_v15 = vpop.xlane.xlu0 %7954  ;;  %v6947_v12 = vpop.permute.xlu1 %6946 }
0x1746   : > { %v15214_v23 = vadd.f32 %v7955_v15, %v17143_v35 }
0x1748   : > { %8090 = vperm.xlu1 %10920, %v15179_v60   ;;  %17166 = vst [vmem:[#allocation86_spill] sm:$0xff] %v15214_v23 }
0x1749   : > { %8093 = vperm.xlu0 %10919, %v15183_v25   ;;  %v6938_v3 = vpop.permute.xlu0 %6937  ;;  %v7976_v27 = vpop.xlane.xlu1 %7975 }
0x174c   : > { %8096 = vperm.xlu1 %10920, %v15188_v56  }
0x174d   : > { %8099 = vperm.xlu0 %10919, %v15191_v38   ;;  %v7961_v18 = vpop.xlane.xlu0 %7960  ;;  %v6953_v8 = vpop.permute.xlu1 %6952 }
0x174e   : > { %v15222_v59 = vadd.f32 %v7961_v18, %v17147_v13  ;;  %v15234_v13 = vadd.f32 %v7976_v27, %v17156_v32  ;;  %v7032_v32 = vrot.slane %v15141_v28, %v17172_v39 }
0x1750   : > { %8102 = vperm.xlu1 %10920, %v15198_v21   ;;  %17167 = vst [vmem:[#allocation91_spill] sm:$0xff] %v15222_v59  ;;  %17170 = vst [vmem:[#allocation103_spill] sm:$0xff] %v15234_v13 }
0x1751   : > { %8105 = vperm.xlu0 %10919, %v15201_v47   ;;  %v6944_v33 = vpop.permute.xlu0 %6943 }
0x1754   : > { %8108 = vperm.xlu1 %10920, %v15206_v34  }
0x1755   : > { %8111 = vperm.xlu0 %10919, %v15209_v61   ;;  %v7967_v35 = vpop.xlane.xlu0 %7966 }
0x1757   : > { %v7982_v48 = vpop.xlane.xlu1 %7981 }
0x1758   : > { %8114 = vperm.xlu1 %10920, %v15214_v23   ;;  %v15238_v6 = vadd.f32 %v7982_v48, %v17159_v57  ;;  %v7014_v57 = vrot.slane %v15148_v9, %v17172_v39  ;;  %v7041_v48 = vrot.slane %v15170_v17, %v17172_v39 }
0x1759   : > { %8117 = vperm.xlu0 %10919, %v15217_v43   ;;  %v6950_v50 = vpop.permute.xlu0 %6949 }
0x175a   : > { %17171 = vst [vmem:[#allocation93_spill] sm:$0xff] %v15238_v6 }
0x175c   : > { %8120 = vperm.xlu1 %10920, %v15222_v59   ;;  %v17173_v59 = vld [vmem:[#allocation11_spill] sm:$0xff] }
0x175d   : > { %8123 = vperm.xlu0 %10919, %v15225_v2   ;;  %v7973_v54 = vpop.xlane.xlu0 %7972  ;;  %v7027_v23 = vrot.slane %v15168_v7, %v17173_v59  ;;  %v7036_v27 = vrot.slane %v6932_v37, %v17173_v59  ;;  %v7018_v34 = vrot.slane %v15097_v44, %v17173_v59  ;;  %v7045_v21 = vrot.slane %v6938_v3, %v17173_v59 }
0x175e   : > { %v7054_v7 = vrot.slane %v6944_v33, %v17173_v59  ;;  %v7063_v44 = vrot.slane %v6950_v50, %v17173_v59 }
0x175f   : > { %v7028_v37 = vsel %vm1642_vm9, %v7027_v23, %v7023_v55  ;;  %v7037_v9 = vsel %vm1642_vm9, %v7036_v27, %v7032_v32  ;;  %v7019_v3 = vsel %vm1642_vm9, %v7018_v34, %v7014_v57  ;;  %v7046_v53 = vsel %vm1642_vm9, %v7045_v21, %v7041_v48 }
0x1760   : > { %v7155_v23 = vsel %vm1779_vm10, %v7028_v37, %v7019_v3 }
0x1761   : > { %8129 = vperm.xlu0 %10919, %v15230_v0   ;;  %v6956_v15 = vpop.permute.xlu0 %6955  ;;  %v7068_v0 = vrot.slane %v6953_v8, %v17172_v39  ;;  %v7156_v50 = vsel %vm1781_vm11, %v7037_v9, %v7155_v23 }
0x1762   : > { %v7072_v17 = vrot.slane %v6956_v15, %v17173_v59  ;;  %v7157_v8 = vsel %vm1783_vm12, %v7046_v53, %v7156_v50 }
0x1764   : > { %v7073_v15 = vsel %vm1642_vm9, %v7072_v17, %v7068_v0  ;;  %v15284_v0 = vadd.f32 %v7967_v35, %v17151_v30 }
0x1765   : > { %8135 = vperm.xlu0 %10919, %v15234_v13   ;;  %v7979_v18 = vpop.xlane.xlu0 %7978  ;;  %v7059_v13 = vrot.slane %v6947_v12, %v17172_v39  ;;  %v7055_v12 = vsel %vm1642_vm9, %v7054_v7, %v7050_v46 }
0x1766   : > { %v7158_v34 = vsel %vm1785_vm13, %v7055_v12, %v7157_v8  ;;  %v15293_v9 = vadd.f32 %v7979_v18, %v17157_v16 }
0x1767   : > { %v7064_v55 = vsel %vm1642_vm9, %v7063_v44, %v7059_v13 }
0x1768   : > { %17174 = vst [vmem:[#allocation92_spill] sm:$0xff] %v15293_v9 }
0x1769   : > { %8141 = vperm.xlu0 %10919, %v15238_v6   ;;  %v6959_v6 = vpop.permute.xlu1 %6958  ;;  %v6962_v28 = vpop.permute.xlu0 %6961 }
0x176a   : > { %v7077_v33 = vrot.slane %v6959_v6, %v17172_v39  ;;  %v7081_v2 = vrot.slane %v6962_v28, %v17173_v59  ;;  %v7159_v6 = vsel %vm1787_vm14, %v7064_v55, %v7158_v34  ;;  %v15289_v28 = vadd.f32 %v7973_v54, %v17155_v4 }
0x176b   : > { %v7160_v32 = vsel %vm1789_vm15, %v7073_v15, %v7159_v6 }
0x176c   : > { %v7082_v21 = vsel %vm1642_vm9, %v7081_v2, %v7077_v33 }
0x176d   : > { %v7161_v27 = vsel %vm1791_vm1, %v7082_v21, %v7160_v32 }
0x176e   : > { %v7171_v57 = vsel %vm1802_vm2, %v7161_v27, -inf }
0x1780   : > { %7172 = vmax.xlane.f32.xlu1 %v7171_v57 }
0x1788   : > { %v7985_v48 = vpop.xlane.xlu0 %7984 }
0x1789   : > { %v15297_v30 = vadd.f32 %v7985_v48, %v17161_v14 }
0x178b   : > { %17175 = vst [vmem:[#allocation90_spill] sm:$0xff] %v15297_v30 }
0x178c   : > { %v7988_v46 = vpop.xlane.xlu1 %7987 }
0x178d   : > { %v15281_v13 = vadd.f32 %v7988_v46, %v17163_v36 }
0x178f   : > { %8147 = vperm.xlu0 %10919, %v15281_v13  }
0x1790   : > { %v6965_v2 = vpop.permute.xlu1 %6964  ;;  %v6968_v7 = vpop.permute.xlu0 %6967 }
0x1791   : > { %8126 = vperm.xlu1 %10920, %v15284_v0   ;;  %v7086_v50 = vrot.slane %v6965_v2, %v17172_v39  ;;  %v7090_v14 = vrot.slane %v6968_v7, %v17173_v59 }
0x1793   : > { %v7091_v46 = vsel %vm1642_vm9, %v7090_v14, %v7086_v50 }
0x1794   : > { %v6971_v37 = vpop.permute.xlu1 %6970  ;;  %v6974_v44 = vpop.permute.xlu0 %6973 }
0x1795   : > { %8132 = vperm.xlu1 %10920, %v15289_v28   ;;  %v7095_v53 = vrot.slane %v6971_v37, %v17172_v39  ;;  %v7099_v33 = vrot.slane %v6974_v44, %v17173_v59 }
0x1797   : > { %v7100_v21 = vsel %vm1642_vm9, %v7099_v33, %v7095_v53 }
0x1798   : > { %v6977_v36 = vpop.permute.xlu1 %6976  ;;  %v6980_v17 = vpop.permute.xlu0 %6979  ;;  %v7162_v44 = vsel %vm1779_vm10, %v7100_v21, %v7091_v46 }
0x1799   : > { %8138 = vperm.xlu1 %10920, %v15293_v9   ;;  %v7104_v16 = vrot.slane %v6977_v36, %v17172_v39  ;;  %v7108_v18 = vrot.slane %v6980_v17, %v17173_v59 }
0x179b   : > { %v7109_v27 = vsel %vm1642_vm9, %v7108_v18, %v7104_v16 }
0x179c   : > { %v6983_v35 = vpop.permute.xlu1 %6982  ;;  %v6986_v3 = vpop.permute.xlu0 %6985  ;;  %v7163_v17 = vsel %vm1781_vm11, %v7109_v27, %v7162_v44 }
0x179d   : > { %8144 = vperm.xlu1 %10920, %v15297_v30   ;;  %v7113_v55 = vrot.slane %v6983_v35, %v17172_v39  ;;  %v7117_v8 = vrot.slane %v6986_v3, %v17173_v59  ;;  %v17179_v30 = vld [vmem:[#allocation16_spill] sm:$0xff] }
0x179f   : > { %v7118_v2 = vsel %vm1642_vm9, %v7117_v8, %v7113_v55 }
0x17a0   : > { %v6989_v4 = vpop.permute.xlu1 %6988  ;;  %v6992_v54 = vpop.permute.xlu0 %6991  ;;  %v7164_v3 = vsel %vm1783_vm12, %v7118_v2, %v7163_v17 }
0x17a1   : > { %v7122_v15 = vrot.slane %v6989_v4, %v17172_v39  ;;  %v7126_v34 = vrot.slane %v6992_v54, %v17173_v59 }
0x17a3   : > { %v7127_v36 = vsel %vm1642_vm9, %v7126_v34, %v7122_v15 }
0x17a4   : > { %v6995_v23 = vpop.permute.xlu1 %6994  ;;  %v6998_v12 = vpop.permute.xlu0 %6997  ;;  %v7165_v33 = vsel %vm1785_vm13, %v7127_v36, %v7164_v3 }
0x17a5   : > { %v7131_v6 = vrot.slane %v6995_v23, %v17172_v39  ;;  %v7135_v32 = vrot.slane %v6998_v12, %v17173_v59 }
0x17a7   : > { %v7136_v35 = vsel %vm1642_vm9, %v7135_v32, %v7131_v6 }
0x17a8   : > { %v7001_v57 = vpop.permute.xlu1 %7000  ;;  %v7004_v48 = vpop.permute.xlu0 %7003  ;;  %v7166_v23 = vsel %vm1787_vm14, %v7136_v35, %v7165_v33 }
0x17a9   : > { %v7140_v7 = vrot.slane %v7001_v57, %v17172_v39  ;;  %v7144_v37 = vrot.slane %v7004_v48, %v17173_v59 }
0x17ab   : > { %v7145_v4 = vsel %vm1642_vm9, %v7144_v37, %v7140_v7 }
0x17ac   : > { %v7007_v54 = vpop.permute.xlu1 %7006  ;;  %v7010_v53 = vpop.permute.xlu0 %7009  ;;  %v7167_v50 = vsel %vm1789_vm15, %v7145_v4, %v7166_v23 }
0x17ad   : > { %v7149_v16 = vrot.slane %v7007_v54, %v17172_v39  ;;  %v7153_v18 = vrot.slane %v7010_v53, %v17173_v59 }
0x17af   : > { %v7154_v12 = vsel %vm1642_vm9, %v7153_v18, %v7149_v16 }
0x17b0   : > { %v8055_v14 = vpop.permute.xlu1 %8054  ;;  %v8058_v55 = vpop.permute.xlu0 %8057  ;;  %v7168_v8 = vsel %vm1791_vm1, %v7154_v12, %v7167_v50 }
0x17b1   : > { %v7174_v15 = vsel %vm1802_vm2, %v7168_v8, -inf  ;;  %v8152_v35 = vrot.slane %v8055_v14, %v17172_v39  ;;  %v8156_v3 = vrot.slane %v8058_v55, %v17173_v59 }
0x17b2   : > { %7175 = vmax.xlane.f32.xlu0 %v7174_v15 }
0x17b3   : > { %v8157_v55 = vsel %vm1642_vm9, %v8156_v3, %v8152_v35 }
0x17b4   : > { %v8061_v34 = vpop.permute.xlu1 %8060  ;;  %v8064_v21 = vpop.permute.xlu0 %8063 }
0x17b5   : > { %v8161_v2 = vrot.slane %v8061_v34, %v17172_v39  ;;  %v8165_v7 = vrot.slane %v8064_v21, %v17173_v59 }
0x17b7   : > { %v8166_v16 = vsel %vm1642_vm9, %v8165_v7, %v8161_v2 }
0x17b8   : > { %v8067_v6 = vpop.permute.xlu1 %8066  ;;  %v8070_v32 = vpop.permute.xlu0 %8069  ;;  %v8293_v21 = vsel %vm1779_vm10, %v8166_v16, %v8157_v55 }
0x17b9   : > { %v8170_v37 = vrot.slane %v8067_v6, %v17172_v39  ;;  %v8174_v44 = vrot.slane %v8070_v32, %v17173_v59 }
0x17bb   : > { %v8175_v12 = vsel %vm1642_vm9, %v8174_v44, %v8170_v37 }
0x17bc   : > { %v8073_v27 = vpop.permute.xlu1 %8072  ;;  %v8076_v57 = vpop.permute.xlu0 %8075  ;;  %v8294_v32 = vsel %vm1781_vm11, %v8175_v12, %v8293_v21 }
0x17bd   : > { %v8179_v4 = vrot.slane %v8073_v27, %v17172_v39  ;;  %v8183_v54 = vrot.slane %v8076_v57, %v17173_v59 }
0x17bf   : > { %v8184_v8 = vsel %vm1642_vm9, %v8183_v54, %v8179_v4 }
0x17c0   : > { %v8079_v48 = vpop.permute.xlu1 %8078  ;;  %v8082_v46 = vpop.permute.xlu0 %8081  ;;  %v8295_v57 = vsel %vm1783_vm12, %v8184_v8, %v8294_v32 }
0x17c1   : > { %v8188_v53 = vrot.slane %v8079_v48, %v17172_v39  ;;  %v8192_v33 = vrot.slane %v8082_v46, %v17173_v59 }
0x17c3   : > { %v8193_v6 = vsel %vm1642_vm9, %v8192_v33, %v8188_v53 }
0x17c4   : > { %v8085_v36 = vpop.permute.xlu1 %8084  ;;  %v8088_v17 = vpop.permute.xlu0 %8087  ;;  %v8296_v7 = vsel %vm1785_vm13, %v8193_v6, %v8295_v57 }
0x17c5   : > { %v8197_v18 = vrot.slane %v8085_v36, %v17172_v39  ;;  %v8201_v23 = vrot.slane %v8088_v17, %v17173_v59 }
0x17c7   : > { %v8202_v27 = vsel %vm1642_vm9, %v8201_v23, %v8197_v18 }
0x17c8   : > { %v8091_v50 = vpop.permute.xlu1 %8090  ;;  %v8094_v14 = vpop.permute.xlu0 %8093  ;;  %v8297_v36 = vsel %vm1787_vm14, %v8202_v27, %v8296_v7 }
0x17c9   : > { %v8206_v15 = vrot.slane %v8091_v50, %v17172_v39  ;;  %v8210_v34 = vrot.slane %v8094_v14, %v17173_v59 }
0x17cb   : > { %v8211_v48 = vsel %vm1642_vm9, %v8210_v34, %v8206_v15  ;;  %v17176_v15 = vld [vmem:[#allocation13_spill] sm:$0xff] }
0x17cc   : > { %v8097_v46 = vpop.permute.xlu1 %8096  ;;  %v8100_v2 = vpop.permute.xlu0 %8099  ;;  %v8298_v35 = vsel %vm1789_vm15, %v8211_v48, %v8297_v36  ;;  %v17177_v48 = vld [vmem:[#allocation14_spill] sm:$0xff] }
0x17cd   : > { %v8215_v37 = vrot.slane %v8097_v46, %v17172_v39  ;;  %v8219_v44 = vrot.slane %v8100_v2, %v17173_v59 }
0x17cf   : > { %v8220_v17 = vsel %vm1642_vm9, %v8219_v44, %v8215_v37 }
0x17d0   : > { %v8299_v3 = vsel %vm1791_vm1, %v8220_v17, %v8298_v35  ;;  %v8106_v54 = vpop.permute.xlu0 %8105  ;;  %v8103_v53 = vpop.permute.xlu1 %8102 }
0x17d1   : > { %v8309_v4 = vsel %vm1802_vm2, %v8299_v3, -inf  ;;  %v8224_v7 = vrot.slane %v8103_v53, %v17172_v39  ;;  %v8228_v37 = vrot.slane %v8106_v54, %v17173_v59 }
0x17d2   : > { %8310 = vmax.xlane.f32.xlu0 %v8309_v4 }
0x17d4   : > { %v8112_v33 = vpop.permute.xlu0 %8111  ;;  %v8109_v16 = vpop.permute.xlu1 %8108 }
0x17d5   : > { %v8233_v32 = vrot.slane %v8109_v16, %v17172_v39  ;;  %v8237_v27 = vrot.slane %v8112_v33, %v17173_v59  ;;  %v17178_v16 = vld [vmem:[#allocation15_spill] sm:$0xff] }
0x17d7   : > { %v8238_v3 = vsel %vm1642_vm9, %v8237_v27, %v8233_v32 }
0x17d8   : > { %v8118_v18 = vpop.permute.xlu0 %8117  ;;  %v8115_v23 = vpop.permute.xlu1 %8114 }
0x17d9   : > { %v8242_v44 = vrot.slane %v8115_v23, %v17172_v39 }
0x17dc   : > { %v8124_v12 = vpop.permute.xlu0 %8123  ;;  %v8121_v50 = vpop.permute.xlu1 %8120 }
0x17dd   : > { %v8251_v36 = vrot.slane %v8121_v50, %v17172_v39  ;;  %v8255_v17 = vrot.slane %v8124_v12, %v17173_v59 }
0x17e0   : > { %v8130_v14 = vpop.permute.xlu0 %8129 }
0x17e1   : > { %v8264_v32 = vrot.slane %v8130_v14, %v17173_v59 }
0x17e4   : > { %v8136_v21 = vpop.permute.xlu0 %8135 }
0x17e5   : > { %v8273_v27 = vrot.slane %v8136_v21, %v17173_v59 }
0x17e8   : > { %v8142_v33 = vpop.permute.xlu0 %8141 }
0x17e9   : > { %v8282_v14 = vrot.slane %v8142_v33, %v17173_v59 }
0x180d   : > { %v15364_v55 = vpop.xlane.xlu1 %7172 }
0x180e   : > { %v15368_v8 = vrot.slane %v15364_v55, %v17075_v52  ;;  %v15372_v34 = vrot.slane %v15364_v55, %v17176_v15  ;;  %v15380_v46 = vrot.slane %v15364_v55, %v17177_v48  ;;  %v15406_v9 = vrot.slane %v15364_v55, %v17179_v30 }
0x1810   : > { %v7259_v6 = vsub.f32 %v14922_v24, %v15368_v8  ;;  %v7262_v2 = vsub.f32 %v14938_v40, %v15372_v34  ;;  %v8246_v24 = vrot.slane %v8118_v18, %v17173_v59  ;;  %v15393_v40 = vrot.slane %v15364_v55, %v17178_v16 }
0x1811   : > { %v8127_v57 = vpop.permute.xlu1 %8126  ;;  %v7264_v54 = vsub.f32 %v14954_v49, %v15380_v46  ;;  %v8229_v18 = vsel %vm1642_vm9, %v8228_v37, %v8224_v7  ;;  %v8148_v37 = vpop.permute.xlu0 %8147 }
0x1812   : > { %v7291_v35 = vmul.f32 1.442695, %v7259_v6  ;;  %v7297_v53 = vmul.f32 1.442695, %v7262_v2  ;;  %v8260_v23 = vrot.slane %v8127_v57, %v17172_v39  ;;  %v8300_v12 = vsel %vm1779_vm10, %v8238_v3, %v8229_v18 }
0x1813   : > { %v8247_v50 = vsel %vm1642_vm9, %v8246_v24, %v8242_v44  ;;  %v8256_v6 = vsel %vm1642_vm9, %v8255_v17, %v8251_v36  ;;  %v7266_v57 = vsub.f32 %v14970_v51, %v15393_v40  ;;  %v7301_v7 = vmul.f32 1.442695, %v7264_v54 }
0x1814   : > { %11193 = vpow2.f32 %v7291_v35  ;;  %v8301_v24 = vsel %vm1781_vm11, %v8247_v50, %v8300_v12  ;;  %v8265_v21 = vsel %vm1642_vm9, %v8264_v32, %v8260_v23  ;;  %v17180_v35 = vld [vmem:[#allocation17_spill] sm:$0xff]  ;;  %v7268_v51 = vsub.f32 %v14986_v1, %v15406_v9  ;;  %v17181_v1 = vld [vmem:[#allocation18_spill] sm:$0xff] }
0x1815   : > { %v8133_v4 = vpop.permute.xlu1 %8132  ;;  %11195 = vpow2.f32 %v7297_v53  ;;  %v8302_v36 = vsel %vm1783_vm12, %v8256_v6, %v8301_v24  ;;  %v15419_v3 = vrot.slane %v15364_v55, %v17180_v35  ;;  %v7305_v33 = vmul.f32 1.442695, %v7266_v57 }
0x1816   : > { %v8269_v49 = vrot.slane %v8133_v4, %v17172_v39  ;;  %v8291_v4 = vrot.slane %v8148_v37, %v17173_v59  ;;  %11197 = vpow2.f32 %v7301_v7  ;;  %v8303_v18 = vsel %vm1785_vm13, %v8265_v21, %v8302_v36  ;;  %v17183_v7 = vld [vmem:[#allocation50_spill] sm:$0xff]  ;;  %v17184_v21 = vld [vmem:[#allocation45_spill] sm:$0xff] }
0x1817   : > { %v7270_v37 = vsub.f32 %v17183_v7, %v15419_v3  ;;  %11199 = vpow2.f32 %v7305_v33  ;;  %v7261_v36 = vsub.f32 %v17184_v21, %v15372_v34  ;;  %v17188_v34 = vld [vmem:[#allocation96_spill] sm:$0xff] }
0x1818   : > { %v8274_v17 = vsel %vm1642_vm9, %v8273_v27, %v8269_v49  ;;  %v7206_v27 = vrot.slane %v15364_v55, %v17181_v1  ;;  %v17182_v49 = vld [vmem:[#allocation44_spill] sm:$0xff] }
0x1819   : > { %v8139_v2 = vpop.permute.xlu1 %8138  ;;  %v8304_v12 = vsel %vm1787_vm14, %v8274_v17, %v8303_v18  ;;  %v7313_v18 = vmul.f32 1.442695, %v7270_v37  ;;  %v17190_v37 = vld [vmem:[#allocation48_spill] sm:$0xff] }
0x181a   : > { %v8278_v44 = vrot.slane %v8139_v2, %v17172_v39  ;;  %v7260_v2 = vsub.f32 %v17182_v49, %v15368_v8  ;;  %v17185_v8 = vld [vmem:[#allocation19_spill] sm:$0xff] }
0x181c   : > { %v8283_v54 = vsel %vm1642_vm9, %v8282_v14, %v8278_v44  ;;  %v7309_v44 = vmul.f32 1.442695, %v7268_v51  ;;  %v7293_v17 = vmul.f32 1.442695, %v7260_v2  ;;  %v17187_v51 = vld [vmem:[#allocation46_spill] sm:$0xff] }
0x181d   : > { %v8145_v53 = vpop.permute.xlu1 %8144  ;;  %v8305_v32 = vsel %vm1789_vm15, %v8283_v54, %v8304_v12  ;;  %v17186_v54 = vld [vmem:[#allocation52_spill] sm:$0xff]  ;;  %v7295_v12 = vmul.f32 1.442695, %v7261_v36 }
0x181e   : > { %v8287_v23 = vrot.slane %v8145_v53, %v17172_v39  ;;  %v15428_v50 = vpop.eup %11193  ;;  %v7272_v53 = vsub.f32 %v17186_v54, %v7206_v27  ;;  %11201 = vpow2.f32 %v7309_v44  ;;  %v7267_v44 = vsub.f32 %v17190_v37, %v15406_v9  ;;  %v17197_v37 = vld [vmem:[#allocation95_spill] sm:$0xff] }
0x181f   : > { %7388 = vperm.xlu0 %10919, %v15428_v50   ;;  %v15441_v14 = vpop.eup %11195  ;;  %11203 = vpow2.f32 %v7293_v17 }
0x1820   : > { %v8292_v6 = vsel %vm1642_vm9, %v8291_v4, %v8287_v23  ;;  %v7210_v4 = vrot.slane %v15364_v55, %v17185_v8  ;;  %v15449_v33 = vpop.eup %11197  ;;  %v7263_v23 = vsub.f32 %v17187_v51, %v15380_v46  ;;  %11205 = vpow2.f32 %v7313_v18  ;;  %v17189_v55 = vld [vmem:[#allocation47_spill] sm:$0xff] }
0x1821   : > { %v8306_v57 = vsel %vm1791_vm1, %v8292_v6, %v8305_v32  ;;  %v7317_v32 = vmul.f32 1.442695, %v7272_v53  ;;  %v15455_v49 = vpop.eup %11199  ;;  %v7265_v2 = vsub.f32 %v17189_v55, %v15393_v40  ;;  %11207 = vpow2.f32 %v7295_v12  ;;  %v17191_v40 = vld [vmem:[#allocation49_spill] sm:$0xff]  ;;  %v17193_v18 = vld [vmem:[#allocation51_spill] sm:$0xff] }
0x1822   : > { %v8312_v24 = vsel %vm1802_vm2, %v8306_v57, -inf  ;;  %v7274_v6 = vsub.f32 %v17188_v34, %v7210_v4  ;;  %v7299_v57 = vmul.f32 1.442695, %v7263_v23  ;;  %v7269_v17 = vsub.f32 %v17191_v40, %v15419_v3  ;;  %v17195_v3 = vld [vmem:[#allocation85_spill] sm:$0xff] }
0x1823   : > { %8313 = vmax.xlane.f32.xlu1 %v8312_v24  ;;  %7397 = vperm.xlu0 %10919, %v15441_v14   ;;  %11209 = vpow2.f32 %v7317_v32  ;;  %v7303_v24 = vmul.f32 1.442695, %v7265_v2  ;;  %v7307_v54 = vmul.f32 1.442695, %v7267_v44  ;;  %v7271_v51 = vsub.f32 %v17193_v18, %v7206_v27 }
0x1824   : > { %v7321_v7 = vmul.f32 1.442695, %v7274_v6  ;;  %11211 = vpow2.f32 %v7299_v57  ;;  %v7311_v23 = vmul.f32 1.442695, %v7269_v17  ;;  %v7273_v6 = vsub.f32 %v17195_v3, %v7210_v4 }
0x1825   : > { %v7315_v32 = vmul.f32 1.442695, %v7271_v51  ;;  %v17201_v51 = vld [vmem:[#allocation110_spill] sm:$0xff] }
0x1826   : > { %11213 = vpow2.f32 %v7321_v7  ;;  %v7319_v7 = vmul.f32 1.442695, %v7273_v6  ;;  %v17202_v6 = vld [vmem:[#allocation89_spill] sm:$0xff] }
0x1827   : > { %7403 = vperm.xlu0 %10919, %v15449_v33   ;;  %11215 = vpow2.f32 %v7303_v24  ;;  %v17198_v24 = vld [vmem:[#allocation100_spill] sm:$0xff] }
0x1828   : > { %v15460_v46 = vpop.eup %11201  ;;  %11217 = vpow2.f32 %v7307_v54  ;;  %v17200_v54 = vld [vmem:[#allocation94_spill] sm:$0xff] }
0x1829   : > { %v15465_v21 = vpop.eup %11203  ;;  %11219 = vpow2.f32 %v7311_v23 }
0x182a   : > { %v15467_v36 = vpop.eup %11205  ;;  %11221 = vpow2.f32 %v7315_v32 }
0x182b   : > { %7409 = vperm.xlu0 %10919, %v15455_v49   ;;  %v15473_v53 = vpop.eup %11207  ;;  %11223 = vpow2.f32 %v7319_v7 }
0x182c   : > { %17192 = vst [vmem:[#allocation107_spill] sm:$0xff] %v15473_v53 }
0x182d   : > { %v15475_v9 = vpop.eup %11209 }
0x182e   : > { %v15480_v12 = vpop.eup %11211 }
0x182f   : > { %7415 = vperm.xlu0 %10919, %v15460_v46   ;;  %17194 = vst [vmem:[#allocation99_spill] sm:$0xff] %v15480_v12 }
0x1830   : > { %v15482_v34 = vpop.eup %11213 }
0x1831   : > { %v15487_v55 = vpop.eup %11215 }
0x1832   : > { %17196 = vst [vmem:[#allocation108_spill] sm:$0xff] %v15487_v55  ;;  %v15494_v4 = vpop.eup %11217 }
0x1833   : > { %7421 = vperm.xlu0 %10919, %v15467_v36   ;;  %17199 = vst [vmem:[#allocation106_spill] sm:$0xff] %v15494_v4 }
0x1834   : > { %7391 = vperm.xlu1 %10920, %v15465_v21  }
0x1837   : > { %7427 = vperm.xlu0 %10919, %v15475_v9  }
0x1838   : > { %7394 = vperm.xlu1 %10920, %v15473_v53  }
0x183b   : > { %7433 = vperm.xlu0 %10919, %v15482_v34  }
0x183c   : > { %7400 = vperm.xlu1 %10920, %v15480_v12  }
0x183f   : > { %v7176_v2 = vpop.xlane.xlu0 %7175 }
0x1840   : > { %v7214_v27 = vrot.slane %v7176_v2, %v17075_v52  ;;  %v7218_v57 = vrot.slane %v7176_v2, %v17176_v15  ;;  %7406 = vperm.xlu1 %10920, %v15487_v55   ;;  %v7222_v17 = vrot.slane %v7176_v2, %v17177_v48  ;;  %v15500_v55 = vpop.eup %11219  ;;  %v7230_v7 = vrot.slane %v7176_v2, %v17179_v30 }
0x1842   : > { %v7275_v44 = vsub.f32 %v17197_v37, %v7214_v27  ;;  %v7276_v40 = vsub.f32 %v17198_v24, %v7214_v27  ;;  %v7277_v18 = vsub.f32 %v17200_v54, %v7218_v57  ;;  %v7278_v23 = vsub.f32 %v17201_v51, %v7218_v57  ;;  %v17203_v24 = vld [vmem:[#allocation102_spill] sm:$0xff] }
0x1843   : > { %v7279_v32 = vsub.f32 %v17202_v6, %v7222_v17  ;;  %v7226_v27 = vrot.slane %v7176_v2, %v17178_v16  ;;  %v7280_v53 = vsub.f32 %v17203_v24, %v7222_v17  ;;  %v17206_v51 = vld [vmem:[#allocation98_spill] sm:$0xff]  ;;  %v17208_v17 = vld [vmem:[#allocation101_spill] sm:$0xff] }
0x1844   : > { %7412 = vperm.xlu1 %10920, %v15494_v4   ;;  %v7323_v3 = vmul.f32 1.442695, %v7275_v44  ;;  %v7325_v12 = vmul.f32 1.442695, %v7276_v40  ;;  %v7327_v37 = vmul.f32 1.442695, %v7277_v18  ;;  %v15506_v4 = vpop.eup %11221 }
0x1845   : > { %v7329_v54 = vmul.f32 1.442695, %v7278_v23  ;;  %17204 = vst [vmem:[#allocation104_spill] sm:$0xff] %v15506_v4  ;;  %v7331_v57 = vmul.f32 1.442695, %v7279_v32  ;;  %v17205_v44 = vld [vmem:[#allocation123_spill] sm:$0xff]  ;;  %v15512_v6 = vpop.eup %11223  ;;  %v7284_v23 = vsub.f32 %v17208_v17, %v7230_v7 }
0x1846   : > { %11225 = vpow2.f32 %v7323_v3  ;;  %v7282_v40 = vsub.f32 %v17205_v44, %v7226_v27  ;;  %v7333_v18 = vmul.f32 1.442695, %v7280_v53  ;;  %v7281_v3 = vsub.f32 %v17206_v51, %v7226_v27  ;;  %17207 = vst [vmem:[#allocation20_spill] sm:$0xff] %v15512_v6  ;;  %v17210_v24 = vld [vmem:[#allocation105_spill] sm:$0xff] }
0x1847   : > { %11227 = vpow2.f32 %v7325_v12  ;;  %v7234_v12 = vrot.slane %v7176_v2, %v17180_v35  ;;  %v7238_v53 = vrot.slane %v7176_v2, %v17181_v1  ;;  %v17212_v17 = vld [vmem:[#allocation109_spill] sm:$0xff] }
0x1848   : > { %7418 = vperm.xlu1 %10920, %v15500_v55   ;;  %11229 = vpow2.f32 %v7327_v37  ;;  %v7337_v32 = vmul.f32 1.442695, %v7282_v40  ;;  %v7335_v44 = vmul.f32 1.442695, %v7281_v3  ;;  %v7242_v3 = vrot.slane %v7176_v2, %v17185_v8 }
0x1849   : > { %11231 = vpow2.f32 %v7329_v54  ;;  %v7286_v27 = vsub.f32 %v15095_v10, %v7234_v12  ;;  %v7285_v40 = vsub.f32 %v15092_v11, %v7234_v12 }
0x184a   : > { %11233 = vpow2.f32 %v7331_v57  ;;  %v7341_v57 = vmul.f32 1.442695, %v7284_v23  ;;  %v17214_v23 = vld [vmem:[#allocation122_spill] sm:$0xff] }
0x184b   : > { %11235 = vpow2.f32 %v7333_v18  ;;  %v7345_v10 = vmul.f32 1.442695, %v7286_v27  ;;  %v7343_v11 = vmul.f32 1.442695, %v7285_v40 }
0x184c   : > { %7424 = vperm.xlu1 %10920, %v15506_v4   ;;  %v7283_v4 = vsub.f32 %v17210_v24, %v7230_v7  ;;  %11237 = vpow2.f32 %v7337_v32  ;;  %v7288_v24 = vsub.f32 %v17212_v17, %v7238_v53 }
0x184d   : > { %11239 = vpow2.f32 %v7335_v44  ;;  %v17215_v44 = vld [vmem:[#allocation121_spill] sm:$0xff] }
0x184e   : > { %v7339_v18 = vmul.f32 1.442695, %v7283_v4  ;;  %11241 = vpow2.f32 %v7341_v57  ;;  %v7290_v4 = vsub.f32 %v15113_v42, %v7242_v3  ;;  %v7349_v2 = vmul.f32 1.442695, %v7288_v24 }
0x184f   : > { %v7289_v17 = vsub.f32 %v17215_v44, %v7242_v3 }
0x1850   : > { %7430 = vperm.xlu1 %10920, %v15512_v6   ;;  %v15517_v37 = vpop.eup %11225  ;;  %11243 = vpow2.f32 %v7339_v18  ;;  %v7353_v18 = vmul.f32 1.442695, %v7290_v4 }
0x1851   : > { %17209 = vst [vmem:[#allocation12_spill] sm:$0xff] %v15517_v37  ;;  %v15520_v54 = vpop.eup %11227  ;;  %11245 = vpow2.f32 %v7345_v10 }
0x1852   : > { %7439 = vperm.xlu0 %10919, %v15520_v54   ;;  %v15526_v51 = vpop.eup %11229  ;;  %11247 = vpow2.f32 %v7343_v11 }
0x1853   : > { %17211 = vst [vmem:[#allocation53_spill] sm:$0xff] %v15526_v51  ;;  %v15529_v7 = vpop.eup %11231  ;;  %11249 = vpow2.f32 %v7349_v2 }
0x1854   : > { %7436 = vperm.xlu1 %10920, %v15517_v37   ;;  %v15535_v32 = vpop.eup %11233  ;;  %v7287_v37 = vsub.f32 %v17214_v23, %v7238_v53 }
0x1855   : > { %17213 = vst [vmem:[#allocation58_spill] sm:$0xff] %v15535_v32  ;;  %v15538_v12 = vpop.eup %11235 }
0x1856   : > { %7445 = vperm.xlu0 %10919, %v15529_v7   ;;  %v7347_v27 = vmul.f32 1.442695, %v7287_v37  ;;  %v15544_v57 = vpop.eup %11237  ;;  %v7351_v37 = vmul.f32 1.442695, %v7289_v17 }
0x1857   : > { %v15548_v53 = vpop.eup %11239 }
0x1858   : > { %7442 = vperm.xlu1 %10920, %v15526_v51   ;;  %17216 = vst [vmem:[#allocation60_spill] sm:$0xff] %v15548_v53  ;;  %11251 = vpow2.f32 %v7347_v27  ;;  %v15558_v10 = vpop.eup %11241 }
0x1859   : > { %11253 = vpow2.f32 %v7353_v18 }
0x185a   : > { %7451 = vperm.xlu0 %10919, %v15538_v12   ;;  %v15560_v23 = vpop.eup %11243  ;;  %11255 = vpow2.f32 %v7351_v37 }
0x185b   : > { %17217 = vst [vmem:[#allocation62_spill] sm:$0xff] %v15560_v23 }
0x185c   : > { %7448 = vperm.xlu1 %10920, %v15535_v32  }
0x185e   : > { %7457 = vperm.xlu0 %10919, %v15544_v57  }
0x185f   : > { %v15546_v51 = vpop.xlane.xlu0 %8310 }
0x1860   : > { %v8320_v40 = vrot.slane %v15546_v51, %v17075_v52  ;;  %v8324_v42 = vrot.slane %v15546_v51, %v17176_v15  ;;  %7454 = vperm.xlu1 %10920, %v15548_v53   ;;  %v8328_v11 = vrot.slane %v15546_v51, %v17177_v48  ;;  %v8332_v27 = vrot.slane %v15546_v51, %v17178_v16 }
0x1862   : > { %v8397_v3 = vsub.f32 %v15118_v58, %v8320_v40  ;;  %v8398_v24 = vsub.f32 %v15123_v63, %v8320_v40  ;;  %7463 = vperm.xlu0 %10919, %v15558_v10   ;;  %v8400_v4 = vsub.f32 %v15131_v62, %v8324_v42  ;;  %v8399_v2 = vsub.f32 %v15128_v20, %v8324_v42  ;;  %v15568_v63 = vpop.eup %11245 }
0x1863   : > { %v15570_v17 = vpop.eup %11247  ;;  %v8402_v40 = vsub.f32 %v15139_v31, %v8328_v11  ;;  %v8401_v18 = vsub.f32 %v15136_v5, %v8328_v11 }
0x1864   : > { %7460 = vperm.xlu1 %10920, %v15560_v23   ;;  %v8429_v58 = vmul.f32 1.442695, %v8397_v3  ;;  %v8431_v44 = vmul.f32 1.442695, %v8398_v24  ;;  %17218 = vst [vmem:[#allocation54_spill] sm:$0xff] %v15570_v17  ;;  %v15578_v42 = vpop.eup %11249  ;;  %v8336_v3 = vrot.slane %v15546_v51, %v17179_v30  ;;  %v8404_v24 = vsub.f32 %v15152_v26, %v8332_v27 }
0x1865   : > { %v8435_v62 = vmul.f32 1.442695, %v8400_v4  ;;  %v8433_v20 = vmul.f32 1.442695, %v8399_v2  ;;  %v15580_v37 = vpop.eup %11251  ;;  %v8439_v31 = vmul.f32 1.442695, %v8402_v40  ;;  %v8403_v4 = vsub.f32 %v15146_v41, %v8332_v27 }
0x1866   : > { %7469 = vperm.xlu0 %10919, %v15568_v63   ;;  %11257 = vpow2.f32 %v8431_v44  ;;  %17219 = vst [vmem:[#allocation64_spill] sm:$0xff] %v15580_v37  ;;  %v8437_v5 = vmul.f32 1.442695, %v8401_v18  ;;  %v15588_v11 = vpop.eup %11253  ;;  %v8406_v44 = vsub.f32 %v15161_v29, %v8336_v3  ;;  %v8443_v26 = vmul.f32 1.442695, %v8404_v24 }
0x1867   : > { %11259 = vpow2.f32 %v8429_v58  ;;  %17220 = vst [vmem:[#allocation57_spill] sm:$0xff] %v15588_v11  ;;  %v15590_v2 = vpop.eup %11255  ;;  %v8340_v58 = vrot.slane %v15546_v51, %v17180_v35  ;;  %v8405_v40 = vsub.f32 %v15157_v22, %v8336_v3  ;;  %v8441_v41 = vmul.f32 1.442695, %v8403_v4 }
0x1868   : > { %7466 = vperm.xlu1 %10920, %v15570_v17   ;;  %11261 = vpow2.f32 %v8435_v62  ;;  %17221 = vst [vmem:[#allocation70_spill] sm:$0xff] %v15590_v2  ;;  %v8344_v18 = vrot.slane %v15546_v51, %v17181_v1  ;;  %v8447_v29 = vmul.f32 1.442695, %v8406_v44  ;;  %v8348_v4 = vrot.slane %v15546_v51, %v17185_v8 }
0x1869   : > { %11263 = vpow2.f32 %v8433_v20  ;;  %v8408_v20 = vsub.f32 %v15174_v45, %v8340_v58  ;;  %v8407_v24 = vsub.f32 %v15166_v19, %v8340_v58  ;;  %v8445_v22 = vmul.f32 1.442695, %v8405_v40 }
0x186a   : > { %7475 = vperm.xlu0 %10919, %v15578_v42   ;;  %11265 = vpow2.f32 %v8439_v31  ;;  %v8409_v44 = vsub.f32 %v15179_v60, %v8344_v18  ;;  %v8412_v40 = vsub.f32 %v15191_v38, %v8348_v4 }
0x186b   : > { %11267 = vpow2.f32 %v8437_v5  ;;  %v8410_v5 = vsub.f32 %v15183_v25, %v8344_v18  ;;  %v8451_v45 = vmul.f32 1.442695, %v8408_v20  ;;  %v8449_v19 = vmul.f32 1.442695, %v8407_v24 }
0x186c   : > { %7472 = vperm.xlu1 %10920, %v15580_v37   ;;  %11269 = vpow2.f32 %v8443_v26  ;;  %v8411_v25 = vsub.f32 %v15188_v56, %v8348_v4  ;;  %v8459_v18 = vmul.f32 1.442695, %v8412_v40  ;;  %v17238_v37 = vld [vmem:[#allocation88_spill] sm:$0xff] }
0x186d   : > { %11271 = vpow2.f32 %v8441_v41  ;;  %v8455_v51 = vmul.f32 1.442695, %v8410_v5  ;;  %v8453_v41 = vmul.f32 1.442695, %v8409_v44 }
0x186e   : > { %7481 = vperm.xlu0 %10919, %v15588_v11   ;;  %11273 = vpow2.f32 %v8447_v29  ;;  %v8457_v38 = vmul.f32 1.442695, %v8411_v25 }
0x186f   : > { %11275 = vpow2.f32 %v8445_v22 }
0x1870   : > { %7478 = vperm.xlu1 %10920, %v15590_v2   ;;  %v15598_v27 = vpop.eup %11257  ;;  %11277 = vpow2.f32 %v8451_v45 }
0x1871   : > { %17222 = vst [vmem:[#allocation61_spill] sm:$0xff] %v15598_v27  ;;  %v15600_v62 = vpop.eup %11259  ;;  %11279 = vpow2.f32 %v8449_v19 }
0x1872   : > { %17223 = vst [vmem:[#allocation74_spill] sm:$0xff] %v15600_v62  ;;  %8529 = vperm.xlu0 %10919, %v15598_v27   ;;  %v15608_v3 = vpop.eup %11261  ;;  %11281 = vpow2.f32 %v8455_v51 }
0x1873   : > { %17224 = vst [vmem:[#allocation65_spill] sm:$0xff] %v15608_v3  ;;  %v15610_v31 = vpop.eup %11263  ;;  %11283 = vpow2.f32 %v8453_v41 }
0x1874   : > { %8526 = vperm.xlu1 %10920, %v15600_v62   ;;  %17225 = vst [vmem:[#allocation78_spill] sm:$0xff] %v15610_v31  ;;  %v15618_v58 = vpop.eup %11265  ;;  %11285 = vpow2.f32 %v8459_v18 }
0x1875   : > { %17226 = vst [vmem:[#allocation69_spill] sm:$0xff] %v15618_v58  ;;  %v15620_v26 = vpop.eup %11267  ;;  %11287 = vpow2.f32 %v8457_v38 }
0x1876   : > { %8535 = vperm.xlu0 %10919, %v15608_v3   ;;  %17227 = vst [vmem:[#allocation80_spill] sm:$0xff] %v15620_v26  ;;  %v15626_v20 = vpop.eup %11269 }
0x1877   : > { %17228 = vst [vmem:[#allocation73_spill] sm:$0xff] %v15626_v20  ;;  %v15628_v60 = vpop.eup %11271 }
0x1878   : > { %8532 = vperm.xlu1 %10920, %v15610_v31   ;;  %17229 = vst [vmem:[#allocation82_spill] sm:$0xff] %v15628_v60  ;;  %v15632_v29 = vpop.eup %11273 }
0x1879   : > { %17230 = vst [vmem:[#allocation55_spill] sm:$0xff] %v15632_v29  ;;  %v15634_v24 = vpop.eup %11275 }
0x187a   : > { %8541 = vperm.xlu0 %10919, %v15618_v58   ;;  %17231 = vst [vmem:[#allocation66_spill] sm:$0xff] %v15634_v24  ;;  %v15638_v56 = vpop.eup %11277 }
0x187b   : > { %17232 = vst [vmem:[#allocation56_spill] sm:$0xff] %v15638_v56  ;;  %v15640_v22 = vpop.eup %11279 }
0x187c   : > { %8538 = vperm.xlu1 %10920, %v15620_v26   ;;  %17233 = vst [vmem:[#allocation68_spill] sm:$0xff] %v15640_v22  ;;  %v15644_v4 = vpop.eup %11281 }
0x187d   : > { %17234 = vst [vmem:[#allocation59_spill] sm:$0xff] %v15644_v4  ;;  %v15646_v5 = vpop.eup %11283 }
0x187e   : > { %8547 = vperm.xlu0 %10919, %v15626_v20   ;;  %17235 = vst [vmem:[#allocation72_spill] sm:$0xff] %v15646_v5  ;;  %v15650_v45 = vpop.eup %11285 }
0x187f   : > { %17236 = vst [vmem:[#allocation63_spill] sm:$0xff] %v15650_v45  ;;  %v15652_v44 = vpop.eup %11287 }
0x1880   : > { %8544 = vperm.xlu1 %10920, %v15628_v60   ;;  %17237 = vst [vmem:[#allocation76_spill] sm:$0xff] %v15652_v44 }
0x1882   : > { %8553 = vperm.xlu0 %10919, %v15632_v29   ;;  %v17239_v29 = vld [vmem:[#allocation97_spill] sm:$0xff] }
0x1884   : > { %8550 = vperm.xlu1 %10920, %v15634_v24  }
0x1886   : > { %8559 = vperm.xlu0 %10919, %v15638_v56  }
0x1888   : > { %8556 = vperm.xlu1 %10920, %v15640_v22  }
0x188a   : > { %8565 = vperm.xlu0 %10919, %v15644_v4  }
0x188c   : > { %8562 = vperm.xlu1 %10920, %v15646_v5  }
0x188e   : > { %8571 = vperm.xlu0 %10919, %v15650_v45  }
0x1890   : > { %8568 = vperm.xlu1 %10920, %v15652_v44  }
0x189e   : > { %v15656_v19 = vpop.permute.xlu0 %7388 }
0x18a2   : > { %v7398_v40 = vpop.permute.xlu0 %7397 }
0x18a3   : > { %v7499_v27 = vrot.slane %v7398_v40, %v17173_v59 }
0x18a6   : > { %v7404_v51 = vpop.permute.xlu0 %7403 }
0x18aa   : > { %v7410_v22 = vpop.permute.xlu0 %7409 }
0x18ab   : > { %v7517_v40 = vrot.slane %v7410_v22, %v17173_v59 }
0x18ae   : > { %v7416_v2 = vpop.permute.xlu0 %7415 }
0x18b0   : > { %v8314_v25 = vpop.xlane.xlu1 %8313 }
0x18b1   : > { %v15659_v41 = vrot.slane %v8314_v25, %v17075_v52  ;;  %v15662_v18 = vrot.slane %v8314_v25, %v17176_v15  ;;  %v15667_v24 = vrot.slane %v8314_v25, %v17177_v48  ;;  %v15672_v31 = vrot.slane %v8314_v25, %v17178_v16 }
0x18b2   : > { %v15677_v4 = vrot.slane %v8314_v25, %v17179_v30  ;;  %v15682_v17 = vrot.slane %v8314_v25, %v17180_v35  ;;  %v15689_v53 = vrot.slane %v8314_v25, %v17181_v1 }
0x18b3   : > { %v8414_v38 = vsub.f32 %v15201_v47, %v15659_v41  ;;  %v8416_v44 = vsub.f32 %v15209_v61, %v15662_v18  ;;  %v8418_v62 = vsub.f32 %v15217_v43, %v15667_v24  ;;  %v8420_v56 = vsub.f32 %v17238_v37, %v15672_v31  ;;  %v17241_v37 = vld [vmem:[#allocation103_spill] sm:$0xff] }
0x18b4   : > { %v7392_v5 = vpop.permute.xlu1 %7391  ;;  %v8422_v23 = vsub.f32 %v17239_v29, %v15677_v4  ;;  %v15698_v29 = vrot.slane %v8314_v25, %v17185_v8 }
0x18b5   : > { %v8463_v60 = vmul.f32 1.442695, %v8414_v38  ;;  %v8467_v45 = vmul.f32 1.442695, %v8416_v44  ;;  %v8471_v61 = vmul.f32 1.442695, %v8418_v62  ;;  %v8424_v62 = vsub.f32 %v17241_v37, %v15682_v17 }
0x18b6   : > { %v8475_v43 = vmul.f32 1.442695, %v8420_v56  ;;  %v7490_v37 = vrot.slane %v7392_v5, %v17173_v59 }
0x18b7   : > { %11289 = vpow2.f32 %v8463_v60  ;;  %v7422_v60 = vpop.permute.xlu0 %7421  ;;  %v8483_v25 = vmul.f32 1.442695, %v8424_v62 }
0x18b8   : > { %v7395_v26 = vpop.permute.xlu1 %7394  ;;  %11291 = vpow2.f32 %v8467_v45  ;;  %v8479_v45 = vmul.f32 1.442695, %v8422_v23  ;;  %v7535_v62 = vrot.slane %v7422_v60, %v17173_v59 }
0x18b9   : > { %11293 = vpow2.f32 %v8471_v61  ;;  %v7495_v58 = vrot.slane %v7395_v26, %v17172_v39  ;;  %v7508_v26 = vrot.slane %v7404_v51, %v17173_v59  ;;  %v8428_v51 = vsub.f32 %v15281_v13, %v15698_v29 }
0x18ba   : > { %11295 = vpow2.f32 %v8475_v43 }
0x18bb   : > { %v7428_v56 = vpop.permute.xlu0 %7427  ;;  %11297 = vpow2.f32 %v8479_v45  ;;  %v7500_v6 = vsel %vm1642_vm9, %v7499_v27, %v7495_v58 }
0x18bc   : > { %v7401_v47 = vpop.permute.xlu1 %7400  ;;  %11299 = vpow2.f32 %v8483_v25 }
0x18bd   : > { %v7504_v61 = vrot.slane %v7401_v47, %v17172_v39  ;;  %v7486_v47 = vrot.slane %v15656_v19, %v17172_v39 }
0x18bf   : > { %v7491_v19 = vsel %vm1642_vm9, %v7490_v37, %v7486_v47  ;;  %v7434_v13 = vpop.permute.xlu0 %7433 }
0x18c0   : > { %v7407_v38 = vpop.permute.xlu1 %7406  ;;  %v7553_v25 = vrot.slane %v7434_v13, %v17173_v59 }
0x18c1   : > { %v15686_v44 = vpop.eup %11289  ;;  %v7513_v23 = vrot.slane %v7407_v38, %v17172_v39  ;;  %v7526_v38 = vrot.slane %v7416_v2, %v17173_v59  ;;  %v7544_v2 = vrot.slane %v7428_v56, %v17173_v59 }
0x18c2   : > { %17240 = vst [vmem:[#allocation67_spill] sm:$0xff] %v15686_v44  ;;  %8577 = vperm.xlu0 %10919, %v15686_v44   ;;  %v15695_v32 = vpop.eup %11291  ;;  %v17243_v44 = vld [vmem:[#allocation93_spill] sm:$0xff] }
0x18c3   : > { %17242 = vst [vmem:[#allocation79_spill] sm:$0xff] %v15695_v32  ;;  %v8426_v11 = vsub.f32 %v17243_v44, %v15689_v53  ;;  %v15714_v5 = vpop.eup %11293  ;;  %v7518_v22 = vsel %vm1642_vm9, %v7517_v40, %v7513_v23 }
0x18c4   : > { %v7413_v20 = vpop.permute.xlu1 %7412 }
0x18c5   : > { %v7522_v43 = vrot.slane %v7413_v20, %v17172_v39  ;;  %v7509_v20 = vsel %vm1642_vm9, %v7508_v26, %v7504_v61  ;;  %v15730_v61 = vpop.eup %11295 }
0x18c6   : > { %8583 = vperm.xlu0 %10919, %v15695_v32   ;;  %v8487_v32 = vmul.f32 1.442695, %v8426_v11 }
0x18c7   : > { %v7527_v58 = vsel %vm1642_vm9, %v7526_v38, %v7522_v43  ;;  %v8491_v43 = vmul.f32 1.442695, %v8428_v51 }
0x18c8   : > { %v7419_v3 = vpop.permute.xlu1 %7418  ;;  %11301 = vpow2.f32 %v8487_v32 }
0x18c9   : > { %v7531_v44 = vrot.slane %v7419_v3, %v17172_v39  ;;  %v7627_v3 = vsel %vm1779_vm10, %v7500_v6, %v7491_v19  ;;  %11303 = vpow2.f32 %v8491_v43 }
0x18ca   : > { %8589 = vperm.xlu0 %10919, %v15714_v5   ;;  %v7628_v60 = vsel %vm1781_vm11, %v7509_v20, %v7627_v3  ;;  %v17244_v20 = vld [vmem:[#allocation120_spill] sm:$0xff] }
0x18cb   : > { %v7536_v11 = vsel %vm1642_vm9, %v7535_v62, %v7531_v44  ;;  %v7629_v37 = vsel %vm1783_vm12, %v7518_v22, %v7628_v60  ;;  %v15743_v62 = vpop.eup %11297 }
0x18cc   : > { %v7425_v45 = vpop.permute.xlu1 %7424  ;;  %v7630_v56 = vsel %vm1785_vm13, %v7527_v58, %v7629_v37 }
0x18cd   : > { %v7540_v27 = vrot.slane %v7425_v45, %v17172_v39  ;;  %v7631_v47 = vsel %vm1787_vm14, %v7536_v11, %v7630_v56  ;;  %v8413_v45 = vsub.f32 %v17244_v20, %v15659_v41  ;;  %v17247_v11 = vld [vmem:[#allocation86_spill] sm:$0xff] }
0x18ce   : > { %8595 = vperm.xlu0 %10919, %v15730_v61   ;;  %v8417_v37 = vsub.f32 %v17247_v11, %v15667_v24  ;;  %v8421_v24 = vsub.f32 %v15284_v0, %v15677_v4  ;;  %v17250_v0 = vld [vmem:[#allocation92_spill] sm:$0xff] }
0x18cf   : > { %v7545_v23 = vsel %vm1642_vm9, %v7544_v2, %v7540_v27  ;;  %v15752_v27 = vpop.eup %11299  ;;  %v17245_v2 = vld [vmem:[#allocation87_spill] sm:$0xff]  ;;  %v8461_v13 = vmul.f32 1.442695, %v8413_v45  ;;  %v8425_v4 = vsub.f32 %v17250_v0, %v15689_v53 }
0x18d0   : > { %v7431_v26 = vpop.permute.xlu1 %7430  ;;  %v7632_v38 = vsel %vm1789_vm15, %v7545_v23, %v7631_v47  ;;  %v8415_v3 = vsub.f32 %v17245_v2, %v15662_v18  ;;  %v17249_v18 = vld [vmem:[#allocation91_spill] sm:$0xff]  ;;  %v8469_v43 = vmul.f32 1.442695, %v8417_v37 }
0x18d1   : > { %v7549_v6 = vrot.slane %v7431_v26, %v17172_v39  ;;  %v15739_v40 = vpop.permute.xlu0 %7439  ;;  %11305 = vpow2.f32 %v8461_v13 }
0x18d2   : > { %8601 = vperm.xlu0 %10919, %v15743_v62   ;;  %v15757_v60 = vpop.eup %11301  ;;  %v8465_v23 = vmul.f32 1.442695, %v8415_v3 }
0x18d3   : > { %v7554_v44 = vsel %vm1642_vm9, %v7553_v25, %v7549_v6  ;;  %17246 = vst [vmem:[#allocation71_spill] sm:$0xff] %v15757_v60  ;;  %v15762_v56 = vpop.eup %11303  ;;  %v8419_v6 = vsub.f32 %v17249_v18, %v15672_v31  ;;  %v8423_v31 = vsub.f32 %v15289_v28, %v15682_v17  ;;  %v17251_v18 = vld [vmem:[#allocation90_spill] sm:$0xff] }
0x18d4   : > { %v15747_v19 = vpop.permute.xlu1 %7436  ;;  %v7633_v22 = vsel %vm1791_vm1, %v7554_v44, %v7632_v38  ;;  %17248 = vst [vmem:[#allocation81_spill] sm:$0xff] %v15762_v56  ;;  %11307 = vpow2.f32 %v8465_v23 }
0x18d5   : > { %v7643_v32 = vsel %vm1802_vm2, %v7633_v22, 0.0  ;;  %v7446_v51 = vpop.permute.xlu0 %7445  ;;  %11309 = vpow2.f32 %v8469_v43  ;;  %v8473_v38 = vmul.f32 1.442695, %v8419_v6  ;;  %v8481_v11 = vmul.f32 1.442695, %v8423_v31 }
0x18d6   : > { %7644 = vadd.xlane.f32.xlu1 %v7643_v32  ;;  %8607 = vperm.xlu0 %10919, %v15752_v27   ;;  %v8477_v32 = vmul.f32 1.442695, %v8421_v24  ;;  %v8427_v6 = vsub.f32 %v17251_v18, %v15698_v29  ;;  %v8485_v43 = vmul.f32 1.442695, %v8425_v4  ;;  %v7558_v53 = vrot.slane %v15747_v19, %v17172_v39 }
0x18d7   : > { %11311 = vpow2.f32 %v8473_v38  ;;  %v7571_v31 = vrot.slane %v7446_v51, %v17173_v59  ;;  %v7562_v4 = vrot.slane %v15739_v40, %v17173_v59 }
0x18d8   : > { %v7443_v58 = vpop.permute.xlu1 %7442  ;;  %11313 = vpow2.f32 %v8477_v32  ;;  %v8489_v29 = vmul.f32 1.442695, %v8427_v6 }
0x18d9   : > { %v7452_v41 = vpop.permute.xlu0 %7451  ;;  %v7567_v28 = vrot.slane %v7443_v58, %v17172_v39  ;;  %11315 = vpow2.f32 %v8481_v11  ;;  %v7563_v6 = vsel %vm1642_vm9, %v7562_v4, %v7558_v53 }
0x18da   : > { %8613 = vperm.xlu0 %10919, %v15757_v60   ;;  %v7580_v58 = vrot.slane %v7452_v41, %v17173_v59  ;;  %11317 = vpow2.f32 %v8485_v43 }
0x18db   : > { %v15769_v45 = vpop.eup %11305  ;;  %11319 = vpow2.f32 %v8489_v29 }
0x18dc   : > { %v7449_v26 = vpop.permute.xlu1 %7448 }
0x18dd   : > { %v7458_v25 = vpop.permute.xlu0 %7457  ;;  %v7576_v24 = vrot.slane %v7449_v26, %v17172_v39  ;;  %v7572_v26 = vsel %vm1642_vm9, %v7571_v31, %v7567_v28 }
0x18de   : > { %8619 = vperm.xlu0 %10919, %v15762_v56   ;;  %v15774_v3 = vpop.eup %11307  ;;  %v7589_v11 = vrot.slane %v7458_v25, %v17173_v59  ;;  %v7634_v31 = vsel %vm1779_vm10, %v7572_v26, %v7563_v6 }
0x18df   : > { %v15779_v23 = vpop.eup %11309  ;;  %v7581_v51 = vsel %vm1642_vm9, %v7580_v58, %v7576_v24 }
0x18e0   : > { %v7455_v47 = vpop.permute.xlu1 %7454 }
0x18e1   : > { %v7464_v44 = vpop.permute.xlu0 %7463  ;;  %v7585_v32 = vrot.slane %v7455_v47, %v17172_v39  ;;  %v15790_v0 = vpop.eup %11311 }
0x18e2   : > { %v7598_v47 = vrot.slane %v7464_v44, %v17173_v59  ;;  %v7635_v44 = vsel %vm1781_vm11, %v7581_v51, %v7634_v31 }
0x18e3   : > { %v7590_v40 = vsel %vm1642_vm9, %v7589_v11, %v7585_v32 }
0x18e4   : > { %v7461_v20 = vpop.permute.xlu1 %7460 }
0x18e5   : > { %v7470_v22 = vpop.permute.xlu0 %7469  ;;  %v7594_v18 = vrot.slane %v7461_v20, %v17172_v39 }
0x18e6   : > { %v7607_v28 = vrot.slane %v7470_v22, %v17173_v59  ;;  %v7636_v22 = vsel %vm1783_vm12, %v7590_v40, %v7635_v44 }
0x18e7   : > { %8574 = vperm.xlu1 %10920, %v15769_v45   ;;  %v7599_v43 = vsel %vm1642_vm9, %v7598_v47, %v7594_v18 }
0x18e8   : > { %v7467_v2 = vpop.permute.xlu1 %7466  ;;  %v7637_v4 = vsel %vm1785_vm13, %v7599_v43, %v7636_v22 }
0x18e9   : > { %v7476_v13 = vpop.permute.xlu0 %7475  ;;  %v7603_v19 = vrot.slane %v7467_v2, %v17172_v39  ;;  %v15807_v2 = vpop.eup %11313 }
0x18ea   : > { %v7616_v24 = vrot.slane %v7476_v13, %v17173_v59  ;;  %v15820_v13 = vpop.eup %11315 }
0x18eb   : > { %8580 = vperm.xlu1 %10920, %v15774_v3   ;;  %v15826_v51 = vpop.eup %11317 }
0x18ec   : > { %v7473_v37 = vpop.permute.xlu1 %7472  ;;  %17252 = vst [vmem:[#allocation75_spill] sm:$0xff] %v15826_v51  ;;  %v15830_v40 = vpop.eup %11319 }
0x18ed   : > { %v7482_v17 = vpop.permute.xlu0 %7481  ;;  %v7612_v41 = vrot.slane %v7473_v37, %v17172_v39  ;;  %v7608_v37 = vsel %vm1642_vm9, %v7607_v28, %v7603_v19  ;;  %17253 = vst [vmem:[#allocation83_spill] sm:$0xff] %v15830_v40 }
0x18ee   : > { %v7625_v53 = vrot.slane %v7482_v17, %v17173_v59  ;;  %v7638_v26 = vsel %vm1787_vm14, %v7608_v37, %v7637_v4 }
0x18ef   : > { %8586 = vperm.xlu1 %10920, %v15779_v23  }
0x18f0   : > { %v7479_v38 = vpop.permute.xlu1 %7478 }
0x18f1   : > { %v8530_v56 = vpop.permute.xlu0 %8529  ;;  %v7621_v25 = vrot.slane %v7479_v38, %v17172_v39  ;;  %v7617_v38 = vsel %vm1642_vm9, %v7616_v24, %v7612_v41 }
0x18f2   : > { %v7639_v17 = vsel %vm1789_vm15, %v7617_v38, %v7638_v26 }
0x18f3   : > { %8592 = vperm.xlu1 %10920, %v15790_v0   ;;  %v7626_v18 = vsel %vm1642_vm9, %v7625_v53, %v7621_v25 }
0x18f4   : > { %v8527_v20 = vpop.permute.xlu1 %8526  ;;  %v7640_v29 = vsel %vm1791_vm1, %v7626_v18, %v7639_v17  ;;  %v8628_v18 = vrot.slane %v8530_v56, %v17173_v59 }
0x18f5   : > { %v8536_v58 = vpop.permute.xlu0 %8535  ;;  %v7646_v41 = vsel %vm1802_vm2, %v7640_v29, 0.0  ;;  %v8624_v37 = vrot.slane %v8527_v20, %v17172_v39 }
0x18f6   : > { %v8637_v53 = vrot.slane %v8536_v58, %v17173_v59 }
0x18f7   : > { %8598 = vperm.xlu1 %10920, %v15807_v2  }
0x18f8   : > { %v8533_v32 = vpop.permute.xlu1 %8532 }
0x18f9   : > { %v8542_v11 = vpop.permute.xlu0 %8541  ;;  %v8633_v31 = vrot.slane %v8533_v32, %v17172_v39 }
0x18fa   : > { %v8646_v38 = vrot.slane %v8542_v11, %v17173_v59 }
0x18fb   : > { %8604 = vperm.xlu1 %10920, %v15820_v13   ;;  %v8638_v26 = vsel %vm1642_vm9, %v8637_v53, %v8633_v31 }
0x18fc   : > { %v8539_v19 = vpop.permute.xlu1 %8538 }
0x18fd   : > { %v8548_v47 = vpop.permute.xlu0 %8547  ;;  %7647 = vadd.xlane.f32.xlu0 %v7646_v41  ;;  %v8642_v24 = vrot.slane %v8539_v19, %v17172_v39  ;;  %v8629_v41 = vsel %vm1642_vm9, %v8628_v18, %v8624_v37 }
0x18fe   : > { %v8655_v32 = vrot.slane %v8548_v47, %v17173_v59 }
0x18ff   : > { %8610 = vperm.xlu1 %10920, %v15826_v51   ;;  %v8647_v29 = vsel %vm1642_vm9, %v8646_v38, %v8642_v24 }
0x1900   : > { %v8545_v6 = vpop.permute.xlu1 %8544 }
0x1901   : > { %v8554_v28 = vpop.permute.xlu0 %8553  ;;  %v8651_v22 = vrot.slane %v8545_v6, %v17172_v39 }
0x1902   : > { %v8664_v20 = vrot.slane %v8554_v28, %v17173_v59 }
0x1903   : > { %8616 = vperm.xlu1 %10920, %v15830_v40   ;;  %v8656_v11 = vsel %vm1642_vm9, %v8655_v32, %v8651_v22 }
0x1904   : > { %v8551_v25 = vpop.permute.xlu1 %8550 }
0x1905   : > { %v8560_v43 = vpop.permute.xlu0 %8559  ;;  %v8660_v4 = vrot.slane %v8551_v25, %v17172_v39  ;;  %v8765_v25 = vsel %vm1779_vm10, %v8638_v26, %v8629_v41 }
0x1906   : > { %v8673_v6 = vrot.slane %v8560_v43, %v17173_v59 }
0x1907   : > { %v8665_v47 = vsel %vm1642_vm9, %v8664_v20, %v8660_v4 }
0x1908   : > { %v8557_v44 = vpop.permute.xlu1 %8556 }
0x1909   : > { %v8669_v17 = vrot.slane %v8557_v44, %v17172_v39  ;;  %v8566_v19 = vpop.permute.xlu0 %8565  ;;  %v8766_v44 = vsel %vm1781_vm11, %v8647_v29, %v8765_v25 }
0x190a   : > { %v8682_v31 = vrot.slane %v8566_v19, %v17173_v59  ;;  %v8767_v53 = vsel %vm1783_vm12, %v8656_v11, %v8766_v44 }
0x190b   : > { %v8674_v24 = vsel %vm1642_vm9, %v8673_v6, %v8669_v17  ;;  %v8768_v43 = vsel %vm1785_vm13, %v8665_v47, %v8767_v53 }
0x190c   : > { %v8563_v58 = vpop.permute.xlu1 %8562  ;;  %v8769_v4 = vsel %vm1787_vm14, %v8674_v24, %v8768_v43 }
0x190d   : > { %v8678_v56 = vrot.slane %v8563_v58, %v17172_v39  ;;  %v8572_v28 = vpop.permute.xlu0 %8571 }
0x190e   : > { %v8691_v38 = vrot.slane %v8572_v28, %v17173_v59 }
0x190f   : > { %v8683_v37 = vsel %vm1642_vm9, %v8682_v31, %v8678_v56 }
0x1910   : > { %v8569_v22 = vpop.permute.xlu1 %8568  ;;  %v8770_v32 = vsel %vm1789_vm15, %v8683_v37, %v8769_v4 }
0x1911   : > { %v8687_v18 = vrot.slane %v8569_v22, %v17172_v39 }
0x1913   : > { %v8692_v26 = vsel %vm1642_vm9, %v8691_v38, %v8687_v18 }
0x1914   : > { %v8771_v17 = vsel %vm1791_vm1, %v8692_v26, %v8770_v32 }
0x1915   : > { %v8781_v19 = vsel %vm1802_vm2, %v8771_v17, 0.0 }
0x1916   : > { %8782 = vadd.xlane.f32.xlu0 %v8781_v19 }
0x1941   : > { %v8578_v29 = vpop.permute.xlu0 %8577 }
0x1945   : > { %v8584_v20 = vpop.permute.xlu0 %8583 }
0x1949   : > { %v8590_v58 = vpop.permute.xlu0 %8589 }
0x194d   : > { %v8596_v6 = vpop.permute.xlu0 %8595 }
0x1951   : > { %v8602_v47 = vpop.permute.xlu0 %8601 }
0x1955   : > { %v8608_v37 = vpop.permute.xlu0 %8607 }
0x1959   : > { %v8614_v26 = vpop.permute.xlu0 %8613 }
0x195d   : > { %v8620_v60 = vpop.permute.xlu0 %8619 }
0x1963   : > { %v7645_v41 = vpop.xlane.xlu1 %7644 }
0x1964   : > { %11321 = vrcp.f32 %v7645_v41 }
0x1967   : > { %v8575_v11 = vpop.permute.xlu1 %8574 }
0x1968   : > { %v8696_v19 = vrot.slane %v8575_v11, %v17172_v39 }
0x196b   : > { %v8581_v56 = vpop.permute.xlu1 %8580 }
0x196c   : > { %v8705_v4 = vrot.slane %v8581_v56, %v17172_v39 }
0x196e   : > { %v15865_v25 = vpop.eup %11321 }
0x196f   : > { %v8587_v31 = vpop.permute.xlu1 %8586  ;;  %v15869_v44 = vrot.slane %v15865_v25, %v17075_v52  ;;  %v15875_v28 = vrot.slane %v15865_v25, %v17176_v15  ;;  %v15881_v43 = vrot.slane %v15865_v25, %v17177_v48  ;;  %v15900_v56 = vrot.slane %v15865_v25, %v17179_v30 }
0x1970   : > { %v8714_v32 = vrot.slane %v8587_v31, %v17172_v39  ;;  %v8700_v31 = vrot.slane %v8578_v29, %v17173_v59 }
0x1971   : > { %v7733_v24 = vmul.f32 %v15428_v50, %v15869_v44  ;;  %v7736_v22 = vmul.f32 %v15441_v14, %v15875_v28  ;;  %v7738_v18 = vmul.f32 %v15449_v33, %v15881_v43  ;;  %v15887_v50 = vrot.slane %v15865_v25, %v17178_v16 }
0x1972   : > { %v8709_v14 = vrot.slane %v8584_v20, %v17173_v59  ;;  %v8701_v51 = vsel %vm1642_vm9, %v8700_v31, %v8696_v19 }
0x1973   : > { %v8593_v53 = vpop.permute.xlu1 %8592  ;;  %8905 = vperm.xlu0 %10919, %v7733_v24   ;;  %v8718_v24 = vrot.slane %v8590_v58, %v17173_v59  ;;  %v8745_v58 = vrot.slane %v8608_v37, %v17173_v59  ;;  %v7676_v37 = vrot.slane %v15865_v25, %v17180_v35 }
0x1974   : > { %v8723_v41 = vrot.slane %v8593_v53, %v17172_v39  ;;  %v8710_v20 = vsel %vm1642_vm9, %v8709_v14, %v8705_v4  ;;  %v8736_v53 = vrot.slane %v8602_v47, %v17173_v59  ;;  %v7742_v47 = vmul.f32 %v15460_v46, %v15900_v56 }
0x1975   : > { %v8772_v4 = vsel %vm1779_vm10, %v8710_v20, %v8701_v51  ;;  %v8763_v51 = vrot.slane %v8620_v60, %v17173_v59  ;;  %v7744_v46 = vmul.f32 %v15467_v36, %v7676_v37 }
0x1977   : > { %v8599_v38 = vpop.permute.xlu1 %8598  ;;  %8920 = vperm.xlu0 %10919, %v7736_v22   ;;  %v7740_v22 = vmul.f32 %v15455_v49, %v15887_v50  ;;  %v8754_v49 = vrot.slane %v8614_v26, %v17173_v59 }
0x1978   : > { %v8732_v33 = vrot.slane %v8599_v38, %v17172_v39  ;;  %v8719_v38 = vsel %vm1642_vm9, %v8718_v24, %v8714_v32 }
0x1979   : > { %v8773_v32 = vsel %vm1781_vm11, %v8719_v38, %v8772_v4  ;;  %v17255_v4 = vld [vmem:[#allocation99_spill] sm:$0xff] }
0x197b   : > { %v8605_v17 = vpop.permute.xlu1 %8604  ;;  %8930 = vperm.xlu0 %10919, %v7738_v18   ;;  %v8727_v18 = vrot.slane %v8596_v6, %v17173_v59 }
0x197c   : > { %v8741_v11 = vrot.slane %v8605_v17, %v17172_v39  ;;  %v8737_v17 = vsel %vm1642_vm9, %v8736_v53, %v8732_v33 }
0x197d   : > { %v8728_v29 = vsel %vm1642_vm9, %v8727_v18, %v8723_v41 }
0x197e   : > { %v8746_v26 = vsel %vm1642_vm9, %v8745_v58, %v8741_v11  ;;  %v8774_v14 = vsel %vm1783_vm12, %v8728_v29, %v8773_v32  ;;  %v7734_v58 = vmul.f32 %v15465_v21, %v15869_v44  ;;  %v17254_v29 = vld [vmem:[#allocation107_spill] sm:$0xff]  ;;  %v17256_v44 = vld [vmem:[#allocation108_spill] sm:$0xff] }
0x197f   : > { %v8611_v40 = vpop.permute.xlu1 %8610  ;;  %8940 = vperm.xlu0 %10919, %v7740_v22   ;;  %v8775_v41 = vsel %vm1785_vm13, %v8737_v17, %v8774_v14  ;;  %v7680_v22 = vrot.slane %v15865_v25, %v17181_v1  ;;  %v7737_v17 = vmul.f32 %v17255_v4, %v15881_v43 }
0x1980   : > { %v8750_v6 = vrot.slane %v8611_v40, %v17172_v39  ;;  %v8776_v33 = vsel %vm1787_vm14, %v8746_v26, %v8775_v41  ;;  %v17257_v26 = vld [vmem:[#allocation106_spill] sm:$0xff] }
0x1981   : > { %v7746_v60 = vmul.f32 %v15475_v9, %v7680_v22  ;;  %v7741_v14 = vmul.f32 %v17257_v26, %v15900_v56  ;;  %v17272_v26 = vld [vmem:[#allocation56_spill] sm:$0xff] }
0x1982   : > { %v8755_v19 = vsel %vm1642_vm9, %v8754_v49, %v8750_v6 }
0x1983   : > { %v8617_v40 = vpop.permute.xlu1 %8616  ;;  %8950 = vperm.xlu0 %10919, %v7742_v47   ;;  %v8777_v18 = vsel %vm1789_vm15, %v8755_v19, %v8776_v33  ;;  %v7739_v47 = vmul.f32 %v17256_v44, %v15887_v50  ;;  %v7743_v19 = vmul.f32 %v15500_v55, %v7676_v37  ;;  %v17260_v55 = vld [vmem:[#allocation57_spill] sm:$0xff]  ;;  %v17270_v44 = vld [vmem:[#allocation55_spill] sm:$0xff] }
0x1984   : > { %v8759_v24 = vrot.slane %v8617_v40, %v17172_v39  ;;  %v7684_v39 = vrot.slane %v15865_v25, %v17185_v8  ;;  %v7735_v25 = vmul.f32 %v17254_v29, %v15875_v28  ;;  %v17258_v40 = vld [vmem:[#allocation104_spill] sm:$0xff] }
0x1985   : > { %v17267_v29 = vld [vmem:[#allocation60_spill] sm:$0xff] }
0x1986   : > { %v8764_v31 = vsel %vm1642_vm9, %v8763_v51, %v8759_v24  ;;  %v7748_v11 = vmul.f32 %v15482_v34, %v7684_v39  ;;  %v7745_v51 = vmul.f32 %v17258_v40, %v7680_v22  ;;  %v17262_v22 = vld [vmem:[#allocation61_spill] sm:$0xff] }
0x1987   : > { %8960 = vperm.xlu0 %10919, %v7744_v46   ;;  %v8778_v20 = vsel %vm1791_vm1, %v8764_v31, %v8777_v18 }
0x1988   : > { %v8784_v59 = vsel %vm1802_vm2, %v8778_v20, 0.0 }
0x1989   : > { %8785 = vadd.xlane.f32.xlu1 %v8784_v59 }
0x198a   : > { %v7648_v36 = vpop.xlane.xlu0 %7647 }
0x198b   : > { %8970 = vperm.xlu0 %10919, %v7746_v60   ;;  %11323 = vrcp.f32 %v7648_v36  ;;  %v17264_v60 = vld [vmem:[#allocation65_spill] sm:$0xff] }
0x198f   : > { %8980 = vperm.xlu0 %10919, %v7748_v11   ;;  %v17265_v11 = vld [vmem:[#allocation58_spill] sm:$0xff] }
0x1995   : > { %v11324_v53 = vpop.eup %11323 }
0x1996   : > { %v7688_v38 = vrot.slane %v11324_v53, %v17075_v52  ;;  %v7692_v9 = vrot.slane %v11324_v53, %v17176_v15  ;;  %v7696_v6 = vrot.slane %v11324_v53, %v17177_v48  ;;  %v7708_v43 = vrot.slane %v11324_v53, %v17180_v35 }
0x1997   : > { %v7716_v41 = vrot.slane %v11324_v53, %v17185_v8 }
0x1998   : > { %v7750_v49 = vmul.f32 %v15520_v54, %v7688_v38  ;;  %v7752_v34 = vmul.f32 %v15529_v7, %v7692_v9  ;;  %v7754_v21 = vmul.f32 %v15538_v12, %v7696_v6  ;;  %v7700_v54 = vrot.slane %v11324_v53, %v17178_v16 }
0x1999   : > { %v7704_v7 = vrot.slane %v11324_v53, %v17179_v30  ;;  %v7760_v50 = vmul.f32 %v15568_v63, %v7708_v43  ;;  %v7764_v37 = vmul.f32 %v17260_v55, %v7716_v41  ;;  %v17261_v63 = vld [vmem:[#allocation12_spill] sm:$0xff] }
0x199a   : > { %8910 = vperm.xlu1 %10920, %v7734_v58   ;;  %8990 = vperm.xlu0 %10919, %v7750_v49   ;;  %v7756_v32 = vmul.f32 %v15544_v57, %v7700_v54  ;;  %v7712_v57 = vrot.slane %v11324_v53, %v17181_v1  ;;  %v7749_v31 = vmul.f32 %v17261_v63, %v7688_v38  ;;  %v17266_v58 = vld [vmem:[#allocation69_spill] sm:$0xff] }
0x199b   : > { %v7758_v12 = vmul.f32 %v15558_v10, %v7704_v7  ;;  %v17259_v10 = vld [vmem:[#allocation20_spill] sm:$0xff]  ;;  %v7753_v53 = vmul.f32 %v17265_v11, %v7696_v6 }
0x199c   : > { %v7762_v56 = vmul.f32 %v15578_v42, %v7712_v57  ;;  %v7747_v46 = vmul.f32 %v17259_v10, %v7684_v39  ;;  %v17263_v42 = vld [vmem:[#allocation53_spill] sm:$0xff]  ;;  %v17276_v10 = vld [vmem:[#allocation63_spill] sm:$0xff]  ;;  %v17284_v11 = vld [vmem:[#allocation76_spill] sm:$0xff] }
0x199d   : > { %v7751_v59 = vmul.f32 %v17263_v42, %v7692_v9 }
0x199e   : > { %8915 = vperm.xlu1 %10920, %v7735_v25   ;;  %9000 = vperm.xlu0 %10919, %v7752_v34   ;;  %v7755_v25 = vmul.f32 %v17267_v29, %v7700_v54  ;;  %v17268_v34 = vld [vmem:[#allocation73_spill] sm:$0xff]  ;;  %v10110_v29 = vld [vmem:[%s16389_s4 + $0x48] sm:$0xff] }
0x19a2   : > { %8925 = vperm.xlu1 %10920, %v7737_v17   ;;  %9010 = vperm.xlu0 %10919, %v7754_v21   ;;  %v17269_v17 = vld [vmem:[#allocation62_spill] sm:$0xff] }
0x19a3   : > { %v8783_v28 = vpop.xlane.xlu0 %8782  ;;  %v7757_v21 = vmul.f32 %v17269_v17, %v7704_v7 }
0x19a4   : > { %11325 = vrcp.f32 %v8783_v28  ;;  %v17271_v28 = vld [vmem:[#allocation54_spill] sm:$0xff] }
0x19a6   : > { %8935 = vperm.xlu1 %10920, %v7739_v47   ;;  %9020 = vperm.xlu0 %10919, %v7756_v32   ;;  %v7759_v32 = vmul.f32 %v17271_v28, %v7708_v43 }
0x19aa   : > { %8945 = vperm.xlu1 %10920, %v7741_v14   ;;  %9030 = vperm.xlu0 %10919, %v7758_v12   ;;  %v17273_v12 = vld [vmem:[#allocation64_spill] sm:$0xff] }
0x19ae   : > { %8955 = vperm.xlu1 %10920, %v7743_v19   ;;  %9040 = vperm.xlu0 %10919, %v7760_v50   ;;  %v11326_v24 = vpop.eup %11325  ;;  %v7761_v19 = vmul.f32 %v17273_v12, %v7712_v57  ;;  %v17274_v50 = vld [vmem:[#allocation59_spill] sm:$0xff]  ;;  %v17279_v57 = vld [vmem:[#allocation80_spill] sm:$0xff] }
0x19af   : > { %v8794_v33 = vrot.slane %v11326_v24, %v17075_v52  ;;  %v8798_v20 = vrot.slane %v11326_v24, %v17176_v15  ;;  %v8802_v36 = vrot.slane %v11326_v24, %v17177_v48  ;;  %v8806_v49 = vrot.slane %v11326_v24, %v17178_v16 }
0x19b0   : > { %v8810_v4 = vrot.slane %v11326_v24, %v17179_v30  ;;  %v8814_v47 = vrot.slane %v11326_v24, %v17180_v35  ;;  %v8818_v14 = vrot.slane %v11326_v24, %v17181_v1  ;;  %v8822_v40 = vrot.slane %v11326_v24, %v17185_v8  ;;  %v17281_v24 = vld [vmem:[#allocation66_spill] sm:$0xff] }
0x19b1   : > { %v8872_v18 = vmul.f32 %v17262_v22, %v8794_v33  ;;  %v8874_v39 = vmul.f32 %v17264_v60, %v8798_v20  ;;  %v8876_v38 = vmul.f32 %v17266_v58, %v8802_v36  ;;  %v8878_v9 = vmul.f32 %v17268_v34, %v8806_v49  ;;  %v17280_v22 = vld [vmem:[#allocation82_spill] sm:$0xff]  ;;  %v17283_v60 = vld [vmem:[#allocation72_spill] sm:$0xff] }
0x19b2   : > { %8965 = vperm.xlu1 %10920, %v7745_v51   ;;  %9050 = vperm.xlu0 %10919, %v7762_v56   ;;  %v8880_v6 = vmul.f32 %v17270_v44, %v8810_v4  ;;  %v8882_v54 = vmul.f32 %v17272_v26, %v8814_v47  ;;  %v8884_v7 = vmul.f32 %v17274_v50, %v8818_v14  ;;  %v17275_v51 = vld [vmem:[#allocation70_spill] sm:$0xff]  ;;  %v17285_v50 = vld [vmem:[#allocation67_spill] sm:$0xff] }
0x19b3   : > { %v7763_v56 = vmul.f32 %v17275_v51, %v7716_v41  ;;  %v8886_v43 = vmul.f32 %v17276_v10, %v8822_v40  ;;  %v8879_v42 = vmul.f32 %v17281_v24, %v8810_v4  ;;  %v17282_v41 = vld [vmem:[#allocation68_spill] sm:$0xff] }
0x19b6   : > { %8975 = vperm.xlu1 %10920, %v7747_v46   ;;  %9060 = vperm.xlu0 %10919, %v7764_v37   ;;  %v17277_v46 = vld [vmem:[#allocation74_spill] sm:$0xff] }
0x19b7   : > { %v8871_v55 = vmul.f32 %v17277_v46, %v8794_v33  ;;  %v17278_v37 = vld [vmem:[#allocation78_spill] sm:$0xff] }
0x19b8   : > { %v8873_v63 = vmul.f32 %v17278_v37, %v8798_v20  ;;  %v8885_v20 = vmul.f32 %v17284_v11, %v8822_v40 }
0x19ba   : > { %8985 = vperm.xlu1 %10920, %v7749_v31   ;;  %9070 = vperm.xlu0 %10919, %v8872_v18   ;;  %v8875_v31 = vmul.f32 %v17279_v57, %v8802_v36  ;;  %v8877_v18 = vmul.f32 %v17280_v22, %v8806_v49  ;;  %v10109_v49 = vld [vmem:[%s16389_s4 + $0x40] sm:$0xff] }
0x19bb   : > { %v10834_v34 = vpack.c.bf16 %v10110_v29, %v10109_v49  ;;  %v17289_v29 = vld [vmem:[#allocation124_spill] sm:$0xff] }
0x19bd   : > { %10835 = vmatprep.subr.bf16.mxu1 %v10834_v34 }
0x19be   : > { %8995 = vperm.xlu1 %10920, %v7751_v59   ;;  %9080 = vperm.xlu0 %10919, %v8874_v39   ;;  %v8881_v59 = vmul.f32 %v17282_v41, %v8814_v47  ;;  %v8883_v39 = vmul.f32 %v17283_v60, %v8818_v14 }
0x19bf   : > { %10837 = vmatpush3.bf16.msra.mxu1 %v10834_v34 }
0x19c2   : > { %9005 = vperm.xlu1 %10920, %v7753_v53   ;;  %9090 = vperm.xlu0 %10919, %v8876_v38  }
0x19c6   : > { %9015 = vperm.xlu1 %10920, %v7755_v25   ;;  %9100 = vperm.xlu0 %10919, %v8878_v9   ;;  %v10111_v25 = vld [vmem:[%s16389_s4 + $0x50] sm:$0xff]  ;;  %v10112_v9 = vld [vmem:[%s16389_s4 + $0x58] sm:$0xff] }
0x19c7   : > { %v10838_v17 = vpack.c.bf16 %v10112_v9, %v10111_v25  ;;  %v17291_v9 = vld [vmem:[#allocation83_spill] sm:$0xff] }
0x19c9   : > { %10839 = vmatprep.subr.bf16.mxu1 %v10838_v17 }
0x19ca   : > { %9025 = vperm.xlu1 %10920, %v7757_v21   ;;  %9110 = vperm.xlu0 %10919, %v8880_v6  }
0x19cb   : > { %10841 = vmatpush3.bf16.msra.mxu1 %v10838_v17 }
0x19ce   : > { %9035 = vperm.xlu1 %10920, %v7759_v32   ;;  %9120 = vperm.xlu0 %10919, %v8882_v54  }
0x19d2   : > { %9045 = vperm.xlu1 %10920, %v7761_v19   ;;  %9130 = vperm.xlu0 %10919, %v8884_v7  }
0x19d6   : > { %9055 = vperm.xlu1 %10920, %v7763_v56   ;;  %9140 = vperm.xlu0 %10919, %v8886_v43   ;;  %v17286_v43 = vld [vmem:[#allocation79_spill] sm:$0xff] }
0x19da   : > { %9065 = vperm.xlu1 %10920, %v8871_v55  }
0x19de   : > { %9075 = vperm.xlu1 %10920, %v8873_v63  }
0x19e2   : > { %9085 = vperm.xlu1 %10920, %v8875_v31  }
0x19e6   : > { %9095 = vperm.xlu1 %10920, %v8877_v18  }
0x19ea   : > { %9105 = vperm.xlu1 %10920, %v8879_v42  }
0x19ee   : > { %9115 = vperm.xlu1 %10920, %v8881_v59  }
0x19f2   : > { %9125 = vperm.xlu1 %10920, %v8883_v39   ;;  %v15998_v33 = vpop.permute.xlu0 %8905 }
0x19f6   : > { %9135 = vperm.xlu1 %10920, %v8885_v20   ;;  %v16001_v53 = vpop.permute.xlu0 %8920 }
0x19fa   : > { %v16003_v36 = vpop.permute.xlu0 %8930 }
0x19fe   : > { %v16005_v58 = vpop.permute.xlu0 %8940 }
0x1a02   : > { %v16007_v38 = vpop.permute.xlu0 %8950 }
0x1a06   : > { %v16021_v4 = vpop.permute.xlu0 %8960 }
0x1a0a   : > { %v16023_v21 = vpop.permute.xlu0 %8970 }
0x1a0e   : > { %v16025_v6 = vpop.permute.xlu0 %8980 }
0x1a16   : > { %v8786_v44 = vpop.xlane.xlu1 %8785 }
0x1a17   : > { %11327 = vrcp.f32 %v8786_v44 }
0x1a19   : > { %v16027_v28 = vpop.permute.xlu0 %8990 }
0x1a1a   : > { %v8911_v47 = vpop.permute.xlu1 %8910 }
0x1a1d   : > { %v16031_v26 = vpop.permute.xlu0 %9000 }
0x1a1e   : > { %v16029_v32 = vpop.permute.xlu1 %8915 }
0x1a21   : > { %v11328_v54 = vpop.eup %11327  ;;  %v16036_v19 = vpop.permute.xlu0 %9010 }
0x1a22   : > { %v16033_v14 = vpop.permute.xlu1 %8925  ;;  %v8826_v12 = vrot.slane %v11328_v54, %v17075_v52  ;;  %v8830_v51 = vrot.slane %v11328_v54, %v17176_v15  ;;  %v8834_v52 = vrot.slane %v11328_v54, %v17177_v48  ;;  %v8838_v57 = vrot.slane %v11328_v54, %v17178_v16 }
0x1a23   : > { %v8842_v18 = vrot.slane %v11328_v54, %v17179_v30  ;;  %v8846_v42 = vrot.slane %v11328_v54, %v17180_v35  ;;  %v8850_v59 = vrot.slane %v11328_v54, %v17181_v1  ;;  %v17288_v35 = vld [vmem:[#allocation75_spill] sm:$0xff]  ;;  %v8854_v20 = vrot.slane %v11328_v54, %v17185_v8  ;;  %v10113_v8 = vld [vmem:[%s16389_s4 + $0x60] sm:$0xff] }
0x1a24   : > { %v8888_v7 = vmul.f32 %v17285_v50, %v8826_v12  ;;  %v8887_v40 = vmul.f32 %v15769_v45, %v8826_v12  ;;  %v8890_v46 = vmul.f32 %v17286_v43, %v8830_v51  ;;  %v8889_v55 = vmul.f32 %v15774_v3, %v8830_v51 }
0x1a25   : > { %v16043_v10 = vpop.permute.xlu0 %9020  ;;  %v8892_v15 = vmul.f32 %v15714_v5, %v8834_v52  ;;  %v8891_v45 = vmul.f32 %v15779_v23, %v8834_v52  ;;  %v8894_v48 = vmul.f32 %v15730_v61, %v8838_v57  ;;  %v8893_v3 = vmul.f32 %v15790_v0, %v8838_v57  ;;  %v10115_v52 = vld [vmem:[%s16389_s4 + $0x70] sm:$0xff] }
0x1a26   : > { %v16041_v56 = vpop.permute.xlu1 %8935  ;;  %9150 = vperm.xlu0 %10919, %v8888_v7   ;;  %9145 = vperm.xlu1 %10920, %v8887_v40   ;;  %v8896_v16 = vmul.f32 %v15743_v62, %v8842_v18  ;;  %v8895_v23 = vmul.f32 %v15807_v2, %v8842_v18  ;;  %v8898_v30 = vmul.f32 %v15752_v27, %v8846_v42  ;;  %v17287_v2 = vld [vmem:[#allocation71_spill] sm:$0xff] }
0x1a27   : > { %v8897_v0 = vmul.f32 %v15820_v13, %v8846_v42  ;;  %v8900_v39 = vmul.f32 %v17287_v2, %v8850_v59  ;;  %v8899_v11 = vmul.f32 %v17288_v35, %v8850_v59  ;;  %v17290_v13 = vld [vmem:[#allocation81_spill] sm:$0xff]  ;;  %v8901_v17 = vmul.f32 %v17291_v9, %v8854_v20 }
0x1a28   : > { %v8902_v34 = vmul.f32 %v17290_v13, %v8854_v20  ;;  %v17294_v2 = vld [vmem:[#allocation125_spill] sm:$0xff] }
0x1a29   : > { %v16050_v63 = vpop.permute.xlu0 %9030 }
0x1a2a   : > { %v16048_v37 = vpop.permute.xlu1 %8945  ;;  %9160 = vperm.xlu0 %10919, %v8890_v46   ;;  %9155 = vperm.xlu1 %10920, %v8889_v55  }
0x1a2d   : > { %v16057_v22 = vpop.permute.xlu0 %9040 }
0x1a2e   : > { %v16055_v31 = vpop.permute.xlu1 %8955  ;;  %9170 = vperm.xlu0 %10919, %v8892_v15   ;;  %9165 = vperm.xlu1 %10920, %v8891_v45   ;;  %v10116_v15 = vld [vmem:[%s16389_s4 + $0x78] sm:$0xff] }
0x1a2f   : > { %v10846_v57 = vpack.c.bf16 %v10116_v15, %v10115_v52 }
0x1a31   : > { %v16064_v5 = vpop.permute.xlu0 %9050 }
0x1a32   : > { %v16062_v24 = vpop.permute.xlu1 %8965  ;;  %9180 = vperm.xlu0 %10919, %v8894_v48   ;;  %9175 = vperm.xlu1 %10920, %v8893_v3   ;;  %v17292_v3 = vld [vmem:[#allocation24_spill] sm:$0xff] }
0x1a35   : > { %v16071_v61 = vpop.permute.xlu0 %9060 }
0x1a36   : > { %v16069_v41 = vpop.permute.xlu1 %8975  ;;  %9190 = vperm.xlu0 %10919, %v8896_v16   ;;  %9185 = vperm.xlu1 %10920, %v8895_v23  }
0x1a39   : > { %v9071_v62 = vpop.permute.xlu0 %9070 }
0x1a3a   : > { %v16076_v60 = vpop.permute.xlu1 %8985  ;;  %9200 = vperm.xlu0 %10919, %v8898_v30   ;;  %9195 = vperm.xlu1 %10920, %v8897_v0   ;;  %v9224_v49 = vsel %vm548_vm0, %v8911_v47, %v9071_v62  ;;  %v10114_v47 = vld [vmem:[%s16389_s4 + $0x68] sm:$0xff]  ;;  %v17293_v30 = vld [vmem:[#allocation26_spill] sm:$0xff] }
0x1a3b   : > { %v9256_v25 = vmul.f32 %v17289_v29, %v9224_v49  ;;  %v10842_v50 = vpack.c.bf16 %v10114_v47, %v10113_v8 }
0x1a3d   : > { %v9081_v1 = vpop.permute.xlu0 %9080  ;;  %10843 = vmatprep.subr.bf16.mxu1 %v10842_v50  ;;  %v9288_v35 = vsel %vm3919_vm3, %v9256_v25, 0.0 }
0x1a3e   : > { %v16083_v27 = vpop.permute.xlu1 %8995  ;;  %9210 = vperm.xlu0 %10919, %v8900_v39   ;;  %9205 = vperm.xlu1 %10920, %v8899_v11   ;;  %v9226_v62 = vsel %vm548_vm0, %v16001_v53, %v9081_v1  ;;  %v17295_v11 = vld [vmem:[#allocation115_spill] sm:$0xff]  ;;  %v17296_v53 = vld [vmem:[#allocation116_spill] sm:$0xff] }
0x1a3f   : > { %10845 = vmatpush3.bf16.msra.mxu1 %v10842_v50  ;;  %v9258_v20 = vmul.f32 %v17295_v11, %v9226_v62 }
0x1a40   : > { %10847 = vmatprep.subr.bf16.mxu1 %v10846_v57 }
0x1a41   : > { %v9091_v12 = vpop.permute.xlu0 %9090 }
0x1a42   : > { %v16087_v44 = vpop.permute.xlu1 %9005  ;;  %9220 = vperm.xlu0 %10919, %v8902_v34   ;;  %9215 = vperm.xlu1 %10920, %v8901_v17   ;;  %v17297_v17 = vld [vmem:[#allocation112_spill] sm:$0xff] }
0x1a43   : > { %10849 = vmatpush3.bf16.msra.mxu1 %v10846_v57 }
0x1a45   : > { %v9101_v7 = vpop.permute.xlu0 %9100 }
0x1a46   : > { %v16095_v54 = vpop.permute.xlu1 %9015  ;;  %v9230_v50 = vsel %vm548_vm0, %v16005_v58, %v9101_v7 }
0x1a49   : > { %v9111_v51 = vpop.permute.xlu0 %9110 }
0x1a4a   : > { %v16097_v40 = vpop.permute.xlu1 %9025 }
0x1a4d   : > { %v9121_v46 = vpop.permute.xlu0 %9120 }
0x1a4e   : > { %v16099_v43 = vpop.permute.xlu1 %9035 }
0x1a51   : > { %v9131_v45 = vpop.permute.xlu0 %9130 }
0x1a52   : > { %v16101_v55 = vpop.permute.xlu1 %9045  ;;  %v9236_v48 = vsel %vm548_vm0, %v16023_v21, %v9131_v45 }
0x1a53   : > { %v16112_v18 = vmul.f32 %v17292_v3, %v9236_v48  ;;  %v17299_v3 = vld [vmem:[#allocation113_spill] sm:$0xff] }
0x1a55   : > { %v9141_v23 = vpop.permute.xlu0 %9140 }
0x1a56   : > { %v16114_v16 = vpop.permute.xlu1 %9055  ;;  %v9238_v42 = vsel %vm548_vm0, %v16025_v6, %v9141_v23  ;;  %v9228_v6 = vsel %vm548_vm0, %v16003_v36, %v9091_v12  ;;  %v17298_v12 = vld [vmem:[#allocation117_spill] sm:$0xff]  ;;  %v9262_v23 = vmul.f32 %v17299_v3, %v9230_v50  ;;  %v17304_v3 = vld [vmem:[#allocation23_spill] sm:$0xff] }
0x1a57   : > { %v16119_v0 = vmul.f32 %v17293_v30, %v9238_v42  ;;  %v9260_v8 = vmul.f32 %v17297_v17, %v9228_v6  ;;  %v9232_v42 = vsel %vm548_vm0, %v16007_v38, %v9111_v51  ;;  %v9234_v6 = vsel %vm548_vm0, %v16021_v4, %v9121_v46  ;;  %v17302_v17 = vld [vmem:[#allocation21_spill] sm:$0xff] }
0x1a58   : > { %v9315_v11 = vsel %vm3919_vm3, %v9262_v23, 0.0 }
0x1a59   : > { %v9306_v48 = vsel %vm3919_vm3, %v9260_v8, 0.0 }
0x1a5a   : > { %v9066_v59 = vpop.permute.xlu1 %9065 }
0x1a5b   : > { %v9223_v21 = vsel %vm548_vm0, %v15998_v33, %v9066_v59  ;;  %v9297_v33 = vsel %vm3919_vm3, %v9258_v20, 0.0  ;;  %v17301_v20 = vld [vmem:[#allocation114_spill] sm:$0xff] }
0x1a5c   : > { %v9255_v39 = vmul.f32 %v9223_v21, %v17294_v2  ;;  %v17300_v21 = vld [vmem:[#allocation111_spill] sm:$0xff] }
0x1a5e   : > { %v9287_v49 = vsel %vm3919_vm3, %v9255_v39, 0.0  ;;  %v9076_v29 = vpop.permute.xlu1 %9075 }
0x1a5f   : > { %v9289_v13 = vadd.f32 %v9288_v35, %v9287_v49  ;;  %v9225_v34 = vsel %vm548_vm0, %v16029_v32, %v9076_v29  ;;  %v9264_v49 = vmul.f32 %v17301_v20, %v9232_v42  ;;  %v9342_v20 = vsel %vm3919_vm3, %v16112_v18, 0.0 }
0x1a60   : > { %v9257_v1 = vmul.f32 %v9225_v34, %v17296_v53  ;;  %v9351_v18 = vsel %vm3919_vm3, %v16119_v0, 0.0 }
0x1a61   : > { %v9290_v9 = vrot.slane %v9289_v13, 4 }
0x1a62   : > { %v9296_v25 = vsel %vm3919_vm3, %v9257_v1, 0.0  ;;  %v9086_v47 = vpop.permute.xlu1 %9085 }
0x1a63   : > { %v9291_v52 = vadd.f32 %v9290_v9, %v9289_v13  ;;  %v9298_v15 = vadd.f32 %v9297_v33, %v9296_v25  ;;  %v9227_v36 = vsel %vm548_vm0, %v16033_v14, %v9086_v47  ;;  %v9324_v25 = vsel %vm3919_vm3, %v9264_v49, 0.0  ;;  %v17303_v47 = vld [vmem:[#allocation22_spill] sm:$0xff] }
0x1a64   : > { %v9259_v32 = vmul.f32 %v9227_v36, %v17298_v12  ;;  %v9266_v50 = vmul.f32 %v17303_v47, %v9234_v6 }
0x1a65   : > { %v9292_v45 = vrot.slane %v9291_v52, 2  ;;  %v9299_v57 = vrot.slane %v9298_v15, 4 }
0x1a66   : > { %v9305_v30 = vsel %vm3919_vm3, %v9259_v32, 0.0  ;;  %v9096_v59 = vpop.permute.xlu1 %9095  ;;  %v9333_v42 = vsel %vm3919_vm3, %v9266_v50, 0.0 }
0x1a67   : > { %v9293_v58 = vadd.f32 %v9292_v45, %v9291_v52  ;;  %v9300_v7 = vadd.f32 %v9299_v57, %v9298_v15  ;;  %v9307_v62 = vadd.f32 %v9306_v48, %v9305_v30  ;;  %v9229_v14 = vsel %vm548_vm0, %v16041_v56, %v9096_v59 }
0x1a68   : > { %v9261_v2 = vmul.f32 %v9229_v14, %v17300_v21 }
0x1a69   : > { %v9301_v39 = vrot.slane %v9300_v7, 2  ;;  %v9308_v35 = vrot.slane %v9307_v62, 4  ;;  %v9294_v29 = vrot.slane %v9293_v58, 1 }
0x1a6a   : > { %v9314_v38 = vsel %vm3919_vm3, %v9261_v2, 0.0  ;;  %v9106_v51 = vpop.permute.xlu1 %9105 }
0x1a6b   : > { %v9302_v13 = vadd.f32 %v9301_v39, %v9300_v7  ;;  %v9309_v34 = vadd.f32 %v9308_v35, %v9307_v62  ;;  %v9316_v53 = vadd.f32 %v9315_v11, %v9314_v38  ;;  %v9231_v56 = vsel %vm548_vm0, %v16048_v37, %v9106_v51 }
0x1a6c   : > { %v9263_v8 = vmul.f32 %v9231_v56, %v17302_v17  ;;  %v9295_v52 = vadd.f32 %v9294_v29, %v9293_v58  ;;  %v17306_v56 = vld [vmem:[#allocation27_spill] sm:$0xff] }
0x1a6d   : > { %v9303_v1 = vrot.slane %v9302_v13, 1  ;;  %v9310_v9 = vrot.slane %v9309_v34, 2  ;;  %v9317_v33 = vrot.slane %v9316_v53, 4 }
0x1a6e   : > { %v9116_v15 = vpop.permute.xlu1 %9115  ;;  %v9323_v46 = vsel %vm3919_vm3, %v9263_v8, 0.0 }
0x1a6f   : > { %v9304_v36 = vadd.f32 %v9303_v1, %v9302_v13  ;;  %v9311_v12 = vadd.f32 %v9310_v9, %v9309_v34  ;;  %v9318_v4 = vadd.f32 %v9317_v33, %v9316_v53  ;;  %v9325_v32 = vadd.f32 %v9324_v25, %v9323_v46 }
0x1a70   : > { %v9233_v37 = vsel %vm548_vm0, %v16055_v31, %v9116_v15  ;;  %v17305_v31 = vld [vmem:[#allocation25_spill] sm:$0xff] }
0x1a71   : > { %v9464_v45 = vsel %vm1779_vm10, %v9304_v36, %v9295_v52  ;;  %v9312_v57 = vrot.slane %v9311_v12, 1  ;;  %v9319_v48 = vrot.slane %v9318_v4, 2  ;;  %v9265_v23 = vmul.f32 %v9233_v37, %v17304_v3 }
0x1a72   : > { %v9326_v30 = vrot.slane %v9325_v32, 4  ;;  %v9126_v59 = vpop.permute.xlu1 %9125 }
0x1a73   : > { %v9313_v58 = vadd.f32 %v9312_v57, %v9311_v12  ;;  %v9320_v7 = vadd.f32 %v9319_v48, %v9318_v4  ;;  %v9332_v62 = vsel %vm3919_vm3, %v9265_v23, 0.0  ;;  %v9235_v14 = vsel %vm548_vm0, %v16062_v24, %v9126_v59 }
0x1a74   : > { %v9327_v21 = vadd.f32 %v9326_v30, %v9325_v32  ;;  %v9334_v2 = vadd.f32 %v9333_v42, %v9332_v62  ;;  %v9267_v39 = vmul.f32 %v9235_v14, %v17305_v31  ;;  %v17308_v31 = vld [vmem:[#allocation28_spill] sm:$0xff] }
0x1a75   : > { %v9321_v35 = vrot.slane %v9320_v7, 1  ;;  %v9465_v11 = vsel %vm1781_vm11, %v9313_v58, %v9464_v45 }
0x1a76   : > { %v9328_v49 = vrot.slane %v9327_v21, 2  ;;  %v9335_v29 = vrot.slane %v9334_v2, 4  ;;  %v9341_v38 = vsel %vm3919_vm3, %v9267_v39, 0.0  ;;  %v9136_v51 = vpop.permute.xlu1 %9135 }
0x1a77   : > { %v9322_v6 = vadd.f32 %v9321_v35, %v9320_v7  ;;  %v9343_v13 = vadd.f32 %v9342_v20, %v9341_v38  ;;  %v9237_v24 = vsel %vm548_vm0, %v16069_v41, %v9136_v51  ;;  %v17309_v51 = vld [vmem:[#allocation31_spill] sm:$0xff] }
0x1a78   : > { %v9329_v34 = vadd.f32 %v9328_v49, %v9327_v21  ;;  %v9336_v53 = vadd.f32 %v9335_v29, %v9334_v2  ;;  %v9269_v1 = vmul.f32 %v9237_v24, %v17306_v56  ;;  %v17307_v21 = vld [vmem:[#allocation29_spill] sm:$0xff] }
0x1a79   : > { %v9344_v9 = vrot.slane %v9343_v13, 4  ;;  %v9466_v33 = vsel %vm1783_vm12, %v9322_v6, %v9465_v11 }
0x1a7a   : > { %v9330_v17 = vrot.slane %v9329_v34, 1  ;;  %v9337_v8 = vrot.slane %v9336_v53, 2  ;;  %v9350_v25 = vsel %vm3919_vm3, %v9269_v1, 0.0 }
0x1a7b   : > { %v9345_v47 = vadd.f32 %v9344_v9, %v9343_v13  ;;  %v9352_v50 = vadd.f32 %v9351_v18, %v9350_v25 }
0x1a7c   : > { %v9331_v52 = vadd.f32 %v9330_v17, %v9329_v34  ;;  %v9338_v15 = vadd.f32 %v9337_v8, %v9336_v53  ;;  %v17312_v8 = vld [vmem:[#allocation33_spill] sm:$0xff] }
0x1a7d   : > { %v9346_v36 = vrot.slane %v9345_v47, 2  ;;  %v9353_v41 = vrot.slane %v9352_v50, 4 }
0x1a7e   : > { %v9339_v12 = vrot.slane %v9338_v15, 1  ;;  %v9467_v4 = vsel %vm1785_vm13, %v9331_v52, %v9466_v33 }
0x1a7f   : > { %v9347_v46 = vadd.f32 %v9346_v36, %v9345_v47  ;;  %v9354_v32 = vadd.f32 %v9353_v41, %v9352_v50 }
0x1a80   : > { %v9340_v37 = vadd.f32 %v9339_v12, %v9338_v15 }
0x1a81   : > { %v9348_v45 = vrot.slane %v9347_v46, 1  ;;  %v9355_v57 = vrot.slane %v9354_v32, 2 }
0x1a82   : > { %v9468_v0 = vsel %vm1787_vm14, %v9340_v37, %v9467_v4 }
0x1a83   : > { %v9356_v48 = vadd.f32 %v9355_v57, %v9354_v32  ;;  %v9349_v3 = vadd.f32 %v9348_v45, %v9347_v46  ;;  %v17313_v32 = vld [vmem:[#allocation35_spill] sm:$0xff] }
0x1a85   : > { %v9357_v23 = vrot.slane %v9356_v48, 1  ;;  %v9469_v42 = vsel %vm1789_vm15, %v9349_v3, %v9468_v0  ;;  %v17314_v0 = vld [vmem:[#allocation34_spill] sm:$0xff] }
0x1a87   : > { %v9358_v30 = vadd.f32 %v9357_v23, %v9356_v48 }
0x1a89   : > { %v9470_v59 = vsel %vm1791_vm1, %v9358_v30, %v9469_v42 }
0x1a8a   : > { %10697 = vmatprep.mubr.msk.f32.mxu1 %vm3919_vm3, %v9470_v59 }
0x1aa5   : > { %v9146_v58 = vpop.permute.xlu1 %9145  ;;  %v9151_v7 = vpop.permute.xlu0 %9150 }
0x1aa6   : > { %v9239_v62 = vsel %vm548_vm0, %v16076_v60, %v9146_v58  ;;  %v9240_v14 = vsel %vm548_vm0, %v16027_v28, %v9151_v7  ;;  %v17310_v28 = vld [vmem:[#allocation30_spill] sm:$0xff] }
0x1aa7   : > { %v9271_v2 = vmul.f32 %v9239_v62, %v17307_v21  ;;  %v9272_v39 = vmul.f32 %v17308_v31, %v9240_v14 }
0x1aa9   : > { %v9359_v35 = vsel %vm3919_vm3, %v9271_v2, 0.0  ;;  %v9360_v11 = vsel %vm3919_vm3, %v9272_v39, 0.0  ;;  %v9156_v20 = vpop.permute.xlu1 %9155  ;;  %v9161_v49 = vpop.permute.xlu0 %9160  ;;  %v17315_v2 = vld [vmem:[#allocation37_spill] sm:$0xff]  ;;  %v17316_v39 = vld [vmem:[#allocation36_spill] sm:$0xff] }
0x1aaa   : > { %v9361_v29 = vadd.f32 %v9360_v11, %v9359_v35  ;;  %v9241_v38 = vsel %vm548_vm0, %v16083_v27, %v9156_v20  ;;  %v9242_v60 = vsel %vm548_vm0, %v16031_v26, %v9161_v49  ;;  %v17311_v26 = vld [vmem:[#allocation32_spill] sm:$0xff] }
0x1aab   : > { %v9273_v6 = vmul.f32 %v9241_v38, %v17309_v51  ;;  %v9274_v13 = vmul.f32 %v17310_v28, %v9242_v60 }
0x1aac   : > { %v9362_v24 = vrot.slane %v9361_v29, 4 }
0x1aad   : > { %v9368_v34 = vsel %vm3919_vm3, %v9273_v6, 0.0  ;;  %v9369_v53 = vsel %vm3919_vm3, %v9274_v13, 0.0  ;;  %v9166_v56 = vpop.permute.xlu1 %9165  ;;  %v9171_v1 = vpop.permute.xlu0 %9170 }
0x1aae   : > { %v9363_v9 = vadd.f32 %v9362_v24, %v9361_v29  ;;  %v9370_v33 = vadd.f32 %v9369_v53, %v9368_v34  ;;  %v9243_v18 = vsel %vm548_vm0, %v16087_v44, %v9166_v56  ;;  %v9244_v27 = vsel %vm548_vm0, %v16036_v19, %v9171_v1  ;;  %v17317_v53 = vld [vmem:[#allocation39_spill] sm:$0xff]  ;;  %v17318_v1 = vld [vmem:[#allocation38_spill] sm:$0xff] }
0x1aaf   : > { %v9275_v17 = vmul.f32 %v9243_v18, %v17311_v26  ;;  %v9276_v25 = vmul.f32 %v17312_v8, %v9244_v27 }
0x1ab0   : > { %v9364_v47 = vrot.slane %v9363_v9, 2  ;;  %v9371_v50 = vrot.slane %v9370_v33, 4 }
0x1ab1   : > { %v9377_v52 = vsel %vm3919_vm3, %v9275_v17, 0.0  ;;  %v9378_v15 = vsel %vm3919_vm3, %v9276_v25, 0.0  ;;  %v9176_v36 = vpop.permute.xlu1 %9175  ;;  %v9181_v41 = vpop.permute.xlu0 %9180 }
0x1ab2   : > { %v9365_v12 = vadd.f32 %v9364_v47, %v9363_v9  ;;  %v9372_v4 = vadd.f32 %v9371_v50, %v9370_v33  ;;  %v9379_v46 = vadd.f32 %v9378_v15, %v9377_v52  ;;  %v9245_v44 = vsel %vm548_vm0, %v16095_v54, %v9176_v36  ;;  %v17319_v52 = vld [vmem:[#allocation41_spill] sm:$0xff] }
0x1ab3   : > { %v9277_v19 = vmul.f32 %v9245_v44, %v17313_v32  ;;  %v9246_v37 = vsel %vm548_vm0, %v16043_v10, %v9181_v41 }
0x1ab4   : > { %v9373_v45 = vrot.slane %v9372_v4, 2  ;;  %v9380_v57 = vrot.slane %v9379_v46, 4  ;;  %v9278_v48 = vmul.f32 %v17314_v0, %v9246_v37  ;;  %v9366_v3 = vrot.slane %v9365_v12, 1  ;;  %v17320_v37 = vld [vmem:[#allocation40_spill] sm:$0xff] }
0x1ab5   : > { %v9386_v23 = vsel %vm3919_vm3, %v9277_v19, 0.0  ;;  %v9186_v42 = vpop.permute.xlu1 %9185  ;;  %v9191_v30 = vpop.permute.xlu0 %9190 }
0x1ab6   : > { %v9374_v59 = vadd.f32 %v9373_v45, %v9372_v4  ;;  %v9381_v58 = vadd.f32 %v9380_v57, %v9379_v46  ;;  %v9387_v7 = vsel %vm3919_vm3, %v9278_v48, 0.0  ;;  %v9247_v54 = vsel %vm548_vm0, %v16097_v40, %v9186_v42 }
0x1ab7   : > { %v9388_v62 = vadd.f32 %v9387_v7, %v9386_v23  ;;  %v9248_v10 = vsel %vm548_vm0, %v16050_v63, %v9191_v30  ;;  %v9279_v31 = vmul.f32 %v9247_v54, %v17315_v2  ;;  %v9367_v11 = vadd.f32 %v9366_v3, %v9365_v12  ;;  %v17321_v23 = vld [vmem:[#allocation43_spill] sm:$0xff]  ;;  %v17322_v30 = vld [vmem:[#allocation42_spill] sm:$0xff] }
0x1ab8   : > { %v9375_v14 = vrot.slane %v9374_v59, 1  ;;  %v9382_v21 = vrot.slane %v9381_v58, 2  ;;  %v9280_v35 = vmul.f32 %v17316_v39, %v9248_v10 }
0x1ab9   : > { %v9389_v20 = vrot.slane %v9388_v62, 4  ;;  %v9196_v49 = vpop.permute.xlu1 %9195  ;;  %v9201_v29 = vpop.permute.xlu0 %9200  ;;  %v9395_v51 = vsel %vm3919_vm3, %v9279_v31, 0.0 }
0x1aba   : > { %v9376_v38 = vadd.f32 %v9375_v14, %v9374_v59  ;;  %v9383_v60 = vadd.f32 %v9382_v21, %v9381_v58  ;;  %v9396_v6 = vsel %vm3919_vm3, %v9280_v35, 0.0  ;;  %v9249_v63 = vsel %vm548_vm0, %v16099_v43, %v9196_v49 }
0x1abb   : > { %v9390_v40 = vadd.f32 %v9389_v20, %v9388_v62  ;;  %v9397_v28 = vadd.f32 %v9396_v6, %v9395_v51  ;;  %v9250_v13 = vsel %vm548_vm0, %v16057_v22, %v9201_v29  ;;  %v9281_v56 = vmul.f32 %v9249_v63, %v17317_v53  ;;  %v10118_v53 = vld [vmem:[%s16390_s5 + $0x1] ss:$0 sm:$0xff] }
0x1abc   : > { %v9471_v24 = vsel %vm1779_vm10, %v9376_v38, %v9367_v11  ;;  %v9384_v34 = vrot.slane %v9383_v60, 1  ;;  %v9282_v9 = vmul.f32 %v17318_v1, %v9250_v13 }
0x1abd   : > { %v9391_v33 = vrot.slane %v9390_v40, 2  ;;  %v9398_v18 = vrot.slane %v9397_v28, 4  ;;  %v9206_v27 = vpop.permute.xlu1 %9205  ;;  %v9211_v26 = vpop.permute.xlu0 %9210  ;;  %v9404_v8 = vsel %vm3919_vm3, %v9281_v56, 0.0 }
0x1abe   : > { %v9385_v17 = vadd.f32 %v9384_v34, %v9383_v60  ;;  %v9405_v25 = vsel %vm3919_vm3, %v9282_v9, 0.0  ;;  %v9251_v43 = vsel %vm548_vm0, %v16101_v55, %v9206_v27  ;;  %v9252_v41 = vsel %vm548_vm0, %v16064_v5, %v9211_v26  ;;  %v17324_v26 = vld [vmem:[#allocation118_spill] sm:$0xff] }
0x1abf   : > { %v9392_v22 = vadd.f32 %v9391_v33, %v9390_v40  ;;  %v9399_v47 = vadd.f32 %v9398_v18, %v9397_v28  ;;  %v9406_v50 = vadd.f32 %v9405_v25, %v9404_v8  ;;  %v9283_v15 = vmul.f32 %v9251_v43, %v17319_v52  ;;  %v17323_v18 = vld [vmem:[#allocation119_spill] sm:$0xff] }
0x1ac0   : > { %v9472_v36 = vsel %vm1781_vm11, %v9385_v17, %v9471_v24  ;;  %v9284_v45 = vmul.f32 %v17320_v37, %v9252_v41  ;;  %v10124_v37 = vld [vmem:[%s16393_s8 + $0x58] sm:$0xff] }
0x1ac1   : > { %v9393_v12 = vrot.slane %v9392_v22, 1  ;;  %v9400_v4 = vrot.slane %v9399_v47, 2  ;;  %v9407_v46 = vrot.slane %v9406_v50, 4  ;;  %v9216_v44 = vpop.permute.xlu1 %9215  ;;  %v9221_v32 = vpop.permute.xlu0 %9220  ;;  %v9413_v19 = vsel %vm3919_vm3, %v9283_v15, 0.0 }
0x1ac2   : > { %v9253_v55 = vsel %vm548_vm0, %v16114_v16, %v9216_v44  ;;  %v9254_v57 = vsel %vm548_vm0, %v16071_v61, %v9221_v32  ;;  %v9414_v42 = vsel %vm3919_vm3, %v9284_v45, 0.0  ;;  %v10122_v44 = vld [vmem:[%s16393_s8 + $0x48] sm:$0xff]  ;;  %v10123_v32 = vld [vmem:[%s16393_s8 + $0x50] sm:$0xff] }
0x1ac3   : > { %v9394_v0 = vadd.f32 %v9393_v12, %v9392_v22  ;;  %v9401_v48 = vadd.f32 %v9400_v4, %v9399_v47  ;;  %v9408_v3 = vadd.f32 %v9407_v46, %v9406_v50  ;;  %v9285_v5 = vmul.f32 %v9253_v55, %v17321_v23  ;;  %v10121_v46 = vld [vmem:[%s16393_s8 + $0x40] sm:$0xff] }
0x1ac4   : > { %v9286_v59 = vmul.f32 %v17322_v30, %v9254_v57  ;;  %v9415_v54 = vadd.f32 %v9414_v42, %v9413_v19  ;;  %v10850_v19 = vpack.c.bf16 %v10122_v44, %v10121_v46  ;;  %v10854_v45 = vpack.c.bf16 %v10124_v37, %v10123_v32 }
0x1ac5   : > { %v9473_v58 = vsel %vm1783_vm12, %v9394_v0, %v9472_v36  ;;  %v9402_v7 = vrot.slane %v9401_v48, 1  ;;  %v9409_v62 = vrot.slane %v9408_v3, 2  ;;  %v9422_v10 = vsel %vm3919_vm3, %v9285_v5, 0.0 }
0x1ac6   : > { %v9423_v16 = vsel %vm3919_vm3, %v9286_v59, 0.0  ;;  %v9416_v21 = vrot.slane %v9415_v54, 4  ;;  %10851 = vmatprep.subr.bf16.mxu1 %v10850_v19 }
0x1ac7   : > { %v9403_v14 = vadd.f32 %v9402_v7, %v9401_v48  ;;  %v9410_v61 = vadd.f32 %v9409_v62, %v9408_v3  ;;  %v9424_v2 = vadd.f32 %v9423_v16, %v9422_v10  ;;  %v10130_v7 = vld [vmem:[%s16395_s10 + $0x88] sm:$0xff]  ;;  %v10131_v62 = vld [vmem:[%s16395_s10 + $0x90] sm:$0xff]  ;;  %v10132_v10 = vld [vmem:[%s16395_s10 + $0x98] sm:$0xff] }
0x1ac8   : > { %v9417_v39 = vadd.f32 %v9416_v21, %v9415_v54  ;;  %v10862_v16 = vpack.c.bf16 %v10132_v10, %v10131_v62 }
0x1ac9   : > { %v9411_v31 = vrot.slane %v9410_v61, 1  ;;  %v9425_v35 = vrot.slane %v9424_v2, 4  ;;  %v9474_v11 = vsel %vm1785_vm13, %v9403_v14, %v9473_v58  ;;  %v10129_v58 = vld [vmem:[%s16395_s10 + $0x80] sm:$0xff] }
0x1aca   : > { %v9418_v49 = vrot.slane %v9417_v39, 2  ;;  %v10858_v54 = vpack.c.bf16 %v10130_v7, %v10129_v58  ;;  %v10133_v14 = vld [vmem:[%s16395_s10 + $0xa0] sm:$0xff] }
0x1acb   : > { %v9412_v20 = vadd.f32 %v9411_v31, %v9410_v61  ;;  %v9426_v29 = vadd.f32 %v9425_v35, %v9424_v2  ;;  %v10134_v61 = vld [vmem:[%s16395_s10 + $0xa8] sm:$0xff]  ;;  %v10135_v2 = vld [vmem:[%s16395_s10 + $0xb0] sm:$0xff]  ;;  %v10136_v31 = vld [vmem:[%s16395_s10 + $0xb8] sm:$0xff] }
0x1acc   : > { %v9419_v38 = vadd.f32 %v9418_v49, %v9417_v39  ;;  %v10866_v21 = vpack.c.bf16 %v10134_v61, %v10133_v14  ;;  %v10870_v39 = vpack.c.bf16 %v10136_v31, %v10135_v2  ;;  %v10126_v35 = vld [vmem:[%s16394_s9 + $0x2] ss:$0 sm:$0xff]  ;;  %v10142_v58 = vld [vmem:[%s16398_s13] ss:$0 sm:$0xff] }
0x1acd   : > { %v9427_v60 = vrot.slane %v9426_v29, 2  ;;  %v9475_v51 = vsel %vm1787_vm14, %v9412_v20, %v9474_v11 }
0x1ace   : > { %v9420_v6 = vrot.slane %v9419_v38, 1 }
0x1acf   : > { %v9428_v40 = vadd.f32 %v9427_v60, %v9426_v29 }
0x1ad0   : > { %v9421_v28 = vadd.f32 %v9420_v6, %v9419_v38 }
0x1ad1   : > { %v9429_v63 = vrot.slane %v9428_v40, 1 }
0x1ad2   : > { %v9476_v24 = vsel %vm1789_vm15, %v9421_v28, %v9475_v51 }
0x1ad3   : > { %v9430_v13 = vadd.f32 %v9429_v63, %v9428_v40 }
0x1ad5   : > { %v9477_v34 = vsel %vm1791_vm1, %v9430_v13, %v9476_v24 }
0x1ad6   : > { %10698 = vmatmul.mubr.msk.f32.vlgmr.msra.gmra.mrb[66].mxu1 %vm3919_vm3, %v9477_v34 }
0x1ad7   : > { %10853 = vmatpush3.bf16.msra.mxu1 %v10850_v19 }
0x1ad8   : > { %10855 = vmatprep.subr.bf16.mxu1 %v10854_v45 }
0x1adb   : > { %10857 = vmatpush3.bf16.msra.mxu1 %v10854_v45 }
0x1adc   : > { %10859 = vmatprep.subr.bf16.mxu1 %v10858_v54 }
0x1ba9   : > { %v10699_v56 = vpop.f32.mrb[66].mxu1 }
0x1baa   : > { %v9554_v1 = vadd.f32 %v10699_v56, %v10118_v53  ;;  %v9548_v9 = vpop.f32.mrb[67].mxu1 }
0x1bab   : > { %v9549_v33 = vadd.f32 %v10118_v53, %v9548_v9 }
0x1bac   : > { %v16262_v27 = vadd.f32 %v9554_v1, %v17323_v18 }
0x1bad   : > { %v16265_v17 = vadd.f32 %v9549_v33, %v17324_v26 }
0x1bae   : > { %v9562_v8 = vsel %vm548_vm0, %v16262_v27, 0.0 }
0x1baf   : > { %9563 = vadd.xlane.f32.xlu0 %v9562_v8  ;;  %v9559_v25 = vsel %vm548_vm0, %v16265_v17, 0.0 }
0x1bb0   : > { %9560 = vadd.xlane.f32.xlu1 %v9559_v25  ;;  %v10138_v25 = vld [vmem:[%s16396_s11 + $0x2] ss:$0 sm:$0xff] }
0x1c3c   : > { %v9564_v43 = vpop.xlane.xlu0 %9563 }
0x1c3d   : > { %v9566_v22 = vmul.f32 0.03125, %v9564_v43  ;;  %v9561_v47 = vpop.xlane.xlu1 %9560 }
0x1c3e   : > { %v9565_v50 = vmul.f32 0.03125, %v9561_v47 }
0x1c3f   : > { %v9568_v52 = vsub.f32 %v16262_v27, %v9566_v22 }
0x1c40   : > { %v9567_v15 = vsub.f32 %v16265_v17, %v9565_v50 }
0x1c41   : > { %v9570_v36 = vmul.f32 %v9568_v52, %v9568_v52 }
0x1c42   : > { %v9569_v41 = vmul.f32 %v9567_v15, %v9567_v15 }
0x1c43   : > { %v9574_v12 = vsel %vm548_vm0, %v9570_v36, 0.0 }
0x1c44   : > { %9575 = vadd.xlane.f32.xlu1 %v9574_v12  ;;  %v9571_v4 = vsel %vm548_vm0, %v9569_v41, 0.0 }
0x1c45   : > { %9572 = vadd.xlane.f32.xlu0 %v9571_v4 }
0x1cd1   : > { %v9576_v55 = vpop.xlane.xlu1 %9575 }
0x1cd2   : > { %v9578_v57 = vmul.f32 0.03125, %v9576_v55  ;;  %v9573_v0 = vpop.xlane.xlu0 %9572 }
0x1cd3   : > { %v9577_v48 = vmul.f32 0.03125, %v9573_v0 }
0x1cd4   : > { %v9580_v3 = vadd.f32 1e-05, %v9578_v57 }
0x1cd5   : > { %v9579_v23 = vadd.f32 1e-05, %v9577_v48 }
0x1cd6   : > { %11329 = vrsqrt.f32 %v9580_v3 }
0x1cd7   : > { %11331 = vrsqrt.f32 %v9579_v23 }
0x1ce0   : > { %v11330_v5 = vpop.eup %11329 }
0x1ce1   : > { %v11332_v42 = vpop.eup %11331  ;;  %v9584_v59 = vmul.f32 %v11330_v5, %v9568_v52 }
0x1ce2   : > { %v9583_v30 = vmul.f32 %v11332_v42, %v9567_v15  ;;  %v10141_v42 = vld [vmem:[%s16397_s12] ss:$0 sm:$0xff] }
0x1ce4   : > { %10708 = vmatprep.mubr.msk.f32.mxu1 %vm548_vm0, %v9583_v30 }
0x1ce5   : > { %10709 = vmatmul.mubr.msk.f32.vlgmr.msra.gmra.mrb[68].mxu1 %vm548_vm0, %v9584_v59 }
0x1ce6   : > { %10861 = vmatpush3.bf16.msra.mxu1 %v10858_v54 }
0x1ce7   : > { %10863 = vmatprep.subr.bf16.mxu1 %v10862_v16 }
0x1cea   : > { %10865 = vmatpush3.bf16.msra.mxu1 %v10862_v16 }
0x1ceb   : > { %10867 = vmatprep.subr.bf16.mxu1 %v10866_v21 }
0x1cee   : > { %10869 = vmatpush3.bf16.msra.mxu1 %v10866_v21 }
0x1cef   : > { %10871 = vmatprep.subr.bf16.mxu1 %v10870_v39 }
0x1cf2   : > { %10873 = vmatpush3.bf16.msra.mxu1 %v10870_v39 }
0x1db8   : > { %v10710_v11 = vpop.f32.mrb[68].mxu1 }
0x1db9   : > { %v9676_v20 = vadd.f32 %v10710_v11, %v10126_v35  ;;  %v9670_v49 = vpop.f32.mrb[69].mxu1 }
0x1dba   : > { %v9671_v29 = vadd.f32 %v10126_v35, %v9670_v49 }
0x1dbb   : > { %v9680_v38 = vmul.f32 %v9676_v20, %v9676_v20 }
0x1dbc   : > { %v9679_v60 = vmul.f32 %v9671_v29, %v9671_v29 }
0x1dbd   : > { %v9682_v51 = vmul.f32 %v9680_v38, %v9676_v20 }
0x1dbe   : > { %v9681_v6 = vmul.f32 %v9679_v60, %v9671_v29 }
0x1dbf   : > { %v9684_v40 = vmul.f32 0.044715, %v9682_v51 }
0x1dc0   : > { %v9683_v28 = vmul.f32 0.044715, %v9681_v6 }
0x1dc1   : > { %v9686_v63 = vadd.f32 %v9684_v40, %v9676_v20 }
0x1dc2   : > { %v9685_v13 = vadd.f32 %v9683_v28, %v9671_v29 }
0x1dc3   : > { %v9688_v24 = vmul.f32 0.7978846, %v9686_v63 }
0x1dc4   : > { %v9687_v34 = vmul.f32 0.7978846, %v9685_v13 }
0x1dc5   : > { %11333 = vtanh.f32 %v9688_v24 }
0x1dc6   : > { %11335 = vtanh.f32 %v9687_v34 }
0x1dcf   : > { %v11334_v53 = vpop.eup %11333 }
0x1dd0   : > { %v11336_v56 = vpop.eup %11335  ;;  %v9692_v1 = vadd.f32 1.0, %v11334_v53 }
0x1dd1   : > { %v9691_v9 = vadd.f32 1.0, %v11336_v56 }
0x1dd2   : > { %v9694_v33 = vmul.f32 0.5, %v9692_v1 }
0x1dd3   : > { %v9693_v18 = vmul.f32 0.5, %v9691_v9 }
0x1dd4   : > { %v9696_v8 = vmul.f32 %v9694_v33, %v9676_v20 }
0x1dd5   : > { %v9695_v26 = vmul.f32 %v9693_v18, %v9671_v29 }
0x1dd7   : > { %10727 = vmatprep.mubr.msk.f32.mxu1 %vm3919_vm3, %v9695_v26 }
0x1dd8   : > { %10728 = vmatmul.mubr.msk.f32.vlgmr.msra.gmra.mrb[70].mxu1 %vm3919_vm3, %v9696_v8 }
0x1eab   : > { %v10729_v43 = vpop.f32.mrb[70].mxu1 }
0x1eac   : > { %v9792_v22 = vadd.f32 %v10729_v43, %v10138_v25  ;;  %v9786_v47 = vpop.f32.mrb[71].mxu1 }
0x1ead   : > { %v9787_v50 = vadd.f32 %v10138_v25, %v9786_v47 }
0x1eae   : > { %v9796_v52 = vadd.f32 %v9792_v22, %v16262_v27 }
0x1eaf   : > { %v9795_v15 = vadd.f32 %v9787_v50, %v16265_v17 }
0x1eb0   : > { %v9800_v36 = vsel %vm548_vm0, %v9796_v52, 0.0 }
0x1eb1   : > { %9801 = vadd.xlane.f32.xlu1 %v9800_v36  ;;  %v9797_v41 = vsel %vm548_vm0, %v9795_v15, 0.0 }
0x1eb2   : > { %9798 = vadd.xlane.f32.xlu0 %v9797_v41 }
0x1f3e   : > { %v9802_v12 = vpop.xlane.xlu1 %9801 }
0x1f3f   : > { %v9804_v4 = vmul.f32 0.03125, %v9802_v12  ;;  %v9799_v46 = vpop.xlane.xlu0 %9798 }
0x1f40   : > { %v9803_v44 = vmul.f32 0.03125, %v9799_v46 }
0x1f41   : > { %v9806_v32 = vsub.f32 %v9796_v52, %v9804_v4 }
0x1f42   : > { %v9805_v19 = vsub.f32 %v9795_v15, %v9803_v44 }
0x1f43   : > { %v9808_v37 = vmul.f32 %v9806_v32, %v9806_v32 }
0x1f44   : > { %v9807_v45 = vmul.f32 %v9805_v19, %v9805_v19 }
0x1f45   : > { %v9812_v55 = vsel %vm548_vm0, %v9808_v37, 0.0 }
0x1f46   : > { %9813 = vadd.xlane.f32.xlu1 %v9812_v55  ;;  %v9809_v27 = vsel %vm548_vm0, %v9807_v45, 0.0 }
0x1f47   : > { %9810 = vadd.xlane.f32.xlu0 %v9809_v27 }
0x1fd3   : > { %v9814_v17 = vpop.xlane.xlu1 %9813 }
0x1fd4   : > { %v9816_v57 = vmul.f32 0.03125, %v9814_v17  ;;  %v9811_v0 = vpop.xlane.xlu0 %9810 }
0x1fd5   : > { %v9815_v48 = vmul.f32 0.03125, %v9811_v0 }
0x1fd6   : > { %v9818_v3 = vadd.f32 1e-05, %v9816_v57 }
0x1fd7   : > { %v9817_v23 = vadd.f32 1e-05, %v9815_v48 }
0x1fd8   : > { %11337 = vrsqrt.f32 %v9818_v3 }
0x1fd9   : > { %11339 = vrsqrt.f32 %v9817_v23 }
0x1fe2   : > { %v11338_v5 = vpop.eup %11337 }
0x1fe3   : > { %v11340_v30 = vpop.eup %11339  ;;  %v9822_v59 = vmul.f32 %v11338_v5, %v9806_v32 }
0x1fe4   : > { %v9821_v7 = vmul.f32 %v11340_v30, %v9805_v19 }
0x1fe5   : > { %v9831_v62 = vmul.f32 %v10141_v42, %v9822_v59 }
0x1fe6   : > { %v9830_v54 = vmul.f32 %v10141_v42, %v9821_v7 }
0x1fe7   : > { %v9840_v10 = vadd.f32 %v10142_v58, %v9831_v62 }
0x1fe8   : > { %v9839_v16 = vadd.f32 %v10142_v58, %v9830_v54 }
0x1fe9   : > { %9842 = vst.msk [vmem:[%s477_s21 + $0x8] sm:$0xff] %vm548_vm0, %v9840_v10 }
0x1fea   : > { %9841 = vst.msk [vmem:[%s477_s21] sm:$0xff] %vm548_vm0, %v9839_v16 }
0x1feb   : > { %11388 = shalt.err (!%p11385_p4)
}
0x1fec   : > { %s11389_s25 = scalar_lea.hbm %s16338_s24, 256  ;;  %s11393_s21 = scalar_lea.hbm %s16399_s14, 512 }
0x1fed   : > { %p11390_p7 = scmp.ne.s32.totalorder %s16338_s24, %s11389_s25  ;;  %p11394_p10 = scmp.lt.u32.totalorder %s16338_s24, %s16399_s14 }
0x1fee   : > { %p11395_p11 = scmp.lt.u32.totalorder %s11393_s21, %s11389_s25  ;;  %p11397_p13 = scmp.lt.u32.totalorder %s11389_s25, %s16338_s24 }
0x1fef   : > { %p11391_p8 = pnand %p11390_p7, %p11559_p5 }
0x1ff0   : > { %p11396_p12 = por %p11395_p11, %p11394_p10 }
0x1ff1   : > { %p11392_p9 = pneg %p11391_p8 }
0x1ff2   : > { %p11398_p0 = por %p11397_p13, %p11396_p12 }
0x1ff4   : > { %p11399_p1 = pnand %p11398_p0, %p11392_p9 }
0x1ff6   : > { %11402 = shalt.err (!%p11399_p1)
}
0x1ff7   : > { %s11444_s26 = smov 128   ;;  %s11445_s22 = smov 8  }
0x1ff8   : > { %10874 = dma.vmem_to_hbm [thread:$0]  (%p11559_p5), %s16340_s20, 256, %s16338_s24, %s16344_s17, %s11444_s26, %s11444_s26, %s11445_s22  }
0x1ff9 PF: > { %s17325_s18 = sld [smem:[#allocation5_spill]]  ;;  %p10880_p2 = scmp.ge.s32.totalorder %s11437_s16, 2 }
0x1ffb   : > { %p10877_p3 = pnand %p10880_p2, %p11563_p6 }
0x1fff   : > { %s9872_s28 = sand.u32 1, %s17325_s18  }
0x2000   : > { %s9873_s25 = scalar_lea.sflag [#allocation3], %s9872_s28 }
0x2001   : > { %11420 = dma.done.wait (!%p10877_p3), %s9873_s25, 256  }
0x2002   : > { %11422 = vsyncadd (!%p10877_p3), %s9873_s25, 4294967040  ;;  %s17327_s16 = sld [smem:[#allocation7_spill]]  ;;  %s17328_s21 = sld [smem:[#allocation6_spill]] }
0x2003   : > { %s17329_s15 = sld [smem:[#allocation8_spill]]  ;;  %s17330_s29 = smov %s11429_s30 }
0x2008   : > { %p24_p4 = scmp.ge.s32.totalorder %s17327_s16, 4   ;;  %s17331_s30 = smov %s17328_s21 }
0x200a   :  { %26 = sbr.rel (!%p24_p4) target bundleno = 3 (0x3), region = 126 }
0x2011   :  { %9878 = vsyncpa [#allocation3], 1 }
0x2012   :  { %9880 = vsyncpa [#allocation3 + $0x1], 1 }

</bundles_post_ra>
